<compile_context>
chip_gen: v7x
topology: tpu7x:2x2x1
jax: 0.10.0
libtpu: 0.0.40
codegen_flags: <defaults>
</compile_context>

<pallas_src>
import jax
import jax.numpy as jnp
from jax.experimental import pallas as pl
from jax.experimental.pallas import tpu as pltpu

VIEW_RADIUS = 4
OBS_C, OBS_H, OBS_W = 4, 16, 16
NUM_ACTIONS = 5

# ---------------- static geometry ----------------
W_PAD = 24                        # row stride of flattened maps (row = y*24 + x)
H0 = OBS_H + 2 * VIEW_RADIUS      # 24 (padded height == width)

K1, P1, K2, P2, K3 = 4, 4, 5, 2, 3
H1 = H0 - K1 + 1                  # 21
H1P = H1 - P1 + 1                 # 18
H2 = H1P - K2 + 1                 # 14
H2P = H2 - P2 + 1                 # 13
H3 = H2P - K3 + 1                 # 11

R1 = H1 * W_PAD                   # 504  conv1 rows computed
RP1 = H1P * W_PAD                 # 432  pool1 rows
R2 = H2 * W_PAD                   # 336  conv2 rows
RP2 = H2P * W_PAD                 # 312  pool2 rows
R3 = H3 * W_PAD                   # 264  conv3 / output rows

C0 = K1 * K1 * OBS_C              # 64   im2col'd conv1 input channels
C1, C2, C3PAD = 64, 32, 128       # conv3 out channels padded 5 -> 128
P1_LANES = K2 * C1                # 320  kx-packed pool1 lanes
P2_LANES = K3 * C2                # 96   kx-packed pool2 lanes

X_S = R1                          # input rows per sample fed to the kernel

# scratch row counts: big enough for every shifted (garbage-tolerant) read
A1_ROWS = 512                     # pool1 reads a1 up to row 510
A2_ROWS = 344                     # pool2 reads a2 up to row 338
P1_ROWS = RP1                     # conv2 reads p1 up to row 431
P2_ROWS = RP2                     # conv3 reads p2 up to row 311

# row-chunk sizes (all divide their extent; starts stay multiples of 8)
CHUNK1, CHUNK_P1, CHUNK2, CHUNK_P2, CHUNK3 = 168, 72, 112, 104, 88


def _chunks(total, size):
    r, out = 0, []
    while r < total:
        out.append((r, min(size, total - r)))
        r += size
    return out


# ---------------- fused Pallas kernel ----------------

def _net1_fused_kernel(x_ref, w1_ref, b1_ref, w2_ref, b2_ref, w3_ref, b3_ref,
                       out_ref, a1_ref, p1_ref, a2_ref, p2_ref):
    w1 = w1_ref[...]                      # (64, 64)  bf16
    b1 = b1_ref[...]                      # (1, 64)   f32
    b2 = b2_ref[...]                      # (1, 32)   f32
    b3 = b3_ref[...]                      # (1, 128)  f32 (-1e30 on padded lanes)

    bs = x_ref.shape[0]
    for s in range(bs):                   # static loop: BS samples per grid step
        # ---- conv1: im2col'd single matmul (K=64), chunked, direct store ----
        for r0, n in _chunks(R1, CHUNK1):
            a1_ref[pl.ds(r0, n), :] = jnp.dot(
                x_ref[s, pl.ds(r0, n), :], w1, preferred_element_type=jnp.float32)

        # ---- pool1(4,s1) + bias + ReLU, kx-packed (5 x 64 lanes) bf16 ----
        for r0, n in _chunks(RP1, CHUNK_P1):
            nval = n + K2 - 1             # extra rows so the kx-pack stays local
            ndy = nval + P1 - 1
            m = a1_ref[pl.ds(r0, ndy), :]
            for dy in range(1, P1):       # dy over 8-aligned loads
                m = jnp.maximum(m, a1_ref[pl.ds(r0 + dy * W_PAD, ndy), :])
            v = m[0:nval, :]
            for dx in range(1, P1):       # dx over register slices
                v = jnp.maximum(v, m[dx:dx + nval, :])
            v = jnp.maximum(v + b1, 0.0)  # pool/bias/ReLU commute (bias const, relu monotone)
            p1_ref[pl.ds(r0, n), :] = jnp.concatenate(
                [v[kx:kx + n, :].astype(jnp.bfloat16) for kx in range(K2)], axis=-1)

        # ---- conv2: 5 matmuls, K=320, register accumulation, chunked ----
        for r0, n in _chunks(R2, CHUNK2):
            acc = jnp.dot(p1_ref[pl.ds(r0, n), :], w2_ref[0],
                          preferred_element_type=jnp.float32)
            for ky in range(1, K2):
                acc = acc + jnp.dot(p1_ref[pl.ds(r0 + ky * W_PAD, n), :],
                                    w2_ref[ky], preferred_element_type=jnp.float32)
            a2_ref[pl.ds(r0, n), :] = acc

        # ---- pool2(2,s1) + bias + ReLU, kx-packed (3 x 32 lanes) bf16 ----
        for r0, n in _chunks(RP2, CHUNK_P2):
            nval = n + K3 - 1
            ndy = nval + P2 - 1
            m = jnp.maximum(a2_ref[pl.ds(r0, ndy), :],
                            a2_ref[pl.ds(r0 + W_PAD, ndy), :])
            v = jnp.maximum(m[0:nval, :], m[1:1 + nval, :])
            v = jnp.maximum(v + b2, 0.0)
            p2_ref[pl.ds(r0, n), :] = jnp.concatenate(
                [v[kx:kx + n, :].astype(jnp.bfloat16) for kx in range(K3)], axis=-1)

        # ---- conv3 (out padded 5->128) + bias + softmax, bf16 lane-dense store ----
        for r0, n in _chunks(R3, CHUNK3):
            acc = jnp.dot(p2_ref[pl.ds(r0, n), :], w3_ref[0],
                          preferred_element_type=jnp.float32)
            for ky in range(1, K3):
                acc = acc + jnp.dot(p2_ref[pl.ds(r0 + ky * W_PAD, n), :],
                                    w3_ref[ky], preferred_element_type=jnp.float32)
            logits = acc + b3             # padded lanes carry -1e30 -> exp == 0 (f32)
            mx = jnp.max(logits, axis=-1, keepdims=True)
            e = jnp.exp(logits - mx)
            ssum = jnp.sum(e, axis=-1, keepdims=True)
            out_ref[s, pl.ds(r0, n), :] = (e * pl.reciprocal(ssum)).astype(out_ref.dtype)


# ---------------- JAX-side glue ----------------

def symmetric_pad_nchw(x, r):
    """Matches Net1._symmetric_pad: zero pad by r, wrap-add edges (corners stay zero)."""
    B, C, H, W = x.shape
    p = jnp.pad(x, ((0, 0), (0, 0), (r, r), (r, r)))
    p = p.at[:, :, r:r + H, :r].add(x[:, :, :, -r:])
    p = p.at[:, :, r:r + H, -r:].add(x[:, :, :, :r])
    p = p.at[:, :, :r, r:r + W].add(x[:, :, -r:, :])
    p = p.at[:, :, -r:, r:r + W].add(x[:, :, :r, :])
    return p


def net1_forward(x_nchw, params, block_samples=None):
    """x_nchw: (B, 4, 16, 16) f32 -> (B, 5, 11, 11) softmax probabilities."""
    B = x_nchw.shape[0]

    # TODO(synk): symmetric wrap-pad + conv1 im2col stay as tiny XLA ops (~37 KB/sample).
    xp = symmetric_pad_nchw(x_nchw, VIEW_RADIUS)                    # (B, 4, 24, 24)
    xh = jnp.transpose(xp, (0, 2, 3, 1))                            # (B, 24, 24, 4)
    xh = jnp.pad(xh, ((0, 0), (0, K1 - 1), (0, K1 - 1), (0, 0)))    # (B, 27, 27, 4)
    cols = [xh[:, ky:ky + H0, kx:kx + H0, :]
            for ky in range(K1) for kx in range(K1)]
    xcol = jnp.concatenate(cols, axis=-1)                           # (B, 24, 24, 64)
    xcol = xcol.reshape(B, H0 * W_PAD, C0)[:, :X_S, :].astype(jnp.bfloat16)

    # batch blocking: BS samples per grid step, grid >= 2 when B >= 2 (v7x megacore)
    if block_samples is None:
        bs = max(1, min(8, (B + 1) // 2))
    else:
        bs = block_samples
    grid = (B + bs - 1) // bs
    bp = grid * bs
    if bp != B:
        xcol = jnp.pad(xcol, ((0, bp - B), (0, 0), (0, 0)))

    out = pl.pallas_call(
        _net1_fused_kernel,
        out_shape=jax.ShapeDtypeStruct((bp, R3, C3PAD), jnp.bfloat16),
        grid=(grid,),
        in_specs=[
            pl.BlockSpec((bs, X_S, C0), lambda i: (i, 0, 0)),
            pl.BlockSpec((C0, C1), lambda i: (0, 0)),
            pl.BlockSpec((1, C1), lambda i: (0, 0)),
            pl.BlockSpec((K2, P1_LANES, C2), lambda i: (0, 0, 0)),
            pl.BlockSpec((1, C2), lambda i: (0, 0)),
            pl.BlockSpec((K3, P2_LANES, C3PAD), lambda i: (0, 0, 0)),
            pl.BlockSpec((1, C3PAD), lambda i: (0, 0)),
        ],
        out_specs=pl.BlockSpec((bs, R3, C3PAD), lambda i: (i, 0, 0)),
        scratch_shapes=[
            pltpu.VMEM((A1_ROWS, C1), jnp.float32),      # conv1 output (per sample, reused)
            pltpu.VMEM((P1_ROWS, P1_LANES), jnp.bfloat16),   # pool1, kx-packed
            pltpu.VMEM((A2_ROWS, C2), jnp.float32),      # conv2 output
            pltpu.VMEM((P2_ROWS, P2_LANES), jnp.bfloat16),   # pool2, kx-packed
        ],
        compiler_params=pltpu.CompilerParams(
            dimension_semantics=("parallel",)),
    )(xcol, params["w1"], params["b1"], params["w2"], params["b2"],
      params["w3"], params["b3"])

    # lane-dense (bp, 264, 128) bf16 slab -> valid (B, 11, 11, 5) -> NCHW f32
    out = out[:B].astype(jnp.float32)
    y = out.reshape(B, H3, W_PAD, C3PAD)[:, :, :H3, :NUM_ACTIONS]
    return jnp.transpose(y, (0, 3, 1, 2))


# ---------------- parameters ----------------

def init_params(key):
    """Deterministic synthetic parameters in PyTorch layout (Cout, Cin, k, k)."""
    ks = jax.random.split(key, 6)
    return {
        "w1": jax.random.normal(ks[0], (C1, OBS_C, K1, K1), jnp.float32) * 0.05,
        "b1": jax.random.normal(ks[1], (C1,), jnp.float32) * 0.05,
        "w2": jax.random.normal(ks[2], (C2, C1, K2, K2), jnp.float32) * 0.05,
        "b2": jax.random.normal(ks[3], (C2,), jnp.float32) * 0.05,
        "w3": jax.random.normal(ks[4], (NUM_ACTIONS, C2, K3, K3), jnp.float32) * 0.05,
        "b3": jax.random.normal(ks[5], (NUM_ACTIONS,), jnp.float32) * 0.05,
    }


def pack_kernel_params(p):
    """Convert PyTorch-layout params to the kernel's packed layouts (host side, once)."""
    def tap_major(w):        # (Cout, Cin, k, k) -> (k*k, Cin, Cout), tap = ky*k + kx
        cout, cin, k, _ = w.shape
        return jnp.transpose(w, (2, 3, 1, 0)).reshape(k * k, cin, cout)

    w1 = tap_major(p["w1"]).reshape(K1 * K1 * OBS_C, C1).astype(jnp.bfloat16)
    w2 = tap_major(p["w2"]).reshape(K2, P1_LANES, C2).astype(jnp.bfloat16)
    w3 = tap_major(p["w3"]).reshape(K3, P2_LANES, NUM_ACTIONS)
    w3 = jnp.pad(w3, ((0, 0), (0, 0), (0, C3PAD - NUM_ACTIONS))).astype(jnp.bfloat16)
    b3 = jnp.full((1, C3PAD), -1e30, jnp.float32).at[0, :NUM_ACTIONS].set(p["b3"])
    return {
        "w1": w1, "b1": p["b1"].reshape(1, C1).astype(jnp.float32),
        "w2": w2, "b2": p["b2"].reshape(1, C2).astype(jnp.float32),
        "w3": w3, "b3": b3,
    }


# ---------------- pure-JAX f32 reference (for validation) ----------------

def net1_reference(x_nchw, p):
    xp = symmetric_pad_nchw(x_nchw, VIEW_RADIUS)

    def conv(z, w, b):
        y = jax.lax.conv_general_dilated(
            z, w, window_strides=(1, 1), padding="VALID",
            dimension_numbers=("NCHW", "OIHW", "NCHW"))
        return y + b.reshape(1, -1, 1, 1)

    def pool(z, k):          # MaxPool2d(k, stride=1)
        oh, ow = z.shape[2] - k + 1, z.shape[3] - k + 1
        out = z[:, :, :oh, :ow]
        for dy in range(k):
            for dx in range(k):
                out = jnp.maximum(out, z[:, :, dy:dy + oh, dx:dx + ow])
        return out

    y = pool(jax.nn.relu(conv(xp, p["w1"], p["b1"])), P1)
    y = pool(jax.nn.relu(conv(y, p["w2"], p["b2"])), P2)
    y = conv(y, p["w3"], p["b3"])
    return jax.nn.softmax(y, axis=1)


if __name__ == "__main__":
    key = jax.random.PRNGKey(0)
    k_in, k_par = jax.random.split(key)

    x = jax.random.normal(k_in, (2, OBS_C, OBS_H, OBS_W), jnp.float32)   # NCHW
    params_pt = init_params(k_par)             # PyTorch-layout f32 params
    params = pack_kernel_params(params_pt)     # kernel layout (bf16, tap-packed, padded)

    fwd = jax.jit(lambda inp: net1_forward(inp, params))
    out = jax.block_until_ready(fwd(x))

    assert out.shape == (2, NUM_ACTIONS, H3, H3), out.shape

    # softmax over dim=1 must sum to ~1 (bf16 output store -> loose tolerance)
    sums = jnp.sum(out, axis=1)
    assert bool(jnp.all(jnp.abs(sums - 1.0) < 1e-2)), float(jnp.max(jnp.abs(sums - 1.0)))

    # cross-check against a pure-JAX f32 reference (bf16 MXU path -> loose tolerance)
    ref = jax.block_until_ready(jax.jit(lambda inp: net1_reference(inp, params_pt))(x))
    err = float(jnp.max(jnp.abs(out - ref)))
    assert err < 5e-2, err

    print("KERNEL_OK")
</pallas_src>

<mosaic_0001>
module attributes {stable_mosaic.version = 11 : i64} {
  func.func @_net1_fused_kernel(%arg0: i32, %arg1: memref<1x504x64xbf16, #tpu.memory_space<vmem>>, %arg2: memref<64x64xbf16, #tpu.memory_space<vmem>>, %arg3: memref<1x64xf32, #tpu.memory_space<vmem>>, %arg4: memref<5x320x32xbf16, #tpu.memory_space<vmem>>, %arg5: memref<1x32xf32, #tpu.memory_space<vmem>>, %arg6: memref<3x96x128xbf16, #tpu.memory_space<vmem>>, %arg7: memref<1x128xf32, #tpu.memory_space<vmem>>, %arg8: memref<1x264x128xbf16, #tpu.memory_space<vmem>>, %arg9: memref<512x64xf32, #tpu.memory_space<vmem>>, %arg10: memref<432x320xbf16, #tpu.memory_space<vmem>>, %arg11: memref<344x32xf32, #tpu.memory_space<vmem>>, %arg12: memref<312x96xbf16, #tpu.memory_space<vmem>>) attributes {dimension_semantics = [#tpu.dimension_semantics<parallel>], iteration_bounds = array<i64: 2>, scalar_prefetch = 0 : i64, scratch_operands = 4 : i64, tpu.core_type = #tpu.core_type<tc>, window_params = [{transform_indices = @transform_0, window_bounds = array<i64: 1, 504, 64>}, {pipeline_mode = #tpu.pipeline_mode<synchronous>, transform_indices = @transform_1, window_bounds = array<i64: 64, 64>}, {pipeline_mode = #tpu.pipeline_mode<synchronous>, transform_indices = @transform_2, window_bounds = array<i64: 1, 64>}, {pipeline_mode = #tpu.pipeline_mode<synchronous>, transform_indices = @transform_3, window_bounds = array<i64: 5, 320, 32>}, {pipeline_mode = #tpu.pipeline_mode<synchronous>, transform_indices = @transform_4, window_bounds = array<i64: 1, 32>}, {pipeline_mode = #tpu.pipeline_mode<synchronous>, transform_indices = @transform_5, window_bounds = array<i64: 3, 96, 128>}, {pipeline_mode = #tpu.pipeline_mode<synchronous>, transform_indices = @transform_6, window_bounds = array<i64: 1, 128>}, {transform_indices = @transform_7, window_bounds = array<i64: 1, 264, 128>}]} {
    %c0 = arith.constant 0 : index
    %c0_0 = arith.constant 0 : index
    %0 = vector.load %arg2[%c0, %c0_0] : memref<64x64xbf16, #tpu.memory_space<vmem>>, vector<64x64xbf16>
    %c0_1 = arith.constant 0 : index
    %c0_2 = arith.constant 0 : index
    %1 = vector.load %arg3[%c0_1, %c0_2] : memref<1x64xf32, #tpu.memory_space<vmem>>, vector<1x64xf32>
    %c0_3 = arith.constant 0 : index
    %c0_4 = arith.constant 0 : index
    %2 = vector.load %arg5[%c0_3, %c0_4] : memref<1x32xf32, #tpu.memory_space<vmem>>, vector<1x32xf32>
    %c0_5 = arith.constant 0 : index
    %c0_6 = arith.constant 0 : index
    %3 = vector.load %arg7[%c0_5, %c0_6] : memref<1x128xf32, #tpu.memory_space<vmem>>, vector<1x128xf32>
    %c0_7 = arith.constant 0 : index
    %c0_8 = arith.constant 0 : index
    %c0_9 = arith.constant 0 : index
    %4 = vector.load %arg1[%c0_7, %c0_8, %c0_9] : memref<1x504x64xbf16, #tpu.memory_space<vmem>>, vector<1x168x64xbf16>
    %5 = vector.shape_cast %4 : vector<1x168x64xbf16> to vector<168x64xbf16>
    %cst = arith.constant dense<0.000000e+00> : vector<168x64xf32>
    %6 = tpu.matmul %5, %0, %cst {dimension_numbers = #tpu.dot_dimension_numbers<[1], [0], [0], [1], [0, 0, 1, 1], [], []>} : vector<168x64xbf16>, vector<64x64xbf16>, vector<168x64xf32> -> vector<168x64xf32>
    %c0_10 = arith.constant 0 : index
    %c0_11 = arith.constant 0 : index
    %7 = vector.load %arg9[%c0_10, %c0_11] : memref<512x64xf32, #tpu.memory_space<vmem>>, vector<168x64xf32>
    tpu.vector_store %arg9[%c0_10, %c0_11], %6 {strides = array<i32>} : memref<512x64xf32, #tpu.memory_space<vmem>>, vector<168x64xf32>,
    %c0_12 = arith.constant 0 : index
    %c168 = arith.constant 168 : index
    %c0_13 = arith.constant 0 : index
    %8 = vector.load %arg1[%c0_12, %c168, %c0_13] : memref<1x504x64xbf16, #tpu.memory_space<vmem>>, vector<1x168x64xbf16>
    %9 = vector.shape_cast %8 : vector<1x168x64xbf16> to vector<168x64xbf16>
    %cst_14 = arith.constant dense<0.000000e+00> : vector<168x64xf32>
    %10 = tpu.matmul %9, %0, %cst_14 {dimension_numbers = #tpu.dot_dimension_numbers<[1], [0], [0], [1], [0, 0, 1, 1], [], []>} : vector<168x64xbf16>, vector<64x64xbf16>, vector<168x64xf32> -> vector<168x64xf32>
    %c168_15 = arith.constant 168 : index
    %c0_16 = arith.constant 0 : index
    %11 = vector.load %arg9[%c168_15, %c0_16] : memref<512x64xf32, #tpu.memory_space<vmem>>, vector<168x64xf32>
    tpu.vector_store %arg9[%c168_15, %c0_16], %10 {strides = array<i32>} : memref<512x64xf32, #tpu.memory_space<vmem>>, vector<168x64xf32>,
    %c0_17 = arith.constant 0 : index
    %c336 = arith.constant 336 : index
    %c0_18 = arith.constant 0 : index
    %12 = vector.load %arg1[%c0_17, %c336, %c0_18] : memref<1x504x64xbf16, #tpu.memory_space<vmem>>, vector<1x168x64xbf16>
    %13 = vector.shape_cast %12 : vector<1x168x64xbf16> to vector<168x64xbf16>
    %cst_19 = arith.constant dense<0.000000e+00> : vector<168x64xf32>
    %14 = tpu.matmul %13, %0, %cst_19 {dimension_numbers = #tpu.dot_dimension_numbers<[1], [0], [0], [1], [0, 0, 1, 1], [], []>} : vector<168x64xbf16>, vector<64x64xbf16>, vector<168x64xf32> -> vector<168x64xf32>
    %c336_20 = arith.constant 336 : index
    %c0_21 = arith.constant 0 : index
    %15 = vector.load %arg9[%c336_20, %c0_21] : memref<512x64xf32, #tpu.memory_space<vmem>>, vector<168x64xf32>
    tpu.vector_store %arg9[%c336_20, %c0_21], %14 {strides = array<i32>} : memref<512x64xf32, #tpu.memory_space<vmem>>, vector<168x64xf32>,
    %c0_22 = arith.constant 0 : index
    %c0_23 = arith.constant 0 : index
    %16 = vector.load %arg9[%c0_22, %c0_23] : memref<512x64xf32, #tpu.memory_space<vmem>>, vector<79x64xf32>
    %c24 = arith.constant 24 : index
    %c0_24 = arith.constant 0 : index
    %17 = vector.load %arg9[%c24, %c0_24] : memref<512x64xf32, #tpu.memory_space<vmem>>, vector<79x64xf32>
    %18 = arith.maximumf %16, %17 : vector<79x64xf32>
    %c48 = arith.constant 48 : index
    %c0_25 = arith.constant 0 : index
    %19 = vector.load %arg9[%c48, %c0_25] : memref<512x64xf32, #tpu.memory_space<vmem>>, vector<79x64xf32>
    %20 = arith.maximumf %18, %19 : vector<79x64xf32>
    %c72 = arith.constant 72 : index
    %c0_26 = arith.constant 0 : index
    %21 = vector.load %arg9[%c72, %c0_26] : memref<512x64xf32, #tpu.memory_space<vmem>>, vector<79x64xf32>
    %22 = arith.maximumf %20, %21 : vector<79x64xf32>
    %23 = vector.extract_strided_slice %22 {offsets = [0, 0], sizes = [76, 64], strides = [1, 1]} : vector<79x64xf32> to vector<76x64xf32>
    %24 = vector.extract_strided_slice %22 {offsets = [1, 0], sizes = [76, 64], strides = [1, 1]} : vector<79x64xf32> to vector<76x64xf32>
    %25 = arith.maximumf %23, %24 : vector<76x64xf32>
    %26 = vector.extract_strided_slice %22 {offsets = [2, 0], sizes = [76, 64], strides = [1, 1]} : vector<79x64xf32> to vector<76x64xf32>
    %27 = arith.maximumf %25, %26 : vector<76x64xf32>
    %28 = vector.extract_strided_slice %22 {offsets = [3, 0], sizes = [76, 64], strides = [1, 1]} : vector<79x64xf32> to vector<76x64xf32>
    %29 = arith.maximumf %27, %28 : vector<76x64xf32>
    %30 = vector.broadcast %1 : vector<1x64xf32> to vector<76x64xf32>
    %31 = arith.addf %29, %30 : vector<76x64xf32>
    %cst_27 = arith.constant 0.000000e+00 : f32
    %32 = vector.broadcast %cst_27 : f32 to vector<76x64xf32>
    %33 = arith.maximumf %31, %32 : vector<76x64xf32>
    %34 = vector.extract_strided_slice %33 {offsets = [0, 0], sizes = [72, 64], strides = [1, 1]} : vector<76x64xf32> to vector<72x64xf32>
    %35 = arith.truncf %34 : vector<72x64xf32> to vector<72x64xbf16>
    %36 = vector.extract_strided_slice %33 {offsets = [1, 0], sizes = [72, 64], strides = [1, 1]} : vector<76x64xf32> to vector<72x64xf32>
    %37 = arith.truncf %36 : vector<72x64xf32> to vector<72x64xbf16>
    %38 = vector.extract_strided_slice %33 {offsets = [2, 0], sizes = [72, 64], strides = [1, 1]} : vector<76x64xf32> to vector<72x64xf32>
    %39 = arith.truncf %38 : vector<72x64xf32> to vector<72x64xbf16>
    %40 = vector.extract_strided_slice %33 {offsets = [3, 0], sizes = [72, 64], strides = [1, 1]} : vector<76x64xf32> to vector<72x64xf32>
    %41 = arith.truncf %40 : vector<72x64xf32> to vector<72x64xbf16>
    %42 = vector.extract_strided_slice %33 {offsets = [4, 0], sizes = [72, 64], strides = [1, 1]} : vector<76x64xf32> to vector<72x64xf32>
    %43 = arith.truncf %42 : vector<72x64xf32> to vector<72x64xbf16>
    %44 = tpu.concatenate %35, %37, %39, %41, %43 in 1 : vector<72x64xbf16>, vector<72x64xbf16>, vector<72x64xbf16>, vector<72x64xbf16>, vector<72x64xbf16> -> vector<72x320xbf16>
    %c0_28 = arith.constant 0 : index
    %c0_29 = arith.constant 0 : index
    %45 = vector.load %arg10[%c0_28, %c0_29] : memref<432x320xbf16, #tpu.memory_space<vmem>>, vector<72x320xbf16>
    tpu.vector_store %arg10[%c0_28, %c0_29], %44 {strides = array<i32>} : memref<432x320xbf16, #tpu.memory_space<vmem>>, vector<72x320xbf16>,
    %c72_30 = arith.constant 72 : index
    %c0_31 = arith.constant 0 : index
    %46 = vector.load %arg9[%c72_30, %c0_31] : memref<512x64xf32, #tpu.memory_space<vmem>>, vector<79x64xf32>
    %c96 = arith.constant 96 : index
    %c0_32 = arith.constant 0 : index
    %47 = vector.load %arg9[%c96, %c0_32] : memref<512x64xf32, #tpu.memory_space<vmem>>, vector<79x64xf32>
    %48 = arith.maximumf %46, %47 : vector<79x64xf32>
    %c120 = arith.constant 120 : index
    %c0_33 = arith.constant 0 : index
    %49 = vector.load %arg9[%c120, %c0_33] : memref<512x64xf32, #tpu.memory_space<vmem>>, vector<79x64xf32>
    %50 = arith.maximumf %48, %49 : vector<79x64xf32>
    %c144 = arith.constant 144 : index
    %c0_34 = arith.constant 0 : index
    %51 = vector.load %arg9[%c144, %c0_34] : memref<512x64xf32, #tpu.memory_space<vmem>>, vector<79x64xf32>
    %52 = arith.maximumf %50, %51 : vector<79x64xf32>
    %53 = vector.extract_strided_slice %52 {offsets = [0, 0], sizes = [76, 64], strides = [1, 1]} : vector<79x64xf32> to vector<76x64xf32>
    %54 = vector.extract_strided_slice %52 {offsets = [1, 0], sizes = [76, 64], strides = [1, 1]} : vector<79x64xf32> to vector<76x64xf32>
    %55 = arith.maximumf %53, %54 : vector<76x64xf32>
    %56 = vector.extract_strided_slice %52 {offsets = [2, 0], sizes = [76, 64], strides = [1, 1]} : vector<79x64xf32> to vector<76x64xf32>
    %57 = arith.maximumf %55, %56 : vector<76x64xf32>
    %58 = vector.extract_strided_slice %52 {offsets = [3, 0], sizes = [76, 64], strides = [1, 1]} : vector<79x64xf32> to vector<76x64xf32>
    %59 = arith.maximumf %57, %58 : vector<76x64xf32>
    %60 = vector.broadcast %1 : vector<1x64xf32> to vector<76x64xf32>
    %61 = arith.addf %59, %60 : vector<76x64xf32>
    %cst_35 = arith.constant 0.000000e+00 : f32
    %62 = vector.broadcast %cst_35 : f32 to vector<76x64xf32>
    %63 = arith.maximumf %61, %62 : vector<76x64xf32>
    %64 = vector.extract_strided_slice %63 {offsets = [0, 0], sizes = [72, 64], strides = [1, 1]} : vector<76x64xf32> to vector<72x64xf32>
    %65 = arith.truncf %64 : vector<72x64xf32> to vector<72x64xbf16>
    %66 = vector.extract_strided_slice %63 {offsets = [1, 0], sizes = [72, 64], strides = [1, 1]} : vector<76x64xf32> to vector<72x64xf32>
    %67 = arith.truncf %66 : vector<72x64xf32> to vector<72x64xbf16>
    %68 = vector.extract_strided_slice %63 {offsets = [2, 0], sizes = [72, 64], strides = [1, 1]} : vector<76x64xf32> to vector<72x64xf32>
    %69 = arith.truncf %68 : vector<72x64xf32> to vector<72x64xbf16>
    %70 = vector.extract_strided_slice %63 {offsets = [3, 0], sizes = [72, 64], strides = [1, 1]} : vector<76x64xf32> to vector<72x64xf32>
    %71 = arith.truncf %70 : vector<72x64xf32> to vector<72x64xbf16>
    %72 = vector.extract_strided_slice %63 {offsets = [4, 0], sizes = [72, 64], strides = [1, 1]} : vector<76x64xf32> to vector<72x64xf32>
    %73 = arith.truncf %72 : vector<72x64xf32> to vector<72x64xbf16>
    %74 = tpu.concatenate %65, %67, %69, %71, %73 in 1 : vector<72x64xbf16>, vector<72x64xbf16>, vector<72x64xbf16>, vector<72x64xbf16>, vector<72x64xbf16> -> vector<72x320xbf16>
    %c72_36 = arith.constant 72 : index
    %c0_37 = arith.constant 0 : index
    %75 = vector.load %arg10[%c72_36, %c0_37] : memref<432x320xbf16, #tpu.memory_space<vmem>>, vector<72x320xbf16>
    tpu.vector_store %arg10[%c72_36, %c0_37], %74 {strides = array<i32>} : memref<432x320xbf16, #tpu.memory_space<vmem>>, vector<72x320xbf16>,
    %c144_38 = arith.constant 144 : index
    %c0_39 = arith.constant 0 : index
    %76 = vector.load %arg9[%c144_38, %c0_39] : memref<512x64xf32, #tpu.memory_space<vmem>>, vector<79x64xf32>
    %c168_40 = arith.constant 168 : index
    %c0_41 = arith.constant 0 : index
    %77 = vector.load %arg9[%c168_40, %c0_41] : memref<512x64xf32, #tpu.memory_space<vmem>>, vector<79x64xf32>
    %78 = arith.maximumf %76, %77 : vector<79x64xf32>
    %c192 = arith.constant 192 : index
    %c0_42 = arith.constant 0 : index
    %79 = vector.load %arg9[%c192, %c0_42] : memref<512x64xf32, #tpu.memory_space<vmem>>, vector<79x64xf32>
    %80 = arith.maximumf %78, %79 : vector<79x64xf32>
    %c216 = arith.constant 216 : index
    %c0_43 = arith.constant 0 : index
    %81 = vector.load %arg9[%c216, %c0_43] : memref<512x64xf32, #tpu.memory_space<vmem>>, vector<79x64xf32>
    %82 = arith.maximumf %80, %81 : vector<79x64xf32>
    %83 = vector.extract_strided_slice %82 {offsets = [0, 0], sizes = [76, 64], strides = [1, 1]} : vector<79x64xf32> to vector<76x64xf32>
    %84 = vector.extract_strided_slice %82 {offsets = [1, 0], sizes = [76, 64], strides = [1, 1]} : vector<79x64xf32> to vector<76x64xf32>
    %85 = arith.maximumf %83, %84 : vector<76x64xf32>
    %86 = vector.extract_strided_slice %82 {offsets = [2, 0], sizes = [76, 64], strides = [1, 1]} : vector<79x64xf32> to vector<76x64xf32>
    %87 = arith.maximumf %85, %86 : vector<76x64xf32>
    %88 = vector.extract_strided_slice %82 {offsets = [3, 0], sizes = [76, 64], strides = [1, 1]} : vector<79x64xf32> to vector<76x64xf32>
    %89 = arith.maximumf %87, %88 : vector<76x64xf32>
    %90 = vector.broadcast %1 : vector<1x64xf32> to vector<76x64xf32>
    %91 = arith.addf %89, %90 : vector<76x64xf32>
    %cst_44 = arith.constant 0.000000e+00 : f32
    %92 = vector.broadcast %cst_44 : f32 to vector<76x64xf32>
    %93 = arith.maximumf %91, %92 : vector<76x64xf32>
    %94 = vector.extract_strided_slice %93 {offsets = [0, 0], sizes = [72, 64], strides = [1, 1]} : vector<76x64xf32> to vector<72x64xf32>
    %95 = arith.truncf %94 : vector<72x64xf32> to vector<72x64xbf16>
    %96 = vector.extract_strided_slice %93 {offsets = [1, 0], sizes = [72, 64], strides = [1, 1]} : vector<76x64xf32> to vector<72x64xf32>
    %97 = arith.truncf %96 : vector<72x64xf32> to vector<72x64xbf16>
    %98 = vector.extract_strided_slice %93 {offsets = [2, 0], sizes = [72, 64], strides = [1, 1]} : vector<76x64xf32> to vector<72x64xf32>
    %99 = arith.truncf %98 : vector<72x64xf32> to vector<72x64xbf16>
    %100 = vector.extract_strided_slice %93 {offsets = [3, 0], sizes = [72, 64], strides = [1, 1]} : vector<76x64xf32> to vector<72x64xf32>
    %101 = arith.truncf %100 : vector<72x64xf32> to vector<72x64xbf16>
    %102 = vector.extract_strided_slice %93 {offsets = [4, 0], sizes = [72, 64], strides = [1, 1]} : vector<76x64xf32> to vector<72x64xf32>
    %103 = arith.truncf %102 : vector<72x64xf32> to vector<72x64xbf16>
    %104 = tpu.concatenate %95, %97, %99, %101, %103 in 1 : vector<72x64xbf16>, vector<72x64xbf16>, vector<72x64xbf16>, vector<72x64xbf16>, vector<72x64xbf16> -> vector<72x320xbf16>
    %c144_45 = arith.constant 144 : index
    %c0_46 = arith.constant 0 : index
    %105 = vector.load %arg10[%c144_45, %c0_46] : memref<432x320xbf16, #tpu.memory_space<vmem>>, vector<72x320xbf16>
    tpu.vector_store %arg10[%c144_45, %c0_46], %104 {strides = array<i32>} : memref<432x320xbf16, #tpu.memory_space<vmem>>, vector<72x320xbf16>,
    %c216_47 = arith.constant 216 : index
    %c0_48 = arith.constant 0 : index
    %106 = vector.load %arg9[%c216_47, %c0_48] : memref<512x64xf32, #tpu.memory_space<vmem>>, vector<79x64xf32>
    %c240 = arith.constant 240 : index
    %c0_49 = arith.constant 0 : index
    %107 = vector.load %arg9[%c240, %c0_49] : memref<512x64xf32, #tpu.memory_space<vmem>>, vector<79x64xf32>
    %108 = arith.maximumf %106, %107 : vector<79x64xf32>
    %c264 = arith.constant 264 : index
    %c0_50 = arith.constant 0 : index
    %109 = vector.load %arg9[%c264, %c0_50] : memref<512x64xf32, #tpu.memory_space<vmem>>, vector<79x64xf32>
    %110 = arith.maximumf %108, %109 : vector<79x64xf32>
    %c288 = arith.constant 288 : index
    %c0_51 = arith.constant 0 : index
    %111 = vector.load %arg9[%c288, %c0_51] : memref<512x64xf32, #tpu.memory_space<vmem>>, vector<79x64xf32>
    %112 = arith.maximumf %110, %111 : vector<79x64xf32>
    %113 = vector.extract_strided_slice %112 {offsets = [0, 0], sizes = [76, 64], strides = [1, 1]} : vector<79x64xf32> to vector<76x64xf32>
    %114 = vector.extract_strided_slice %112 {offsets = [1, 0], sizes = [76, 64], strides = [1, 1]} : vector<79x64xf32> to vector<76x64xf32>
    %115 = arith.maximumf %113, %114 : vector<76x64xf32>
    %116 = vector.extract_strided_slice %112 {offsets = [2, 0], sizes = [76, 64], strides = [1, 1]} : vector<79x64xf32> to vector<76x64xf32>
    %117 = arith.maximumf %115, %116 : vector<76x64xf32>
    %118 = vector.extract_strided_slice %112 {offsets = [3, 0], sizes = [76, 64], strides = [1, 1]} : vector<79x64xf32> to vector<76x64xf32>
    %119 = arith.maximumf %117, %118 : vector<76x64xf32>
    %120 = vector.broadcast %1 : vector<1x64xf32> to vector<76x64xf32>
    %121 = arith.addf %119, %120 : vector<76x64xf32>
    %cst_52 = arith.constant 0.000000e+00 : f32
    %122 = vector.broadcast %cst_52 : f32 to vector<76x64xf32>
    %123 = arith.maximumf %121, %122 : vector<76x64xf32>
    %124 = vector.extract_strided_slice %123 {offsets = [0, 0], sizes = [72, 64], strides = [1, 1]} : vector<76x64xf32> to vector<72x64xf32>
    %125 = arith.truncf %124 : vector<72x64xf32> to vector<72x64xbf16>
    %126 = vector.extract_strided_slice %123 {offsets = [1, 0], sizes = [72, 64], strides = [1, 1]} : vector<76x64xf32> to vector<72x64xf32>
    %127 = arith.truncf %126 : vector<72x64xf32> to vector<72x64xbf16>
    %128 = vector.extract_strided_slice %123 {offsets = [2, 0], sizes = [72, 64], strides = [1, 1]} : vector<76x64xf32> to vector<72x64xf32>
    %129 = arith.truncf %128 : vector<72x64xf32> to vector<72x64xbf16>
    %130 = vector.extract_strided_slice %123 {offsets = [3, 0], sizes = [72, 64], strides = [1, 1]} : vector<76x64xf32> to vector<72x64xf32>
    %131 = arith.truncf %130 : vector<72x64xf32> to vector<72x64xbf16>
    %132 = vector.extract_strided_slice %123 {offsets = [4, 0], sizes = [72, 64], strides = [1, 1]} : vector<76x64xf32> to vector<72x64xf32>
    %133 = arith.truncf %132 : vector<72x64xf32> to vector<72x64xbf16>
    %134 = tpu.concatenate %125, %127, %129, %131, %133 in 1 : vector<72x64xbf16>, vector<72x64xbf16>, vector<72x64xbf16>, vector<72x64xbf16>, vector<72x64xbf16> -> vector<72x320xbf16>
    %c216_53 = arith.constant 216 : index
    %c0_54 = arith.constant 0 : index
    %135 = vector.load %arg10[%c216_53, %c0_54] : memref<432x320xbf16, #tpu.memory_space<vmem>>, vector<72x320xbf16>
    tpu.vector_store %arg10[%c216_53, %c0_54], %134 {strides = array<i32>} : memref<432x320xbf16, #tpu.memory_space<vmem>>, vector<72x320xbf16>,
    %c288_55 = arith.constant 288 : index
    %c0_56 = arith.constant 0 : index
    %136 = vector.load %arg9[%c288_55, %c0_56] : memref<512x64xf32, #tpu.memory_space<vmem>>, vector<79x64xf32>
    %c312 = arith.constant 312 : index
    %c0_57 = arith.constant 0 : index
    %137 = vector.load %arg9[%c312, %c0_57] : memref<512x64xf32, #tpu.memory_space<vmem>>, vector<79x64xf32>
    %138 = arith.maximumf %136, %137 : vector<79x64xf32>
    %c336_58 = arith.constant 336 : index
    %c0_59 = arith.constant 0 : index
    %139 = vector.load %arg9[%c336_58, %c0_59] : memref<512x64xf32, #tpu.memory_space<vmem>>, vector<79x64xf32>
    %140 = arith.maximumf %138, %139 : vector<79x64xf32>
    %c360 = arith.constant 360 : index
    %c0_60 = arith.constant 0 : index
    %141 = vector.load %arg9[%c360, %c0_60] : memref<512x64xf32, #tpu.memory_space<vmem>>, vector<79x64xf32>
    %142 = arith.maximumf %140, %141 : vector<79x64xf32>
    %143 = vector.extract_strided_slice %142 {offsets = [0, 0], sizes = [76, 64], strides = [1, 1]} : vector<79x64xf32> to vector<76x64xf32>
    %144 = vector.extract_strided_slice %142 {offsets = [1, 0], sizes = [76, 64], strides = [1, 1]} : vector<79x64xf32> to vector<76x64xf32>
    %145 = arith.maximumf %143, %144 : vector<76x64xf32>
    %146 = vector.extract_strided_slice %142 {offsets = [2, 0], sizes = [76, 64], strides = [1, 1]} : vector<79x64xf32> to vector<76x64xf32>
    %147 = arith.maximumf %145, %146 : vector<76x64xf32>
    %148 = vector.extract_strided_slice %142 {offsets = [3, 0], sizes = [76, 64], strides = [1, 1]} : vector<79x64xf32> to vector<76x64xf32>
    %149 = arith.maximumf %147, %148 : vector<76x64xf32>
    %150 = vector.broadcast %1 : vector<1x64xf32> to vector<76x64xf32>
    %151 = arith.addf %149, %150 : vector<76x64xf32>
    %cst_61 = arith.constant 0.000000e+00 : f32
    %152 = vector.broadcast %cst_61 : f32 to vector<76x64xf32>
    %153 = arith.maximumf %151, %152 : vector<76x64xf32>
    %154 = vector.extract_strided_slice %153 {offsets = [0, 0], sizes = [72, 64], strides = [1, 1]} : vector<76x64xf32> to vector<72x64xf32>
    %155 = arith.truncf %154 : vector<72x64xf32> to vector<72x64xbf16>
    %156 = vector.extract_strided_slice %153 {offsets = [1, 0], sizes = [72, 64], strides = [1, 1]} : vector<76x64xf32> to vector<72x64xf32>
    %157 = arith.truncf %156 : vector<72x64xf32> to vector<72x64xbf16>
    %158 = vector.extract_strided_slice %153 {offsets = [2, 0], sizes = [72, 64], strides = [1, 1]} : vector<76x64xf32> to vector<72x64xf32>
    %159 = arith.truncf %158 : vector<72x64xf32> to vector<72x64xbf16>
    %160 = vector.extract_strided_slice %153 {offsets = [3, 0], sizes = [72, 64], strides = [1, 1]} : vector<76x64xf32> to vector<72x64xf32>
    %161 = arith.truncf %160 : vector<72x64xf32> to vector<72x64xbf16>
    %162 = vector.extract_strided_slice %153 {offsets = [4, 0], sizes = [72, 64], strides = [1, 1]} : vector<76x64xf32> to vector<72x64xf32>
    %163 = arith.truncf %162 : vector<72x64xf32> to vector<72x64xbf16>
    %164 = tpu.concatenate %155, %157, %159, %161, %163 in 1 : vector<72x64xbf16>, vector<72x64xbf16>, vector<72x64xbf16>, vector<72x64xbf16>, vector<72x64xbf16> -> vector<72x320xbf16>
    %c288_62 = arith.constant 288 : index
    %c0_63 = arith.constant 0 : index
    %165 = vector.load %arg10[%c288_62, %c0_63] : memref<432x320xbf16, #tpu.memory_space<vmem>>, vector<72x320xbf16>
    tpu.vector_store %arg10[%c288_62, %c0_63], %164 {strides = array<i32>} : memref<432x320xbf16, #tpu.memory_space<vmem>>, vector<72x320xbf16>,
    %c360_64 = arith.constant 360 : index
    %c0_65 = arith.constant 0 : index
    %166 = vector.load %arg9[%c360_64, %c0_65] : memref<512x64xf32, #tpu.memory_space<vmem>>, vector<79x64xf32>
    %c384 = arith.constant 384 : index
    %c0_66 = arith.constant 0 : index
    %167 = vector.load %arg9[%c384, %c0_66] : memref<512x64xf32, #tpu.memory_space<vmem>>, vector<79x64xf32>
    %168 = arith.maximumf %166, %167 : vector<79x64xf32>
    %c408 = arith.constant 408 : index
    %c0_67 = arith.constant 0 : index
    %169 = vector.load %arg9[%c408, %c0_67] : memref<512x64xf32, #tpu.memory_space<vmem>>, vector<79x64xf32>
    %170 = arith.maximumf %168, %169 : vector<79x64xf32>
    %c432 = arith.constant 432 : index
    %c0_68 = arith.constant 0 : index
    %171 = vector.load %arg9[%c432, %c0_68] : memref<512x64xf32, #tpu.memory_space<vmem>>, vector<79x64xf32>
    %172 = arith.maximumf %170, %171 : vector<79x64xf32>
    %173 = vector.extract_strided_slice %172 {offsets = [0, 0], sizes = [76, 64], strides = [1, 1]} : vector<79x64xf32> to vector<76x64xf32>
    %174 = vector.extract_strided_slice %172 {offsets = [1, 0], sizes = [76, 64], strides = [1, 1]} : vector<79x64xf32> to vector<76x64xf32>
    %175 = arith.maximumf %173, %174 : vector<76x64xf32>
    %176 = vector.extract_strided_slice %172 {offsets = [2, 0], sizes = [76, 64], strides = [1, 1]} : vector<79x64xf32> to vector<76x64xf32>
    %177 = arith.maximumf %175, %176 : vector<76x64xf32>
    %178 = vector.extract_strided_slice %172 {offsets = [3, 0], sizes = [76, 64], strides = [1, 1]} : vector<79x64xf32> to vector<76x64xf32>
    %179 = arith.maximumf %177, %178 : vector<76x64xf32>
    %180 = vector.broadcast %1 : vector<1x64xf32> to vector<76x64xf32>
    %181 = arith.addf %179, %180 : vector<76x64xf32>
    %cst_69 = arith.constant 0.000000e+00 : f32
    %182 = vector.broadcast %cst_69 : f32 to vector<76x64xf32>
    %183 = arith.maximumf %181, %182 : vector<76x64xf32>
    %184 = vector.extract_strided_slice %183 {offsets = [0, 0], sizes = [72, 64], strides = [1, 1]} : vector<76x64xf32> to vector<72x64xf32>
    %185 = arith.truncf %184 : vector<72x64xf32> to vector<72x64xbf16>
    %186 = vector.extract_strided_slice %183 {offsets = [1, 0], sizes = [72, 64], strides = [1, 1]} : vector<76x64xf32> to vector<72x64xf32>
    %187 = arith.truncf %186 : vector<72x64xf32> to vector<72x64xbf16>
    %188 = vector.extract_strided_slice %183 {offsets = [2, 0], sizes = [72, 64], strides = [1, 1]} : vector<76x64xf32> to vector<72x64xf32>
    %189 = arith.truncf %188 : vector<72x64xf32> to vector<72x64xbf16>
    %190 = vector.extract_strided_slice %183 {offsets = [3, 0], sizes = [72, 64], strides = [1, 1]} : vector<76x64xf32> to vector<72x64xf32>
    %191 = arith.truncf %190 : vector<72x64xf32> to vector<72x64xbf16>
    %192 = vector.extract_strided_slice %183 {offsets = [4, 0], sizes = [72, 64], strides = [1, 1]} : vector<76x64xf32> to vector<72x64xf32>
    %193 = arith.truncf %192 : vector<72x64xf32> to vector<72x64xbf16>
    %194 = tpu.concatenate %185, %187, %189, %191, %193 in 1 : vector<72x64xbf16>, vector<72x64xbf16>, vector<72x64xbf16>, vector<72x64xbf16>, vector<72x64xbf16> -> vector<72x320xbf16>
    %c360_70 = arith.constant 360 : index
    %c0_71 = arith.constant 0 : index
    %195 = vector.load %arg10[%c360_70, %c0_71] : memref<432x320xbf16, #tpu.memory_space<vmem>>, vector<72x320xbf16>
    tpu.vector_store %arg10[%c360_70, %c0_71], %194 {strides = array<i32>} : memref<432x320xbf16, #tpu.memory_space<vmem>>, vector<72x320xbf16>,
    %c0_72 = arith.constant 0 : index
    %c0_73 = arith.constant 0 : index
    %196 = vector.load %arg10[%c0_72, %c0_73] : memref<432x320xbf16, #tpu.memory_space<vmem>>, vector<112x320xbf16>
    %c0_74 = arith.constant 0 : index
    %c0_75 = arith.constant 0 : index
    %c0_76 = arith.constant 0 : index
    %197 = vector.load %arg4[%c0_74, %c0_75, %c0_76] : memref<5x320x32xbf16, #tpu.memory_space<vmem>>, vector<1x320x32xbf16>
    %198 = vector.shape_cast %197 : vector<1x320x32xbf16> to vector<320x32xbf16>
    %cst_77 = arith.constant dense<0.000000e+00> : vector<112x32xf32>
    %199 = tpu.matmul %196, %198, %cst_77 {dimension_numbers = #tpu.dot_dimension_numbers<[1], [0], [0], [1], [0, 0, 1, 1], [], []>} : vector<112x320xbf16>, vector<320x32xbf16>, vector<112x32xf32> -> vector<112x32xf32>
    %c24_78 = arith.constant 24 : index
    %c0_79 = arith.constant 0 : index
    %200 = vector.load %arg10[%c24_78, %c0_79] : memref<432x320xbf16, #tpu.memory_space<vmem>>, vector<112x320xbf16>
    %c1 = arith.constant 1 : index
    %c0_80 = arith.constant 0 : index
    %c0_81 = arith.constant 0 : index
    %201 = vector.load %arg4[%c1, %c0_80, %c0_81] : memref<5x320x32xbf16, #tpu.memory_space<vmem>>, vector<1x320x32xbf16>
    %202 = vector.shape_cast %201 : vector<1x320x32xbf16> to vector<320x32xbf16>
    %cst_82 = arith.constant dense<0.000000e+00> : vector<112x32xf32>
    %203 = tpu.matmul %200, %202, %cst_82 {dimension_numbers = #tpu.dot_dimension_numbers<[1], [0], [0], [1], [0, 0, 1, 1], [], []>} : vector<112x320xbf16>, vector<320x32xbf16>, vector<112x32xf32> -> vector<112x32xf32>
    %204 = arith.addf %199, %203 : vector<112x32xf32>
    %c48_83 = arith.constant 48 : index
    %c0_84 = arith.constant 0 : index
    %205 = vector.load %arg10[%c48_83, %c0_84] : memref<432x320xbf16, #tpu.memory_space<vmem>>, vector<112x320xbf16>
    %c2 = arith.constant 2 : index
    %c0_85 = arith.constant 0 : index
    %c0_86 = arith.constant 0 : index
    %206 = vector.load %arg4[%c2, %c0_85, %c0_86] : memref<5x320x32xbf16, #tpu.memory_space<vmem>>, vector<1x320x32xbf16>
    %207 = vector.shape_cast %206 : vector<1x320x32xbf16> to vector<320x32xbf16>
    %cst_87 = arith.constant dense<0.000000e+00> : vector<112x32xf32>
    %208 = tpu.matmul %205, %207, %cst_87 {dimension_numbers = #tpu.dot_dimension_numbers<[1], [0], [0], [1], [0, 0, 1, 1], [], []>} : vector<112x320xbf16>, vector<320x32xbf16>, vector<112x32xf32> -> vector<112x32xf32>
    %209 = arith.addf %204, %208 : vector<112x32xf32>
    %c72_88 = arith.constant 72 : index
    %c0_89 = arith.constant 0 : index
    %210 = vector.load %arg10[%c72_88, %c0_89] : memref<432x320xbf16, #tpu.memory_space<vmem>>, vector<112x320xbf16>
    %c3 = arith.constant 3 : index
    %c0_90 = arith.constant 0 : index
    %c0_91 = arith.constant 0 : index
    %211 = vector.load %arg4[%c3, %c0_90, %c0_91] : memref<5x320x32xbf16, #tpu.memory_space<vmem>>, vector<1x320x32xbf16>
    %212 = vector.shape_cast %211 : vector<1x320x32xbf16> to vector<320x32xbf16>
    %cst_92 = arith.constant dense<0.000000e+00> : vector<112x32xf32>
    %213 = tpu.matmul %210, %212, %cst_92 {dimension_numbers = #tpu.dot_dimension_numbers<[1], [0], [0], [1], [0, 0, 1, 1], [], []>} : vector<112x320xbf16>, vector<320x32xbf16>, vector<112x32xf32> -> vector<112x32xf32>
    %214 = arith.addf %209, %213 : vector<112x32xf32>
    %c96_93 = arith.constant 96 : index
    %c0_94 = arith.constant 0 : index
    %215 = vector.load %arg10[%c96_93, %c0_94] : memref<432x320xbf16, #tpu.memory_space<vmem>>, vector<112x320xbf16>
    %c4 = arith.constant 4 : index
    %c0_95 = arith.constant 0 : index
    %c0_96 = arith.constant 0 : index
    %216 = vector.load %arg4[%c4, %c0_95, %c0_96] : memref<5x320x32xbf16, #tpu.memory_space<vmem>>, vector<1x320x32xbf16>
    %217 = vector.shape_cast %216 : vector<1x320x32xbf16> to vector<320x32xbf16>
    %cst_97 = arith.constant dense<0.000000e+00> : vector<112x32xf32>
    %218 = tpu.matmul %215, %217, %cst_97 {dimension_numbers = #tpu.dot_dimension_numbers<[1], [0], [0], [1], [0, 0, 1, 1], [], []>} : vector<112x320xbf16>, vector<320x32xbf16>, vector<112x32xf32> -> vector<112x32xf32>
    %219 = arith.addf %214, %218 : vector<112x32xf32>
    %c0_98 = arith.constant 0 : index
    %c0_99 = arith.constant 0 : index
    %220 = vector.load %arg11[%c0_98, %c0_99] : memref<344x32xf32, #tpu.memory_space<vmem>>, vector<112x32xf32>
    tpu.vector_store %arg11[%c0_98, %c0_99], %219 {strides = array<i32>} : memref<344x32xf32, #tpu.memory_space<vmem>>, vector<112x32xf32>,
    %c112 = arith.constant 112 : index
    %c0_100 = arith.constant 0 : index
    %221 = vector.load %arg10[%c112, %c0_100] : memref<432x320xbf16, #tpu.memory_space<vmem>>, vector<112x320xbf16>
    %c0_101 = arith.constant 0 : index
    %c0_102 = arith.constant 0 : index
    %c0_103 = arith.constant 0 : index
    %222 = vector.load %arg4[%c0_101, %c0_102, %c0_103] : memref<5x320x32xbf16, #tpu.memory_space<vmem>>, vector<1x320x32xbf16>
    %223 = vector.shape_cast %222 : vector<1x320x32xbf16> to vector<320x32xbf16>
    %cst_104 = arith.constant dense<0.000000e+00> : vector<112x32xf32>
    %224 = tpu.matmul %221, %223, %cst_104 {dimension_numbers = #tpu.dot_dimension_numbers<[1], [0], [0], [1], [0, 0, 1, 1], [], []>} : vector<112x320xbf16>, vector<320x32xbf16>, vector<112x32xf32> -> vector<112x32xf32>
    %c136 = arith.constant 136 : index
    %c0_105 = arith.constant 0 : index
    %225 = vector.load %arg10[%c136, %c0_105] : memref<432x320xbf16, #tpu.memory_space<vmem>>, vector<112x320xbf16>
    %c1_106 = arith.constant 1 : index
    %c0_107 = arith.constant 0 : index
    %c0_108 = arith.constant 0 : index
    %226 = vector.load %arg4[%c1_106, %c0_107, %c0_108] : memref<5x320x32xbf16, #tpu.memory_space<vmem>>, vector<1x320x32xbf16>
    %227 = vector.shape_cast %226 : vector<1x320x32xbf16> to vector<320x32xbf16>
    %cst_109 = arith.constant dense<0.000000e+00> : vector<112x32xf32>
    %228 = tpu.matmul %225, %227, %cst_109 {dimension_numbers = #tpu.dot_dimension_numbers<[1], [0], [0], [1], [0, 0, 1, 1], [], []>} : vector<112x320xbf16>, vector<320x32xbf16>, vector<112x32xf32> -> vector<112x32xf32>
    %229 = arith.addf %224, %228 : vector<112x32xf32>
    %c160 = arith.constant 160 : index
    %c0_110 = arith.constant 0 : index
    %230 = vector.load %arg10[%c160, %c0_110] : memref<432x320xbf16, #tpu.memory_space<vmem>>, vector<112x320xbf16>
    %c2_111 = arith.constant 2 : index
    %c0_112 = arith.constant 0 : index
    %c0_113 = arith.constant 0 : index
    %231 = vector.load %arg4[%c2_111, %c0_112, %c0_113] : memref<5x320x32xbf16, #tpu.memory_space<vmem>>, vector<1x320x32xbf16>
    %232 = vector.shape_cast %231 : vector<1x320x32xbf16> to vector<320x32xbf16>
    %cst_114 = arith.constant dense<0.000000e+00> : vector<112x32xf32>
    %233 = tpu.matmul %230, %232, %cst_114 {dimension_numbers = #tpu.dot_dimension_numbers<[1], [0], [0], [1], [0, 0, 1, 1], [], []>} : vector<112x320xbf16>, vector<320x32xbf16>, vector<112x32xf32> -> vector<112x32xf32>
    %234 = arith.addf %229, %233 : vector<112x32xf32>
    %c184 = arith.constant 184 : index
    %c0_115 = arith.constant 0 : index
    %235 = vector.load %arg10[%c184, %c0_115] : memref<432x320xbf16, #tpu.memory_space<vmem>>, vector<112x320xbf16>
    %c3_116 = arith.constant 3 : index
    %c0_117 = arith.constant 0 : index
    %c0_118 = arith.constant 0 : index
    %236 = vector.load %arg4[%c3_116, %c0_117, %c0_118] : memref<5x320x32xbf16, #tpu.memory_space<vmem>>, vector<1x320x32xbf16>
    %237 = vector.shape_cast %236 : vector<1x320x32xbf16> to vector<320x32xbf16>
    %cst_119 = arith.constant dense<0.000000e+00> : vector<112x32xf32>
    %238 = tpu.matmul %235, %237, %cst_119 {dimension_numbers = #tpu.dot_dimension_numbers<[1], [0], [0], [1], [0, 0, 1, 1], [], []>} : vector<112x320xbf16>, vector<320x32xbf16>, vector<112x32xf32> -> vector<112x32xf32>
    %239 = arith.addf %234, %238 : vector<112x32xf32>
    %c208 = arith.constant 208 : index
    %c0_120 = arith.constant 0 : index
    %240 = vector.load %arg10[%c208, %c0_120] : memref<432x320xbf16, #tpu.memory_space<vmem>>, vector<112x320xbf16>
    %c4_121 = arith.constant 4 : index
    %c0_122 = arith.constant 0 : index
    %c0_123 = arith.constant 0 : index
    %241 = vector.load %arg4[%c4_121, %c0_122, %c0_123] : memref<5x320x32xbf16, #tpu.memory_space<vmem>>, vector<1x320x32xbf16>
    %242 = vector.shape_cast %241 : vector<1x320x32xbf16> to vector<320x32xbf16>
    %cst_124 = arith.constant dense<0.000000e+00> : vector<112x32xf32>
    %243 = tpu.matmul %240, %242, %cst_124 {dimension_numbers = #tpu.dot_dimension_numbers<[1], [0], [0], [1], [0, 0, 1, 1], [], []>} : vector<112x320xbf16>, vector<320x32xbf16>, vector<112x32xf32> -> vector<112x32xf32>
    %244 = arith.addf %239, %243 : vector<112x32xf32>
    %c112_125 = arith.constant 112 : index
    %c0_126 = arith.constant 0 : index
    %245 = vector.load %arg11[%c112_125, %c0_126] : memref<344x32xf32, #tpu.memory_space<vmem>>, vector<112x32xf32>
    tpu.vector_store %arg11[%c112_125, %c0_126], %244 {strides = array<i32>} : memref<344x32xf32, #tpu.memory_space<vmem>>, vector<112x32xf32>,
    %c224 = arith.constant 224 : index
    %c0_127 = arith.constant 0 : index
    %246 = vector.load %arg10[%c224, %c0_127] : memref<432x320xbf16, #tpu.memory_space<vmem>>, vector<112x320xbf16>
    %c0_128 = arith.constant 0 : index
    %c0_129 = arith.constant 0 : index
    %c0_130 = arith.constant 0 : index
    %247 = vector.load %arg4[%c0_128, %c0_129, %c0_130] : memref<5x320x32xbf16, #tpu.memory_space<vmem>>, vector<1x320x32xbf16>
    %248 = vector.shape_cast %247 : vector<1x320x32xbf16> to vector<320x32xbf16>
    %cst_131 = arith.constant dense<0.000000e+00> : vector<112x32xf32>
    %249 = tpu.matmul %246, %248, %cst_131 {dimension_numbers = #tpu.dot_dimension_numbers<[1], [0], [0], [1], [0, 0, 1, 1], [], []>} : vector<112x320xbf16>, vector<320x32xbf16>, vector<112x32xf32> -> vector<112x32xf32>
    %c248 = arith.constant 248 : index
    %c0_132 = arith.constant 0 : index
    %250 = vector.load %arg10[%c248, %c0_132] : memref<432x320xbf16, #tpu.memory_space<vmem>>, vector<112x320xbf16>
    %c1_133 = arith.constant 1 : index
    %c0_134 = arith.constant 0 : index
    %c0_135 = arith.constant 0 : index
    %251 = vector.load %arg4[%c1_133, %c0_134, %c0_135] : memref<5x320x32xbf16, #tpu.memory_space<vmem>>, vector<1x320x32xbf16>
    %252 = vector.shape_cast %251 : vector<1x320x32xbf16> to vector<320x32xbf16>
    %cst_136 = arith.constant dense<0.000000e+00> : vector<112x32xf32>
    %253 = tpu.matmul %250, %252, %cst_136 {dimension_numbers = #tpu.dot_dimension_numbers<[1], [0], [0], [1], [0, 0, 1, 1], [], []>} : vector<112x320xbf16>, vector<320x32xbf16>, vector<112x32xf32> -> vector<112x32xf32>
    %254 = arith.addf %249, %253 : vector<112x32xf32>
    %c272 = arith.constant 272 : index
    %c0_137 = arith.constant 0 : index
    %255 = vector.load %arg10[%c272, %c0_137] : memref<432x320xbf16, #tpu.memory_space<vmem>>, vector<112x320xbf16>
    %c2_138 = arith.constant 2 : index
    %c0_139 = arith.constant 0 : index
    %c0_140 = arith.constant 0 : index
    %256 = vector.load %arg4[%c2_138, %c0_139, %c0_140] : memref<5x320x32xbf16, #tpu.memory_space<vmem>>, vector<1x320x32xbf16>
    %257 = vector.shape_cast %256 : vector<1x320x32xbf16> to vector<320x32xbf16>
    %cst_141 = arith.constant dense<0.000000e+00> : vector<112x32xf32>
    %258 = tpu.matmul %255, %257, %cst_141 {dimension_numbers = #tpu.dot_dimension_numbers<[1], [0], [0], [1], [0, 0, 1, 1], [], []>} : vector<112x320xbf16>, vector<320x32xbf16>, vector<112x32xf32> -> vector<112x32xf32>
    %259 = arith.addf %254, %258 : vector<112x32xf32>
    %c296 = arith.constant 296 : index
    %c0_142 = arith.constant 0 : index
    %260 = vector.load %arg10[%c296, %c0_142] : memref<432x320xbf16, #tpu.memory_space<vmem>>, vector<112x320xbf16>
    %c3_143 = arith.constant 3 : index
    %c0_144 = arith.constant 0 : index
    %c0_145 = arith.constant 0 : index
    %261 = vector.load %arg4[%c3_143, %c0_144, %c0_145] : memref<5x320x32xbf16, #tpu.memory_space<vmem>>, vector<1x320x32xbf16>
    %262 = vector.shape_cast %261 : vector<1x320x32xbf16> to vector<320x32xbf16>
    %cst_146 = arith.constant dense<0.000000e+00> : vector<112x32xf32>
    %263 = tpu.matmul %260, %262, %cst_146 {dimension_numbers = #tpu.dot_dimension_numbers<[1], [0], [0], [1], [0, 0, 1, 1], [], []>} : vector<112x320xbf16>, vector<320x32xbf16>, vector<112x32xf32> -> vector<112x32xf32>
    %264 = arith.addf %259, %263 : vector<112x32xf32>
    %c320 = arith.constant 320 : index
    %c0_147 = arith.constant 0 : index
    %265 = vector.load %arg10[%c320, %c0_147] : memref<432x320xbf16, #tpu.memory_space<vmem>>, vector<112x320xbf16>
    %c4_148 = arith.constant 4 : index
    %c0_149 = arith.constant 0 : index
    %c0_150 = arith.constant 0 : index
    %266 = vector.load %arg4[%c4_148, %c0_149, %c0_150] : memref<5x320x32xbf16, #tpu.memory_space<vmem>>, vector<1x320x32xbf16>
    %267 = vector.shape_cast %266 : vector<1x320x32xbf16> to vector<320x32xbf16>
    %cst_151 = arith.constant dense<0.000000e+00> : vector<112x32xf32>
    %268 = tpu.matmul %265, %267, %cst_151 {dimension_numbers = #tpu.dot_dimension_numbers<[1], [0], [0], [1], [0, 0, 1, 1], [], []>} : vector<112x320xbf16>, vector<320x32xbf16>, vector<112x32xf32> -> vector<112x32xf32>
    %269 = arith.addf %264, %268 : vector<112x32xf32>
    %c224_152 = arith.constant 224 : index
    %c0_153 = arith.constant 0 : index
    %270 = vector.load %arg11[%c224_152, %c0_153] : memref<344x32xf32, #tpu.memory_space<vmem>>, vector<112x32xf32>
    tpu.vector_store %arg11[%c224_152, %c0_153], %269 {strides = array<i32>} : memref<344x32xf32, #tpu.memory_space<vmem>>, vector<112x32xf32>,
    %c0_154 = arith.constant 0 : index
    %c0_155 = arith.constant 0 : index
    %271 = vector.load %arg11[%c0_154, %c0_155] : memref<344x32xf32, #tpu.memory_space<vmem>>, vector<107x32xf32>
    %c24_156 = arith.constant 24 : index
    %c0_157 = arith.constant 0 : index
    %272 = vector.load %arg11[%c24_156, %c0_157] : memref<344x32xf32, #tpu.memory_space<vmem>>, vector<107x32xf32>
    %273 = arith.maximumf %271, %272 : vector<107x32xf32>
    %274 = vector.extract_strided_slice %273 {offsets = [0, 0], sizes = [106, 32], strides = [1, 1]} : vector<107x32xf32> to vector<106x32xf32>
    %275 = vector.extract_strided_slice %273 {offsets = [1, 0], sizes = [106, 32], strides = [1, 1]} : vector<107x32xf32> to vector<106x32xf32>
    %276 = arith.maximumf %274, %275 : vector<106x32xf32>
    %277 = vector.broadcast %2 : vector<1x32xf32> to vector<106x32xf32>
    %278 = arith.addf %276, %277 : vector<106x32xf32>
    %cst_158 = arith.constant 0.000000e+00 : f32
    %279 = vector.broadcast %cst_158 : f32 to vector<106x32xf32>
    %280 = arith.maximumf %278, %279 : vector<106x32xf32>
    %281 = vector.extract_strided_slice %280 {offsets = [0, 0], sizes = [104, 32], strides = [1, 1]} : vector<106x32xf32> to vector<104x32xf32>
    %282 = arith.truncf %281 : vector<104x32xf32> to vector<104x32xbf16>
    %283 = vector.extract_strided_slice %280 {offsets = [1, 0], sizes = [104, 32], strides = [1, 1]} : vector<106x32xf32> to vector<104x32xf32>
    %284 = arith.truncf %283 : vector<104x32xf32> to vector<104x32xbf16>
    %285 = vector.extract_strided_slice %280 {offsets = [2, 0], sizes = [104, 32], strides = [1, 1]} : vector<106x32xf32> to vector<104x32xf32>
    %286 = arith.truncf %285 : vector<104x32xf32> to vector<104x32xbf16>
    %287 = tpu.concatenate %282, %284, %286 in 1 : vector<104x32xbf16>, vector<104x32xbf16>, vector<104x32xbf16> -> vector<104x96xbf16>
    %c0_159 = arith.constant 0 : index
    %c0_160 = arith.constant 0 : index
    %288 = vector.load %arg12[%c0_159, %c0_160] : memref<312x96xbf16, #tpu.memory_space<vmem>>, vector<104x96xbf16>
    tpu.vector_store %arg12[%c0_159, %c0_160], %287 {strides = array<i32>} : memref<312x96xbf16, #tpu.memory_space<vmem>>, vector<104x96xbf16>,
    %c104 = arith.constant 104 : index
    %c0_161 = arith.constant 0 : index
    %289 = vector.load %arg11[%c104, %c0_161] : memref<344x32xf32, #tpu.memory_space<vmem>>, vector<107x32xf32>
    %c128 = arith.constant 128 : index
    %c0_162 = arith.constant 0 : index
    %290 = vector.load %arg11[%c128, %c0_162] : memref<344x32xf32, #tpu.memory_space<vmem>>, vector<107x32xf32>
    %291 = arith.maximumf %289, %290 : vector<107x32xf32>
    %292 = vector.extract_strided_slice %291 {offsets = [0, 0], sizes = [106, 32], strides = [1, 1]} : vector<107x32xf32> to vector<106x32xf32>
    %293 = vector.extract_strided_slice %291 {offsets = [1, 0], sizes = [106, 32], strides = [1, 1]} : vector<107x32xf32> to vector<106x32xf32>
    %294 = arith.maximumf %292, %293 : vector<106x32xf32>
    %295 = vector.broadcast %2 : vector<1x32xf32> to vector<106x32xf32>
    %296 = arith.addf %294, %295 : vector<106x32xf32>
    %cst_163 = arith.constant 0.000000e+00 : f32
    %297 = vector.broadcast %cst_163 : f32 to vector<106x32xf32>
    %298 = arith.maximumf %296, %297 : vector<106x32xf32>
    %299 = vector.extract_strided_slice %298 {offsets = [0, 0], sizes = [104, 32], strides = [1, 1]} : vector<106x32xf32> to vector<104x32xf32>
    %300 = arith.truncf %299 : vector<104x32xf32> to vector<104x32xbf16>
    %301 = vector.extract_strided_slice %298 {offsets = [1, 0], sizes = [104, 32], strides = [1, 1]} : vector<106x32xf32> to vector<104x32xf32>
    %302 = arith.truncf %301 : vector<104x32xf32> to vector<104x32xbf16>
    %303 = vector.extract_strided_slice %298 {offsets = [2, 0], sizes = [104, 32], strides = [1, 1]} : vector<106x32xf32> to vector<104x32xf32>
    %304 = arith.truncf %303 : vector<104x32xf32> to vector<104x32xbf16>
    %305 = tpu.concatenate %300, %302, %304 in 1 : vector<104x32xbf16>, vector<104x32xbf16>, vector<104x32xbf16> -> vector<104x96xbf16>
    %c104_164 = arith.constant 104 : index
    %c0_165 = arith.constant 0 : index
    %306 = vector.load %arg12[%c104_164, %c0_165] : memref<312x96xbf16, #tpu.memory_space<vmem>>, vector<104x96xbf16>
    tpu.vector_store %arg12[%c104_164, %c0_165], %305 {strides = array<i32>} : memref<312x96xbf16, #tpu.memory_space<vmem>>, vector<104x96xbf16>,
    %c208_166 = arith.constant 208 : index
    %c0_167 = arith.constant 0 : index
    %307 = vector.load %arg11[%c208_166, %c0_167] : memref<344x32xf32, #tpu.memory_space<vmem>>, vector<107x32xf32>
    %c232 = arith.constant 232 : index
    %c0_168 = arith.constant 0 : index
    %308 = vector.load %arg11[%c232, %c0_168] : memref<344x32xf32, #tpu.memory_space<vmem>>, vector<107x32xf32>
    %309 = arith.maximumf %307, %308 : vector<107x32xf32>
    %310 = vector.extract_strided_slice %309 {offsets = [0, 0], sizes = [106, 32], strides = [1, 1]} : vector<107x32xf32> to vector<106x32xf32>
    %311 = vector.extract_strided_slice %309 {offsets = [1, 0], sizes = [106, 32], strides = [1, 1]} : vector<107x32xf32> to vector<106x32xf32>
    %312 = arith.maximumf %310, %311 : vector<106x32xf32>
    %313 = vector.broadcast %2 : vector<1x32xf32> to vector<106x32xf32>
    %314 = arith.addf %312, %313 : vector<106x32xf32>
    %cst_169 = arith.constant 0.000000e+00 : f32
    %315 = vector.broadcast %cst_169 : f32 to vector<106x32xf32>
    %316 = arith.maximumf %314, %315 : vector<106x32xf32>
    %317 = vector.extract_strided_slice %316 {offsets = [0, 0], sizes = [104, 32], strides = [1, 1]} : vector<106x32xf32> to vector<104x32xf32>
    %318 = arith.truncf %317 : vector<104x32xf32> to vector<104x32xbf16>
    %319 = vector.extract_strided_slice %316 {offsets = [1, 0], sizes = [104, 32], strides = [1, 1]} : vector<106x32xf32> to vector<104x32xf32>
    %320 = arith.truncf %319 : vector<104x32xf32> to vector<104x32xbf16>
    %321 = vector.extract_strided_slice %316 {offsets = [2, 0], sizes = [104, 32], strides = [1, 1]} : vector<106x32xf32> to vector<104x32xf32>
    %322 = arith.truncf %321 : vector<104x32xf32> to vector<104x32xbf16>
    %323 = tpu.concatenate %318, %320, %322 in 1 : vector<104x32xbf16>, vector<104x32xbf16>, vector<104x32xbf16> -> vector<104x96xbf16>
    %c208_170 = arith.constant 208 : index
    %c0_171 = arith.constant 0 : index
    %324 = vector.load %arg12[%c208_170, %c0_171] : memref<312x96xbf16, #tpu.memory_space<vmem>>, vector<104x96xbf16>
    tpu.vector_store %arg12[%c208_170, %c0_171], %323 {strides = array<i32>} : memref<312x96xbf16, #tpu.memory_space<vmem>>, vector<104x96xbf16>,
    %c0_172 = arith.constant 0 : index
    %c0_173 = arith.constant 0 : index
    %325 = vector.load %arg12[%c0_172, %c0_173] : memref<312x96xbf16, #tpu.memory_space<vmem>>, vector<88x96xbf16>
    %c0_174 = arith.constant 0 : index
    %c0_175 = arith.constant 0 : index
    %c0_176 = arith.constant 0 : index
    %326 = vector.load %arg6[%c0_174, %c0_175, %c0_176] : memref<3x96x128xbf16, #tpu.memory_space<vmem>>, vector<1x96x128xbf16>
    %327 = vector.shape_cast %326 : vector<1x96x128xbf16> to vector<96x128xbf16>
    %cst_177 = arith.constant dense<0.000000e+00> : vector<88x128xf32>
    %328 = tpu.matmul %325, %327, %cst_177 {dimension_numbers = #tpu.dot_dimension_numbers<[1], [0], [0], [1], [0, 0, 1, 1], [], []>} : vector<88x96xbf16>, vector<96x128xbf16>, vector<88x128xf32> -> vector<88x128xf32>
    %c24_178 = arith.constant 24 : index
    %c0_179 = arith.constant 0 : index
    %329 = vector.load %arg12[%c24_178, %c0_179] : memref<312x96xbf16, #tpu.memory_space<vmem>>, vector<88x96xbf16>
    %c1_180 = arith.constant 1 : index
    %c0_181 = arith.constant 0 : index
    %c0_182 = arith.constant 0 : index
    %330 = vector.load %arg6[%c1_180, %c0_181, %c0_182] : memref<3x96x128xbf16, #tpu.memory_space<vmem>>, vector<1x96x128xbf16>
    %331 = vector.shape_cast %330 : vector<1x96x128xbf16> to vector<96x128xbf16>
    %cst_183 = arith.constant dense<0.000000e+00> : vector<88x128xf32>
    %332 = tpu.matmul %329, %331, %cst_183 {dimension_numbers = #tpu.dot_dimension_numbers<[1], [0], [0], [1], [0, 0, 1, 1], [], []>} : vector<88x96xbf16>, vector<96x128xbf16>, vector<88x128xf32> -> vector<88x128xf32>
    %333 = arith.addf %328, %332 : vector<88x128xf32>
    %c48_184 = arith.constant 48 : index
    %c0_185 = arith.constant 0 : index
    %334 = vector.load %arg12[%c48_184, %c0_185] : memref<312x96xbf16, #tpu.memory_space<vmem>>, vector<88x96xbf16>
    %c2_186 = arith.constant 2 : index
    %c0_187 = arith.constant 0 : index
    %c0_188 = arith.constant 0 : index
    %335 = vector.load %arg6[%c2_186, %c0_187, %c0_188] : memref<3x96x128xbf16, #tpu.memory_space<vmem>>, vector<1x96x128xbf16>
    %336 = vector.shape_cast %335 : vector<1x96x128xbf16> to vector<96x128xbf16>
    %cst_189 = arith.constant dense<0.000000e+00> : vector<88x128xf32>
    %337 = tpu.matmul %334, %336, %cst_189 {dimension_numbers = #tpu.dot_dimension_numbers<[1], [0], [0], [1], [0, 0, 1, 1], [], []>} : vector<88x96xbf16>, vector<96x128xbf16>, vector<88x128xf32> -> vector<88x128xf32>
    %338 = arith.addf %333, %337 : vector<88x128xf32>
    %339 = vector.broadcast %3 : vector<1x128xf32> to vector<88x128xf32>
    %340 = arith.addf %338, %339 : vector<88x128xf32>
    %cst_190 = arith.constant dense<0xFF800000> : vector<88xf32>
    %341 = vector.multi_reduction <maximumf>, %340, %cst_190 [1] : vector<88x128xf32> to vector<88xf32>
    %342 = vector.shape_cast %341 : vector<88xf32> to vector<88x1xf32>
    %343 = vector.broadcast %342 : vector<88x1xf32> to vector<88x128xf32>
    %344 = arith.subf %340, %343 : vector<88x128xf32>
    %345 = math.exp %344 : vector<88x128xf32>
    %cst_191 = arith.constant dense<0.000000e+00> : vector<88xf32>
    %346 = vector.multi_reduction <add>, %345, %cst_191 [1] : vector<88x128xf32> to vector<88xf32>
    %347 = vector.shape_cast %346 : vector<88xf32> to vector<88x1xf32>
    %348 = tpu.reciprocal %347 : vector<88x1xf32> -> vector<88x1xf32>
    %349 = vector.broadcast %348 : vector<88x1xf32> to vector<88x128xf32>
    %350 = arith.mulf %345, %349 : vector<88x128xf32>
    %351 = arith.truncf %350 : vector<88x128xf32> to vector<88x128xbf16>
    %c0_192 = arith.constant 0 : index
    %c0_193 = arith.constant 0 : index
    %c0_194 = arith.constant 0 : index
    %352 = vector.load %arg8[%c0_192, %c0_193, %c0_194] : memref<1x264x128xbf16, #tpu.memory_space<vmem>>, vector<1x88x128xbf16>
    %353 = vector.shape_cast %352 : vector<1x88x128xbf16> to vector<88x128xbf16>
    %354 = vector.shape_cast %351 : vector<88x128xbf16> to vector<1x88x128xbf16>
    tpu.vector_store %arg8[%c0_192, %c0_193, %c0_194], %354 {strides = array<i32>} : memref<1x264x128xbf16, #tpu.memory_space<vmem>>, vector<1x88x128xbf16>,
    %c88 = arith.constant 88 : index
    %c0_195 = arith.constant 0 : index
    %355 = vector.load %arg12[%c88, %c0_195] : memref<312x96xbf16, #tpu.memory_space<vmem>>, vector<88x96xbf16>
    %c0_196 = arith.constant 0 : index
    %c0_197 = arith.constant 0 : index
    %c0_198 = arith.constant 0 : index
    %356 = vector.load %arg6[%c0_196, %c0_197, %c0_198] : memref<3x96x128xbf16, #tpu.memory_space<vmem>>, vector<1x96x128xbf16>
    %357 = vector.shape_cast %356 : vector<1x96x128xbf16> to vector<96x128xbf16>
    %cst_199 = arith.constant dense<0.000000e+00> : vector<88x128xf32>
    %358 = tpu.matmul %355, %357, %cst_199 {dimension_numbers = #tpu.dot_dimension_numbers<[1], [0], [0], [1], [0, 0, 1, 1], [], []>} : vector<88x96xbf16>, vector<96x128xbf16>, vector<88x128xf32> -> vector<88x128xf32>
    %c112_200 = arith.constant 112 : index
    %c0_201 = arith.constant 0 : index
    %359 = vector.load %arg12[%c112_200, %c0_201] : memref<312x96xbf16, #tpu.memory_space<vmem>>, vector<88x96xbf16>
    %c1_202 = arith.constant 1 : index
    %c0_203 = arith.constant 0 : index
    %c0_204 = arith.constant 0 : index
    %360 = vector.load %arg6[%c1_202, %c0_203, %c0_204] : memref<3x96x128xbf16, #tpu.memory_space<vmem>>, vector<1x96x128xbf16>
    %361 = vector.shape_cast %360 : vector<1x96x128xbf16> to vector<96x128xbf16>
    %cst_205 = arith.constant dense<0.000000e+00> : vector<88x128xf32>
    %362 = tpu.matmul %359, %361, %cst_205 {dimension_numbers = #tpu.dot_dimension_numbers<[1], [0], [0], [1], [0, 0, 1, 1], [], []>} : vector<88x96xbf16>, vector<96x128xbf16>, vector<88x128xf32> -> vector<88x128xf32>
    %363 = arith.addf %358, %362 : vector<88x128xf32>
    %c136_206 = arith.constant 136 : index
    %c0_207 = arith.constant 0 : index
    %364 = vector.load %arg12[%c136_206, %c0_207] : memref<312x96xbf16, #tpu.memory_space<vmem>>, vector<88x96xbf16>
    %c2_208 = arith.constant 2 : index
    %c0_209 = arith.constant 0 : index
    %c0_210 = arith.constant 0 : index
    %365 = vector.load %arg6[%c2_208, %c0_209, %c0_210] : memref<3x96x128xbf16, #tpu.memory_space<vmem>>, vector<1x96x128xbf16>
    %366 = vector.shape_cast %365 : vector<1x96x128xbf16> to vector<96x128xbf16>
    %cst_211 = arith.constant dense<0.000000e+00> : vector<88x128xf32>
    %367 = tpu.matmul %364, %366, %cst_211 {dimension_numbers = #tpu.dot_dimension_numbers<[1], [0], [0], [1], [0, 0, 1, 1], [], []>} : vector<88x96xbf16>, vector<96x128xbf16>, vector<88x128xf32> -> vector<88x128xf32>
    %368 = arith.addf %363, %367 : vector<88x128xf32>
    %369 = vector.broadcast %3 : vector<1x128xf32> to vector<88x128xf32>
    %370 = arith.addf %368, %369 : vector<88x128xf32>
    %cst_212 = arith.constant dense<0xFF800000> : vector<88xf32>
    %371 = vector.multi_reduction <maximumf>, %370, %cst_212 [1] : vector<88x128xf32> to vector<88xf32>
    %372 = vector.shape_cast %371 : vector<88xf32> to vector<88x1xf32>
    %373 = vector.broadcast %372 : vector<88x1xf32> to vector<88x128xf32>
    %374 = arith.subf %370, %373 : vector<88x128xf32>
    %375 = math.exp %374 : vector<88x128xf32>
    %cst_213 = arith.constant dense<0.000000e+00> : vector<88xf32>
    %376 = vector.multi_reduction <add>, %375, %cst_213 [1] : vector<88x128xf32> to vector<88xf32>
    %377 = vector.shape_cast %376 : vector<88xf32> to vector<88x1xf32>
    %378 = tpu.reciprocal %377 : vector<88x1xf32> -> vector<88x1xf32>
    %379 = vector.broadcast %378 : vector<88x1xf32> to vector<88x128xf32>
    %380 = arith.mulf %375, %379 : vector<88x128xf32>
    %381 = arith.truncf %380 : vector<88x128xf32> to vector<88x128xbf16>
    %c0_214 = arith.constant 0 : index
    %c88_215 = arith.constant 88 : index
    %c0_216 = arith.constant 0 : index
    %382 = vector.load %arg8[%c0_214, %c88_215, %c0_216] : memref<1x264x128xbf16, #tpu.memory_space<vmem>>, vector<1x88x128xbf16>
    %383 = vector.shape_cast %382 : vector<1x88x128xbf16> to vector<88x128xbf16>
    %384 = vector.shape_cast %381 : vector<88x128xbf16> to vector<1x88x128xbf16>
    tpu.vector_store %arg8[%c0_214, %c88_215, %c0_216], %384 {strides = array<i32>} : memref<1x264x128xbf16, #tpu.memory_space<vmem>>, vector<1x88x128xbf16>,
    %c176 = arith.constant 176 : index
    %c0_217 = arith.constant 0 : index
    %385 = vector.load %arg12[%c176, %c0_217] : memref<312x96xbf16, #tpu.memory_space<vmem>>, vector<88x96xbf16>
    %c0_218 = arith.constant 0 : index
    %c0_219 = arith.constant 0 : index
    %c0_220 = arith.constant 0 : index
    %386 = vector.load %arg6[%c0_218, %c0_219, %c0_220] : memref<3x96x128xbf16, #tpu.memory_space<vmem>>, vector<1x96x128xbf16>
    %387 = vector.shape_cast %386 : vector<1x96x128xbf16> to vector<96x128xbf16>
    %cst_221 = arith.constant dense<0.000000e+00> : vector<88x128xf32>
    %388 = tpu.matmul %385, %387, %cst_221 {dimension_numbers = #tpu.dot_dimension_numbers<[1], [0], [0], [1], [0, 0, 1, 1], [], []>} : vector<88x96xbf16>, vector<96x128xbf16>, vector<88x128xf32> -> vector<88x128xf32>
    %c200 = arith.constant 200 : index
    %c0_222 = arith.constant 0 : index
    %389 = vector.load %arg12[%c200, %c0_222] : memref<312x96xbf16, #tpu.memory_space<vmem>>, vector<88x96xbf16>
    %c1_223 = arith.constant 1 : index
    %c0_224 = arith.constant 0 : index
    %c0_225 = arith.constant 0 : index
    %390 = vector.load %arg6[%c1_223, %c0_224, %c0_225] : memref<3x96x128xbf16, #tpu.memory_space<vmem>>, vector<1x96x128xbf16>
    %391 = vector.shape_cast %390 : vector<1x96x128xbf16> to vector<96x128xbf16>
    %cst_226 = arith.constant dense<0.000000e+00> : vector<88x128xf32>
    %392 = tpu.matmul %389, %391, %cst_226 {dimension_numbers = #tpu.dot_dimension_numbers<[1], [0], [0], [1], [0, 0, 1, 1], [], []>} : vector<88x96xbf16>, vector<96x128xbf16>, vector<88x128xf32> -> vector<88x128xf32>
    %393 = arith.addf %388, %392 : vector<88x128xf32>
    %c224_227 = arith.constant 224 : index
    %c0_228 = arith.constant 0 : index
    %394 = vector.load %arg12[%c224_227, %c0_228] : memref<312x96xbf16, #tpu.memory_space<vmem>>, vector<88x96xbf16>
    %c2_229 = arith.constant 2 : index
    %c0_230 = arith.constant 0 : index
    %c0_231 = arith.constant 0 : index
    %395 = vector.load %arg6[%c2_229, %c0_230, %c0_231] : memref<3x96x128xbf16, #tpu.memory_space<vmem>>, vector<1x96x128xbf16>
    %396 = vector.shape_cast %395 : vector<1x96x128xbf16> to vector<96x128xbf16>
    %cst_232 = arith.constant dense<0.000000e+00> : vector<88x128xf32>
    %397 = tpu.matmul %394, %396, %cst_232 {dimension_numbers = #tpu.dot_dimension_numbers<[1], [0], [0], [1], [0, 0, 1, 1], [], []>} : vector<88x96xbf16>, vector<96x128xbf16>, vector<88x128xf32> -> vector<88x128xf32>
    %398 = arith.addf %393, %397 : vector<88x128xf32>
    %399 = vector.broadcast %3 : vector<1x128xf32> to vector<88x128xf32>
    %400 = arith.addf %398, %399 : vector<88x128xf32>
    %cst_233 = arith.constant dense<0xFF800000> : vector<88xf32>
    %401 = vector.multi_reduction <maximumf>, %400, %cst_233 [1] : vector<88x128xf32> to vector<88xf32>
    %402 = vector.shape_cast %401 : vector<88xf32> to vector<88x1xf32>
    %403 = vector.broadcast %402 : vector<88x1xf32> to vector<88x128xf32>
    %404 = arith.subf %400, %403 : vector<88x128xf32>
    %405 = math.exp %404 : vector<88x128xf32>
    %cst_234 = arith.constant dense<0.000000e+00> : vector<88xf32>
    %406 = vector.multi_reduction <add>, %405, %cst_234 [1] : vector<88x128xf32> to vector<88xf32>
    %407 = vector.shape_cast %406 : vector<88xf32> to vector<88x1xf32>
    %408 = tpu.reciprocal %407 : vector<88x1xf32> -> vector<88x1xf32>
    %409 = vector.broadcast %408 : vector<88x1xf32> to vector<88x128xf32>
    %410 = arith.mulf %405, %409 : vector<88x128xf32>
    %411 = arith.truncf %410 : vector<88x128xf32> to vector<88x128xbf16>
    %c0_235 = arith.constant 0 : index
    %c176_236 = arith.constant 176 : index
    %c0_237 = arith.constant 0 : index
    %412 = vector.load %arg8[%c0_235, %c176_236, %c0_237] : memref<1x264x128xbf16, #tpu.memory_space<vmem>>, vector<1x88x128xbf16>
    %413 = vector.shape_cast %412 : vector<1x88x128xbf16> to vector<88x128xbf16>
    %414 = vector.shape_cast %411 : vector<88x128xbf16> to vector<1x88x128xbf16>
    tpu.vector_store %arg8[%c0_235, %c176_236, %c0_237], %414 {strides = array<i32>} : memref<1x264x128xbf16, #tpu.memory_space<vmem>>, vector<1x88x128xbf16>,
    return
  }
  func.func @transform_0(%arg0: i32) -> (i32, i32, i32) {
    %c0_i32 = arith.constant 0 : i32
    %c0_i32_0 = arith.constant 0 : i32
    %c0_i32_1 = arith.constant 0 : i32
    return %arg0, %c0_i32, %c0_i32_0 : i32, i32, i32
  }
  func.func @transform_1(%arg0: i32) -> (i32, i32) {
    %c0_i32 = arith.constant 0 : i32
    %c0_i32_0 = arith.constant 0 : i32
    %c0_i32_1 = arith.constant 0 : i32
    return %c0_i32, %c0_i32_0 : i32, i32
  }
  func.func @transform_2(%arg0: i32) -> (i32, i32) {
    %c0_i32 = arith.constant 0 : i32
    %c0_i32_0 = arith.constant 0 : i32
    %c0_i32_1 = arith.constant 0 : i32
    return %c0_i32, %c0_i32_0 : i32, i32
  }
  func.func @transform_3(%arg0: i32) -> (i32, i32, i32) {
    %c0_i32 = arith.constant 0 : i32
    %c0_i32_0 = arith.constant 0 : i32
    %c0_i32_1 = arith.constant 0 : i32
    %c0_i32_2 = arith.constant 0 : i32
    return %c0_i32, %c0_i32_0, %c0_i32_1 : i32, i32, i32
  }
  func.func @transform_4(%arg0: i32) -> (i32, i32) {
    %c0_i32 = arith.constant 0 : i32
    %c0_i32_0 = arith.constant 0 : i32
    %c0_i32_1 = arith.constant 0 : i32
    return %c0_i32, %c0_i32_0 : i32, i32
  }
  func.func @transform_5(%arg0: i32) -> (i32, i32, i32) {
    %c0_i32 = arith.constant 0 : i32
    %c0_i32_0 = arith.constant 0 : i32
    %c0_i32_1 = arith.constant 0 : i32
    %c0_i32_2 = arith.constant 0 : i32
    return %c0_i32, %c0_i32_0, %c0_i32_1 : i32, i32, i32
  }
  func.func @transform_6(%arg0: i32) -> (i32, i32) {
    %c0_i32 = arith.constant 0 : i32
    %c0_i32_0 = arith.constant 0 : i32
    %c0_i32_1 = arith.constant 0 : i32
    return %c0_i32, %c0_i32_0 : i32, i32
  }
  func.func @transform_7(%arg0: i32) -> (i32, i32, i32) {
    %c0_i32 = arith.constant 0 : i32
    %c0_i32_0 = arith.constant 0 : i32
    %c0_i32_1 = arith.constant 0 : i32
    return %arg0, %c0_i32, %c0_i32_0 : i32, i32, i32
  }
}

</mosaic_0001>

<bundles_post_ra>
// kernel: _lambda_.1
= control target key start
LH: loop header
LB: loop body
LE: loop exit
PB: predicated region body
PF: predicated region fallthrough
CT: control target
= control target key end

     0   :  { %s17638_s24 = smov 0   ;;  %s23891_s0 = inlined_call_operand.vmem [shape: bf16[2,504,64], index: 0, kind: input, shape index: {}]   ;;  %s23892_s1 = inlined_call_operand.vmem [shape: bf16[64,64], index: 1, kind: input, shape index: {}]   ;;  %s23893_s2 = inlined_call_operand.vmem [shape: f32[1,64], index: 2, kind: input, shape index: {}]   ;;  %s23894_s3 = inlined_call_operand.vmem [shape: bf16[5,320,32], index: 3, kind: input, shape index: {}]   ;;  %s23895_s4 = inlined_call_operand.vmem [shape: f32[1,32], index: 4, kind: input, shape index: {}]   ;;  %s23896_s5 = inlined_call_operand.vmem [shape: bf16[3,96,128], index: 5, kind: input, shape index: {}]   ;;  %s23897_s6 = inlined_call_operand.vmem [shape: f32[1,128], index: 6, kind: input, shape index: {}]   ;;  %s23898_s7 = inlined_call_operand.vmem [shape: bf16[2,264,128], index: 7, kind: output, shape index: {}]  }
   0x1 LB: > { %s12882_s25 = sadd.s32 4294967295, %s17592_s24   ;;  %p12886_p0 = scmp.ge.s32.totalorder %s17592_s24, 1  ;;  %s17592_s24 = sphi %s17638_s24, %s17_s24  }
   0x2   : > { %p237_p1 = scmp.lt.s32.totalorder %s17592_s24, 3 }
   0x4   : > { %p238_p2 = pnand %p12886_p0, %p237_p1 }
   0x6   : > { %241 = sbr.rel (%p238_p2) target bundleno = 2387 (0x953), region = 48 }
   0xd   : > { %v16993_v0 = vld [vmem:[%s23892_s1] sm:$0xff]   ;;  %v23900_v1 = vmov 0.0   ;;  %v16994_v2 = vld [vmem:[%s23892_s1 + $0x8] sm:$0xff]   ;;  %p269_p3 = scmp.lt.s32.totalorder %s12882_s25, 1  ;;  %vm17595_vm0 = vmmov 0   ;;  %v16995_v3 = vld [vmem:[%s23892_s1 + $0x10] sm:$0xff]  }
   0xe   : > { %15465 = vmatprep.subr.bf16.mxu0 %v23900_v1  ;;  %16377 = vmatprep.subr.bf16.mxu1 %v23900_v1  ;;  %v16996_v4 = vld [vmem:[%s23892_s1 + $0x18] sm:$0xff]   ;;  %vm389_vm1 = vcmask 523264   ;;  %vm1122_vm2 = vcmask 1046528   ;;  %vm1162_vm3 = vcmask 1045504   ;;  %vm1202_vm4 = vcmask 1044480   ;;  %s17596_s23 = smov 64  }
   0xf   : > { %15466 = vmatpush3.bf16.msra.mxu0 %v16993_v0  ;;  %16381 = vmatpush3.bf16.msra.mxu1 %v16993_v0  ;;  %s24171_s25 = smov (!%p269_p3, %s12882_s25), 1  ;;  %vm1274_vm5 = vsmask.f32 7424  ;;  %vm1339_vm6 = vsmask.f32 6400  ;;  %vm1434_vm7 = vcmask 519168  }
  0x10   : > { %15467 = vmatprep.subr.bf16.mxu0 %v23900_v1  ;;  %16378 = vmatprep.subr.bf16.mxu1 %v23900_v1  ;;  %s16979_s9 = smul.u32 252, %s24171_s25  ;;  %vm1823_vm8 = vcmask 523268   ;;  %vm1778_vm9 = vcmask 1043456   ;;  %vm5462_vm10 = vcmask 261120   ;;  %s17597_s30 = smov 32   ;;  %vm10024_vm11 = vcmask 781312  }
  0x11   : > { %15473 = vmatprep.mubr.msk.bf16.mxu0 %vm17595_vm0, %v23900_v1  ;;  %15505 = vmatprep.mubr.msk.bf16.mxu1 %vm17595_vm0, %v23900_v1  ;;  %vm10797_vm12 = vcmask 785408  }
  0x12   : > { %s17671_s12 = scalar_lea.vmem %s23891_s0, %s16979_s9  ;;  %s16980_s9 = smul.u32 132, %s24171_s25 }
  0x13   : > { %15468 = vmatpush3.bf16.msra.mxu0 %v16994_v2  ;;  %16382 = vmatpush3.bf16.msra.mxu1 %v16994_v2  ;;  %v16997_v5 = vld [vmem:[%s17671_s12] sm:$0xff]   ;;  %v16999_v7 = vld [vmem:[%s17671_s12 + $0x8] sm:$0xff]   ;;  %v17001_v9 = vld [vmem:[%s17671_s12 + $0x10] sm:$0xff]  }
  0x14   : > { %15469 = vmatprep.subr.bf16.mxu0 %v23900_v1  ;;  %16379 = vmatprep.subr.bf16.mxu1 %v23900_v1  ;;  %v16998_v6 = vld [vmem:[%s17671_s12 + $0x40] sm:$0xff]   ;;  %v17000_v8 = vld [vmem:[%s17671_s12 + $0x48] sm:$0xff]   ;;  %v17002_v10 = vld [vmem:[%s17671_s12 + $0x50] ss:$0 sps:$4 sm:$0xff]  }
  0x15   : > { %v17003_v11 = vld [vmem:[%s17671_s12 + $0x18] sm:$0xff]   ;;  %v17005_v13 = vld [vmem:[%s17671_s12 + $0x20] sm:$0xff]   ;;  %v17007_v15 = vld [vmem:[%s17671_s12 + $0x28] sm:$0xff]  }
  0x16   : > { %v17004_v12 = vld [vmem:[%s17671_s12 + $0x54] sm:$0xff]   ;;  %v17006_v14 = vld [vmem:[%s17671_s12 + $0x5c] sm:$0xff]   ;;  %v17008_v16 = vld [vmem:[%s17671_s12 + $0x64] sm:$0xff]  }
  0x17   : > { %15470 = vmatpush3.bf16.msra.mxu0 %v16995_v3  ;;  %16383 = vmatpush3.bf16.msra.mxu1 %v16995_v3  ;;  %v17009_v17 = vld [vmem:[%s17671_s12 + $0x30] sm:$0xff]   ;;  %v17011_v19 = vld [vmem:[%s17671_s12 + $0x38] sm:$0xff]   ;;  %v17018_v22 = vld [vmem:[%s17671_s12 + $0xa8] sm:$0xff]  }
  0x18   : > { %15471 = vmatprep.subr.bf16.mxu0 %v23900_v1  ;;  %16380 = vmatprep.subr.bf16.mxu1 %v23900_v1  ;;  %v17010_v18 = vld [vmem:[%s17671_s12 + $0x6c] sm:$0xff]   ;;  %v17012_v20 = vld [vmem:[%s17671_s12 + $0x74] sm:$0xff]   ;;  %v17013_v21 = vld [vmem:[%s17671_s12 + $0x7c] sm:$0xff]  }
  0x19   : > { %v17014_v23 = vld [vmem:[%s17671_s12 + $0x84] sm:$0xff]   ;;  %v17020_v24 = vld [vmem:[%s17671_s12 + $0xb0] sm:$0xff]   ;;  %v17021_v26 = vld [vmem:[%s17671_s12 + $0xb8] sm:$0xff]  }
  0x1a   : > { %v17015_v25 = vld [vmem:[%s17671_s12 + $0x8c] sm:$0xff]   ;;  %v17016_v27 = vld [vmem:[%s17671_s12 + $0x94] sm:$0xff]   ;;  %v17022_v28 = vld [vmem:[%s17671_s12 + $0xc0] sm:$0xff]  }
  0x1b   : > { %15472 = vmatpush3.bf16.msra.mxu0 %v16996_v4  ;;  %16384 = vmatpush3.bf16.msra.mxu1 %v16996_v4  ;;  %v17017_v29 = vld [vmem:[%s17671_s12 + $0x9c] sm:$0xff]   ;;  %v17023_v30 = vld [vmem:[%s17671_s12 + $0xc8] sm:$0xff]   ;;  %v17019_v31 = vld [vmem:[%s17671_s12 + $0xa4] ss:$0 sps:$4 sm:$0xff]  }
  0x1c   : > { %15517 = vmatprep.subr.bf16.mxu1 %v23900_v1  ;;  %15569 = vmatprep.subr.bf16.mxu0 %v23900_v1  ;;  %v17024_v32 = vld [vmem:[%s17671_s12 + $0xd0] sm:$0xff]   ;;  %v17025_v33 = vld [vmem:[%s17671_s12 + $0xd8] sm:$0xff]   ;;  %v17026_v34 = vld [vmem:[%s17671_s12 + $0xe0] sm:$0xff]  }
  0x1d   : > { %v17027_v35 = vld [vmem:[%s17671_s12 + $0xe8] sm:$0xff]   ;;  %v17028_v36 = vld [vmem:[%s17671_s12 + $0xf0] sm:$0xff]   ;;  %v17029_v45 = vld [vmem:[%s17671_s12 + $0xf8] ss:$0 sps:$4 sm:$0xff]   ;;  %s23837_s12 = scalar_lea.vmem %s23898_s7, %s16980_s9 }
  0x1e   : > { %15474 = vmatmul.mubr.msk.bf16.vlgmr.msra.gmra.mrb[0].mxu0 %vm389_vm1, %v16997_v5  ;;  %15506 = vmatmul.mubr.msk.bf16.vlgmr.msra.gmra.mrb[0].mxu1 %vm389_vm1, %v16998_v6 }
  0x1f   : > { %15477 = vmatprep.mubr.msk.bf16.mxu0 %vm17595_vm0, %v23900_v1  ;;  %15509 = vmatprep.mubr.msk.bf16.mxu1 %vm17595_vm0, %v23900_v1 }
  0x20   : > { %15518 = vmatpush3.bf16.msra.mxu1 %v16993_v0  ;;  %15570 = vmatpush3.bf16.msra.mxu0 %v16993_v0 }
  0x21   : > { %15519 = vmatprep.subr.bf16.mxu1 %v23900_v1  ;;  %15571 = vmatprep.subr.bf16.mxu0 %v23900_v1 }
  0x24   : > { %15520 = vmatpush3.bf16.msra.mxu1 %v16994_v2  ;;  %15572 = vmatpush3.bf16.msra.mxu0 %v16994_v2 }
  0x25   : > { %15521 = vmatprep.subr.bf16.mxu1 %v23900_v1  ;;  %15573 = vmatprep.subr.bf16.mxu0 %v23900_v1 }
  0x26   : > { %15478 = vmatmul.mubr.msk.bf16.gmra.mrb[4].mxu0 %vm389_vm1, %v16999_v7  ;;  %15510 = vmatmul.mubr.msk.bf16.gmra.mrb[4].mxu1 %vm389_vm1, %v17000_v8 }
  0x27   : > { %15481 = vmatprep.mubr.msk.bf16.mxu0 %vm17595_vm0, %v23900_v1  ;;  %15513 = vmatprep.mubr.msk.bf16.mxu1 %vm17595_vm0, %v23900_v1 }
  0x28   : > { %15522 = vmatpush3.bf16.msra.mxu1 %v16995_v3  ;;  %15574 = vmatpush3.bf16.msra.mxu0 %v16995_v3 }
  0x29   : > { %15523 = vmatprep.subr.bf16.mxu1 %v23900_v1  ;;  %15575 = vmatprep.subr.bf16.mxu0 %v23900_v1 }
  0x2c   : > { %15524 = vmatpush3.bf16.msra.mxu1 %v16996_v4  ;;  %15576 = vmatpush3.bf16.msra.mxu0 %v16996_v4 }
  0x2e   : > { %15482 = vmatmul.mubr.msk.bf16.gmra.mrb[8].mxu0 %vm389_vm1, %v17001_v9  ;;  %15514 = vmatmul.mubr.msk.bf16.gmra.mrb[8].mxu1 %vm389_vm1, %v17002_v10 }
  0x2f   : > { %15485 = vmatprep.mubr.msk.bf16.mxu0 %vm17595_vm0, %v23900_v1  ;;  %15525 = vmatprep.mubr.msk.bf16.mxu1 %vm17595_vm0, %v23900_v1 }
  0x36   : > { %15486 = vmatmul.mubr.msk.bf16.gmra.mrb[12].mxu0 %vm389_vm1, %v17003_v11  ;;  %15526 = vmatmul.mubr.msk.bf16.vlgmr.msra.gmra.mrb[12].mxu1 %vm389_vm1, %v17004_v12 }
  0x37   : > { %15489 = vmatprep.mubr.msk.bf16.mxu0 %vm17595_vm0, %v23900_v1  ;;  %15529 = vmatprep.mubr.msk.bf16.mxu1 %vm17595_vm0, %v23900_v1 }
  0x3e   : > { %15490 = vmatmul.mubr.msk.bf16.gmra.mrb[16].mxu0 %vm389_vm1, %v17005_v13  ;;  %15530 = vmatmul.mubr.msk.bf16.gmra.mrb[16].mxu1 %vm389_vm1, %v17006_v14 }
  0x3f   : > { %15493 = vmatprep.mubr.msk.bf16.mxu0 %vm17595_vm0, %v23900_v1  ;;  %15533 = vmatprep.mubr.msk.bf16.mxu1 %vm17595_vm0, %v23900_v1 }
  0x46   : > { %15494 = vmatmul.mubr.msk.bf16.gmra.mrb[20].mxu0 %vm389_vm1, %v17007_v15  ;;  %15534 = vmatmul.mubr.msk.bf16.gmra.mrb[20].mxu1 %vm389_vm1, %v17008_v16 }
  0x47   : > { %15497 = vmatprep.mubr.msk.bf16.mxu0 %vm17595_vm0, %v23900_v1  ;;  %15537 = vmatprep.mubr.msk.bf16.mxu1 %vm17595_vm0, %v23900_v1 }
  0x4e   : > { %15498 = vmatmul.mubr.msk.bf16.gmra.mrb[24].mxu0 %vm389_vm1, %v17009_v17  ;;  %15538 = vmatmul.mubr.msk.bf16.gmra.mrb[24].mxu1 %vm389_vm1, %v17010_v18 }
  0x4f   : > { %15501 = vmatprep.mubr.msk.bf16.mxu0 %vm17595_vm0, %v23900_v1  ;;  %15541 = vmatprep.mubr.msk.bf16.mxu1 %vm17595_vm0, %v23900_v1 }
  0x56   : > { %15502 = vmatmul.mubr.msk.bf16.gmra.mrb[28].mxu0 %vm389_vm1, %v17011_v19  ;;  %15542 = vmatmul.mubr.msk.bf16.gmra.mrb[28].mxu1 %vm389_vm1, %v17012_v20 }
  0x57   : > { %15545 = vmatprep.mubr.msk.bf16.mxu1 %vm17595_vm0, %v23900_v1  ;;  %15577 = vmatprep.mubr.msk.bf16.mxu0 %vm17595_vm0, %v23900_v1 }
  0x5e   : > { %15546 = vmatmul.mubr.msk.bf16.gmra.mrb[32].mxu1 %vm389_vm1, %v17013_v21  ;;  %15578 = vmatmul.mubr.msk.bf16.vlgmr.msra.gmra.mrb[32].mxu0 %vm389_vm1, %v17018_v22 }
  0x5f   : > { %15549 = vmatprep.mubr.msk.bf16.mxu1 %vm17595_vm0, %v23900_v1  ;;  %15581 = vmatprep.mubr.msk.bf16.mxu0 %vm17595_vm0, %v23900_v1 }
  0x66   : > { %15550 = vmatmul.mubr.msk.bf16.gmra.mrb[36].mxu1 %vm389_vm1, %v17014_v23  ;;  %15582 = vmatmul.mubr.msk.bf16.gmra.mrb[36].mxu0 %vm389_vm1, %v17020_v24 }
  0x67   : > { %15553 = vmatprep.mubr.msk.bf16.mxu1 %vm17595_vm0, %v23900_v1  ;;  %15585 = vmatprep.mubr.msk.bf16.mxu0 %vm17595_vm0, %v23900_v1 }
  0x6e   : > { %15554 = vmatmul.mubr.msk.bf16.gmra.mrb[40].mxu1 %vm389_vm1, %v17015_v25  ;;  %15586 = vmatmul.mubr.msk.bf16.gmra.mrb[40].mxu0 %vm389_vm1, %v17021_v26 }
  0x6f   : > { %15557 = vmatprep.mubr.msk.bf16.mxu1 %vm17595_vm0, %v23900_v1  ;;  %15589 = vmatprep.mubr.msk.bf16.mxu0 %vm17595_vm0, %v23900_v1 }
  0x76   : > { %15558 = vmatmul.mubr.msk.bf16.gmra.mrb[44].mxu1 %vm389_vm1, %v17016_v27  ;;  %15590 = vmatmul.mubr.msk.bf16.gmra.mrb[44].mxu0 %vm389_vm1, %v17022_v28 }
  0x77   : > { %15561 = vmatprep.mubr.msk.bf16.mxu1 %vm17595_vm0, %v23900_v1  ;;  %15593 = vmatprep.mubr.msk.bf16.mxu0 %vm17595_vm0, %v23900_v1 }
  0x7e   : > { %15562 = vmatmul.mubr.msk.bf16.gmra.mrb[48].mxu1 %vm389_vm1, %v17017_v29  ;;  %15594 = vmatmul.mubr.msk.bf16.gmra.mrb[48].mxu0 %vm389_vm1, %v17023_v30 }
  0x7f   : > { %15565 = vmatprep.mubr.msk.bf16.mxu1 %vm17595_vm0, %v23900_v1  ;;  %15597 = vmatprep.mubr.msk.bf16.mxu0 %vm17595_vm0, %v23900_v1 }
  0x86   : > { %15566 = vmatmul.mubr.msk.bf16.gmra.mrb[52].mxu1 %vm389_vm1, %v17019_v31  ;;  %15598 = vmatmul.mubr.msk.bf16.gmra.mrb[52].mxu0 %vm389_vm1, %v17024_v32 }
  0x87   : > { %15601 = vmatprep.mubr.msk.bf16.mxu0 %vm17595_vm0, %v23900_v1 }
  0x8e   : > { %15602 = vmatmul.mubr.msk.bf16.gmra.mrb[56].mxu0 %vm389_vm1, %v17025_v33 }
  0x8f   : > { %15605 = vmatprep.mubr.msk.bf16.mxu0 %vm17595_vm0, %v23900_v1 }
  0x96   : > { %15606 = vmatmul.mubr.msk.bf16.gmra.mrb[60].mxu0 %vm389_vm1, %v17026_v34 }
  0x97   : > { %15609 = vmatprep.mubr.msk.bf16.mxu0 %vm17595_vm0, %v23900_v1 }
  0x9e   : > { %15610 = vmatmul.mubr.msk.bf16.gmra.mrb[64].mxu0 %vm389_vm1, %v17027_v35 }
  0x9f   : > { %15613 = vmatprep.mubr.msk.bf16.mxu0 %vm17595_vm0, %v23900_v1 }
  0xa6   : > { %15614 = vmatmul.mubr.msk.bf16.gmra.mrb[68].mxu0 %vm389_vm1, %v17028_v36 }
  0xa7   : > { %15617 = vmatprep.mubr.msk.bf16.mxu0 %vm17595_vm0, %v23900_v1 }
  0xae   : > { %15618 = vmatmul.mubr.msk.bf16.gmra.mrb[72].mxu0 %vm389_vm1, %v17029_v45 }
  0xf1   : > { %v457_v37 = vpop.f32.mrb[0].mxu0  ;;  %v521_v38 = vpop.f32.mrb[0].mxu1 }
  0xf2   : > { %543 = vst.msk [vmem:[#allocation2] sm:$0xff] %vm389_vm1, %v457_v37  ;;  %v15475_v39 = vpop.f32.mrb[1].mxu0  ;;  %559 = vst.msk [vmem:[#allocation2 + $0x80] sm:$0xff] %vm389_vm1, %v521_v38  ;;  %v15507_v40 = vpop.f32.mrb[1].mxu1 }
  0xf3   : > { %v460_v41 = vpop.f32.mrb[2].mxu0  ;;  %v524_v42 = vpop.f32.mrb[2].mxu1 }
  0xf4   : > { %544 = vst.msk [vmem:[#allocation2 + $0x8] sm:$0xff] %vm389_vm1, %v460_v41  ;;  %v15476_v43 = vpop.f32.mrb[3].mxu0  ;;  %560 = vst.msk [vmem:[#allocation2 + $0x88] sm:$0xff] %vm389_vm1, %v524_v42  ;;  %v15508_v44 = vpop.f32.mrb[3].mxu1 }
  0xf9   : > { %v465_v46 = vpop.f32.mrb[4].mxu0  ;;  %v529_v47 = vpop.f32.mrb[4].mxu1  ;;  %v1060_v8 = vld [vmem:[#allocation2] sm:$0xff] }
  0xfa   : > { %545 = vst.msk [vmem:[#allocation2 + $0x10] sm:$0xff] %vm389_vm1, %v465_v46  ;;  %v15479_v48 = vpop.f32.mrb[5].mxu0  ;;  %561 = vst.msk [vmem:[#allocation2 + $0x90] sm:$0xff] %vm389_vm1, %v529_v47  ;;  %v15511_v49 = vpop.f32.mrb[5].mxu1  ;;  %v17845_v25 = vld [vmem:[#allocation2 + $0x80] sm:$0xff] }
  0xfb   : > { %v468_v50 = vpop.f32.mrb[6].mxu0  ;;  %v532_v51 = vpop.f32.mrb[6].mxu1  ;;  %v1061_v11 = vld [vmem:[#allocation2 + $0x8] sm:$0xff] }
  0xfc   : > { %546 = vst.msk [vmem:[#allocation2 + $0x18] sm:$0xff] %vm389_vm1, %v468_v50  ;;  %v15480_v52 = vpop.f32.mrb[7].mxu0  ;;  %562 = vst.msk [vmem:[#allocation2 + $0x98] sm:$0xff] %vm389_vm1, %v532_v51  ;;  %v15512_v53 = vpop.f32.mrb[7].mxu1  ;;  %v17849_v27 = vld [vmem:[#allocation2 + $0x88] sm:$0xff] }
 0x101   : > { %v473_v54 = vpop.f32.mrb[8].mxu0  ;;  %v537_v55 = vpop.f32.mrb[8].mxu1  ;;  %v1445_v34 = vld [vmem:[#allocation2 + $0x90] sm:$0x7f] }
 0x102   : > { %547 = vst.msk [vmem:[#allocation2 + $0x20] sm:$0xff] %vm389_vm1, %v473_v54  ;;  %v15483_v56 = vpop.f32.mrb[9].mxu0  ;;  %563 = vst.msk [vmem:[#allocation2 + $0xa0] sm:$0xff] %vm389_vm1, %v537_v55  ;;  %v15515_v57 = vpop.f32.mrb[9].mxu1  ;;  %v17863_v39 = vld [vmem:[#allocation2 + $0x90] sm:$0xff] }
 0x103   : > { %v476_v58 = vpop.f32.mrb[10].mxu0  ;;  %v540_v59 = vpop.f32.mrb[10].mxu1  ;;  %v17827_v3 = vld [vmem:[#allocation2 + $0x18] sm:$0xff]  ;;  %v1062_v47 = vld [vmem:[#allocation2 + $0x10] sm:$0xff] }
 0x104   : > { %548 = vst.msk [vmem:[#allocation2 + $0x28] sm:$0xff] %vm389_vm1, %v476_v58  ;;  %v15484_v60 = vpop.f32.mrb[11].mxu0  ;;  %v15516_v61 = vpop.f32.mrb[11].mxu1  ;;  %v1074_v10 = vmax.f32 %v1060_v8, %v17827_v3  ;;  %v17847_v26 = vld [vmem:[#allocation2 + $0x98] sm:$0xff] }
 0x105   : > { %v1457_v31 = vmax.f32 %v17845_v25, %v17847_v26 }
 0x109   : > { %v481_v62 = vpop.f32.mrb[12].mxu0  ;;  %v705_v63 = vpop.f32.mrb[12].mxu1  ;;  %v17831_v9 = vld [vmem:[#allocation2 + $0x20] sm:$0xff] }
 0x10a   : > { %549 = vst.msk [vmem:[#allocation2 + $0x30] sm:$0xff] %vm389_vm1, %v481_v62  ;;  %v15487_v0 = vpop.f32.mrb[13].mxu0  ;;  %791 = vst.msk [vmem:[#allocation2 + $0xa8] sm:$0xff] %vm389_vm1, %v705_v63  ;;  %v15527_v2 = vpop.f32.mrb[13].mxu1  ;;  %v1075_v15 = vmax.f32 %v1061_v11, %v17831_v9  ;;  %v17851_v28 = vld [vmem:[#allocation2 + $0xa0] sm:$0xff] }
 0x10b   : > { %v484_v4 = vpop.f32.mrb[14].mxu0  ;;  %v708_v5 = vpop.f32.mrb[14].mxu1  ;;  %v17861_v38 = vld [vmem:[#allocation2 + $0x28] sm:$0xff]  ;;  %v1458_v44 = vmax.f32 %v17849_v27, %v17851_v28 }
 0x10c   : > { %550 = vst.msk [vmem:[#allocation2 + $0x38] sm:$0xff] %vm389_vm1, %v484_v4  ;;  %v15488_v6 = vpop.f32.mrb[15].mxu0  ;;  %792 = vst.msk [vmem:[#allocation2 + $0xb0] sm:$0xff] %vm389_vm1, %v708_v5  ;;  %v15528_v7 = vpop.f32.mrb[15].mxu1  ;;  %v1076_v54 = vmax.f32 %v1062_v47, %v17861_v38 }
 0x111   : > { %v17834_v12 = vld [vmem:[#allocation2 + $0x30] sm:$0xff]  ;;  %v489_v13 = vpop.f32.mrb[16].mxu0  ;;  %v713_v14 = vpop.f32.mrb[16].mxu1  ;;  %v1449_v40 = vld [vmem:[#allocation2 + $0xa8] sm:$0x7f] }
 0x112   : > { %v1088_v16 = vmax.f32 %v1074_v10, %v17834_v12  ;;  %551 = vst.msk [vmem:[#allocation2 + $0x40] sm:$0xff] %vm389_vm1, %v489_v13  ;;  %v15491_v17 = vpop.f32.mrb[17].mxu0  ;;  %793 = vst.msk [vmem:[#allocation2 + $0xb8] sm:$0xff] %vm389_vm1, %v713_v14  ;;  %v15531_v18 = vpop.f32.mrb[17].mxu1  ;;  %v17871_v45 = vld [vmem:[#allocation2 + $0xa8] sm:$0xff]  ;;  %v1459_v52 = vmax.f32 %v1445_v34, %v1449_v40  ;;  %v1077_v61 = vmax.f32 %v17827_v3, %v17834_v12 }
 0x113   : > { %v17840_v19 = vld [vmem:[#allocation2 + $0x38] sm:$0xff]  ;;  %v492_v20 = vpop.f32.mrb[18].mxu0  ;;  %v716_v21 = vpop.f32.mrb[18].mxu1  ;;  %v17859_v36 = vld [vmem:[#allocation2 + $0xb0] sm:$0xff]  ;;  %v1851_v55 = vmax.f32 %v17863_v39, %v17871_v45 }
 0x114   : > { %v1089_v22 = vmax.f32 %v1075_v15, %v17840_v19  ;;  %552 = vst.msk [vmem:[#allocation2 + $0x48] sm:$0xff] %vm389_vm1, %v492_v20  ;;  %v15492_v23 = vpop.f32.mrb[19].mxu0  ;;  %794 = vst.msk [vmem:[#allocation2 + $0xc0] sm:$0xff] %vm389_vm1, %v716_v21  ;;  %v15532_v24 = vpop.f32.mrb[19].mxu1  ;;  %v1471_v49 = vmax.f32 %v1457_v31, %v17859_v36  ;;  %v1078_v62 = vmax.f32 %v17831_v9, %v17840_v19 }
 0x115   : > { %v1852_v3 = vmax.f32 %v17847_v26, %v17859_v36 }
 0x119   : > { %v497_v29 = vpop.f32.mrb[20].mxu0  ;;  %v721_v30 = vpop.f32.mrb[20].mxu1  ;;  %v17874_v48 = vld [vmem:[#allocation2 + $0x40] sm:$0xff]  ;;  %v17877_v50 = vld [vmem:[#allocation2 + $0xb8] sm:$0xff] }
 0x11a   : > { %553 = vst.msk [vmem:[#allocation2 + $0x50] sm:$0xff] %vm389_vm1, %v497_v29  ;;  %v15495_v32 = vpop.f32.mrb[21].mxu0  ;;  %795 = vst.msk [vmem:[#allocation2 + $0xc8] sm:$0xff] %vm389_vm1, %v721_v30  ;;  %v15535_v33 = vpop.f32.mrb[21].mxu1  ;;  %v1472_v57 = vmax.f32 %v1458_v44, %v17877_v50  ;;  %v1079_v4 = vmax.f32 %v17861_v38, %v17874_v48  ;;  %v1090_v5 = vmax.f32 %v1076_v54, %v17874_v48 }
 0x11b   : > { %v17857_v35 = vld [vmem:[#allocation2 + $0x48] sm:$0xff]  ;;  %v500_v37 = vpop.f32.mrb[22].mxu0  ;;  %v724_v42 = vpop.f32.mrb[22].mxu1  ;;  %v1463_v51 = vld [vmem:[#allocation2 + $0xc0] sm:$0x7f]  ;;  %v1853_v13 = vmax.f32 %v17851_v28, %v17877_v50 }
 0x11c   : > { %554 = vst.msk [vmem:[#allocation2 + $0x58] sm:$0xff] %vm389_vm1, %v500_v37  ;;  %v15496_v41 = vpop.f32.mrb[23].mxu0  ;;  %v17867_v43 = vmax.f32 %v1088_v16, %v17857_v35  ;;  %796 = vst.msk [vmem:[#allocation2 + $0xd0] sm:$0xff] %vm389_vm1, %v724_v42  ;;  %v15536_v46 = vpop.f32.mrb[23].mxu1  ;;  %v17879_v53 = vld [vmem:[#allocation2 + $0xc0] sm:$0xff]  ;;  %v1080_v10 = vmax.f32 %v17834_v12, %v17857_v35  ;;  %v1091_v11 = vmax.f32 %v1077_v61, %v17857_v35 }
 0x11d   : > { %v17917_v17 = vmax.f32 %v1459_v52, %v1463_v51  ;;  %v1854_v18 = vmax.f32 %v17871_v45, %v17879_v53  ;;  %v17922_v12 = vmax.f32 %v1851_v55, %v17879_v53 }
 0x11e   : > { %v1123_v23 = vrot.slane %v17867_v43, 1 }
 0x121   : > { %v17884_v56 = vld [vmem:[#allocation2 + $0x50] sm:$0xff]  ;;  %v17887_v58 = vld [vmem:[#allocation2 + $0xc8] sm:$0xff]  ;;  %v505_v59 = vpop.f32.mrb[24].mxu0  ;;  %v729_v60 = vpop.f32.mrb[24].mxu1 }
 0x122   : > { %v17894_v63 = vmax.f32 %v1471_v49, %v17887_v58  ;;  %555 = vst.msk [vmem:[#allocation2 + $0x60] sm:$0xff] %vm389_vm1, %v505_v59  ;;  %797 = vst.msk [vmem:[#allocation2 + $0xd8] sm:$0xff] %vm389_vm1, %v729_v60  ;;  %v15499_v0 = vpop.f32.mrb[25].mxu0  ;;  %v15539_v2 = vpop.f32.mrb[25].mxu1  ;;  %v17906_v9 = vmax.f32 %v1089_v22, %v17884_v56  ;;  %v1081_v34 = vmax.f32 %v17840_v19, %v17884_v56  ;;  %v17963_v60 = vld [vmem:[#allocation2 + $0x48] sm:$0x7f] }
 0x123   : > { %v17903_v6 = vld [vmem:[#allocation2 + $0x58] sm:$0xff]  ;;  %v508_v7 = vpop.f32.mrb[26].mxu0  ;;  %v732_v8 = vpop.f32.mrb[26].mxu1  ;;  %v17913_v14 = vld [vmem:[#allocation2 + $0xd0] sm:$0xff]  ;;  %v1092_v37 = vmax.f32 %v1078_v62, %v17884_v56  ;;  %v1855_v19 = vmax.f32 %v17859_v36, %v17887_v58  ;;  %v1866_v0 = vmax.f32 %v1852_v3, %v17887_v58 }
 0x124   : > { %556 = vst.msk [vmem:[#allocation2 + $0x68] sm:$0xff] %vm389_vm1, %v508_v7  ;;  %v15500_v15 = vpop.f32.mrb[27].mxu0  ;;  %798 = vst.msk [vmem:[#allocation2 + $0xe0] sm:$0xff] %vm389_vm1, %v732_v8  ;;  %v15540_v16 = vpop.f32.mrb[27].mxu1  ;;  %v17925_v20 = vmax.f32 %v1472_v57, %v17913_v14  ;;  %v17928_v21 = vmax.f32 %v1090_v5, %v17903_v6  ;;  %v23907_v22 = vrot.slane %v17894_v63, 1  ;;  %v23906_v31 = vrot.slane %v17894_v63, 2 }
 0x125   : > { %v23905_v32 = vrot.slane %v17894_v63, 3  ;;  %v23904_v33 = vrot.slane %v17906_v9, 1  ;;  %v1082_v61 = vmax.f32 %v17874_v48, %v17903_v6  ;;  %v1093_v62 = vmax.f32 %v1079_v4, %v17903_v6 }
 0x126   : > { %v23903_v30 = vrot.slane %v17925_v20, 1  ;;  %v23902_v38 = vrot.slane %v17925_v20, 2  ;;  %v23899_v40 = vrot.slane %v17925_v20, 3  ;;  %v23908_v44 = vrot.slane %v17928_v21, 1 }
 0x127   : > { %v23910_v46 = vrot.slane %v17928_v21, 2  ;;  %v23909_v47 = vrot.slane %v17928_v21, 3  ;;  %v17951_v49 = vsel %vm1122_vm2, %v1123_v23, %v23904_v33  ;;  %v1856_v2 = vmax.f32 %v17877_v50, %v17913_v14 }
 0x128   : > { %v17975_v15 = vmax.f32 %v1853_v13, %v17913_v14  ;;  %v17983_v4 = vsel %vm1122_vm2, %v23907_v22, %v23903_v30  ;;  %v17990_v3 = vsel %vm1162_vm3, %v23906_v31, %v23902_v38  ;;  %v17997_v13 = vsel %vm1202_vm4, %v23905_v32, %v23899_v40 }
 0x129   : > { %v17943_v41 = vld [vmem:[#allocation2 + $0x60] sm:$0xff]  ;;  %v513_v42 = vpop.f32.mrb[28].mxu0  ;;  %v737_v52 = vpop.f32.mrb[28].mxu1  ;;  %v17971_v5 = vld [vmem:[#allocation2 + $0xd8] sm:$0xff] }
 0x12a   : > { %v17955_v51 = vld [vmem:[#allocation2 + $0x60] sm:$0x7f]  ;;  %557 = vst.msk [vmem:[#allocation2 + $0x70] sm:$0xff] %vm389_vm1, %v513_v42  ;;  %v15503_v54 = vpop.f32.mrb[29].mxu0  ;;  %v17959_v55 = vmax.f32 %v1091_v11, %v17943_v41  ;;  %799 = vst.msk [vmem:[#allocation2 + $0xe8] sm:$0xff] %vm389_vm1, %v737_v52  ;;  %v15543_v11 = vpop.f32.mrb[29].mxu1  ;;  %v1094_v23 = vmax.f32 %v1080_v10, %v17943_v41  ;;  %v18028_v38 = vmax.f32 %v1854_v18, %v17971_v5 }
 0x12b   : > { %v1085_v7 = vld [vmem:[#allocation2 + $0x68] sm:$0xff]  ;;  %v516_v8 = vpop.f32.mrb[30].mxu0  ;;  %v740_v16 = vpop.f32.mrb[30].mxu1  ;;  %v18001_v52 = vld [vmem:[#allocation2 + $0xe0] sm:$0xff]  ;;  %v18032_v30 = vmax.f32 %v17922_v12, %v17971_v5 }
 0x12c   : > { %558 = vst.msk [vmem:[#allocation2 + $0x78] sm:$0xff] %vm389_vm1, %v516_v8  ;;  %v15504_v48 = vpop.f32.mrb[31].mxu0  ;;  %v1451_v42 = vmax.f32 %v17884_v56, %v1085_v7  ;;  %800 = vst.msk [vmem:[#allocation2 + $0xf0] sm:$0xff] %vm389_vm1, %v740_v16  ;;  %v15544_v54 = vpop.f32.mrb[31].mxu1  ;;  %v18004_v8 = vmax.f32 %v1092_v37, %v1085_v7  ;;  %v1128_v11 = vrot.slane %v17959_v55, 1  ;;  %v1454_v59 = vmax.f32 %v1085_v7, %v17845_v25  ;;  %v17030_v10 = vld [vmem:[%s23894_s3 + $0xe0] sm:$0xff]  }
 0x12d   : > { %v17031_v37 = vld [vmem:[%s23894_s3 + $0xa0] sm:$0xff]   ;;  %v1168_v54 = vrot.slane %v17959_v55, 2  ;;  %v1208_v1 = vrot.slane %v17959_v55, 3  ;;  %v1095_v33 = vmax.f32 %v1081_v34, %v1085_v7  ;;  %14322 = vmatprep.subr.bf16.mxu1 %v17030_v10  ;;  %v18044_v34 = vmax.f32 %v1855_v19, %v18001_v52 }
 0x12e   : > { %v1130_v16 = vrot.slane %v18004_v8, 1  ;;  %v1170_v40 = vrot.slane %v18004_v8, 2  ;;  %v1129_v24 = vsel %vm1122_vm2, %v23908_v44, %v1128_v11  ;;  %v1465_v57 = vmax.f32 %v1451_v42, %v17845_v25  ;;  %14323 = vmatpush3.bf16.msra.mxu1 %v17031_v37 }
 0x12f   : > { %v23911_v18 = vrot.slane %v18004_v8, 3  ;;  %v18047_v7 = vmax.f32 %v1866_v0, %v18001_v52  ;;  %v18055_v29 = vmax.f32 %v1454_v59, %v17847_v26  ;;  %v1154_v12 = vmax.f32 %v17928_v21, %v1129_v24 }
 0x130   : > { %v1131_v44 = vsel %vm1122_vm2, %v1128_v11, %v1130_v16  ;;  %v1171_v24 = vsel %vm1162_vm3, %v1168_v54, %v1170_v40 }
 0x131   : > { %v1086_v31 = vld [vmem:[#allocation2 + $0x70] sm:$0xff]  ;;  %v745_v22 = vpop.f32.mrb[32].mxu1  ;;  %v953_v56 = vpop.f32.mrb[32].mxu0  ;;  %23992 = vst [vmem:[#allocation6_spill] sm:$0xff] %v18047_v7 }
 0x132   : > { %801 = vst.msk [vmem:[#allocation2 + $0xf8] sm:$0xff] %vm389_vm1, %v745_v22  ;;  %v15547_v42 = vpop.f32.mrb[33].mxu1  ;;  %v18050_v10 = vmax.f32 %v1093_v62, %v1086_v31  ;;  %1039 = vst.msk [vmem:[#allocation2 + $0x150] sm:$0xff] %vm389_vm1, %v953_v56  ;;  %v15579_v32 = vpop.f32.mrb[33].mxu0  ;;  %v1169_v22 = vsel %vm1162_vm3, %v23910_v46, %v1168_v54  ;;  %v1209_v62 = vsel %vm1202_vm4, %v23909_v47, %v1208_v1  ;;  %v18066_v56 = vld [vmem:[#allocation2 + $0xe8] sm:$0xff] }
 0x133   : > { %v18057_v37 = vld [vmem:[#allocation2 + $0x78] sm:$0xff]  ;;  %v748_v19 = vpop.f32.mrb[34].mxu1  ;;  %v956_v0 = vpop.f32.mrb[34].mxu0  ;;  %v1096_v11 = vmax.f32 %v1082_v61, %v1086_v31  ;;  %v18076_v42 = vmax.f32 %v1095_v33, %v17845_v25  ;;  %v1452_v61 = vmax.f32 %v17903_v6, %v1086_v31  ;;  %v1155_v46 = vmax.f32 %v17959_v55, %v1131_v44 }
 0x134   : > { %v18069_v32 = vmax.f32 %v1094_v23, %v18057_v37  ;;  %802 = vst.msk [vmem:[#allocation2 + $0x100] sm:$0xff] %vm389_vm1, %v748_v19  ;;  %v15548_v59 = vpop.f32.mrb[35].mxu1  ;;  %1040 = vst.msk [vmem:[#allocation2 + $0x158] sm:$0xff] %vm389_vm1, %v956_v0  ;;  %v15580_v47 = vpop.f32.mrb[35].mxu0  ;;  %v1211_v23 = vsel %vm1202_vm4, %v1208_v1, %v23911_v18  ;;  %v18085_v19 = vmax.f32 %v1465_v57, %v17847_v26  ;;  %v1132_v6 = vrot.slane %v18050_v10, 1 }
 0x135   : > { %v1455_v59 = vmax.f32 %v1086_v31, %v17849_v27  ;;  %v18094_v33 = vmax.f32 %v1856_v2, %v18066_v56  ;;  %v18099_v44 = vmax.f32 %v17975_v15, %v18066_v56  ;;  %v1172_v26 = vrot.slane %v18050_v10, 2  ;;  %v18109_v54 = vld [vmem:[#allocation2 + $0xd8] sm:$0x7f] }
 0x136   : > { %v1134_v1 = vrot.slane %v18069_v32, 1  ;;  %v18105_v47 = vmax.f32 %v1096_v11, %v17849_v27  ;;  %v1133_v55 = vsel %vm1122_vm2, %v1130_v16, %v1132_v6  ;;  %v1194_v57 = vmax.f32 %v1154_v12, %v1169_v22  ;;  %23994 = vst [vmem:[#allocation8_spill] sm:$0xff] %v18109_v54 }
 0x137   : > { %23993 = vst [vmem:[#allocation7_spill] sm:$0xff] %v18099_v44  ;;  %v1212_v2 = vrot.slane %v18050_v10, 3  ;;  %v18112_v0 = vmax.f32 %v1452_v61, %v17849_v27  ;;  %v1156_v18 = vmax.f32 %v18004_v8, %v1133_v55  ;;  %v1195_v48 = vmax.f32 %v1155_v46, %v1171_v24  ;;  %v18125_v27 = vld [vmem:[%s23893_s2] ss:$0 sm:$0xff]  ;;  %v18132_v61 = vld [vmem:[#allocation2 + $0xf0] sm:$0x7f] }
 0x138   : > { %v1135_v25 = vsel %vm1122_vm2, %v1132_v6, %v1134_v1  ;;  %v18117_v11 = vmax.f32 %v1455_v59, %v17851_v28  ;;  %v1173_v46 = vsel %vm1162_vm3, %v1170_v40, %v1172_v26  ;;  %23995 = vst [vmem:[#allocation9_spill] sm:$0xff] %v18132_v61  ;;  %v23996_v6 = vrot.slane %v18069_v32, 2 }
 0x139   : > { %v753_v15 = vpop.f32.mrb[36].mxu1  ;;  %v961_v31 = vpop.f32.mrb[36].mxu0  ;;  %v1157_v22 = vmax.f32 %v18050_v10, %v1135_v25  ;;  %v1234_v16 = vmax.f32 %v1194_v57, %v1209_v62  ;;  %v1456_v10 = vmax.f32 %v18057_v37, %v17863_v39  ;;  %v23997_v40 = vmax.f32 %v17857_v35, %v17943_v41  ;;  %v18154_v35 = vld [vmem:[#allocation2 + $0xf0] sm:$0xff] }
 0x13a   : > { %803 = vst.msk [vmem:[#allocation2 + $0x108] sm:$0xff] %vm389_vm1, %v753_v15  ;;  %v15551_v12 = vpop.f32.mrb[37].mxu1  ;;  %1041 = vst.msk [vmem:[#allocation2 + $0x160] sm:$0xff] %vm389_vm1, %v961_v31  ;;  %v15583_v24 = vpop.f32.mrb[37].mxu0  ;;  %v1175_v55 = vsel %vm1162_vm3, %v1172_v26, %v23996_v6  ;;  %v1196_v15 = vmax.f32 %v1156_v18, %v1173_v46  ;;  %v23998_v44 = vrot.slane %v18004_v8, 3  ;;  %v1235_v62 = vmax.f32 %v1195_v48, %v1211_v23 }
 0x13b   : > { %v756_v59 = vpop.f32.mrb[38].mxu1  ;;  %v1214_v12 = vrot.slane %v18069_v32, 3  ;;  %v18144_v25 = vmax.f32 %v23997_v40, %v18057_v37  ;;  %v1197_v24 = vmax.f32 %v1157_v22, %v1175_v55  ;;  %v1250_v46 = vadd.f32 %v18125_v27, %v1234_v16 }
 0x13c   : > { %804 = vst.msk [vmem:[#allocation2 + $0x110] sm:$0xff] %vm389_vm1, %v756_v59  ;;  %v15552_v31 = vpop.f32.mrb[39].mxu1  ;;  %v1213_v18 = vsel %vm1202_vm4, %v23998_v44, %v1212_v2  ;;  %v1136_v59 = vrot.slane %v18076_v42, 1  ;;  %v23913_v22 = vrot.slane %v18105_v47, 1  ;;  %v23999_v8 = vmax.f32 %v17879_v53, %v17971_v5 }
 0x13d   : > { %v1215_v26 = vsel %vm1202_vm4, %v1212_v2, %v1214_v12  ;;  %v1236_v57 = vmax.f32 %v1196_v15, %v1213_v18  ;;  %v1251_v48 = vadd.f32 %v18125_v27, %v1235_v62  ;;  %v1176_v2 = vrot.slane %v18076_v42, 2 }
 0x13e   : > { %v1237_v40 = vmax.f32 %v1197_v24, %v1215_v26  ;;  %v18162_v44 = vmax.f32 %v23999_v8, %v18154_v35  ;;  %v1137_v55 = vsel %vm1122_vm2, %v1134_v1, %v1136_v59  ;;  %v1139_v15 = vsel %vm1122_vm2, %v1136_v59, %v23913_v22 }
 0x13f   : > { %v1252_v23 = vadd.f32 %v18125_v27, %v1236_v57  ;;  %v23914_v31 = vrot.slane %v18105_v47, 2  ;;  %v1260_v18 = vmax.f32 %v1250_v46, 0.0  ;;  %v1261_v26 = vmax.f32 %v1251_v48, 0.0 }
 0x140   : > { %v1253_v16 = vadd.f32 %v18125_v27, %v1237_v40  ;;  %v1158_v8 = vmax.f32 %v18069_v32, %v1137_v55  ;;  %v1159_v62 = vmax.f32 %v18076_v42, %v1139_v15  ;;  %v18177_v57 = vmax.f32 %v18028_v38, %v18154_v35  ;;  %v18181_v40 = vld [vmem:[#allocation2 + $0xf8] sm:$0xff] }
 0x141   : > { %v761_v24 = vpop.f32.mrb[40].mxu1  ;;  %v1262_v6 = vmax.f32 %v1252_v23, 0.0  ;;  %v18185_v46 = vmax.f32 %v1456_v10, %v17871_v45  ;;  %v24001_v48 = vmax.f32 %v17887_v58, %v18001_v52  ;;  %v18193_v15 = vpack.c.bf16 %v1261_v26, %v1260_v18  ;;  %v17032_v18 = vld [vmem:[%s23894_s3 + $0xe8] sm:$0xff]  }
 0x142   : > { %24000 = vst [vmem:[#allocation10_spill] sm:$0xff] %v18177_v57  ;;  %805 = vst.msk [vmem:[#allocation2 + $0x118] sm:$0xff] %vm389_vm1, %v761_v24  ;;  %v15555_v59 = vpop.f32.mrb[41].mxu1  ;;  %v1263_v22 = vmax.f32 %v1253_v16, 0.0  ;;  %v24003_v1 = vrot.slane %v18069_v32, 2  ;;  %v1179_v16 = vsel %vm1162_vm3, %v1176_v2, %v23914_v31  ;;  %14324 = vmatprep.subr.bf16.mxu1 %v17032_v18  ;;  %v18218_v31 = vld [vmem:[#allocation2 + $0x100] sm:$0xff]  ;;  %v2214_v18 = vmax.f32 %v18001_v52, %v18181_v40 }
 0x143   : > { %v18191_v38 = vmax.f32 %v24001_v48, %v18181_v40  ;;  %v764_v55 = vpop.f32.mrb[42].mxu1  ;;  %24002 = vst [vmem:[#allocation11_spill] sm:$0xff] %v18193_v15  ;;  %v1216_v59 = vrot.slane %v18076_v42, 3  ;;  %v1283_v32 = vshll.u32 %v18193_v15, 16  ;;  %v1287_v26 = vshrl.u32 %v18193_v15, 16 }
 0x144   : > { %v1177_v24 = vsel %vm1162_vm3, %v24003_v1, %v1176_v2  ;;  %806 = vst.msk [vmem:[#allocation2 + $0x120] sm:$0xff] %vm389_vm1, %v764_v55  ;;  %v18199_v23 = vpack.c.bf16 %v1263_v22, %v1262_v6  ;;  %v15556_v10 = vpop.f32.mrb[43].mxu1  ;;  %v23919_v1 = vrot.slane %v18193_v15, 2  ;;  %v1199_v6 = vmax.f32 %v1159_v62, %v1179_v16 }
 0x145   : > { %v1198_v58 = vmax.f32 %v1158_v8, %v1177_v24  ;;  %v1217_v8 = vsel %vm1202_vm4, %v1214_v12, %v1216_v59  ;;  %v18215_v42 = vrot.slane %v1283_v32, 1  ;;  %v1343_v55 = vrot.slane %v1287_v26, 1 }
 0x146   : > { %24004 = vst [vmem:[#allocation12_spill] sm:$0xff] %v18199_v23  ;;  %v1291_v22 = vshll.u32 %v18199_v23, 16  ;;  %v23920_v48 = vrot.slane %v18199_v23, 2  ;;  %v1295_v2 = vshrl.u32 %v18199_v23, 16  ;;  %v1344_v24 = vrot.slane %v1283_v32, 2  ;;  %v18231_v32 = vld [vmem:[#allocation2 + $0x108] sm:$0xff] }
 0x147   : > { %24005 = vst [vmem:[#allocation13_spill] sm:$0xff] %v18215_v42  ;;  %v18227_v12 = vmax.f32 %v18044_v34, %v18181_v40  ;;  %v1289_v10 = vor.u32 %v1287_v26, %v18215_v42  ;;  %v1238_v7 = vmax.f32 %v1198_v58, %v1217_v8  ;;  %v24007_v15 = vrot.slane %v18105_v47, 3  ;;  %v1087_v42 = vld [vmem:[#allocation2 + $0x78] sm:$0x7f]  ;;  %v18251_v8 = vld [vmem:[#allocation2 + $0x110] sm:$0xff] }
 0x148   : > { %v1293_v61 = vrot.slane %v1291_v22, 1  ;;  %v1374_v62 = vsel %vm1162_vm3, %v23919_v1, %v23920_v48  ;;  %v1347_v16 = vrot.slane %v1295_v2, 1  ;;  %v1348_v54 = vrot.slane %v1291_v22, 2 }
 0x149   : > { %1425 = vst.msk [vmem:[#allocation3 + $0x28] sm:$0xff] %vm389_vm1, %v1374_v62  ;;  %v769_v57 = vpop.f32.mrb[44].mxu1  ;;  %v24006_v1 = vmax.f32 %v17913_v14, %v18066_v56  ;;  %v18239_v48 = vor.u32 %v1344_v24, %v1343_v55  ;;  %v1219_v26 = vsel %vm1202_vm4, %v1216_v59, %v24007_v15  ;;  %v18249_v58 = vmax.f32 %v18094_v33, %v18218_v31  ;;  %v18263_v33 = vld [vmem:[#allocation2 + $0x118] sm:$0xff] }
 0x14a   : > { %v18241_v34 = vor.u32 %v1348_v54, %v1347_v16  ;;  %807 = vst.msk [vmem:[#allocation2 + $0x128] sm:$0xff] %vm389_vm1, %v769_v57  ;;  %v15559_v52 = vpop.f32.mrb[45].mxu1  ;;  %v1294_v14 = vsel %vm1274_vm5, %v1289_v10, %v1293_v61  ;;  %v1254_v54 = vadd.f32 %v18125_v27, %v1238_v7  ;;  %v2215_v57 = vmax.f32 %v18066_v56, %v18218_v31 }
 0x14b   : > { %v1873_v22 = vmax.f32 %v24006_v1, %v18218_v31  ;;  %v1239_v1 = vmax.f32 %v1199_v6, %v1219_v26  ;;  %v772_v55 = vpop.f32.mrb[46].mxu1  ;;  %v18259_v24 = vmax.f32 %v18162_v44, %v18231_v32  ;;  %v2216_v15 = vmax.f32 %v18154_v35, %v18231_v32  ;;  %1316 = vrot.lane.b32.xlu1 %v1294_v14, %s17596_s23 }
 0x14c   : > { %v1350_v7 = vsel %vm1339_vm6, %v18239_v48, %v18241_v34  ;;  %808 = vst.msk [vmem:[#allocation2 + $0x130] sm:$0xff] %vm389_vm1, %v772_v55  ;;  %v15560_v59 = vpop.f32.mrb[47].mxu1  ;;  %v24008_v56 = vmax.f32 %v17971_v5, %v18154_v35  ;;  %v1264_v10 = vmax.f32 %v1254_v54, 0.0  ;;  %v24009_v62 = vmax.f32 %v17963_v60, %v17955_v51  ;;  %v1101_v35 = vld [vmem:[#allocation2 + $0x90] sm:$0x7f]  ;;  %v18299_v60 = vld [vmem:[#allocation2 + $0x120] sm:$0xff] }
 0x14d   : > { %1361 = vrot.lane.b32.xlu0 %v1350_v7, %s17596_s23  ;;  %v1255_v6 = vadd.f32 %v18125_v27, %v1239_v1  ;;  %v18283_v52 = vmax.f32 %v18191_v38, %v18251_v8  ;;  %v18288_v5 = vmax.f32 %v2214_v18, %v18251_v8  ;;  %v18292_v14 = vmax.f32 %v18144_v25, %v17863_v39  ;;  %v17033_v18 = vld [vmem:[%s23894_s3 + $0xa8] sm:$0xff]   ;;  %v964_v59 = vpop.f32.mrb[38].mxu0 }
 0x14e   : > { %v18274_v44 = vmax.f32 %v24008_v56, %v18231_v32  ;;  %v1097_v16 = vmax.f32 %v24009_v62, %v1087_v42  ;;  %v18295_v1 = vmax.f32 %v1873_v22, %v18263_v33  ;;  %v18305_v54 = vmax.f32 %v2215_v57, %v18263_v33  ;;  %14325 = vmatpush3.bf16.msra.mxu1 %v17033_v18 }
 0x14f   : > { %v1265_v38 = vmax.f32 %v1255_v6, 0.0  ;;  %v1297_v55 = vor.u32 %v1295_v2, %v1293_v61  ;;  %v24011_v25 = vmax.f32 %v17943_v41, %v18057_v37  ;;  %v18313_v7 = vmax.f32 %v18112_v0, %v17851_v28  ;;  %1042 = vst.msk [vmem:[#allocation2 + $0x168] sm:$0xff] %vm389_vm1, %v964_v59  ;;  %v15584_v61 = vpop.f32.mrb[39].mxu0 }
 0x150   : > { %24010 = vst [vmem:[#allocation14_spill] sm:$0xff] %v18295_v1  ;;  %v1111_v42 = vmax.f32 %v1097_v16, %v1101_v35  ;;  %v18321_v41 = vmax.f32 %v2216_v15, %v18299_v60  ;;  %v18326_v37 = vmax.f32 %v18055_v29, %v17859_v36  ;;  %v1498_v0 = vrot.slane %v18292_v14, 1 }
 0x151   : > { %v1467_v22 = vmax.f32 %v24011_v25, %v17863_v39  ;;  %v18317_v6 = vpack.c.bf16 %v1265_v38, %v1264_v10  ;;  %v777_v62 = vpop.f32.mrb[48].mxu1  ;;  %v24013_v35 = vrot.slane %v18105_v47, 1  ;;  %v1499_v36 = vrot.slane %v18085_v19, 1 }
 0x152   : > { %v1140_v16 = vrot.slane %v1111_v42, 1  ;;  %v1180_v57 = vrot.slane %v1111_v42, 2  ;;  %809 = vst.msk [vmem:[#allocation2 + $0x138] sm:$0xff] %vm389_vm1, %v777_v62  ;;  %v15563_v28 = vpop.f32.mrb[49].mxu1  ;;  %v1220_v39 = vrot.slane %v1111_v42, 3  ;;  %v1501_v29 = vrot.slane %v18313_v7, 1 }
 0x153   : > { %24012 = vst [vmem:[#allocation15_spill] sm:$0xff] %v18317_v6  ;;  %v1299_v2 = vshll.u32 %v18317_v6, 16  ;;  %v1303_v10 = vshrl.u32 %v18317_v6, 16  ;;  %v780_v18 = vpop.f32.mrb[50].mxu1  ;;  %v18337_v59 = vmax.f32 %v1467_v22, %v17871_v45  ;;  %v24014_v51 = vrot.slane %v18105_v47, 2  ;;  %v18346_v45 = vld [vmem:[#allocation2 + $0x128] sm:$0xff] }
 0x154   : > { %v1141_v38 = vsel %vm1122_vm2, %v24013_v35, %v1140_v16  ;;  %v1161_v15 = vmax.f32 %v1111_v42, %v1140_v16  ;;  %810 = vst.msk [vmem:[#allocation2 + $0x140] sm:$0xff] %vm389_vm1, %v780_v18  ;;  %v15564_v62 = vpop.f32.mrb[51].mxu1  ;;  %v1537_v18 = vrot.slane %v18292_v14, 2  ;;  %v1500_v1 = vsel %vm1122_vm2, %v1498_v0, %v1499_v36 }
 0x155   : > { %v1160_v25 = vmax.f32 %v18105_v47, %v1141_v38  ;;  %v1301_v61 = vrot.slane %v1299_v2, 1  ;;  %v1351_v28 = vrot.slane %v1303_v10, 1  ;;  %v1352_v56 = vrot.slane %v1299_v2, 2 }
 0x156   : > { %v1181_v42 = vsel %vm1162_vm3, %v24014_v51, %v1180_v57  ;;  %v1201_v35 = vmax.f32 %v1161_v15, %v1180_v57  ;;  %v23926_v38 = vrot.slane %v18317_v6, 2  ;;  %v24015_v62 = vrot.slane %v18105_v47, 3 }
 0x157   : > { %v1200_v16 = vmax.f32 %v1160_v25, %v1181_v42  ;;  %v1302_v22 = vsel %vm1274_vm5, %v1297_v55, %v1301_v61  ;;  %v18349_v26 = vor.u32 %v1352_v56, %v1351_v28  ;;  %v24016_v15 = vrot.slane %v18199_v23, 2 }
 0x158   : > { %v1221_v2 = vsel %vm1202_vm4, %v24015_v62, %v1220_v39  ;;  %1318 = vrot.lane.b32.xlu1 %v1302_v22, %s17596_s23  ;;  %v1241_v57 = vmax.f32 %v1201_v35, %v1220_v39  ;;  %v1503_v55 = vrot.slane %v18337_v59, 1  ;;  %v18364_v47 = vmax.f32 %v18274_v44, %v18299_v60 }
 0x159   : > { %v1240_v51 = vmax.f32 %v1200_v16, %v1221_v2  ;;  %v1376_v25 = vsel %vm1162_vm3, %v24016_v15, %v23926_v38  ;;  %v1354_v56 = vsel %vm1339_vm6, %v18241_v34, %v18349_v26  ;;  %v1502_v39 = vsel %vm1122_vm2, %v1499_v36, %v1501_v29  ;;  %v785_v28 = vpop.f32.mrb[52].mxu1 }
 0x15a   : > { %1428 = vst.msk [vmem:[#allocation3 + $0x40] sm:$0xff] %vm389_vm1, %v1376_v25  ;;  %v23925_v0 = vrot.slane %v18326_v37, 1  ;;  %v24017_v16 = vmax.f32 %v18181_v40, %v18251_v8  ;;  %1363 = vrot.lane.b32.xlu0 %v1354_v56, %s17596_s23  ;;  %v1527_v34 = vmax.f32 %v18292_v14, %v1500_v1  ;;  %v1538_v35 = vrot.slane %v18085_v19, 2  ;;  %811 = vst.msk [vmem:[#allocation2 + $0x148] sm:$0xff] %vm389_vm1, %v785_v28  ;;  %v15567_v36 = vpop.f32.mrb[53].mxu1 }
 0x15b   : > { %v1256_v22 = vadd.f32 %v18125_v27, %v1240_v51  ;;  %v1257_v62 = vadd.f32 %v18125_v27, %v1241_v57  ;;  %v1504_v2 = vsel %vm1122_vm2, %v1501_v29, %v1503_v55  ;;  %v788_v15 = vpop.f32.mrb[54].mxu1  ;;  %v1305_v25 = vor.u32 %v1303_v10, %v1301_v61 }
 0x15c   : > { %v18378_v44 = vmax.f32 %v24017_v16, %v18346_v45  ;;  %v1506_v40 = vsel %vm1122_vm2, %v1503_v55, %v23925_v0  ;;  %v1528_v56 = vmax.f32 %v18085_v19, %v1502_v39  ;;  %v1529_v1 = vmax.f32 %v18313_v7, %v1504_v2  ;;  %v15568_v28 = vpop.f32.mrb[55].mxu1  ;;  %v17035_v2 = vld [vmem:[%s23894_s3 + $0xb0] sm:$0xff]  }
 0x15d   : > { %v1539_v16 = vsel %vm1162_vm3, %v1537_v18, %v1538_v35  ;;  %v18393_v36 = vmax.f32 %v1256_v22, 0.0  ;;  %v1267_v51 = vmax.f32 %v1257_v62, 0.0  ;;  %v1530_v57 = vmax.f32 %v18337_v59, %v1506_v40  ;;  %v17034_v62 = vld [vmem:[%s23894_s3 + $0xf0] sm:$0xff]  }
 0x15e   : > { %v1540_v29 = vrot.slane %v18313_v7, 2  ;;  %v1542_v42 = vrot.slane %v18337_v59, 2  ;;  %v23927_v55 = vrot.slane %v18326_v37, 2  ;;  %v1566_v15 = vmax.f32 %v1527_v34, %v1539_v16  ;;  %14326 = vmatprep.subr.bf16.mxu1 %v17034_v62  ;;  %v2211_v62 = vld [vmem:[#allocation2 + $0x130] sm:$0xff] }
 0x15f   : > { %24018 = vst [vmem:[#allocation16_spill] sm:$0xff] %v18393_v36  ;;  %v1576_v10 = vrot.slane %v18292_v14, 3  ;;  %v18401_v61 = vpack.c.bf16 %v1267_v51, %v18393_v36  ;;  %v1577_v39 = vrot.slane %v18085_v19, 3  ;;  %v1579_v22 = vrot.slane %v18313_v7, 3  ;;  %14327 = vmatpush3.bf16.msra.mxu1 %v17035_v2  ;;  %v17036_v2 = vld [vmem:[%s23894_s3 + $0xf8] sm:$0xff]  }
 0x160   : > { %v1541_v18 = vsel %vm1162_vm3, %v1538_v35, %v1540_v29  ;;  %v1543_v34 = vsel %vm1162_vm3, %v1540_v29, %v1542_v42  ;;  %v1545_v14 = vsel %vm1162_vm3, %v1542_v42, %v23927_v55  ;;  %v1581_v35 = vrot.slane %v18337_v59, 3  ;;  %v18470_v55 = vld [vmem:[#allocation2 + $0x140] sm:$0xff]  ;;  %14328 = vmatprep.subr.bf16.mxu1 %v17036_v2 }
 0x161   : > { %24019 = vst [vmem:[#allocation17_spill] sm:$0xff] %v18401_v61  ;;  %v1567_v40 = vmax.f32 %v1528_v56, %v1541_v18  ;;  %v1307_v19 = vshll.u32 %v18401_v61, 16  ;;  %v1377_v7 = vrot.slane %v18401_v61, 2  ;;  %v1311_v16 = vshrl.u32 %v18401_v61, 16 }
 0x162   : > { %v1568_v28 = vmax.f32 %v1529_v1, %v1543_v34  ;;  %v1569_v51 = vmax.f32 %v1530_v57, %v1545_v14  ;;  %v1578_v0 = vsel %vm1202_vm4, %v1576_v10, %v1577_v39  ;;  %v1580_v29 = vsel %vm1202_vm4, %v1577_v39, %v1579_v22  ;;  %v17037_v34 = vld [vmem:[%s23894_s3 + $0xb8] sm:$0xff]   ;;  %v18437_v14 = vld [vmem:[#allocation2 + $0x120] sm:$0x7f] }
 0x163   : > { %v1582_v38 = vsel %vm1202_vm4, %v1579_v22, %v1581_v35  ;;  %v1309_v42 = vrot.slane %v1307_v19, 1  ;;  %v24020_v56 = vrot.slane %v18317_v6, 2  ;;  %1435 = vst.msk [vmem:[#allocation3 + $0x70] sm:$0xf] %vm1434_vm7, %v1377_v7  ;;  %v1355_v18 = vrot.slane %v1311_v16, 1  ;;  %14329 = vmatpush3.bf16.msra.mxu1 %v17037_v34 }
 0x164   : > { %v1356_v1 = vrot.slane %v1307_v19, 2  ;;  %v23928_v57 = vrot.slane %v18326_v37, 3  ;;  %v1605_v10 = vmax.f32 %v1566_v15, %v1578_v0  ;;  %v1606_v39 = vmax.f32 %v1567_v40, %v1580_v29  ;;  %v17038_v15 = vld [vmem:[%s23894_s3 + $0x100] sm:$0xff]   ;;  %v18452_v40 = vld [vmem:[#allocation2 + $0x138] sm:$0xff] }
 0x165   : > { %v1378_v59 = vsel %vm1162_vm3, %v24020_v56, %v1377_v7  ;;  %v1607_v22 = vmax.f32 %v1568_v28, %v1582_v38  ;;  %v18441_v19 = vmax.f32 %v18288_v5, %v18346_v45  ;;  %v2221_v7 = vmax.f32 %v18263_v33, %v2211_v62  ;;  %v18444_v56 = vld [vmem:[#allocation2 + $0x138] sm:$0x7f]  ;;  %14330 = vmatprep.subr.bf16.mxu1 %v17038_v15 }
 0x166   : > { %1431 = vst.msk [vmem:[#allocation3 + $0x58] sm:$0xff] %vm389_vm1, %v1378_v59  ;;  %v1310_v38 = vsel %vm1274_vm5, %v1305_v25, %v1309_v42  ;;  %v18447_v0 = vor.u32 %v1356_v1, %v1355_v18  ;;  %v1584_v5 = vsel %vm1202_vm4, %v1581_v35, %v23928_v57  ;;  %v1615_v28 = vadd.f32 %v18125_v27, %v1605_v10 }
 0x167   : > { %1320 = vrot.lane.b32.xlu1 %v1310_v38, %s17596_s23  ;;  %v1616_v29 = vadd.f32 %v18125_v27, %v1606_v39  ;;  %v1617_v25 = vadd.f32 %v18125_v27, %v1607_v22  ;;  %v24021_v59 = vmax.f32 %v18218_v31, %v18263_v33  ;;  %v24022_v1 = vmax.f32 %v18231_v32, %v18299_v60  ;;  %v18481_v32 = vld [vmem:[#allocation2 + $0x150] sm:$0xff] }
 0x168   : > { %v1358_v35 = vsel %vm1339_vm6, %v18349_v26, %v18447_v0  ;;  %v1608_v10 = vmax.f32 %v1569_v51, %v1584_v5  ;;  %v18476_v39 = vmax.f32 %v18305_v54, %v2211_v62  ;;  %v1625_v33 = vmax.f32 %v1615_v28, 0.0  ;;  %v17039_v26 = vld [vmem:[%s23894_s3 + $0xc0] sm:$0xff]  }
 0x169   : > { %v18464_v18 = vmax.f32 %v24021_v59, %v2211_v62  ;;  %v2233_v38 = vmax.f32 %v24022_v1, %v18452_v40  ;;  %1365 = vrot.lane.b32.xlu0 %v1358_v35, %s17596_s23  ;;  %v1626_v22 = vmax.f32 %v1616_v29, 0.0  ;;  %v18483_v59 = vld [vmem:[#allocation2 + $0x148] sm:$0xff]  ;;  %v18490_v54 = vmax.f32 %v18321_v41, %v18452_v40  ;;  %14331 = vmatpush3.bf16.msra.mxu1 %v17039_v26 }
 0x16a   : > { %v1618_v62 = vadd.f32 %v18125_v27, %v1608_v10  ;;  %v1627_v2 = vmax.f32 %v1617_v25, 0.0  ;;  %v24023_v34 = vmax.f32 %v18251_v8, %v18346_v45  ;;  %v18503_v28 = vmax.f32 %v18378_v44, %v18470_v55 }
 0x16b   : > { %v18507_v29 = vpack.c.bf16 %v1626_v22, %v1625_v33  ;;  %v18510_v25 = vmax.f32 %v2233_v38, %v18481_v32  ;;  %v18513_v15 = vmax.f32 %v2221_v7, %v18483_v59  ;;  %v18517_v8 = vmax.f32 %v18117_v11, %v17877_v50 }
 0x16c   : > { %v18499_v5 = vmax.f32 %v24023_v34, %v18470_v55  ;;  %v1628_v1 = vmax.f32 %v1618_v62, 0.0  ;;  %v18523_v10 = vor.u32 %v1311_v16, %v1309_v42  ;;  %v18527_v33 = vmax.f32 %v18185_v46, %v17879_v53 }
 0x16d   : > { %24024 = vst [vmem:[#allocation18_spill] sm:$0xff] %v18507_v29  ;;  %v1642_v35 = vshrl.u32 %v18507_v29, 16  ;;  %v1644_v44 = vshll.u32 %v18507_v29, 16  ;;  %v1733_v7 = vrot.slane %v18507_v29, 2  ;;  %v1507_v50 = vrot.slane %v18517_v8, 1 }
 0x16e   : > { %v18529_v38 = vpack.c.bf16 %v1628_v1, %v1627_v2  ;;  %v1546_v11 = vrot.slane %v18517_v8, 2  ;;  %v1509_v41 = vrot.slane %v18527_v33, 1  ;;  %v24025_v46 = vrot.slane %v18326_v37, 1  ;;  %v17040_v2 = vld [vmem:[%s23894_s3 + $0x108] sm:$0xff]  }
 0x16f   : > { %v1646_v22 = vrot.slane %v1644_v44, 1  ;;  %v1704_v62 = vrot.slane %v1642_v35, 1  ;;  %v1705_v34 = vrot.slane %v1644_v44, 2  ;;  %v17041_v1 = vld [vmem:[%s23894_s3 + $0xc8] sm:$0xff]   ;;  %v1585_v57 = vrot.slane %v18517_v8, 3  ;;  %14332 = vmatprep.subr.bf16.mxu1 %v17040_v2 }
 0x170   : > { %v1649_v16 = vshll.u32 %v18529_v38, 16  ;;  %v1653_v53 = vshrl.u32 %v18529_v38, 16  ;;  %v1508_v26 = vsel %vm1122_vm2, %v24025_v46, %v1507_v50  ;;  %v1510_v51 = vsel %vm1122_vm2, %v1507_v50, %v1509_v41  ;;  %14333 = vmatpush3.bf16.msra.mxu1 %v17041_v1  ;;  %v17046_v1 = vld [vmem:[%s23894_s3 + $0x40] sm:$0xff]  }
 0x171   : > { %v1647_v44 = vor.u32 %v1646_v22, %v1642_v35  ;;  %v1531_v31 = vmax.f32 %v18326_v37, %v1508_v26  ;;  %v24026_v36 = vrot.slane %v18529_v38, 2  ;;  %v1532_v23 = vmax.f32 %v18517_v8, %v1510_v51  ;;  %v969_v26 = vpop.f32.mrb[40].mxu0  ;;  %v17043_v8 = vld [vmem:[%s23894_s3 + $0xd0] sm:$0xff]   ;;  %14391 = vmatprep.subr.bf16.mxu0 %v17046_v1 }
 0x172   : > { %v1651_v42 = vrot.slane %v1649_v16, 1  ;;  %v1707_v29 = vrot.slane %v1653_v53, 1  ;;  %v1708_v61 = vrot.slane %v1649_v16, 2  ;;  %v24028_v35 = vrot.slane %v18326_v37, 2  ;;  %1043 = vst.msk [vmem:[#allocation2 + $0x170] sm:$0xff] %vm389_vm1, %v969_v26  ;;  %v15587_v51 = vpop.f32.mrb[41].mxu0 }
 0x173   : > { %v18553_v46 = vsel %vm1162_vm3, %v1733_v7, %v24026_v36  ;;  %v1548_v22 = vrot.slane %v18527_v33, 2  ;;  %v17042_v36 = vld [vmem:[%s23894_s3 + $0x110] sm:$0xff]   ;;  %v1706_v16 = vor.u32 %v1705_v34, %v1704_v62  ;;  %v1587_v62 = vrot.slane %v18527_v33, 3  ;;  %v972_v26 = vpop.f32.mrb[42].mxu0 }
 0x174   : > { %24027 = vst [vmem:[#allocation19_spill] sm:$0xff] %v18553_v46  ;;  %v1547_v50 = vsel %vm1162_vm3, %v24028_v35, %v1546_v11  ;;  %v1652_v7 = vsel %vm1274_vm5, %v1647_v44, %v1651_v42  ;;  %v18565_v2 = vor.u32 %v1708_v61, %v1707_v29  ;;  %v24029_v35 = vrot.slane %v18553_v46, 4  ;;  %14334 = vmatprep.subr.bf16.mxu1 %v17042_v36 }
 0x175   : > { %v1570_v6 = vmax.f32 %v1531_v31, %v1547_v50  ;;  %1680 = vrot.lane.b32.xlu1 %v1652_v7, %s17596_s23  ;;  %v1549_v61 = vsel %vm1162_vm3, %v1546_v11, %v1548_v22  ;;  %v24030_v31 = vrot.slane %v18326_v37, 3  ;;  %v24031_v34 = vrot.slane %v17894_v63, 1  ;;  %v1477_v50 = vld [vmem:[#allocation2 + $0xd8] sm:$0x7f]  ;;  %1044 = vst.msk [vmem:[#allocation2 + $0x178] sm:$0xff] %vm389_vm1, %v972_v26  ;;  %v15588_v37 = vpop.f32.mrb[43].mxu0  ;;  %14335 = vmatpush3.bf16.msra.mxu1 %v17043_v8 }
 0x176   : > { %1824 = vst.msk [vmem:[#allocation3 + $0x70] sm:$0xf0] %vm1823_vm8, %v24029_v35  ;;  %v1710_v51 = vsel %vm1339_vm6, %v1706_v16, %v18565_v2  ;;  %v1571_v35 = vmax.f32 %v1532_v23, %v1549_v61  ;;  %v1588_v36 = vsel %vm1202_vm4, %v1585_v57, %v1587_v62  ;;  %v18598_v23 = vor.u32 %v1653_v53, %v1651_v42  ;;  %v977_v1 = vpop.f32.mrb[44].mxu0  ;;  %v17045_v42 = vld [vmem:[%s23894_s3 + $0xd8] sm:$0xff]  }
 0x177   : > { %v1586_v29 = vsel %vm1202_vm4, %v24030_v31, %v1585_v57  ;;  %v1512_v44 = vsel %vm1122_vm2, %v1509_v41, %v24031_v34  ;;  %v17044_v31 = vld [vmem:[%s23894_s3 + $0x118] sm:$0xff]   ;;  %v17047_v41 = vld [vmem:[%s23894_s3] sm:$0xff]   ;;  %1723 = vrot.lane.b32.xlu0 %v1710_v51, %s17596_s23  ;;  %v24033_v16 = vmax.f32 %v17894_v63, %v17983_v4  ;;  %v1487_v26 = vmax.f32 %v17917_v17, %v1477_v50  ;;  %v15591_v57 = vpop.f32.mrb[45].mxu0 }
 0x178   : > { %v1609_v7 = vmax.f32 %v1570_v6, %v1586_v29  ;;  %v1533_v11 = vmax.f32 %v18527_v33, %v1512_v44  ;;  %v24032_v6 = vrot.slane %v17894_v63, 2  ;;  %v1610_v29 = vmax.f32 %v1571_v35, %v1588_v36  ;;  %1045 = vst.msk [vmem:[#allocation2 + $0x180] sm:$0xff] %vm389_vm1, %v977_v1  ;;  %v980_v51 = vpop.f32.mrb[46].mxu0  ;;  %14336 = vmatprep.subr.bf16.mxu1 %v17044_v31 }
 0x179   : > { %v1573_v61 = vmax.f32 %v24033_v16, %v17990_v3  ;;  %1322 = vrot.lane.b32.xlu1 %v18523_v10, %s17596_s23  ;;  %v24034_v4 = vrot.slane %v17894_v63, 3  ;;  %v1152_v17 = vmax.f32 %v17867_v43, %v17951_v49  ;;  %v24036_v8 = vrot.slane %v17867_v43, 2  ;;  %1046 = vst.msk [vmem:[#allocation2 + $0x188] sm:$0xff] %vm389_vm1, %v980_v51  ;;  %v15592_v49 = vpop.f32.mrb[47].mxu0  ;;  %14392 = vmatpush3.bf16.msra.mxu0 %v17047_v41  ;;  %v17050_v41 = vld [vmem:[%s23894_s3 + $0x8] sm:$0xff]  }
 0x17a   : > { %v1551_v33 = vsel %vm1162_vm3, %v1548_v22, %v24032_v6  ;;  %v1619_v34 = vadd.f32 %v18125_v27, %v1609_v7  ;;  %v24035_v22 = vrot.slane %v17906_v9, 2  ;;  %v1620_v35 = vadd.f32 %v18125_v27, %v1610_v29  ;;  %14337 = vmatpush3.bf16.msra.mxu1 %v17045_v42 }
 0x17b   : > { %v1572_v44 = vmax.f32 %v1533_v11, %v1551_v33  ;;  %v1590_v3 = vsel %vm1202_vm4, %v1587_v62, %v24034_v4  ;;  %v1612_v53 = vmax.f32 %v1573_v61, %v17997_v13  ;;  %v1515_v10 = vrot.slane %v1487_v26, 1  ;;  %1367 = vrot.lane.b32.xlu0 %v18447_v0, %s17596_s23  ;;  %v985_v33 = vpop.f32.mrb[48].mxu0  ;;  %v17049_v0 = vld [vmem:[%s23894_s3 + $0x48] sm:$0xff]  }
 0x17c   : > { %v1165_v50 = vsel %vm1162_vm3, %v24036_v8, %v24035_v22  ;;  %v24037_v63 = vrot.slane %v17928_v21, 1  ;;  %v24038_v62 = vrot.slane %v17906_v9, 1  ;;  %v1629_v11 = vmax.f32 %v1619_v34, 0.0  ;;  %1047 = vst.msk [vmem:[#allocation2 + $0x190] sm:$0xff] %vm389_vm1, %v985_v33  ;;  %v15595_v31 = vpop.f32.mrb[49].mxu0  ;;  %14393 = vmatprep.subr.bf16.mxu0 %v17049_v0 }
 0x17d   : > { %v1611_v7 = vmax.f32 %v1572_v44, %v1590_v3  ;;  %v1622_v37 = vadd.f32 %v18125_v27, %v1612_v53  ;;  %v1554_v36 = vrot.slane %v1487_v26, 2  ;;  %v1593_v6 = vrot.slane %v1487_v26, 3  ;;  %v988_v53 = vpop.f32.mrb[50].mxu0  ;;  %14394 = vmatpush3.bf16.msra.mxu0 %v17050_v41 }
 0x17e   : > { %v1127_v13 = vsel %vm1122_vm2, %v24038_v62, %v24037_v63  ;;  %v1630_v16 = vmax.f32 %v1620_v35, 0.0  ;;  %v24039_v1 = vrot.slane %v17925_v20, 1  ;;  %v1536_v44 = vmax.f32 %v1487_v26, %v1515_v10  ;;  %1048 = vst.msk [vmem:[#allocation2 + $0x198] sm:$0xff] %vm389_vm1, %v988_v53 }
 0x17f   : > { %v1621_v61 = vadd.f32 %v18125_v27, %v1611_v7  ;;  %v1632_v34 = vmax.f32 %v1622_v37, 0.0  ;;  %v24040_v4 = vrot.slane %v17925_v20, 2  ;;  %v1153_v26 = vmax.f32 %v17906_v9, %v1127_v13 }
 0x180   : > { %v1516_v29 = vsel %vm1122_vm2, %v24039_v1, %v1515_v10  ;;  %v24041_v22 = vmov 0.0   ;;  %v18653_v42 = vpack.c.bf16 %v1630_v16, %v1629_v11  ;;  %v1575_v51 = vmax.f32 %v1536_v44, %v1554_v36  ;;  %v15596_v10 = vpop.f32.mrb[51].mxu0 }
 0x181   : > { %v1535_v57 = vmax.f32 %v17925_v20, %v1516_v29  ;;  %v1555_v3 = vsel %vm1162_vm3, %v24040_v4, %v1554_v36  ;;  %15621 = vmatprep.subr.bf16.mxu1 %v24041_v22  ;;  %v1631_v8 = vmax.f32 %v1621_v61, 0.0  ;;  %v24042_v35 = vrot.slane %v17925_v20, 3  ;;  %v17051_v29 = vld [vmem:[%s23894_s3 + $0x50] sm:$0xff]  }
 0x182   : > { %v24043_v62 = vrot.slane %v17928_v21, 2  ;;  %v24044_v13 = vrot.slane %v17906_v9, 2  ;;  %v1192_v37 = vmax.f32 %v1152_v17, %v1165_v50  ;;  %v24045_v11 = vrot.slane %v17906_v9, 3  ;;  %v17052_v17 = vld [vmem:[%s23894_s3 + $0x10] sm:$0xff]   ;;  %14395 = vmatprep.subr.bf16.mxu0 %v17051_v29 }
 0x183   : > { %v1594_v7 = vsel %vm1202_vm4, %v24042_v35, %v1593_v6  ;;  %v1574_v63 = vmax.f32 %v1535_v57, %v1555_v3  ;;  %v24046_v36 = vrot.slane %v17867_v43, 3  ;;  %v1657_v33 = vshll.u32 %v18653_v42, 16  ;;  %14396 = vmatpush3.bf16.msra.mxu0 %v17052_v17 }
 0x184   : > { %v1167_v49 = vsel %vm1162_vm3, %v24044_v13, %v24043_v62  ;;  %v1736_v16 = vrot.slane %v18653_v42, 2  ;;  %v1661_v61 = vshrl.u32 %v18653_v42, 16  ;;  %v18672_v1 = vpack.c.bf16 %v1632_v34, %v1631_v8 }
 0x185   : > { %v1205_v20 = vsel %vm1202_vm4, %v24046_v36, %v24045_v11  ;;  %v1613_v43 = vmax.f32 %v1574_v63, %v1594_v7  ;;  %v1614_v50 = vmax.f32 %v1575_v51, %v1593_v6  ;;  %v1193_v44 = vmax.f32 %v1153_v26, %v1167_v49 }
 0x186   : > { %v1232_v31 = vmax.f32 %v1192_v37, %v1205_v20  ;;  %v1659_v0 = vrot.slane %v1657_v33, 1  ;;  %v24047_v41 = vrot.slane %v18529_v38, 2  ;;  %v1711_v34 = vrot.slane %v1661_v61, 1  ;;  %v17054_v20 = vld [vmem:[%s23894_s3 + $0x18] sm:$0xff]  }
 0x187   : > { %v1712_v4 = vrot.slane %v1657_v33, 2  ;;  %v1665_v3 = vshll.u32 %v18672_v1, 16  ;;  %v1669_v53 = vshrl.u32 %v18672_v1, 16  ;;  %v1623_v8 = vadd.f32 %v18125_v27, %v1613_v43 }
 0x188   : > { %v18683_v57 = vsel %vm1162_vm3, %v24047_v41, %v1736_v16  ;;  %v24049_v35 = vrot.slane %v17928_v21, 3  ;;  %v24050_v6 = vmov %v24045_v11  ;;  %v1660_v51 = vsel %vm1274_vm5, %v18598_v23, %v1659_v0  ;;  %v17053_v23 = vld [vmem:[%s23894_s3 + $0x58] sm:$0xff]  }
 0x189   : > { %24048 = vst [vmem:[#allocation20_spill] sm:$0xff] %v18683_v57  ;;  %v1713_v7 = vor.u32 %v1712_v4, %v1711_v34  ;;  %v1663_v10 = vor.u32 %v1661_v61, %v1659_v0  ;;  %v1624_v63 = vadd.f32 %v18125_v27, %v1614_v50  ;;  %1682 = vrot.lane.b32.xlu1 %v1660_v51, %s17596_s23  ;;  %v1667_v62 = vrot.slane %v1665_v3, 1  ;;  %v24052_v4 = vld [vmem:[#allocation6_spill] sm:$0xff] }
 0x18a   : > { %v1207_v26 = vsel %vm1202_vm4, %v24050_v6, %v24049_v35  ;;  %v1715_v13 = vrot.slane %v1669_v53, 1  ;;  %v1716_v49 = vrot.slane %v1665_v3, 2  ;;  %v18697_v37 = vmax.f32 %v1623_v8, 0.0  ;;  %14397 = vmatprep.subr.bf16.mxu0 %v17053_v23  ;;  %v24053_v35 = vld [vmem:[#allocation7_spill] sm:$0xff] }
 0x18b   : > { %v1714_v9 = vsel %vm1339_vm6, %v18565_v2, %v1713_v7  ;;  %v1634_v21 = vmax.f32 %v1624_v63, 0.0  ;;  %v1738_v11 = vrot.slane %v18672_v1, 2  ;;  %v1233_v36 = vmax.f32 %v1193_v44, %v1207_v26  ;;  %14398 = vmatpush3.bf16.msra.mxu0 %v17054_v20  ;;  %v24054_v26 = vld [vmem:[#allocation10_spill] sm:$0xff] }
 0x18c   : > { %1725 = vrot.lane.b32.xlu0 %v1714_v9, %s17596_s23  ;;  %v1668_v33 = vsel %vm1274_vm5, %v1663_v10, %v1667_v62  ;;  %v1717_v61 = vor.u32 %v1716_v49, %v1715_v13  ;;  %v1671_v29 = vor.u32 %v1669_v53, %v1667_v62  ;;  %v1248_v2 = vadd.f32 %v18125_v27, %v1232_v31 }
 0x18d   : > { %v18712_v17 = vpack.c.bf16 %v1634_v21, %v18697_v37  ;;  %v18715_v43 = vsel %vm1162_vm3, %v1736_v16, %v1738_v11  ;;  %v1249_v50 = vadd.f32 %v18125_v27, %v1233_v36  ;;  %v1899_v44 = vrot.slane %v18032_v30, 1  ;;  %1684 = vrot.lane.b32.xlu1 %v1668_v33, %s17596_s23 }
 0x18e   : > { %24051 = vst [vmem:[#allocation21_spill] sm:$0xff] %v18715_v43  ;;  %v1718_v0 = vsel %vm1339_vm6, %v1713_v7, %v1717_v61  ;;  %v23939_v41 = vrot.slane %v18715_v43, 4  ;;  %v1258_v34 = vmax.f32 %v1248_v2, 0.0  ;;  %v1900_v31 = vrot.slane %v24052_v4, 1 }
 0x18f   : > { %v1673_v3 = vshll.u32 %v18712_v17, 16  ;;  %v1740_v16 = vrot.slane %v18712_v17, 2  ;;  %v1677_v53 = vshrl.u32 %v18712_v17, 16  ;;  %v1259_v27 = vmax.f32 %v1249_v50, 0.0 }
 0x190   : > { %1727 = vrot.lane.b32.xlu0 %v1718_v0, %s17596_s23  ;;  %v1901_v8 = vsel %vm1122_vm2, %v1899_v44, %v1900_v31  ;;  %v1902_v6 = vrot.slane %v24053_v35, 1  ;;  %v1904_v51 = vrot.slane %v24054_v26, 1  ;;  %v1906_v7 = vrot.slane %v18227_v12, 1 }
 0x191   : > { %v1675_v10 = vrot.slane %v1673_v3, 1  ;;  %v1741_v63 = vsel %vm1162_vm3, %v1738_v11, %v1740_v16  ;;  %v1804_v62 = vrot.slane %v1740_v16, 4  ;;  %v1719_v13 = vrot.slane %v1677_v53, 1 }
 0x192   : > { %v1798_v49 = vrot.slane %v1741_v63, 4  ;;  %v1720_v9 = vrot.slane %v1673_v3, 2  ;;  %v18732_v21 = vpack.c.bf16 %v1259_v27, %v1258_v34  ;;  %v1903_v36 = vsel %vm1122_vm2, %v1900_v31, %v1902_v6  ;;  %v17057_v34 = vld [vmem:[%s23894_s3 + $0x20] sm:$0xff]   ;;  %v17058_v63 = vld [vmem:[%s23894_s3 + $0x68] sm:$0xff]  }
 0x193   : > { %v1676_v23 = vsel %vm1274_vm5, %v1671_v29, %v1675_v10  ;;  %v1679_v20 = vor.u32 %v1677_v53, %v1675_v10  ;;  %v1905_v33 = vsel %vm1122_vm2, %v1902_v6, %v1904_v51  ;;  %v1907_v2 = vsel %vm1122_vm2, %v1904_v51, %v1906_v7  ;;  %v17055_v29 = vld [vmem:[%s23894_s3 + $0x60] sm:$0xff]  }
 0x194   : > { %v1799_v11 = vsel %vm1778_vm9, %v23939_v41, %v1798_v49  ;;  %v1805_v50 = vsel %vm1778_vm9, %v1798_v49, %v1804_v62  ;;  %1686 = vrot.lane.b32.xlu1 %v1676_v23, %s17596_s23  ;;  %v1721_v44 = vor.u32 %v1720_v9, %v1719_v13  ;;  %v1276_v0 = vshrl.u32 %v18732_v21, 16  ;;  %14399 = vmatprep.subr.bf16.mxu0 %v17055_v29  ;;  %v24055_v13 = vld [vmem:[#allocation11_spill] sm:$0xff] }
 0x195   : > { %1833 = vst.msk [vmem:[#allocation3 + $0xb8] sm:$0xff] %vm389_vm1, %v1799_v11  ;;  %1836 = vst.msk [vmem:[#allocation3 + $0xd0] sm:$0xff] %vm389_vm1, %v1805_v50  ;;  %v1278_v31 = vshll.u32 %v18732_v21, 16  ;;  %v1370_v3 = vrot.slane %v18732_v21, 2  ;;  %v1928_v16 = vmax.f32 %v18032_v30, %v1901_v8  ;;  %v1929_v53 = vmax.f32 %v24052_v4, %v1903_v36  ;;  %14400 = vmatpush3.bf16.msra.mxu0 %v17057_v34 }
 0x196   : > { %v1722_v27 = vsel %vm1339_vm6, %v1717_v61, %v1721_v44  ;;  %v1340_v6 = vrot.slane %v1276_v0, 1  ;;  %v1930_v51 = vmax.f32 %v24053_v35, %v1905_v33  ;;  %v1931_v10 = vmax.f32 %v24054_v26, %v1907_v2  ;;  %14401 = vmatprep.subr.bf16.mxu0 %v17058_v63 }
 0x197   : > { %1729 = vrot.lane.b32.xlu0 %v1722_v27, %s17596_s23  ;;  %v1280_v62 = vrot.slane %v1278_v31, 1  ;;  %v24056_v49 = vrot.slane %v24055_v13, 2  ;;  %v1341_v9 = vrot.slane %v1278_v31, 2  ;;  %v1938_v61 = vrot.slane %v18032_v30, 2 }
 0x198   : > { %1688 = vrot.lane.b32.xlu1 %v1679_v20, %s17596_s23  ;;  %v1939_v36 = vrot.slane %v24052_v4, 2  ;;  %v1941_v23 = vrot.slane %v24053_v35, 2  ;;  %v1943_v33 = vrot.slane %v24054_v26, 2  ;;  %v1945_v2 = vrot.slane %v18227_v12, 2 }
 0x199   : > { %v1372_v8 = vsel %vm1162_vm3, %v1370_v3, %v24056_v49  ;;  %v1281_v11 = vor.u32 %v1280_v62, %v1276_v0  ;;  %v1342_v50 = vor.u32 %v1341_v9, %v1340_v6  ;;  %v1977_v29 = vrot.slane %v18032_v30, 3  ;;  %v24057_v49 = vld [vmem:[#allocation13_spill] sm:$0xff] }
 0x19a   : > { %1422 = vst.msk [vmem:[#allocation3 + $0x10] sm:$0xff] %vm389_vm1, %v1372_v8  ;;  %v1978_v31 = vrot.slane %v24052_v4, 3  ;;  %v1940_v34 = vsel %vm1162_vm3, %v1938_v61, %v1939_v36  ;;  %v1942_v20 = vsel %vm1162_vm3, %v1939_v36, %v1941_v23  ;;  %v1944_v3 = vsel %vm1162_vm3, %v1941_v23, %v1943_v33 }
 0x19b   : > { %v1946_v27 = vsel %vm1162_vm3, %v1943_v33, %v1945_v2  ;;  %1731 = vrot.lane.b32.xlu0 %v1721_v44, %s17596_s23  ;;  %v1286_v8 = vsel %vm1274_vm5, %v1281_v11, %v24057_v49  ;;  %v1346_v0 = vsel %vm1339_vm6, %v1342_v50, %v18239_v48  ;;  %v1967_v6 = vmax.f32 %v1928_v16, %v1940_v34 }
 0x19c   : > { %v1968_v30 = vmax.f32 %v1929_v53, %v1942_v20  ;;  %1314 = vrot.lane.b32.xlu1 %v1286_v8, %s17596_s23  ;;  %v1969_v4 = vmax.f32 %v1930_v51, %v1944_v3  ;;  %v1970_v63 = vmax.f32 %v1931_v10, %v1946_v27  ;;  %v1979_v62 = vsel %vm1202_vm4, %v1977_v29, %v1978_v31  ;;  %v18802_v10 = vld [vmem:[%s23893_s2] ss:$0 sm:$0xff] }
 0x19d   : > { %v1980_v9 = vrot.slane %v24053_v35, 3  ;;  %v1982_v61 = vrot.slane %v24054_v26, 3  ;;  %v1984_v44 = vrot.slane %v18227_v12, 3  ;;  %v2006_v36 = vmax.f32 %v1967_v6, %v1979_v62 }
 0x19e   : > { %v1908_v23 = vrot.slane %v18249_v58, 1  ;;  %v1910_v48 = vrot.slane %v18259_v24, 1  ;;  %v1947_v16 = vrot.slane %v18249_v58, 2  ;;  %v1949_v53 = vrot.slane %v18259_v24, 2 }
 0x19f   : > { %v1981_v33 = vsel %vm1202_vm4, %v1978_v31, %v1980_v9  ;;  %1359 = vrot.lane.b32.xlu0 %v1346_v0, %s17596_s23  ;;  %v1983_v51 = vsel %vm1202_vm4, %v1980_v9, %v1982_v61  ;;  %v1985_v35 = vsel %vm1202_vm4, %v1982_v61, %v1984_v44  ;;  %v2016_v11 = vadd.f32 %v18802_v10, %v2006_v36 }
 0x1a0   : > { %v2007_v26 = vmax.f32 %v1968_v30, %v1981_v33  ;;  %v2008_v50 = vmax.f32 %v1969_v4, %v1983_v51  ;;  %v2009_v29 = vmax.f32 %v1970_v63, %v1985_v35  ;;  %v1909_v31 = vsel %vm1122_vm2, %v1906_v7, %v1908_v23  ;;  %v24059_v51 = vld [vmem:[#allocation14_spill] sm:$0xff] }
 0x1a1   : > { %v1911_v34 = vsel %vm1122_vm2, %v1908_v23, %v1910_v48  ;;  %v2026_v3 = vmax.f32 %v2016_v11, 0.0  ;;  %v1932_v27 = vmax.f32 %v18227_v12, %v1909_v31  ;;  %v1948_v6 = vsel %vm1162_vm3, %v1945_v2, %v1947_v16  ;;  %v17059_v23 = vld [vmem:[%s23894_s3 + $0x28] sm:$0xff]  }
 0x1a2   : > { %v2017_v20 = vadd.f32 %v18802_v10, %v2007_v26  ;;  %v1933_v49 = vmax.f32 %v18249_v58, %v1911_v34  ;;  %v2018_v8 = vadd.f32 %v18802_v10, %v2008_v50  ;;  %v2019_v0 = vadd.f32 %v18802_v10, %v2009_v29  ;;  %14402 = vmatpush3.bf16.msra.mxu0 %v17059_v23  ;;  %v17060_v29 = vld [vmem:[%s23894_s3 + $0x70] sm:$0xff]  }
 0x1a3   : > { %v1950_v30 = vsel %vm1162_vm3, %v1947_v16, %v1949_v53  ;;  %v1971_v4 = vmax.f32 %v1932_v27, %v1948_v6  ;;  %v1986_v62 = vrot.slane %v18249_v58, 3  ;;  %v1988_v12 = vrot.slane %v18259_v24, 3  ;;  %14403 = vmatprep.subr.bf16.mxu0 %v17060_v29 }
 0x1a4   : > { %v2027_v7 = vmax.f32 %v2017_v20, 0.0  ;;  %v1972_v63 = vmax.f32 %v1933_v49, %v1950_v30  ;;  %v2028_v9 = vmax.f32 %v2018_v8, 0.0  ;;  %v2029_v61 = vmax.f32 %v2019_v0, 0.0  ;;  %v17062_v8 = vld [vmem:[%s23894_s3 + $0x78] sm:$0xff]  }
 0x1a5   : > { %v1912_v36 = vrot.slane %v18283_v52, 1  ;;  %v18826_v2 = vmax.f32 %v18464_v18, %v18483_v59  ;;  %v1987_v16 = vsel %vm1202_vm4, %v1984_v44, %v1986_v62  ;;  %v1914_v58 = vrot.slane %v24059_v51, 1  ;;  %v17061_v18 = vld [vmem:[%s23894_s3 + $0x30] sm:$0xff]  }
 0x1a6   : > { %v18828_v33 = vpack.c.bf16 %v2027_v7, %v2026_v3  ;;  %v18832_v35 = vpack.c.bf16 %v2029_v61, %v2028_v9  ;;  %v1989_v26 = vsel %vm1202_vm4, %v1986_v62, %v1988_v12  ;;  %v2010_v11 = vmax.f32 %v1971_v4, %v1987_v16  ;;  %14404 = vmatpush3.bf16.msra.mxu0 %v17061_v18  ;;  %v17063_v9 = vld [vmem:[%s23894_s3 + $0x38] sm:$0xff]  }
 0x1a7   : > { %v1951_v50 = vrot.slane %v18283_v52, 2  ;;  %v2011_v31 = vmax.f32 %v1972_v63, %v1989_v26  ;;  %v1913_v34 = vsel %vm1122_vm2, %v1910_v48, %v1912_v36  ;;  %v1915_v26 = vsel %vm1122_vm2, %v1912_v36, %v1914_v58  ;;  %14405 = vmatprep.subr.bf16.mxu0 %v17062_v8 }
 0x1a8   : > { %24058 = vst [vmem:[#allocation6_spill] sm:$0xff] %v18828_v33  ;;  %24060 = vst [vmem:[#allocation7_spill] sm:$0xff] %v18832_v35  ;;  %v2043_v59 = vshrl.u32 %v18828_v33, 16  ;;  %v2045_v44 = vshll.u32 %v18828_v33, 16  ;;  %v2050_v20 = vshll.u32 %v18832_v35, 16  ;;  %v23937_v3 = vrot.slane %v18832_v35, 2 }
 0x1a9   : > { %v2054_v27 = vshrl.u32 %v18832_v35, 16  ;;  %v2020_v49 = vadd.f32 %v18802_v10, %v2010_v11  ;;  %v2021_v7 = vadd.f32 %v18802_v10, %v2011_v31  ;;  %v1935_v31 = vmax.f32 %v18283_v52, %v1915_v26 }
 0x1aa   : > { %v2047_v0 = vrot.slane %v2045_v44, 1  ;;  %v2105_v6 = vrot.slane %v2043_v59, 1  ;;  %v2106_v30 = vrot.slane %v2045_v44, 2  ;;  %v2052_v4 = vrot.slane %v2050_v20, 1  ;;  %14406 = vmatpush3.bf16.msra.mxu0 %v17063_v9 }
 0x1ab   : > { %v2108_v48 = vrot.slane %v2054_v27, 1  ;;  %v2109_v63 = vrot.slane %v2050_v20, 2  ;;  %v2030_v62 = vmax.f32 %v2020_v49, 0.0  ;;  %v2031_v16 = vmax.f32 %v2021_v7, 0.0  ;;  %v1864_v20 = vld [vmem:[#allocation2 + $0x108] sm:$0x7f] }
 0x1ac   : > { %v2048_v61 = vor.u32 %v2047_v0, %v2043_v59  ;;  %v2107_v23 = vor.u32 %v2106_v30, %v2105_v6  ;;  %v2056_v29 = vor.u32 %v2054_v27, %v2052_v4  ;;  %v1934_v44 = vmax.f32 %v18259_v24, %v1913_v34  ;;  %v1878_v7 = vld [vmem:[#allocation2 + $0x120] sm:$0x7f] }
 0x1ad   : > { %v2110_v11 = vor.u32 %v2109_v63, %v2108_v48  ;;  %v18862_v49 = vpack.c.bf16 %v2031_v16, %v2030_v62  ;;  %v1952_v59 = vsel %vm1162_vm3, %v1949_v53, %v1951_v50  ;;  %v1953_v0 = vrot.slane %v24059_v51, 2  ;;  %v24062_v62 = vld [vmem:[#allocation9_spill] sm:$0xff] }
 0x1ae   : > { %v2053_v18 = vsel %vm1274_vm5, %v2048_v61, %v2052_v4  ;;  %v1973_v27 = vmax.f32 %v1934_v44, %v1952_v59  ;;  %v1990_v34 = vrot.slane %v18283_v52, 3  ;;  %v1992_v8 = vrot.slane %v24059_v51, 3  ;;  %v24061_v52 = vld [vmem:[#allocation8_spill] sm:$0xff] }
 0x1af   : > { %2081 = vrot.lane.b32.xlu1 %v2053_v18, %s17596_s23  ;;  %v2111_v36 = vsel %vm1339_vm6, %v2107_v23, %v2110_v11  ;;  %v2058_v6 = vshll.u32 %v18862_v49, 16  ;;  %v2137_v24 = vrot.slane %v18862_v49, 2  ;;  %v2062_v53 = vshrl.u32 %v18862_v49, 16 }
 0x1b0   : > { %2124 = vrot.lane.b32.xlu0 %v2111_v36, %s17596_s23  ;;  %v1954_v30 = vsel %vm1162_vm3, %v1951_v50, %v1953_v0  ;;  %v1991_v48 = vsel %vm1202_vm4, %v1988_v12, %v1990_v34  ;;  %v1993_v63 = vsel %vm1202_vm4, %v1990_v34, %v1992_v8  ;;  %v24063_v61 = vmax.f32 %v24061_v52, %v24062_v62 }
 0x1b1   : > { %v1974_v4 = vmax.f32 %v1935_v31, %v1954_v30  ;;  %v2060_v23 = vrot.slane %v2058_v6, 1  ;;  %v2138_v16 = vsel %vm1162_vm3, %v23937_v3, %v2137_v24  ;;  %v2112_v26 = vrot.slane %v2062_v53, 1 }
 0x1b2   : > { %v1874_v9 = vmax.f32 %v24063_v61, %v1864_v20  ;;  %v2113_v44 = vrot.slane %v2058_v6, 2  ;;  %2189 = vst.msk [vmem:[#allocation3 + $0x100] sm:$0xff] %vm389_vm1, %v2138_v16  ;;  %v2012_v50 = vmax.f32 %v1973_v27, %v1991_v48  ;;  %v2261_v12 = vrot.slane %v18364_v47, 1 }
 0x1b3   : > { %v2013_v18 = vmax.f32 %v1974_v4, %v1993_v63  ;;  %v2061_v59 = vsel %vm1274_vm5, %v2056_v29, %v2060_v23  ;;  %v2064_v34 = vor.u32 %v2062_v53, %v2060_v23  ;;  %v2262_v20 = vrot.slane %v18441_v19, 1 }
 0x1b4   : > { %v1888_v31 = vmax.f32 %v1874_v9, %v1878_v7  ;;  %v2114_v36 = vor.u32 %v2113_v44, %v2112_v26  ;;  %2083 = vrot.lane.b32.xlu1 %v2061_v59, %s17596_s23  ;;  %v2022_v30 = vadd.f32 %v18802_v10, %v2012_v50  ;;  %v2264_v48 = vrot.slane %v18476_v39, 1 }
 0x1b5   : > { %v2023_v52 = vadd.f32 %v18802_v10, %v2013_v18  ;;  %v2263_v7 = vsel %vm1122_vm2, %v2261_v12, %v2262_v20  ;;  %v2266_v50 = vrot.slane %v18490_v54, 1  ;;  %v2268_v18 = vrot.slane %v18503_v28, 1 }
 0x1b6   : > { %v1916_v6 = vrot.slane %v1888_v31, 1  ;;  %v1955_v62 = vrot.slane %v1888_v31, 2  ;;  %v2115_v27 = vsel %vm1339_vm6, %v2110_v11, %v2114_v36  ;;  %v1994_v4 = vrot.slane %v1888_v31, 3 }
 0x1b7   : > { %2126 = vrot.lane.b32.xlu0 %v2115_v27, %s17596_s23  ;;  %v2032_v29 = vmax.f32 %v2022_v30, 0.0  ;;  %v2033_v53 = vmax.f32 %v2023_v52, 0.0  ;;  %v2265_v16 = vsel %vm1122_vm2, %v2262_v20, %v2264_v48  ;;  %v2290_v59 = vmax.f32 %v18364_v47, %v2263_v7 }
 0x1b8   : > { %v1917_v63 = vsel %vm1122_vm2, %v1914_v58, %v1916_v6  ;;  %v1937_v61 = vmax.f32 %v1888_v31, %v1916_v6  ;;  %v1956_v23 = vsel %vm1162_vm3, %v1953_v0, %v1955_v62  ;;  %v1995_v11 = vsel %vm1202_vm4, %v1992_v8, %v1994_v4 }
 0x1b9   : > { %v1936_v9 = vmax.f32 %v24059_v51, %v1917_v63  ;;  %v18903_v26 = vpack.c.bf16 %v2033_v53, %v2032_v29  ;;  %v2291_v58 = vmax.f32 %v18441_v19, %v2265_v16  ;;  %v2300_v51 = vrot.slane %v18364_v47, 2 }
 0x1ba   : > { %v1976_v44 = vmax.f32 %v1937_v61, %v1955_v62  ;;  %v2267_v52 = vsel %vm1122_vm2, %v2264_v48, %v2266_v50  ;;  %v2269_v6 = vsel %vm1122_vm2, %v2266_v50, %v2268_v18  ;;  %v2301_v62 = vrot.slane %v18441_v19, 2 }
 0x1bb   : > { %v1975_v12 = vmax.f32 %v1936_v9, %v1956_v23  ;;  %v2066_v0 = vshll.u32 %v18903_v26, 16  ;;  %v2070_v8 = vshrl.u32 %v18903_v26, 16  ;;  %v2139_v20 = vrot.slane %v18903_v26, 2 }
 0x1bc   : > { %v2015_v31 = vmax.f32 %v1976_v44, %v1994_v4  ;;  %v2292_v61 = vmax.f32 %v18476_v39, %v2267_v52  ;;  %v2293_v9 = vmax.f32 %v18490_v54, %v2269_v6  ;;  %v2302_v50 = vsel %vm1162_vm3, %v2300_v51, %v2301_v62 }
 0x1bd   : > { %v2014_v30 = vmax.f32 %v1975_v12, %v1995_v11  ;;  %v2068_v27 = vrot.slane %v2066_v0, 1  ;;  %v2116_v7 = vrot.slane %v2070_v8, 1  ;;  %v2117_v29 = vrot.slane %v2066_v0, 2 }
 0x1be   : > { %v2025_v53 = vadd.f32 %v18802_v10, %v2015_v31  ;;  %v2140_v4 = vsel %vm1162_vm3, %v2137_v24, %v2139_v20  ;;  %v2303_v12 = vrot.slane %v18476_v39, 2  ;;  %v2305_v24 = vrot.slane %v18490_v54, 2 }
 0x1bf   : > { %v2024_v63 = vadd.f32 %v18802_v10, %v2014_v30  ;;  %v2069_v48 = vsel %vm1274_vm5, %v2064_v34, %v2068_v27  ;;  %v2118_v23 = vor.u32 %v2117_v29, %v2116_v7  ;;  %v2072_v16 = vor.u32 %v2070_v8, %v2068_v27  ;;  %2192 = vst.msk [vmem:[#allocation3 + $0x118] sm:$0xff] %vm389_vm1, %v2140_v4 }
 0x1c0   : > { %v2035_v11 = vmax.f32 %v2025_v53, 0.0  ;;  %2085 = vrot.lane.b32.xlu1 %v2069_v48, %s17596_s23  ;;  %v2307_v31 = vrot.slane %v18503_v28, 2  ;;  %v2329_v34 = vmax.f32 %v2290_v59, %v2302_v50  ;;  %v2339_v30 = vrot.slane %v18364_v47, 3 }
 0x1c1   : > { %v18926_v44 = vmax.f32 %v2024_v63, 0.0  ;;  %v2119_v0 = vsel %vm1339_vm6, %v2114_v36, %v2118_v23  ;;  %v2304_v52 = vsel %vm1162_vm3, %v2301_v62, %v2303_v12  ;;  %v2306_v51 = vsel %vm1162_vm3, %v2303_v12, %v2305_v24 }
 0x1c2   : > { %2128 = vrot.lane.b32.xlu0 %v2119_v0, %s17596_s23  ;;  %v2340_v6 = vrot.slane %v18441_v19, 3  ;;  %v2308_v27 = vsel %vm1162_vm3, %v2305_v24, %v2307_v31  ;;  %v2330_v7 = vmax.f32 %v2291_v58, %v2304_v52  ;;  %v2331_v36 = vmax.f32 %v2292_v61, %v2306_v51 }
 0x1c3   : > { %24064 = vst [vmem:[#allocation10_spill] sm:$0xff] %v18926_v44  ;;  %v18936_v8 = vpack.c.bf16 %v2035_v11, %v18926_v44  ;;  %v2342_v29 = vrot.slane %v18476_v39, 3  ;;  %v2332_v63 = vmax.f32 %v2293_v9, %v2308_v27  ;;  %v2344_v48 = vrot.slane %v18490_v54, 3  ;;  %v18950_v11 = vld [vmem:[#allocation2 + $0x158] sm:$0xff]  ;;  %v18956_v9 = vld [vmem:[#allocation2 + $0x160] sm:$0xff] }
 0x1c4   : > { %v2341_v4 = vsel %vm1202_vm4, %v2339_v30, %v2340_v6  ;;  %v2346_v19 = vrot.slane %v18503_v28, 3  ;;  %v18970_v27 = vmax.f32 %v18499_v5, %v18950_v11 }
 0x1c5   : > { %v2074_v59 = vshll.u32 %v18936_v8, 16  ;;  %v2141_v47 = vrot.slane %v18936_v8, 2  ;;  %v2078_v53 = vshrl.u32 %v18936_v8, 16  ;;  %v2343_v62 = vsel %vm1202_vm4, %v2340_v6, %v2342_v29 }
 0x1c6   : > { %v2345_v12 = vsel %vm1202_vm4, %v2342_v29, %v2344_v48  ;;  %v2347_v54 = vsel %vm1202_vm4, %v2344_v48, %v2346_v19  ;;  %v2368_v24 = vmax.f32 %v2329_v34, %v2341_v4  ;;  %v2369_v0 = vmax.f32 %v2330_v7, %v2343_v62 }
 0x1c7   : > { %v2076_v58 = vrot.slane %v2074_v59, 1  ;;  %v2142_v39 = vsel %vm1162_vm3, %v2139_v20, %v2141_v47  ;;  %2198 = vst.msk [vmem:[#allocation3 + $0x148] sm:$0xf] %vm1434_vm7, %v2141_v47  ;;  %v2120_v61 = vrot.slane %v2078_v53, 1  ;;  %v2121_v50 = vrot.slane %v2074_v59, 2 }
 0x1c8   : > { %2195 = vst.msk [vmem:[#allocation3 + $0x130] sm:$0xff] %vm389_vm1, %v2142_v39  ;;  %v2370_v52 = vmax.f32 %v2331_v36, %v2345_v12  ;;  %v2371_v51 = vmax.f32 %v2332_v63, %v2347_v54  ;;  %v2378_v29 = vadd.f32 %v18802_v10, %v2368_v24  ;;  %v2379_v34 = vadd.f32 %v18802_v10, %v2369_v0 }
 0x1c9   : > { %v2077_v20 = vsel %vm1274_vm5, %v2072_v16, %v2076_v58  ;;  %v18964_v30 = vor.u32 %v2121_v50, %v2120_v61  ;;  %v18977_v16 = vmax.f32 %v18513_v15, %v18956_v9  ;;  %v2270_v63 = vrot.slane %v18826_v2, 1 }
 0x1ca   : > { %2087 = vrot.lane.b32.xlu1 %v2077_v20, %s17596_s23  ;;  %v2380_v36 = vadd.f32 %v18802_v10, %v2370_v52  ;;  %v2381_v59 = vadd.f32 %v18802_v10, %v2371_v51  ;;  %v2388_v5 = vmax.f32 %v2378_v29, 0.0  ;;  %v2389_v47 = vmax.f32 %v2379_v34, 0.0 }
 0x1cb   : > { %v2123_v7 = vsel %vm1339_vm6, %v2118_v23, %v18964_v30  ;;  %v2272_v4 = vrot.slane %v18510_v25, 1  ;;  %v2309_v15 = vrot.slane %v18826_v2, 2  ;;  %v2311_v39 = vrot.slane %v18510_v25, 2 }
 0x1cc   : > { %2130 = vrot.lane.b32.xlu0 %v2123_v7, %s17596_s23  ;;  %v2390_v62 = vmax.f32 %v2380_v36, 0.0  ;;  %v2391_v48 = vmax.f32 %v2381_v59, 0.0  ;;  %v18988_v61 = vpack.c.bf16 %v2389_v47, %v2388_v5  ;;  %v2271_v23 = vsel %vm1122_vm2, %v2268_v18, %v2270_v63 }
 0x1cd   : > { %v2273_v50 = vsel %vm1122_vm2, %v2270_v63, %v2272_v4  ;;  %v2348_v12 = vrot.slane %v18826_v2, 3  ;;  %v2294_v24 = vmax.f32 %v18503_v28, %v2271_v23  ;;  %v2310_v20 = vsel %vm1162_vm3, %v2307_v31, %v2309_v15 }
 0x1ce   : > { %v18995_v54 = vpack.c.bf16 %v2391_v48, %v2390_v62  ;;  %v2295_v0 = vmax.f32 %v18826_v2, %v2273_v50  ;;  %v2405_v52 = vshrl.u32 %v18988_v61, 16  ;;  %v2407_v51 = vshll.u32 %v18988_v61, 16 }
 0x1cf   : > { %v2496_v29 = vrot.slane %v18988_v61, 2  ;;  %v2312_v18 = vsel %vm1162_vm3, %v2309_v15, %v2311_v39  ;;  %v2333_v59 = vmax.f32 %v2294_v24, %v2310_v20  ;;  %v2349_v24 = vsel %vm1202_vm4, %v2346_v19, %v2348_v12 }
 0x1d0   : > { %v2412_v34 = vshll.u32 %v18995_v54, 16  ;;  %v2497_v7 = vrot.slane %v18995_v54, 2  ;;  %v2416_v36 = vshrl.u32 %v18995_v54, 16  ;;  %v2409_v5 = vrot.slane %v2407_v51, 1 }
 0x1d1   : > { %v2467_v47 = vrot.slane %v2405_v52, 1  ;;  %v2468_v2 = vrot.slane %v2407_v51, 2  ;;  %v2334_v63 = vmax.f32 %v2295_v0, %v2312_v18  ;;  %v2080_v0 = vor.u32 %v2078_v53, %v2076_v58 }
 0x1d2   : > { %v2414_v31 = vrot.slane %v2412_v34, 1  ;;  %v19010_v62 = vsel %vm1162_vm3, %v2496_v29, %v2497_v7  ;;  %v2470_v48 = vrot.slane %v2416_v36, 1  ;;  %v2471_v15 = vrot.slane %v2412_v34, 2 }
 0x1d3   : > { %24065 = vst [vmem:[#allocation11_spill] sm:$0xff] %v19010_v62  ;;  %v2410_v23 = vor.u32 %v2409_v5, %v2405_v52  ;;  %v23938_v50 = vrot.slane %v19010_v62, 4  ;;  %v2469_v3 = vor.u32 %v2468_v2, %v2467_v47  ;;  %v2350_v51 = vrot.slane %v18510_v25, 3  ;;  %v2226_v5 = vld [vmem:[#allocation2 + $0x150] sm:$0x7f] }
 0x1d4   : > { %v19018_v20 = vor.u32 %v2471_v15, %v2470_v48  ;;  %v2372_v29 = vmax.f32 %v2333_v59, %v2349_v24  ;;  %v2274_v52 = vrot.slane %v18970_v27, 1  ;;  %v2276_v28 = vrot.slane %v18977_v16, 1 }
 0x1d5   : > { %v2415_v18 = vsel %vm1274_vm5, %v2410_v23, %v2414_v31  ;;  %2585 = vst.msk [vmem:[#allocation3 + $0x148] sm:$0xf0] %vm1823_vm8, %v23938_v50  ;;  %v2313_v19 = vrot.slane %v18970_v27, 2  ;;  %v2351_v58 = vsel %vm1202_vm4, %v2348_v12, %v2350_v51  ;;  %v2315_v59 = vrot.slane %v18977_v16, 2 }
 0x1d6   : > { %2443 = vrot.lane.b32.xlu1 %v2415_v18, %s17596_s23  ;;  %v2473_v53 = vsel %vm1339_vm6, %v2469_v3, %v19018_v20  ;;  %v2382_v34 = vadd.f32 %v18802_v10, %v2372_v29  ;;  %v2373_v47 = vmax.f32 %v2334_v63, %v2351_v58  ;;  %v2275_v2 = vsel %vm1122_vm2, %v2272_v4, %v2274_v52  ;;  %v2240_v29 = vld [vmem:[#allocation2 + $0x168] sm:$0x7f] }
 0x1d7   : > { %2486 = vrot.lane.b32.xlu0 %v2473_v53, %s17596_s23  ;;  %v2277_v48 = vsel %vm1122_vm2, %v2274_v52, %v2276_v28  ;;  %v2314_v15 = vsel %vm1162_vm3, %v2311_v39, %v2313_v19  ;;  %v2296_v24 = vmax.f32 %v18510_v25, %v2275_v2  ;;  %v2316_v12 = vsel %vm1162_vm3, %v2313_v19, %v2315_v59  ;;  %v19049_v53 = vld [vmem:[#allocation2 + $0x150] sm:$0xff]  ;;  %v19059_v58 = vld [vmem:[#allocation2 + $0x148] sm:$0xff]  ;;  %v19068_v2 = vpop.permute.xlu1 %1316 }
 0x1d8   : > { %v2392_v23 = vmax.f32 %v2382_v34, 0.0  ;;  %v2297_v3 = vmax.f32 %v18970_v27, %v2277_v48  ;;  %v2383_v18 = vadd.f32 %v18802_v10, %v2373_v47  ;;  %v2352_v50 = vrot.slane %v18970_v27, 3  ;;  %v19057_v19 = vld [vmem:[#allocation2 + $0x130] sm:$0xff]  ;;  %v19070_v48 = vld [vmem:[#allocation2 + $0x140] sm:$0xff] }
 0x1d9   : > { %v2354_v63 = vrot.slane %v18977_v16, 3  ;;  %v24066_v4 = vmax.f32 %v18437_v14, %v18444_v56  ;;  %v24067_v25 = vmax.f32 %v18299_v60, %v18452_v40  ;;  %v2335_v34 = vmax.f32 %v2296_v24, %v2314_v15 }
 0x1da   : > { %2089 = vrot.lane.b32.xlu1 %v2080_v0, %s17596_s23  ;;  %v2336_v14 = vmax.f32 %v2297_v3, %v2316_v12  ;;  %v2393_v56 = vmax.f32 %v2383_v18, 0.0  ;;  %v24068_v0 = vmax.f32 %v18346_v45, %v18470_v55  ;;  %v2418_v3 = vor.u32 %v2416_v36, %v2414_v31 }
 0x1db   : > { %v2236_v52 = vmax.f32 %v24066_v4, %v2226_v5  ;;  %v19055_v39 = vmax.f32 %v24067_v25, %v19049_v53  ;;  %2132 = vrot.lane.b32.xlu0 %v18964_v30, %s17596_s23  ;;  %v2353_v5 = vsel %vm1202_vm4, %v2350_v51, %v2352_v50  ;;  %v2355_v60 = vsel %vm1202_vm4, %v2352_v50, %v2354_v63  ;;  %v1319_v41 = vpop.permute.xlu1 %1318 }
 0x1dc   : > { %v2616_v4 = vmax.f32 %v19070_v48, %v18950_v11  ;;  %v19078_v15 = vmax.f32 %v24068_v0, %v18950_v11  ;;  %v2374_v30 = vmax.f32 %v2335_v34, %v2353_v5  ;;  %v2375_v24 = vmax.f32 %v2336_v14, %v2355_v60  ;;  %v19095_v60 = vld [vmem:[#allocation2 + $0x168] sm:$0xff] }
 0x1dd   : > { %v2250_v47 = vmax.f32 %v2236_v52, %v2240_v29  ;;  %v2617_v51 = vmax.f32 %v19059_v58, %v18956_v9  ;;  %v19082_v50 = vpack.c.bf16 %v2393_v56, %v2392_v23  ;;  %v19086_v29 = vpop.permute.xlu0 %1361  ;;  %v2618_v27 = vmax.f32 %v19049_v53, %v19095_v60 }
 0x1de   : > { %v2384_v18 = vadd.f32 %v18802_v10, %v2374_v30  ;;  %v2385_v52 = vadd.f32 %v18802_v10, %v2375_v24 }
 0x1df   : > { %24069 = vst [vmem:[#allocation13_spill] sm:$0xff] %v19082_v50  ;;  %v2278_v12 = vrot.slane %v2250_v47, 1  ;;  %v2317_v45 = vrot.slane %v2250_v47, 2  ;;  %v2356_v55 = vrot.slane %v2250_v47, 3  ;;  %v2420_v25 = vshll.u32 %v19082_v50, 16 }
 0x1e0   : > { %v2499_v34 = vrot.slane %v19082_v50, 2  ;;  %v2424_v14 = vshrl.u32 %v19082_v50, 16  ;;  %v2394_v56 = vmax.f32 %v2384_v18, 0.0  ;;  %v2395_v5 = vmax.f32 %v2385_v52, 0.0 }
 0x1e1   : > { %v2279_v23 = vsel %vm1122_vm2, %v2276_v28, %v2278_v12  ;;  %v2299_v31 = vmax.f32 %v2250_v47, %v2278_v12  ;;  %v2422_v48 = vrot.slane %v2420_v25, 1  ;;  %v2475_v24 = vrot.slane %v2420_v25, 2  ;;  %v17066_v47 = vld [vmem:[%s23894_s3 + $0x180] sm:$0xff]   ;;  %v993_v12 = vpop.f32.mrb[52].mxu0  ;;  %v19111_v25 = vpop.permute.xlu0 %1363 }
 0x1e2   : > { %v2298_v36 = vmax.f32 %v18977_v16, %v2279_v23  ;;  %v19100_v0 = vsel %vm1162_vm3, %v2497_v7, %v2499_v34  ;;  %v2474_v30 = vrot.slane %v2424_v14, 1  ;;  %v19104_v28 = vpack.c.bf16 %v2395_v5, %v2394_v56  ;;  %1049 = vst.msk [vmem:[#allocation2 + $0x1a0] sm:$0xff] %vm389_vm1, %v993_v12  ;;  %v15599_v53 = vpop.f32.mrb[53].mxu0  ;;  %14460 = vmatprep.subr.bf16.mxu0 %v17066_v47  ;;  %v19130_v12 = vld [vmem:[#allocation2 + $0x178] sm:$0xff] }
 0x1e3   : > { %24070 = vst [vmem:[#allocation14_spill] sm:$0xff] %v19100_v0  ;;  %v2318_v18 = vsel %vm1162_vm3, %v2315_v59, %v2317_v45  ;;  %v2338_v16 = vmax.f32 %v2299_v31, %v2317_v45  ;;  %v2423_v52 = vsel %vm1274_vm5, %v2418_v3, %v2422_v48  ;;  %v2426_v23 = vor.u32 %v2424_v14, %v2422_v48  ;;  %v19118_v31 = vld [vmem:[#allocation2 + $0x170] sm:$0xff]  ;;  %v996_v3 = vpop.f32.mrb[54].mxu0 }
 0x1e4   : > { %24071 = vst [vmem:[#allocation8_spill] sm:$0xff] %v19104_v28  ;;  %v2476_v7 = vor.u32 %v2475_v24, %v2474_v30  ;;  %v2337_v6 = vmax.f32 %v2298_v36, %v2318_v18  ;;  %2445 = vrot.lane.b32.xlu1 %v2423_v52, %s17596_s23  ;;  %v2428_v59 = vshll.u32 %v19104_v28, 16  ;;  %v2432_v45 = vshrl.u32 %v19104_v28, 16  ;;  %1050 = vst.msk [vmem:[#allocation2 + $0x1a8] sm:$0xff] %vm389_vm1, %v996_v3  ;;  %v15600_v18 = vpop.f32.mrb[55].mxu0  ;;  %v1321_v52 = vpop.permute.xlu1 %1320  ;;  %v19146_v3 = vld [vmem:[#allocation2 + $0x180] sm:$0xff] }
 0x1e5   : > { %v2357_v56 = vsel %vm1202_vm4, %v2354_v63, %v2356_v55  ;;  %v2377_v5 = vmax.f32 %v2338_v16, %v2356_v55  ;;  %v24072_v14 = vmax.f32 %v18452_v40, %v18481_v32  ;;  %v2501_v24 = vrot.slane %v19104_v28, 2  ;;  %v24081_v0 = vld [vmem:[#allocation17_spill] sm:$0xff] }
 0x1e6   : > { %v2477_v48 = vsel %vm1339_vm6, %v19018_v20, %v2476_v7  ;;  %v2376_v30 = vmax.f32 %v2337_v6, %v2357_v56  ;;  %v2430_v63 = vrot.slane %v2428_v59, 1  ;;  %v2478_v55 = vrot.slane %v2432_v45, 1 }
 0x1e7   : > { %v2629_v36 = vmax.f32 %v24072_v14, %v19095_v60  ;;  %2488 = vrot.lane.b32.xlu0 %v2477_v48, %s17596_s23  ;;  %v2479_v16 = vrot.slane %v2428_v59, 2  ;;  %v2387_v47 = vadd.f32 %v18802_v10, %v2377_v5  ;;  %v2630_v32 = vmax.f32 %v2616_v4, %v19118_v31  ;;  %v19163_v14 = vld [vmem:[#allocation2 + $0x190] sm:$0xff]  ;;  %v1366_v48 = vpop.permute.xlu0 %1365 }
 0x1e8   : > { %v2386_v40 = vadd.f32 %v18802_v10, %v2376_v30  ;;  %v2631_v6 = vmax.f32 %v2617_v51, %v19130_v12  ;;  %v19138_v20 = vsel %vm389_vm1, %v24055_v13, %v19068_v2  ;;  %v2431_v53 = vsel %vm1274_vm5, %v2426_v23, %v2430_v63  ;;  %v19161_v23 = vld [vmem:[#allocation2 + $0x188] sm:$0xff]  ;;  %v1681_v51 = vpop.permute.xlu1 %1680 }
 0x1e9   : > { %24073 = vst [vmem:[#allocation9_spill] sm:$0xff] %v19138_v20  ;;  %v19141_v56 = vor.u32 %v2479_v16, %v2478_v55  ;;  %v2397_v59 = vmax.f32 %v2387_v47, 0.0  ;;  %v19144_v5 = vsel %vm1162_vm3, %v2499_v34, %v2501_v24  ;;  %1423 = vst [vmem:[#allocation3 + $0x18] sm:$0xff] %v19138_v20  ;;  %v24075_v10 = vmax.f32 %v19057_v19, %v19059_v58  ;;  %v24077_v58 = vld [vmem:[#allocation12_spill] sm:$0xff]  ;;  %v24083_v20 = vld [vmem:[#allocation18_spill] sm:$0xff] }
 0x1ea   : > { %24074 = vst [vmem:[#allocation22_spill] sm:$0xff] %v19144_v5  ;;  %2447 = vrot.lane.b32.xlu1 %v2431_v53, %s17596_s23  ;;  %v19156_v2 = vmax.f32 %v2386_v40, 0.0  ;;  %v2632_v34 = vmax.f32 %v2618_v27, %v19146_v3  ;;  %v23940_v19 = vrot.slane %v24055_v13, 1  ;;  %v1333_v18 = vrot.slane %v24077_v58, 1 }
 0x1eb   : > { %v19153_v4 = vmax.f32 %v24075_v10, %v18956_v9  ;;  %v2481_v30 = vsel %vm1339_vm6, %v2476_v7, %v19141_v56  ;;  %v19171_v55 = vsel %vm389_vm1, %v24077_v58, %v1319_v41  ;;  %v2434_v16 = vor.u32 %v2432_v45, %v2430_v63  ;;  %v19181_v7 = vld [vmem:[#allocation2 + $0x198] sm:$0xff]  ;;  %v1001_v45 = vpop.f32.mrb[56].mxu0 }
 0x1ec   : > { %24076 = vst [vmem:[#allocation23_spill] sm:$0xff] %v19156_v2  ;;  %24078 = vst [vmem:[#allocation12_spill] sm:$0xff] %v19171_v55  ;;  %2490 = vrot.lane.b32.xlu0 %v2481_v30, %s17596_s23  ;;  %v19175_v27 = vpack.c.bf16 %v2397_v59, %v19156_v2  ;;  %v19179_v40 = vmax.f32 %v2629_v36, %v19146_v3  ;;  %v19184_v53 = vmax.f32 %v2630_v32, %v19161_v23  ;;  %v24080_v59 = vld [vmem:[#allocation15_spill] sm:$0xff] }
 0x1ed   : > { %v1334_v41 = vsel %vm1122_vm2, %v23940_v19, %v1333_v18  ;;  %v19190_v10 = vmax.f32 %v2631_v6, %v19163_v14  ;;  %v1335_v30 = vrot.slane %v24080_v59, 1  ;;  %1051 = vst.msk [vmem:[#allocation2 + $0x1b0] sm:$0xff] %vm389_vm1, %v1001_v45  ;;  %v15603_v19 = vpop.f32.mrb[57].mxu0  ;;  %v19204_v47 = vmax.f32 %v2632_v34, %v19181_v7 }
 0x1ee   : > { %24079 = vst [vmem:[#allocation24_spill] sm:$0xff] %v19175_v27  ;;  %v2436_v63 = vshll.u32 %v19175_v27, 16  ;;  %v2503_v36 = vrot.slane %v19175_v27, 2  ;;  %v2440_v58 = vshrl.u32 %v19175_v27, 16  ;;  %v19198_v32 = vsel %vm389_vm1, %v1334_v41, %v19086_v29  ;;  %v1004_v27 = vpop.f32.mrb[58].mxu0  ;;  %v1724_v19 = vpop.permute.xlu0 %1723 }
 0x1ef   : > { %1424 = vst [vmem:[#allocation3 + $0x20] sm:$0xff] %v19198_v32  ;;  %v1336_v6 = vsel %vm1122_vm2, %v1333_v18, %v1335_v30  ;;  %v19208_v62 = vsel %vm389_vm1, %v24080_v59, %v1321_v52  ;;  %v1337_v2 = vrot.slane %v24081_v0, 1  ;;  %1052 = vst.msk [vmem:[#allocation2 + $0x1b8] sm:$0xff] %vm389_vm1, %v1004_v27  ;;  %v15604_v18 = vpop.f32.mrb[59].mxu0  ;;  %v19225_v28 = vsel %vm389_vm1, %v24083_v20, %v1681_v51 }
 0x1f0   : > { %v2438_v29 = vrot.slane %v2436_v63, 1  ;;  %v2504_v41 = vsel %vm1162_vm3, %v2501_v24, %v2503_v36  ;;  %v2566_v43 = vrot.slane %v2503_v36, 4  ;;  %v2482_v45 = vrot.slane %v2440_v58, 1  ;;  %1429 = vst [vmem:[#allocation3 + $0x48] sm:$0xff] %v19208_v62  ;;  %v1009_v59 = vpop.f32.mrb[60].mxu0  ;;  %v24085_v18 = vld [vmem:[#allocation16_spill] sm:$0xff] }
 0x1f1   : > { %v2560_v34 = vrot.slane %v2504_v41, 4  ;;  %v2483_v46 = vrot.slane %v2436_v63, 2  ;;  %v19216_v52 = vsel %vm389_vm1, %v1336_v6, %v19111_v25  ;;  %v1338_v0 = vsel %vm1122_vm2, %v1335_v30, %v1337_v2  ;;  %v3420_v27 = vld [vmem:[#allocation3 + $0x18] sm:$0xf0]  ;;  %1053 = vst.msk [vmem:[#allocation2 + $0x1c0] sm:$0xff] %vm389_vm1, %v1009_v59  ;;  %v15607_v63 = vpop.f32.mrb[61].mxu0 }
 0x1f2   : > { %24082 = vst [vmem:[#allocation15_spill] sm:$0xff] %v19216_v52  ;;  %v2439_v57 = vsel %vm1274_vm5, %v2434_v16, %v2438_v29  ;;  %v2442_v24 = vor.u32 %v2440_v58, %v2438_v29  ;;  %v19221_v36 = vsel %vm389_vm1, %v1338_v0, %v1366_v48  ;;  %v24084_v25 = vrot.slane %v19144_v5, 4  ;;  %v1323_v58 = vpop.permute.xlu1 %1322  ;;  %v1012_v51 = vpop.f32.mrb[62].mxu0 }
 0x1f3   : > { %v2567_v30 = vsel %vm1778_vm9, %v2560_v34, %v2566_v43  ;;  %2449 = vrot.lane.b32.xlu1 %v2439_v57, %s17596_s23  ;;  %v2484_v16 = vor.u32 %v2483_v46, %v2482_v45  ;;  %1430 = vst [vmem:[#allocation3 + $0x50] sm:$0xff] %v19221_v36  ;;  %v23954_v48 = vrot.slane %v19225_v28, 4  ;;  %v1695_v29 = vrot.slane %v24083_v20, 1  ;;  %1054 = vst.msk [vmem:[#allocation2 + $0x1c8] sm:$0xff] %vm389_vm1, %v1012_v51  ;;  %v15608_v57 = vpop.f32.mrb[63].mxu0 }
 0x1f4   : > { %v2561_v6 = vsel %vm1778_vm9, %v24084_v25, %v2560_v34  ;;  %2597 = vst.msk [vmem:[#allocation3 + $0x1a8] sm:$0xff] %vm389_vm1, %v2567_v30  ;;  %v1696_v41 = vrot.slane %v18529_v38, 1  ;;  %v1272_v43 = vpack.c.bf16 %v24085_v18, %v24085_v18  ;;  %v1368_v34 = vpop.permute.xlu0 %1367  ;;  %v3498_v46 = vrot.slane %v19216_v52, 4  ;;  %v1017_v63 = vpop.f32.mrb[64].mxu0  ;;  %v17048_v57 = vld [vmem:[%s23894_s3 + $0x120] sm:$0xff]  }
 0x1f5   : > { %2594 = vst.msk [vmem:[#allocation3 + $0x190] sm:$0xff] %vm389_vm1, %v2561_v6  ;;  %v2485_v45 = vsel %vm1339_vm6, %v19141_v56, %v2484_v16  ;;  %1821 = vst [vmem:[#allocation3 + $0x60] sm:$0xf0] %v23954_v48  ;;  %v1418_v0 = vsel %vm389_vm1, %v1337_v2, %v1368_v34  ;;  %v3494_v20 = vrot.slane %v3420_v27, 4  ;;  %v3495_v59 = vrot.slane %v19171_v55, 4  ;;  %v15611_v18 = vpop.f32.mrb[65].mxu0 }
 0x1f6   : > { %2492 = vrot.lane.b32.xlu0 %v2485_v45, %s17596_s23  ;;  %v1697_v25 = vsel %vm1122_vm2, %v1695_v29, %v1696_v41  ;;  %v1398_v6 = vsel %vm389_vm1, %v1272_v43, %v1323_v58  ;;  %1433 = vst [vmem:[#allocation3 + $0x68] sm:$0xf] %v1418_v0  ;;  %v3421_v30 = vld [vmem:[#allocation3 + $0x20] sm:$0xf0]  ;;  %v1698_v51 = vrot.slane %v18653_v42, 1  ;;  %v23952_v56 = vrot.slane %v19221_v36, 4 }
 0x1f7   : > { %1055 = vst.msk [vmem:[#allocation2 + $0x1d0] sm:$0xff] %vm389_vm1, %v1017_v63  ;;  %2451 = vrot.lane.b32.xlu1 %v2442_v24, %s17596_s23  ;;  %v19257_v2 = vsel %vm389_vm1, %v1697_v25, %v1724_v19  ;;  %1432 = vst [vmem:[#allocation3 + $0x60] sm:$0xf] %v1398_v6  ;;  %v3497_v27 = vrot.slane %v3421_v30, 4  ;;  %v3496_v29 = vsel %vm1778_vm9, %v3494_v20, %v3495_v59  ;;  %v1700_v58 = vrot.slane %v18672_v1, 1  ;;  %v1020_v43 = vpop.f32.mrb[66].mxu0 }
 0x1f8   : > { %v23953_v34 = vrot.slane %v19257_v2, 4  ;;  %v1699_v45 = vsel %vm1122_vm2, %v1696_v41, %v1698_v51  ;;  %v3506_v19 = vsel %vm1778_vm9, %v3498_v46, %v23952_v56  ;;  %v23951_v24 = vrot.slane %v19208_v62, 4  ;;  %1056 = vst.msk [vmem:[#allocation2 + $0x1d8] sm:$0xff] %vm389_vm1, %v1020_v43  ;;  %v15612_v0 = vpop.f32.mrb[67].mxu0 }
 0x1f9   : > { %v3499_v20 = vsel %vm1778_vm9, %v3497_v27, %v3498_v46  ;;  %v19273_v63 = vsel %vm1122_vm2, %v1698_v51, %v1700_v58  ;;  %v23950_v25 = vrot.slane %v18712_v17, 1  ;;  %v1025_v41 = vpop.f32.mrb[68].mxu0  ;;  %v19286_v46 = vmax.f32 %v19055_v39, %v19095_v60 }
 0x1fa   : > { %2494 = vrot.lane.b32.xlu0 %v2484_v16, %s17596_s23  ;;  %1822 = vst [vmem:[#allocation3 + $0x68] sm:$0xf0] %v23953_v34  ;;  %3726 = vmatprep.mubr.bf16.mxu1 %v3499_v20  ;;  %v3504_v30 = vsel %vm1778_vm9, %v3495_v59, %v23951_v24  ;;  %v19290_v51 = vmax.f32 %v19078_v15, %v19118_v31  ;;  %v2665_v18 = vrot.slane %v19179_v40, 1  ;;  %1057 = vst.msk [vmem:[#allocation2 + $0x1e0] sm:$0xff] %vm389_vm1, %v1025_v41  ;;  %v15615_v16 = vpop.f32.mrb[69].mxu0 }
 0x1fb   : > { %3727 = vmatmul.mubr.bf16.vlgmr.msra.gmra.mrb[56].mxu1 %v3496_v29  ;;  %v19297_v27 = vsel %vm1122_vm2, %v1700_v58, %v23950_v25  ;;  %v19301_v59 = vmax.f32 %v19153_v4, %v19130_v12  ;;  %v23955_v39 = vrot.slane %v19184_v53, 1  ;;  %v2704_v15 = vrot.slane %v19179_v40, 2  ;;  %v1028_v43 = vpop.f32.mrb[70].mxu0  ;;  %v17056_v4 = vld [vmem:[%s23894_s3 + $0x128] sm:$0xff]   ;;  %v1683_v24 = vpop.permute.xlu1 %1682 }
 0x1fc   : > { %15622 = vmatpush3.bf16.msra.mxu1 %v17048_v57  ;;  %3734 = vmatprep.mubr.bf16.mxu1 %v3506_v19  ;;  %v2660_v0 = vrot.slane %v19286_v46, 1  ;;  %v2661_v29 = vrot.slane %v19290_v51, 1  ;;  %v2699_v20 = vrot.slane %v19286_v46, 2  ;;  %v2700_v58 = vrot.slane %v19290_v51, 2  ;;  %1058 = vst.msk [vmem:[#allocation2 + $0x1e8] sm:$0xff] %vm389_vm1, %v1028_v43  ;;  %v15616_v41 = vpop.f32.mrb[71].mxu0 }
 0x1fd   : > { %v2663_v16 = vrot.slane %v19301_v59, 1  ;;  %v2668_v57 = vsel %vm1122_vm2, %v2665_v18, %v23955_v39  ;;  %v2702_v19 = vrot.slane %v19301_v59, 2  ;;  %15623 = vmatprep.subr.bf16.mxu1 %v24041_v22  ;;  %v1033_v6 = vpop.f32.mrb[72].mxu0  ;;  %v2738_v41 = vrot.slane %v19286_v46, 3 }
 0x1fe   : > { %v2662_v56 = vsel %vm1122_vm2, %v2660_v0, %v2661_v29  ;;  %v2692_v34 = vmax.f32 %v19179_v40, %v2668_v57  ;;  %v2701_v43 = vsel %vm1162_vm3, %v2699_v20, %v2700_v58  ;;  %1059 = vst.msk [vmem:[#allocation2 + $0x1f0] sm:$0xff] %vm389_vm1, %v1033_v6  ;;  %v15619_v48 = vpop.f32.mrb[73].mxu0  ;;  %v1745_v39 = vsel %vm389_vm1, %v18529_v38, %v1683_v24  ;;  %v1726_v50 = vpop.permute.xlu0 %1725  ;;  %v17064_v38 = vld [vmem:[%s23894_s3 + $0x130] sm:$0xff]  }
 0x1ff   : > { %v2664_v25 = vsel %vm1122_vm2, %v2661_v29, %v2663_v16  ;;  %v2666_v5 = vsel %vm1122_vm2, %v2663_v16, %v2665_v18  ;;  %v2689_v55 = vmax.f32 %v19286_v46, %v2662_v56  ;;  %v1036_v52 = vpop.f32.mrb[74].mxu0  ;;  %v1782_v0 = vrot.slane %v1745_v39, 4  ;;  %v1685_v29 = vpop.permute.xlu1 %1684 }
 0x200   : > { %v2690_v57 = vmax.f32 %v19290_v51, %v2664_v25  ;;  %v2691_v20 = vmax.f32 %v19301_v59, %v2666_v5  ;;  %v2703_v44 = vsel %vm1162_vm3, %v2700_v58, %v2702_v19  ;;  %15624 = vmatpush3.bf16.msra.mxu1 %v17056_v4  ;;  %v15620_v48 = vpop.f32.mrb[75].mxu0  ;;  %v1758_v24 = vsel %vm389_vm1, %v1699_v45, %v1726_v50 }
 0x201   : > { %v19337_v6 = vld [vmem:[#allocation3 + $0x68] sm:$0xff]  ;;  %v2705_v52 = vsel %vm1162_vm3, %v2702_v19, %v2704_v15  ;;  %v24086_v56 = vrot.slane %v19184_v53, 2  ;;  %v2728_v46 = vmax.f32 %v2689_v55, %v2701_v43  ;;  %15625 = vmatprep.subr.bf16.mxu1 %v24041_v22  ;;  %v24087_v5 = vrot.slane %v19225_v28, 4 }
 0x202   : > { %v1784_v39 = vrot.slane %v1758_v24, 4  ;;  %v3511_v50 = vrot.slane %v19337_v6, 4  ;;  %v2729_v45 = vmax.f32 %v2690_v57, %v2703_v44  ;;  %v1747_v58 = vsel %vm389_vm1, %v18653_v42, %v1685_v29  ;;  %v1728_v43 = vpop.permute.xlu0 %1727 }
 0x203   : > { %v2707_v25 = vsel %vm1162_vm3, %v2704_v15, %v24086_v56  ;;  %v19347_v18 = vsel %vm1778_vm9, %v24087_v5, %v1782_v0  ;;  %3735 = vmatmul.mubr.bf16.gmra.mrb[60].mxu1 %v3504_v30  ;;  %v2730_v15 = vmax.f32 %v2691_v20, %v2705_v52  ;;  %v2739_v4 = vrot.slane %v19290_v51, 3  ;;  %v19365_v30 = vld [vmem:[#allocation3 + $0x60] sm:$0xff] }
 0x204   : > { %1825 = vst [vmem:[#allocation3 + $0x78] sm:$0xff] %v19347_v18  ;;  %v2731_v55 = vmax.f32 %v2692_v34, %v2707_v25  ;;  %v24088_v28 = vrot.slane %v19257_v2, 4  ;;  %v1788_v19 = vrot.slane %v1747_v58, 4  ;;  %v24089_v44 = vrot.slane %v19221_v36, 4  ;;  %15626 = vmatpush3.bf16.msra.mxu1 %v17064_v38  ;;  %v17065_v2 = vld [vmem:[%s23894_s3 + $0x138] sm:$0xff]  }
 0x205   : > { %v2741_v42 = vrot.slane %v19301_v59, 3  ;;  %v1761_v34 = vsel %vm389_vm1, %v19273_v63, %v1728_v43  ;;  %v2740_v51 = vsel %vm1202_vm4, %v2738_v41, %v2739_v4  ;;  %v2743_v20 = vrot.slane %v19179_v40, 3  ;;  %15627 = vmatprep.subr.bf16.mxu1 %v24041_v22 }
 0x206   : > { %v19357_v16 = vsel %vm1778_vm9, %v24088_v28, %v1784_v39  ;;  %v3512_v57 = vsel %vm1778_vm9, %v24089_v44, %v3511_v50  ;;  %v2745_v48 = vrot.slane %v19184_v53, 3  ;;  %v19378_v59 = vsel %vm1778_vm9, %v1782_v0, %v1788_v19  ;;  %v1687_v0 = vpop.permute.xlu1 %1686 }
 0x207   : > { %1826 = vst [vmem:[#allocation3 + $0x80] sm:$0xff] %v19357_v16  ;;  %3742 = vmatprep.mubr.bf16.mxu1 %v3512_v57  ;;  %v1790_v38 = vrot.slane %v1761_v34, 4  ;;  %v2742_v24 = vsel %vm1202_vm4, %v2739_v4, %v2741_v42  ;;  %v2767_v52 = vmax.f32 %v2728_v46, %v2740_v51  ;;  %1828 = vst [vmem:[#allocation3 + $0x90] sm:$0xff] %v19378_v59  ;;  %v3509_v56 = vrot.slane %v19365_v30, 4  ;;  %v19393_v46 = vld [vmem:[%s23893_s2] ss:$0 sm:$0xff] }
 0x208   : > { %v2744_v63 = vsel %vm1202_vm4, %v2741_v42, %v2743_v20  ;;  %v2746_v41 = vsel %vm1202_vm4, %v2743_v20, %v2745_v48  ;;  %v2768_v40 = vmax.f32 %v2729_v45, %v2742_v24  ;;  %15628 = vmatpush3.bf16.msra.mxu1 %v17065_v2  ;;  %v1749_v45 = vsel %vm389_vm1, %v18672_v1, %v1687_v0 }
 0x209   : > { %v19388_v25 = vsel %vm1778_vm9, %v1784_v39, %v1790_v38  ;;  %v2769_v5 = vmax.f32 %v2730_v15, %v2744_v63  ;;  %v2770_v29 = vmax.f32 %v2731_v55, %v2746_v41  ;;  %v2777_v58 = vadd.f32 %v19393_v46, %v2767_v52  ;;  %15657 = vmatprep.subr.bf16.mxu1 %v24041_v22  ;;  %v1730_v42 = vpop.permute.xlu0 %1729 }
 0x20a   : > { %1829 = vst [vmem:[#allocation3 + $0x98] sm:$0xff] %v19388_v25  ;;  %v2778_v4 = vadd.f32 %v19393_v46, %v2768_v40  ;;  %v24090_v39 = vrot.slane %v19208_v62, 4  ;;  %v2669_v55 = vrot.slane %v19190_v10, 1  ;;  %v1794_v28 = vrot.slane %v1749_v45, 4  ;;  %v1689_v63 = vpop.permute.xlu1 %1688 }
 0x20b   : > { %v2779_v43 = vadd.f32 %v19393_v46, %v2769_v5  ;;  %v2780_v44 = vadd.f32 %v19393_v46, %v2770_v29  ;;  %v2787_v57 = vmax.f32 %v2777_v58, 0.0  ;;  %v24091_v2 = vrot.slane %v19184_v53, 1 }
 0x20c   : > { %v3510_v15 = vsel %vm1778_vm9, %v24090_v39, %v3509_v56  ;;  %v2788_v1 = vmax.f32 %v2778_v4, 0.0  ;;  %v23963_v51 = vrot.slane %v19204_v47, 1  ;;  %v2708_v20 = vrot.slane %v19190_v10, 2 }
 0x20d   : > { %3743 = vmatmul.mubr.bf16.gmra.mrb[64].mxu1 %v3510_v15  ;;  %v2670_v34 = vsel %vm1122_vm2, %v24091_v2, %v2669_v55  ;;  %v19415_v24 = vsel %vm1778_vm9, %v1788_v19, %v1794_v28  ;;  %v1764_v52 = vsel %vm389_vm1, %v19297_v27, %v1730_v42  ;;  %v2789_v41 = vmax.f32 %v2779_v43, 0.0 }
 0x20e   : > { %v2790_v40 = vmax.f32 %v2780_v44, 0.0  ;;  %1831 = vst [vmem:[#allocation3 + $0xa8] sm:$0xff] %v19415_v24  ;;  %v1796_v0 = vrot.slane %v1764_v52, 4  ;;  %v24092_v5 = vpack.c.bf16 %v18697_v37, %v18697_v37  ;;  %v19424_v58 = vpack.c.bf16 %v2788_v1, %v2787_v57  ;;  %v1732_v57 = vpop.permute.xlu0 %1731 }
 0x20f   : > { %v2672_v19 = vsel %vm1122_vm2, %v2669_v55, %v23963_v51  ;;  %v2693_v27 = vmax.f32 %v19184_v53, %v2670_v34  ;;  %v24095_v2 = vrot.slane %v18712_v17, 1  ;;  %v1315_v34 = vpop.permute.xlu1 %1314 }
 0x210   : > { %v1752_v29 = vsel %vm389_vm1, %v24092_v5, %v1689_v63  ;;  %24093 = vst [vmem:[#allocation17_spill] sm:$0xff] %v19424_v58  ;;  %v19429_v4 = vpack.c.bf16 %v2790_v40, %v2789_v41  ;;  %v2694_v39 = vmax.f32 %v19190_v10, %v2672_v19  ;;  %v19434_v15 = vsel %vm1778_vm9, %v1790_v38, %v1796_v0 }
 0x211   : > { %v1800_v45 = vrot.slane %v1752_v29, 4  ;;  %v2804_v37 = vshrl.u32 %v19424_v58, 16  ;;  %v2806_v43 = vshll.u32 %v19424_v58, 16  ;;  %v2895_v44 = vrot.slane %v19424_v58, 2  ;;  %1832 = vst [vmem:[#allocation3 + $0xb0] sm:$0xff] %v19434_v15 }
 0x212   : > { %24094 = vst [vmem:[#allocation18_spill] sm:$0xff] %v19429_v4  ;;  %v2811_v42 = vshll.u32 %v19429_v4, 16  ;;  %v23964_v1 = vrot.slane %v19429_v4, 2  ;;  %v1767_v38 = vsel %vm389_vm1, %v24095_v2, %v1732_v57  ;;  %v2815_v41 = vshrl.u32 %v19429_v4, 16  ;;  %v19579_v4 = vld [vmem:[#allocation3 + $0x58] sm:$0xff] }
 0x213   : > { %v1801_v55 = vsel %vm1778_vm9, %v1794_v28, %v1800_v45  ;;  %v2808_v52 = vrot.slane %v2806_v43, 1  ;;  %v1802_v63 = vrot.slane %v1767_v38, 4  ;;  %v2866_v40 = vrot.slane %v2804_v37, 1 }
 0x214   : > { %1834 = vst [vmem:[#allocation3 + $0xc0] sm:$0xff] %v1801_v55  ;;  %v19447_v5 = vrot.slane %v2811_v42, 1  ;;  %v2897_v28 = vsel %vm1162_vm3, %v2895_v44, %v23964_v1  ;;  %v2867_v29 = vrot.slane %v2806_v43, 2  ;;  %v2870_v19 = vrot.slane %v2811_v42, 2 }
 0x215   : > { %v2809_v45 = vor.u32 %v2808_v52, %v2804_v37  ;;  %2947 = vst.msk [vmem:[#allocation3 + $0x1c0] sm:$0xff] %vm389_vm1, %v2897_v28  ;;  %v1803_v17 = vsel %vm1778_vm9, %v1796_v0, %v1802_v63  ;;  %v2869_v57 = vrot.slane %v2815_v41, 1  ;;  %v1385_v55 = vsel %vm389_vm1, %v18732_v21, %v1315_v34  ;;  %v1360_v28 = vpop.permute.xlu0 %1359 }
 0x216   : > { %1835 = vst [vmem:[#allocation3 + $0xc8] sm:$0xff] %v1803_v17  ;;  %v2868_v2 = vor.u32 %v2867_v29, %v2866_v40  ;;  %v24096_v38 = vrot.slane %v19184_v53, 2  ;;  %v23966_v43 = vrot.slane %v19204_v47, 2  ;;  %v2747_v37 = vrot.slane %v19190_v10, 3 }
 0x217   : > { %v2814_v44 = vsel %vm1274_vm5, %v2809_v45, %v19447_v5  ;;  %v19465_v0 = vor.u32 %v2870_v19, %v2869_v57  ;;  %v23965_v52 = vrot.slane %v19204_v47, 3  ;;  %v2620_v34 = vmax.f32 %v18956_v9, %v19130_v12 }
 0x218   : > { %v2709_v51 = vsel %vm1162_vm3, %v24096_v38, %v2708_v20  ;;  %2842 = vrot.lane.b32.xlu1 %v2814_v44, %s17596_s23  ;;  %v2711_v63 = vsel %vm1162_vm3, %v2708_v20, %v23966_v43  ;;  %v2748_v10 = vsel %vm1202_vm4, %v2745_v48, %v2747_v37  ;;  %v1330_v40 = vrot.slane %v18732_v21, 1  ;;  %v17069_v44 = vld [vmem:[%s23894_s3 + $0x188] sm:$0xff]  }
 0x219   : > { %v2732_v42 = vmax.f32 %v2693_v27, %v2709_v51  ;;  %v2872_v51 = vsel %vm1339_vm6, %v2868_v2, %v19465_v0  ;;  %v2733_v27 = vmax.f32 %v2694_v39, %v2711_v63  ;;  %v2750_v9 = vsel %vm1202_vm4, %v2747_v37, %v23965_v52  ;;  %v24100_v52 = vld [vmem:[#allocation13_spill] sm:$0xff] }
 0x21a   : > { %v2974_v19 = vmax.f32 %v19095_v60, %v19146_v3  ;;  %v24097_v53 = vmax.f32 %v18950_v11, %v19118_v31  ;;  %2885 = vrot.lane.b32.xlu0 %v2872_v51, %s17596_s23  ;;  %v24098_v21 = vrot.slane %v24055_v13, 1  ;;  %v3517_v39 = vrot.slane %v19357_v16, 4  ;;  %v17067_v11 = vld [vmem:[%s23894_s3 + $0x140] sm:$0xff]  }
 0x21b   : > { %v2771_v29 = vmax.f32 %v2732_v42, %v2748_v10  ;;  %v2772_v45 = vmax.f32 %v2733_v27, %v2750_v9  ;;  %v3515_v60 = vrot.slane %v19347_v18, 4  ;;  %v2097_v13 = vrot.slane %v18832_v35, 1  ;;  %v24101_v9 = vld [vmem:[#allocation8_spill] sm:$0xff] }
 0x21c   : > { %v19489_v48 = vmax.f32 %v24097_v53, %v19161_v23  ;;  %v1332_v20 = vsel %vm1122_vm2, %v1330_v40, %v24098_v21  ;;  %v3518_v2 = vsel %vm1778_vm9, %v3511_v50, %v3517_v39  ;;  %v3523_v38 = vrot.slane %v19388_v25, 4  ;;  %v24105_v53 = vld [vmem:[#allocation20_spill] sm:$0xff] }
 0x21d   : > { %v2781_v17 = vadd.f32 %v19393_v46, %v2771_v29  ;;  %v1402_v57 = vsel %vm389_vm1, %v1332_v20, %v1360_v28  ;;  %v2099_v37 = vrot.slane %v18862_v49, 1  ;;  %v2782_v42 = vadd.f32 %v19393_v46, %v2772_v45  ;;  %3750 = vmatprep.mubr.bf16.mxu1 %v3518_v2  ;;  %v3426_v2 = vld [vmem:[#allocation3 + $0xc0] sm:$0xf] }
 0x21e   : > { %4045 = vmatprep.mubr.bf16.mxu0 %v1402_v57  ;;  %v3516_v10 = vsel %vm1778_vm9, %v3509_v56, %v3515_v60  ;;  %v2101_v50 = vrot.slane %v18903_v26, 1  ;;  %v2096_v40 = vrot.slane %v18828_v33, 1  ;;  %v3524_v28 = vsel %vm1778_vm9, %v3517_v39, %v3523_v38  ;;  %v17071_v39 = vld [vmem:[%s23894_s3 + $0x190] sm:$0xff]  }
 0x21f   : > { %v2791_v63 = vmax.f32 %v2781_v17, 0.0  ;;  %4046 = vmatmul.mubr.bf16.vlgmr.msra.gmra.mrb[76].mxu0 %v1385_v55  ;;  %3751 = vmatmul.mubr.bf16.gmra.mrb[68].mxu1 %v3516_v10  ;;  %v23968_v51 = vrot.slane %v19378_v59, 4  ;;  %v23967_v27 = vrot.slane %v19434_v15, 4  ;;  %v19524_v29 = vmax.f32 %v2620_v34, %v19163_v14  ;;  %v24099_v10 = vld [vmem:[#allocation10_spill] sm:$0xff] }
 0x220   : > { %4053 = vmatprep.mubr.bf16.mxu0 %v19198_v32  ;;  %v2792_v55 = vmax.f32 %v2782_v42, 0.0  ;;  %3758 = vmatprep.mubr.bf16.mxu1 %v3524_v28  ;;  %v17070_v32 = vld [vmem:[%s23894_s3 + $0x148] sm:$0xff]   ;;  %v19534_v21 = vmax.f32 %v2974_v19, %v19181_v7  ;;  %v2817_v34 = vor.u32 %v2815_v41, %v19447_v5  ;;  %v2098_v20 = vsel %vm1122_vm2, %v2096_v40, %v2097_v13  ;;  %v19560_v42 = vld [vmem:[#allocation3 + $0x40] sm:$0xff]  ;;  %v24102_v19 = vld [vmem:[#allocation9_spill] sm:$0xff] }
 0x221   : > { %14461 = vmatpush3.bf16.msra.mxu0 %v17067_v11  ;;  %v19546_v17 = vsel %vm1122_vm2, %v2097_v13, %v2099_v37  ;;  %v19549_v57 = vsel %vm1122_vm2, %v2099_v37, %v2101_v50  ;;  %v3427_v11 = vld [vmem:[#allocation3 + $0xc8] sm:$0xf]  ;;  %v3522_v41 = vsel %vm1778_vm9, %v3515_v60, %v23968_v51  ;;  %v3530_v5 = vsel %vm1778_vm9, %v3523_v38, %v23967_v27  ;;  %v3422_v60 = vld [vmem:[#allocation3 + $0x28] sm:$0xf0]  ;;  %v17072_v38 = vld [vmem:[%s23894_s3 + $0x150] sm:$0xff]  }
 0x222   : > { %14462 = vmatprep.subr.bf16.mxu0 %v17069_v44  ;;  %v19543_v45 = vpack.c.bf16 %v2792_v55, %v2791_v63  ;;  %v2458_v44 = vrot.slane %v18988_v61, 1  ;;  %v2459_v13 = vrot.slane %v18995_v54, 1  ;;  %v3527_v28 = vrot.slane %v19415_v24, 4  ;;  %v2082_v55 = vpop.permute.xlu1 %2081  ;;  %v2125_v51 = vpop.permute.xlu0 %2124 }
 0x223   : > { %v3535_v1 = vrot.slane %v3427_v11, 4  ;;  %v2461_v43 = vrot.slane %v24100_v52, 1  ;;  %v3533_v56 = vrot.slane %v3426_v2, 4  ;;  %v2149_v40 = vsel %vm389_vm1, %v18828_v33, %v2082_v55  ;;  %v17073_v11 = vld [vmem:[%s23894_s3 + $0x198] sm:$0xff]  }
 0x224   : > { %v2819_v37 = vshll.u32 %v19543_v45, 16  ;;  %v23971_v63 = vshrl.u32 %v19543_v45, 16  ;;  %2184 = vst [vmem:[#allocation3 + $0xd8] sm:$0xff] %v2149_v40  ;;  %v24103_v2 = vrot.slane %v18936_v8, 1  ;;  %v1786_v58 = vrot.slane %v24105_v53, 4  ;;  %v17075_v40 = vld [vmem:[%s23894_s3 + $0x1a0] sm:$0xff]  }
 0x225   : > { %14463 = vmatpush3.bf16.msra.mxu0 %v17070_v32  ;;  %v24106_v53 = vrot.slane %v19378_v59, 4 }
 0x226   : > { %14464 = vmatprep.subr.bf16.mxu0 %v17071_v39  ;;  %v19572_v27 = vrot.slane %v2819_v37, 1  ;;  %v2873_v24 = vrot.slane %v23971_v63, 1  ;;  %v2874_v32 = vrot.slane %v2819_v37, 2  ;;  %v2166_v39 = vsel %vm389_vm1, %v2098_v20, %v2125_v51  ;;  %v24104_v63 = vld [vmem:[#allocation15_spill] sm:$0xff]  ;;  %v17074_v20 = vld [vmem:[%s23894_s3 + $0x158] sm:$0xff]  }
 0x227   : > { %4054 = vmatmul.mubr.bf16.gmra.mrb[80].mxu0 %v24102_v19  ;;  %3759 = vmatmul.mubr.bf16.gmra.mrb[72].mxu1 %v3522_v41  ;;  %v19588_v55 = vsel %vm1122_vm2, %v2101_v50, %v24103_v2  ;;  %v3500_v37 = vrot.slane %v3422_v60, 4  ;;  %v3501_v19 = vrot.slane %v19560_v42, 4  ;;  %2185 = vst [vmem:[#allocation3 + $0xe0] sm:$0xff] %v2166_v39  ;;  %v19598_v51 = vsel %vm1122_vm2, %v2458_v44, %v2459_v13  ;;  %v2637_v50 = vld [vmem:[#allocation2 + $0x1a0] sm:$0xff]  ;;  %v19603_v41 = vld [vmem:[#allocation3 + $0x70] sm:$0xff]  ;;  %v2084_v39 = vpop.permute.xlu1 %2083 }
 0x228   : > { %4061 = vmatprep.mubr.bf16.mxu0 %v24104_v63  ;;  %v2822_v33 = vsel %vm1274_vm5, %v2817_v34, %v19572_v27  ;;  %v19595_v52 = vor.u32 %v2874_v32, %v2873_v24  ;;  %3766 = vmatprep.mubr.bf16.mxu1 %v3530_v5  ;;  %v3528_v34 = vsel %vm1778_vm9, %v24106_v53, %v3527_v28  ;;  %v24107_v42 = vrot.slane %v19434_v15, 4  ;;  %v19617_v60 = vld [vmem:[#allocation2 + $0x1b0] sm:$0xff]  ;;  %v2638_v24 = vld [vmem:[#allocation2 + $0x1a8] sm:$0xff]  ;;  %v19633_v32 = vld [vmem:[#allocation2 + $0x1b8] sm:$0xff] }
 0x229   : > { %14465 = vmatpush3.bf16.msra.mxu0 %v17072_v38  ;;  %2844 = vrot.lane.b32.xlu1 %v2822_v33, %s17596_s23  ;;  %v3507_v44 = vrot.slane %v19579_v4, 4  ;;  %v2978_v63 = vmax.f32 %v19161_v23, %v2637_v50  ;;  %v19623_v38 = vsel %vm1122_vm2, %v2459_v13, %v2461_v43  ;;  %v19626_v15 = vsel %vm1778_vm9, %v3527_v28, %v3533_v56  ;;  %v24112_v28 = vld [vmem:[#allocation19_spill] sm:$0xff] }
 0x22a   : > { %v3536_v5 = vsel %vm1778_vm9, %v24107_v42, %v3535_v1  ;;  %v2876_v33 = vsel %vm1339_vm6, %v19465_v0, %v19595_v52  ;;  %24108 = vst [vmem:[#allocation16_spill] sm:$0xff] %v19623_v38  ;;  %v24109_v4 = vrot.slane %v24101_v9, 1  ;;  %14466 = vmatprep.subr.bf16.mxu0 %v17073_v11  ;;  %v19637_v0 = vsel %vm1778_vm9, %v3500_v37, %v3501_v19  ;;  %v17077_v11 = vld [vmem:[%s23894_s3 + $0x160] sm:$0xff]   ;;  %v2127_v42 = vpop.permute.xlu0 %2126 }
 0x22b   : > { %2887 = vrot.lane.b32.xlu0 %v2876_v33, %s17596_s23  ;;  %v19640_v13 = vmax.f32 %v19489_v48, %v2637_v50  ;;  %v2979_v56 = vmax.f32 %v19163_v14, %v2638_v24  ;;  %v2980_v2 = vmax.f32 %v19181_v7, %v19617_v60  ;;  %v24111_v48 = vmax.f32 %v19146_v3, %v19181_v7 }
 0x22c   : > { %v19631_v1 = vsel %vm1122_vm2, %v2461_v43, %v24109_v4  ;;  %v2152_v43 = vsel %vm389_vm1, %v18832_v35, %v2084_v39  ;;  %v2981_v53 = vmax.f32 %v2637_v50, %v19633_v32  ;;  %v19657_v33 = vsel %vm1778_vm9, %v3501_v19, %v3507_v44  ;;  %v17078_v4 = vld [vmem:[%s23894_s3 + $0x1a8] sm:$0xff]  }
 0x22d   : > { %24110 = vst [vmem:[#allocation10_spill] sm:$0xff] %v19631_v1  ;;  %14467 = vmatpush3.bf16.msra.mxu0 %v17074_v20  ;;  %v2991_v37 = vmax.f32 %v24111_v48, %v19617_v60  ;;  %2187 = vst [vmem:[#allocation3 + $0xf0] sm:$0xff] %v2152_v43  ;;  %v19660_v20 = vmax.f32 %v19524_v29, %v2638_v24  ;;  %v2992_v39 = vmax.f32 %v2978_v63, %v19633_v32  ;;  %v19669_v48 = vld [vmem:[#allocation2 + $0x1c0] sm:$0xff]  ;;  %v2984_v43 = vld [vmem:[#allocation2 + $0x1c8] sm:$0xff] }
 0x22e   : > { %14468 = vmatprep.subr.bf16.mxu0 %v17075_v40  ;;  %v24113_v3 = vrot.slane %v24112_v28, 4  ;;  %v2170_v19 = vsel %vm389_vm1, %v19546_v17, %v2127_v42  ;;  %v24114_v35 = vld [vmem:[#allocation12_spill] sm:$0xff]  ;;  %v24115_v29 = vmax.f32 %v19118_v31, %v19161_v23  ;;  %v24116_v9 = vmax.f32 %v19130_v12, %v19163_v14  ;;  %v24118_v12 = vld [vmem:[#allocation21_spill] sm:$0xff]  ;;  %v2611_v42 = vld [vmem:[#allocation2 + $0x180] sm:$0x7f] }
 0x22f   : > { %4062 = vmatmul.mubr.bf16.gmra.mrb[84].mxu0 %v24114_v35  ;;  %v2982_v28 = vmax.f32 %v2638_v24, %v19669_v48  ;;  %2188 = vst [vmem:[#allocation3 + $0xf8] sm:$0xff] %v2170_v19  ;;  %3767 = vmatmul.mubr.bf16.gmra.mrb[76].mxu1 %v3528_v34  ;;  %v24117_v35 = vrot.slane %v19603_v41, 4  ;;  %v2993_v23 = vmax.f32 %v2979_v56, %v19669_v48  ;;  %v24119_v14 = vrot.slane %v24118_v12, 4  ;;  %v17079_v17 = vld [vmem:[%s23894_s3 + $0x168] sm:$0xff]   ;;  %v19705_v56 = vld [vmem:[#allocation3 + $0xb8] sm:$0xff] }
 0x230   : > { %v1787_v7 = vsel %vm1778_vm9, %v24113_v3, %v1786_v58  ;;  %v2989_v40 = vmax.f32 %v24115_v29, %v2637_v50  ;;  %v2990_v63 = vmax.f32 %v24116_v9, %v2638_v24  ;;  %v2985_v3 = vld [vmem:[#allocation2 + $0x1d0] sm:$0xff]  ;;  %4069 = vmatprep.mubr.bf16.mxu0 %v19221_v36  ;;  %3774 = vmatprep.mubr.bf16.mxu1 %v3536_v5  ;;  %v2986_v5 = vld [vmem:[#allocation2 + $0x1d8] sm:$0xff]  ;;  %v2751_v19 = vrot.slane %v19640_v13, 3  ;;  %v2998_v29 = vld [vmem:[#allocation2 + $0x1e0] sm:$0xff] }
 0x231   : > { %1827 = vst.msk [vmem:[#allocation3 + $0x88] sm:$0xff] %vm389_vm1, %v1787_v7  ;;  %v19687_v31 = vsel %vm1778_vm9, %v3507_v44, %v24117_v35  ;;  %v1793_v9 = vsel %vm1778_vm9, %v1786_v58, %v24119_v14  ;;  %14469 = vmatpush3.bf16.msra.mxu0 %v17077_v11  ;;  %v2994_v50 = vmax.f32 %v2980_v2, %v2984_v43  ;;  %v2673_v44 = vrot.slane %v19640_v13, 1  ;;  %v17080_v24 = vld [vmem:[%s23894_s3 + $0x1b0] sm:$0xff]  }
 0x232   : > { %v19696_v34 = vmax.f32 %v2991_v37, %v2984_v43  ;;  %v2995_v36 = vmax.f32 %v2981_v53, %v2985_v3  ;;  %1830 = vst.msk [vmem:[#allocation3 + $0xa0] sm:$0xff] %vm389_vm1, %v1793_v9  ;;  %14470 = vmatprep.subr.bf16.mxu0 %v17078_v4  ;;  %v19703_v58 = vmax.f32 %v2992_v39, %v2985_v3  ;;  %24120 = vst [vmem:[#allocation9_spill] sm:$0xff] %v19705_v56  ;;  %v2607_v53 = vld [vmem:[#allocation2 + $0x168] sm:$0x7f]  ;;  %v17081_v9 = vld [vmem:[%s23894_s3 + $0x170] sm:$0xff]  }
 0x233   : > { %v23977_v11 = vrot.slane %v19660_v20, 1  ;;  %v2712_v2 = vrot.slane %v19640_v13, 2  ;;  %v23978_v37 = vrot.slane %v19660_v20, 2  ;;  %v2996_v7 = vmax.f32 %v2982_v28, %v2986_v5 }
 0x234   : > { %v24121_v4 = vrot.slane %v19204_v47, 1  ;;  %v23979_v39 = vrot.slane %v19660_v20, 3  ;;  %v24122_v12 = vrot.slane %v19204_v47, 2  ;;  %v19752_v56 = vmax.f32 %v2990_v63, %v19669_v48 }
 0x235   : > { %v2676_v3 = vsel %vm1122_vm2, %v2673_v44, %v23977_v11  ;;  %v2715_v28 = vsel %vm1162_vm3, %v2712_v2, %v23978_v37  ;;  %14471 = vmatpush3.bf16.msra.mxu0 %v17079_v17  ;;  %v2625_v11 = vld [vmem:[#allocation2 + $0x198] sm:$0x7f]  ;;  %v3000_v37 = vld [vmem:[#allocation2 + $0x1f0] sm:$0xff] }
 0x236   : > { %v2674_v43 = vsel %vm1122_vm2, %v24121_v4, %v2673_v44  ;;  %v2713_v14 = vsel %vm1162_vm3, %v24122_v12, %v2712_v2  ;;  %v2696_v1 = vmax.f32 %v19640_v13, %v2676_v3  ;;  %v24123_v44 = vrot.slane %v19204_v47, 3  ;;  %14472 = vmatprep.subr.bf16.mxu0 %v17080_v24  ;;  %v17082_v17 = vld [vmem:[%s23894_s3 + $0x1b8] sm:$0xff]   ;;  %v2999_v2 = vld [vmem:[#allocation2 + $0x1e8] sm:$0xff]  ;;  %v2086_v3 = vpop.permute.xlu1 %2085 }
 0x237   : > { %v2695_v35 = vmax.f32 %v19204_v47, %v2674_v43  ;;  %v2754_v12 = vsel %vm1202_vm4, %v2751_v19, %v23979_v39  ;;  %v2621_v4 = vmax.f32 %v2607_v53, %v2611_v42  ;;  %v19741_v13 = vmax.f32 %v19534_v21, %v19617_v60  ;;  %4070 = vmatmul.mubr.bf16.gmra.mrb[88].mxu0 %v19208_v62  ;;  %v2639_v39 = vld [vmem:[#allocation2 + $0x1b0] sm:$0x7f] }
 0x238   : > { %v2752_v43 = vsel %vm1202_vm4, %v24123_v44, %v2751_v19  ;;  %v19744_v47 = vmax.f32 %v2989_v40, %v19633_v32  ;;  %v19747_v19 = vmax.f32 %v2993_v23, %v2986_v5  ;;  %v19749_v24 = vmax.f32 %v2994_v50, %v2998_v29  ;;  %3775 = vmatmul.mubr.bf16.gmra.mrb[80].mxu1 %v19626_v15  ;;  %v19758_v21 = vld [vmem:[#allocation3 + $0x88] sm:$0xff]  ;;  %v2129_v40 = vpop.permute.xlu0 %2128  ;;  %v17086_v5 = vld [vmem:[%s23894_s3 + $0x220] sm:$0xff]  }
 0x239   : > { %v2734_v38 = vmax.f32 %v2695_v35, %v2713_v14  ;;  %v2735_v44 = vmax.f32 %v2696_v1, %v2715_v28  ;;  %v2155_v53 = vsel %vm389_vm1, %v18862_v49, %v2086_v3  ;;  %4077 = vmatprep.mubr.bf16.mxu0 %v19337_v6  ;;  %v2635_v62 = vmax.f32 %v2621_v4, %v2625_v11  ;;  %v17083_v49 = vld [vmem:[%s23894_s3 + $0x178] sm:$0xff]   ;;  %v17068_v28 = vld [vmem:[%s23894_s3 + $0x80] sm:$0xff]  }
 0x23a   : > { %v3022_v32 = vrot.slane %v19741_v13, 1  ;;  %2190 = vst [vmem:[#allocation3 + $0x108] sm:$0xff] %v2155_v53  ;;  %15629 = vmatprep.mubr.msk.bf16.mxu1 %vm17595_vm0, %v24041_v22  ;;  %14473 = vmatpush3.bf16.msra.mxu0 %v17081_v9  ;;  %v19766_v1 = vmax.f32 %v2995_v36, %v2999_v2  ;;  %v19768_v15 = vmax.f32 %v2996_v7, %v3000_v37  ;;  %v3025_v11 = vrot.slane %v19752_v56, 1 }
 0x23b   : > { %v2773_v60 = vmax.f32 %v2734_v38, %v2752_v43  ;;  %v2774_v48 = vmax.f32 %v2735_v44, %v2754_v12  ;;  %v3023_v38 = vrot.slane %v19744_v47, 1  ;;  %v2174_v63 = vsel %vm389_vm1, %v19549_v57, %v2129_v40  ;;  %14474 = vmatprep.subr.bf16.mxu0 %v17082_v17 }
 0x23c   : > { %v2649_v50 = vmax.f32 %v2635_v62, %v2639_v39  ;;  %2191 = vst [vmem:[#allocation3 + $0x110] sm:$0xff] %v2174_v63  ;;  %v3519_v36 = vrot.slane %v19758_v21, 4  ;;  %v24124_v42 = vshrl.u32 %v19543_v45, 16  ;;  %v3027_v43 = vrot.slane %v19696_v34, 1 }
 0x23d   : > { %v2783_v23 = vadd.f32 %v19393_v46, %v2773_v60  ;;  %v2784_v37 = vadd.f32 %v19393_v46, %v2774_v48  ;;  %v19784_v57 = vsel %vm1122_vm2, %v3022_v32, %v3023_v38  ;;  %v19790_v4 = vsel %vm1122_vm2, %v3023_v38, %v3025_v11  ;;  %v2088_v48 = vpop.permute.xlu1 %2087 }
 0x23e   : > { %v2825_v7 = vor.u32 %v24124_v42, %v19572_v27  ;;  %v2677_v39 = vrot.slane %v2649_v50, 1  ;;  %v2716_v35 = vrot.slane %v2649_v50, 2  ;;  %v2755_v14 = vrot.slane %v2649_v50, 3  ;;  %14475 = vmatpush3.bf16.msra.mxu0 %v17083_v49 }
 0x23f   : > { %v2793_v29 = vmax.f32 %v2783_v23, 0.0  ;;  %v2794_v9 = vmax.f32 %v2784_v37, 0.0  ;;  %v3029_v27 = vrot.slane %v19703_v58, 1  ;;  %v24125_v12 = vrot.slane %v19660_v20, 1  ;;  %14529 = vmatprep.subr.bf16.mxu0 %v17086_v5  ;;  %4078 = vmatmul.mubr.bf16.gmra.mrb[92].mxu0 %v19365_v30 }
 0x240   : > { %v2698_v2 = vmax.f32 %v2649_v50, %v2677_v39  ;;  %v24126_v3 = vrot.slane %v19660_v20, 2  ;;  %v24127_v53 = vrot.slane %v19660_v20, 3  ;;  %v3028_v40 = vsel %vm1122_vm2, %v3025_v11, %v3027_v43  ;;  %15630 = vmatmul.mubr.msk.bf16.vlgmr.msra.gmra.mrb[84].mxu1 %vm389_vm1, %v19637_v0  ;;  %4085 = vmatprep.mubr.bf16.mxu0 %v19357_v16  ;;  %v17076_v16 = vld [vmem:[%s23894_s3 + $0x88] sm:$0xff]   ;;  %v2131_v11 = vpop.permute.xlu0 %2130 }
 0x241   : > { %v2678_v17 = vsel %vm1122_vm2, %v24125_v12, %v2677_v39  ;;  %v19804_v62 = vpack.c.bf16 %v2794_v9, %v2793_v29  ;;  %v19811_v49 = vsel %vm1122_vm2, %v3027_v43, %v3029_v27  ;;  %v3051_v30 = vmax.f32 %v19741_v13, %v19784_v57  ;;  %15658 = vmatpush3.bf16.msra.mxu1 %v17068_v28 }
 0x242   : > { %v2717_v44 = vsel %vm1162_vm3, %v24126_v3, %v2716_v35  ;;  %v2756_v60 = vsel %vm1202_vm4, %v24127_v53, %v2755_v14  ;;  %v2697_v32 = vmax.f32 %v19660_v20, %v2678_v17  ;;  %v2737_v38 = vmax.f32 %v2698_v2, %v2716_v35  ;;  %15633 = vmatprep.mubr.msk.bf16.mxu1 %vm17595_vm0, %v24041_v22 }
 0x243   : > { %v3052_v20 = vmax.f32 %v19744_v47, %v19790_v4  ;;  %v3061_v63 = vrot.slane %v19741_v13, 2  ;;  %v2158_v23 = vsel %vm389_vm1, %v18903_v26, %v2088_v48  ;;  %v2827_v0 = vshll.u32 %v19804_v62, 16  ;;  %15659 = vmatprep.subr.bf16.mxu1 %v24041_v22 }
 0x244   : > { %v2831_v50 = vshrl.u32 %v19804_v62, 16  ;;  %v2736_v5 = vmax.f32 %v2697_v32, %v2717_v44  ;;  %2193 = vst [vmem:[#allocation3 + $0x120] sm:$0xff] %v2158_v23  ;;  %v2776_v37 = vmax.f32 %v2737_v38, %v2755_v14  ;;  %v2900_v26 = vrot.slane %v19804_v62, 2 }
 0x245   : > { %v3053_v42 = vmax.f32 %v19752_v56, %v3028_v40  ;;  %v3054_v57 = vmax.f32 %v19696_v34, %v19811_v49  ;;  %v2178_v29 = vsel %vm389_vm1, %v19588_v55, %v2131_v11  ;;  %v2829_v39 = vrot.slane %v2827_v0, 1  ;;  %15660 = vmatpush3.bf16.msra.mxu1 %v17076_v16  ;;  %v17084_v55 = vld [vmem:[%s23894_s3 + $0x90] sm:$0xff]  }
 0x246   : > { %v2877_v35 = vrot.slane %v2831_v50, 1  ;;  %v2878_v28 = vrot.slane %v2827_v0, 2  ;;  %2194 = vst [vmem:[#allocation3 + $0x128] sm:$0xff] %v2178_v29  ;;  %v2775_v9 = vmax.f32 %v2736_v5, %v2756_v60  ;;  %v2786_v4 = vadd.f32 %v19393_v46, %v2776_v37  ;;  %15661 = vmatprep.subr.bf16.mxu1 %v24041_v22 }
 0x247   : > { %v24128_v14 = vrot.slane %v19543_v45, 2  ;;  %v3062_v12 = vrot.slane %v19744_v47, 2  ;;  %v2830_v17 = vsel %vm1274_vm5, %v2825_v7, %v2829_v39  ;;  %v19850_v3 = vor.u32 %v2831_v50, %v2829_v39  ;;  %4086 = vmatmul.mubr.bf16.gmra.mrb[96].mxu0 %v19347_v18 }
 0x248   : > { %v19848_v2 = vor.u32 %v2878_v28, %v2877_v35  ;;  %v3064_v44 = vrot.slane %v19752_v56, 2  ;;  %2846 = vrot.lane.b32.xlu1 %v2830_v17, %s17596_s23  ;;  %v2785_v53 = vadd.f32 %v19393_v46, %v2775_v9  ;;  %v2796_v60 = vmax.f32 %v2786_v4, 0.0  ;;  %15634 = vmatmul.mubr.msk.bf16.gmra.mrb[88].mxu1 %vm389_vm1, %v19657_v33  ;;  %v2444_v35 = vpop.permute.xlu1 %2443 }
 0x249   : > { %v2901_v43 = vsel %vm1162_vm3, %v24128_v14, %v2900_v26  ;;  %v3063_v32 = vsel %vm1162_vm3, %v3061_v63, %v3062_v12  ;;  %v3066_v40 = vrot.slane %v19696_v34, 2  ;;  %v3068_v48 = vrot.slane %v19703_v58, 2  ;;  %4093 = vmatprep.mubr.bf16.mxu0 %v19388_v25  ;;  %15637 = vmatprep.mubr.msk.bf16.mxu1 %vm17595_vm0, %v24041_v22 }
 0x24a   : > { %2953 = vst.msk [vmem:[#allocation3 + $0x1f0] sm:$0xff] %vm389_vm1, %v2901_v43  ;;  %v2880_v7 = vsel %vm1339_vm6, %v19595_v52, %v19848_v2  ;;  %v3065_v49 = vsel %vm1162_vm3, %v3062_v12, %v3064_v44  ;;  %v3090_v38 = vmax.f32 %v3051_v30, %v3063_v32  ;;  %v19868_v23 = vmax.f32 %v2785_v53, 0.0  ;;  %15662 = vmatpush3.bf16.msra.mxu1 %v17084_v55  ;;  %v17085_v52 = vld [vmem:[%s23894_s3 + $0x98] sm:$0xff]   ;;  %v2487_v43 = vpop.permute.xlu0 %2486 }
 0x24b   : > { %v3067_v63 = vsel %vm1162_vm3, %v3064_v44, %v3066_v40  ;;  %v3091_v16 = vmax.f32 %v3052_v20, %v3065_v49  ;;  %v3100_v18 = vrot.slane %v19741_v13, 3  ;;  %v3069_v33 = vsel %vm1162_vm3, %v3066_v40, %v3068_v48  ;;  %15663 = vmatprep.subr.bf16.mxu1 %v24041_v22  ;;  %2889 = vrot.lane.b32.xlu0 %v2880_v7, %s17596_s23 }
 0x24c   : > { %v3092_v25 = vmax.f32 %v3053_v42, %v3067_v63  ;;  %v3101_v30 = vrot.slane %v19744_v47, 3  ;;  %v3103_v0 = vrot.slane %v19752_v56, 3  ;;  %v19885_v13 = vpack.c.bf16 %v2796_v60, %v19868_v23 }
 0x24d   : > { %v3093_v20 = vmax.f32 %v3054_v57, %v3069_v33  ;;  %v3105_v50 = vrot.slane %v19696_v34, 3  ;;  %v3107_v5 = vrot.slane %v19703_v58, 3  ;;  %v3031_v47 = vrot.slane %v19747_v19, 1 }
 0x24e   : > { %v3102_v11 = vsel %vm1202_vm4, %v3100_v18, %v3101_v30  ;;  %v3104_v37 = vsel %vm1202_vm4, %v3101_v30, %v3103_v0  ;;  %v3033_v56 = vrot.slane %v19749_v24, 1  ;;  %v2835_v42 = vshll.u32 %v19885_v13, 16  ;;  %15664 = vmatpush3.bf16.msra.mxu1 %v17085_v52  ;;  %v2133_v18 = vpop.permute.xlu0 %2132 }
 0x24f   : > { %v2902_v29 = vrot.slane %v19885_v13, 2  ;;  %v2839_v39 = vshrl.u32 %v19885_v13, 16  ;;  %v3106_v57 = vsel %vm1202_vm4, %v3103_v0, %v3105_v50  ;;  %v3108_v34 = vsel %vm1202_vm4, %v3105_v50, %v3107_v5  ;;  %15693 = vmatprep.subr.bf16.mxu1 %v24041_v22  ;;  %4094 = vmatmul.mubr.bf16.gmra.mrb[100].mxu0 %v19378_v59  ;;  %v2090_v59 = vpop.permute.xlu1 %2089 }
 0x250   : > { %v3129_v28 = vmax.f32 %v3090_v38, %v3102_v11  ;;  %v3130_v9 = vmax.f32 %v3091_v16, %v3104_v37  ;;  %v3131_v4 = vmax.f32 %v3092_v25, %v3106_v57  ;;  %v19902_v14 = vsel %vm389_vm1, %v18988_v61, %v2444_v35  ;;  %v4192_v61 = vld [vmem:[#allocation3 + $0x50] sm:$0xff]  ;;  %15638 = vmatmul.mubr.msk.bf16.gmra.mrb[92].mxu1 %vm389_vm1, %v19687_v31 }
 0x251   : > { %v2837_v12 = vrot.slane %v2835_v42, 1  ;;  %v2903_v55 = vsel %vm1162_vm3, %v2900_v26, %v2902_v29  ;;  %2959 = vst.msk [vmem:[#allocation3 + $0x220] sm:$0xf] %vm1434_vm7, %v2902_v29  ;;  %v2881_v17 = vrot.slane %v2839_v39, 1  ;;  %v2541_v44 = vrot.slane %v19902_v14, 4  ;;  %4426 = vmatprep.mubr.bf16.mxu0 %v4192_v61  ;;  %15641 = vmatprep.mubr.msk.bf16.mxu1 %vm17595_vm0, %v24041_v22 }
 0x252   : > { %v19912_v53 = vsel %vm389_vm1, %v19598_v51, %v2487_v43  ;;  %2956 = vst.msk [vmem:[#allocation3 + $0x208] sm:$0xff] %vm389_vm1, %v2903_v55  ;;  %v2882_v60 = vrot.slane %v2835_v42, 2  ;;  %v3132_v32 = vmax.f32 %v3093_v20, %v3108_v34  ;;  %v3139_v51 = vadd.f32 %v19393_v46, %v3129_v28  ;;  %v19943_v20 = vld [vmem:[#allocation3 + $0xa0] sm:$0xff]  ;;  %v4191_v34 = vld [vmem:[#allocation3 + $0x48] sm:$0xff] }
 0x253   : > { %v2542_v26 = vrot.slane %v19912_v53, 4  ;;  %v2838_v40 = vsel %vm1274_vm5, %v19850_v3, %v2837_v12  ;;  %v2841_v7 = vor.u32 %v2839_v39, %v2837_v12  ;;  %2583 = vst [vmem:[#allocation3 + $0x138] sm:$0xf0] %v2541_v44  ;;  %v3140_v38 = vadd.f32 %v19393_v46, %v3130_v9  ;;  %v17089_v9 = vld [vmem:[%s23894_s3 + $0x228] sm:$0xff]  }
 0x254   : > { %2848 = vrot.lane.b32.xlu1 %v2838_v40, %s17596_s23  ;;  %v2883_v49 = vor.u32 %v2882_v60, %v2881_v17  ;;  %v3141_v31 = vadd.f32 %v19393_v46, %v3131_v4  ;;  %v3070_v63 = vrot.slane %v19747_v19, 2  ;;  %v24129_v3 = vpack.c.bf16 %v24099_v10, %v24099_v10  ;;  %v17090_v40 = vld [vmem:[%s23894_s3 + $0x1e8] sm:$0xff]  }
 0x255   : > { %2584 = vst [vmem:[#allocation3 + $0x140] sm:$0xf0] %v2542_v26  ;;  %v3142_v52 = vadd.f32 %v19393_v46, %v3132_v32  ;;  %v3149_v33 = vmax.f32 %v3139_v51, 0.0  ;;  %v3032_v25 = vsel %vm1122_vm2, %v3029_v27, %v3031_v47  ;;  %v24130_v30 = vrot.slane %v18936_v8, 1 }
 0x256   : > { %v2162_v16 = vsel %vm389_vm1, %v24129_v3, %v2090_v59  ;;  %v2884_v10 = vsel %vm1339_vm6, %v19848_v2, %v2883_v49  ;;  %v3150_v50 = vmax.f32 %v3140_v38, 0.0  ;;  %v3151_v11 = vmax.f32 %v3141_v31, 0.0  ;;  %v17087_v2 = vld [vmem:[%s23894_s3 + $0x1e0] sm:$0xff]   ;;  %v17091_v31 = vld [vmem:[%s23894_s3 + $0x230] sm:$0xff]  }
 0x257   : > { %2196 = vst [vmem:[#allocation3 + $0x138] sm:$0xf] %v2162_v16  ;;  %v2182_v0 = vsel %vm389_vm1, %v24130_v30, %v2133_v18  ;;  %2891 = vrot.lane.b32.xlu0 %v2884_v10, %s17596_s23  ;;  %v3152_v37 = vmax.f32 %v3142_v52, 0.0  ;;  %v3034_v27 = vsel %vm1122_vm2, %v3031_v47, %v3033_v56  ;;  %v3055_v42 = vmax.f32 %v19703_v58, %v3032_v25  ;;  %v2446_v18 = vpop.permute.xlu1 %2445 }
 0x258   : > { %2197 = vst [vmem:[#allocation3 + $0x140] sm:$0xf] %v2182_v0  ;;  %v3071_v8 = vsel %vm1162_vm3, %v3068_v48, %v3070_v63  ;;  %2850 = vrot.lane.b32.xlu1 %v2841_v7, %s17596_s23  ;;  %v19959_v29 = vpack.c.bf16 %v3150_v50, %v3149_v33  ;;  %v3056_v39 = vmax.f32 %v19747_v19, %v3034_v27  ;;  %v3072_v57 = vrot.slane %v19749_v24, 2 }
 0x259   : > { %v3109_v47 = vrot.slane %v19747_v19, 3  ;;  %v24131_v35 = vrot.slane %v19603_v41, 4  ;;  %v3525_v28 = vrot.slane %v19943_v20, 4  ;;  %v19973_v4 = vpack.c.bf16 %v3152_v37, %v3151_v11  ;;  %4427 = vmatmul.mubr.bf16.vlgmr.msra.gmra.mrb[104].mxu0 %v4191_v34  ;;  %v2489_v50 = vpop.permute.xlu0 %2488 }
 0x25a   : > { %v3111_v43 = vrot.slane %v19749_v24, 3  ;;  %v3166_v19 = vshrl.u32 %v19959_v29, 16  ;;  %v3168_v12 = vshll.u32 %v19959_v29, 16  ;;  %v3073_v41 = vsel %vm1162_vm3, %v3070_v63, %v3072_v57  ;;  %4434 = vmatprep.mubr.bf16.mxu0 %v19337_v6  ;;  %14530 = vmatpush3.bf16.msra.mxu0 %v17087_v2 }
 0x25b   : > { %v3520_v48 = vsel %vm1778_vm9, %v24131_v35, %v3519_v36  ;;  %v3094_v55 = vmax.f32 %v3055_v42, %v3071_v8  ;;  %v3173_v17 = vshll.u32 %v19973_v4, 16  ;;  %v3177_v61 = vshrl.u32 %v19973_v4, 16  ;;  %14531 = vmatprep.subr.bf16.mxu0 %v17089_v9  ;;  %2893 = vrot.lane.b32.xlu0 %v2883_v49, %s17596_s23  ;;  %v17093_v8 = vld [vmem:[%s23894_s3 + $0x238] sm:$0xff]   ;;  %v17561_v35 = vld [vmem:[#allocation3 + $0x60] sm:$0xff] }
 0x25c   : > { %15642 = vmatmul.mubr.msk.bf16.gmra.mrb[96].mxu1 %vm389_vm1, %v3520_v48  ;;  %v3095_v60 = vmax.f32 %v3056_v39, %v3073_v41  ;;  %v3035_v32 = vrot.slane %v19766_v1, 1  ;;  %v3170_v7 = vrot.slane %v3168_v12, 1  ;;  %v3228_v51 = vrot.slane %v3166_v19, 1  ;;  %v20034_v48 = vld [vmem:[#allocation3 + $0x80] sm:$0xff] }
 0x25d   : > { %15645 = vmatprep.mubr.msk.bf16.mxu1 %vm17595_vm0, %v24041_v22  ;;  %v3229_v59 = vrot.slane %v3168_v12, 2  ;;  %v3110_v6 = vsel %vm1202_vm4, %v3107_v5, %v3109_v47  ;;  %v3175_v38 = vrot.slane %v3173_v17, 1  ;;  %v3231_v63 = vrot.slane %v3177_v61, 1 }
 0x25e   : > { %v3232_v3 = vrot.slane %v3173_v17, 2  ;;  %v3112_v16 = vsel %vm1202_vm4, %v3109_v47, %v3111_v43  ;;  %v3171_v58 = vor.u32 %v3170_v7, %v3166_v19  ;;  %v3133_v5 = vmax.f32 %v3094_v55, %v3110_v6  ;;  %14532 = vmatpush3.bf16.msra.mxu0 %v17090_v40  ;;  %v2448_v19 = vpop.permute.xlu1 %2447  ;;  %v24133_v17 = vld [vmem:[#allocation13_spill] sm:$0xff] }
 0x25f   : > { %v3230_v52 = vor.u32 %v3229_v59, %v3228_v51  ;;  %v3134_v33 = vmax.f32 %v3095_v60, %v3112_v16  ;;  %v2508_v49 = vsel %vm389_vm1, %v18995_v54, %v2446_v18  ;;  %v3526_v25 = vsel %vm1778_vm9, %v3519_v36, %v3525_v28  ;;  %v17092_v54 = vld [vmem:[%s23894_s3 + $0x1f0] sm:$0xff]   ;;  %14533 = vmatprep.subr.bf16.mxu0 %v17091_v31  ;;  %v17095_v51 = vld [vmem:[%s23894_s3 + $0x240] sm:$0xff]  }
 0x260   : > { %v20010_v30 = vor.u32 %v3232_v3, %v3231_v63  ;;  %v3036_v0 = vsel %vm1122_vm2, %v3033_v56, %v3035_v32  ;;  %v2544_v10 = vrot.slane %v2508_v49, 4  ;;  %v3176_v11 = vsel %vm1274_vm5, %v3171_v58, %v3175_v38  ;;  %v24132_v36 = vld [vmem:[#allocation16_spill] sm:$0xff]  ;;  %v24134_v63 = vld [vmem:[#allocation10_spill] sm:$0xff] }
 0x261   : > { %v3143_v37 = vadd.f32 %v19393_v46, %v3133_v5  ;;  %v3144_v27 = vadd.f32 %v19393_v46, %v3134_v33  ;;  %v2521_v42 = vsel %vm389_vm1, %v24132_v36, %v2489_v50  ;;  %3204 = vrot.lane.b32.xlu1 %v3176_v11, %s17596_s23  ;;  %v3037_v2 = vrot.slane %v19768_v15, 1  ;;  %4435 = vmatmul.mubr.bf16.gmra.mrb[108].mxu0 %v17561_v35  ;;  %v24135_v33 = vld [vmem:[#allocation24_spill] sm:$0xff]  ;;  %v20123_v35 = vld [vmem:[%s23893_s2] ss:$0 sm:$0xff] }
 0x262   : > { %v3234_v56 = vsel %vm1339_vm6, %v3230_v52, %v20010_v30  ;;  %v3057_v39 = vmax.f32 %v19749_v24, %v3036_v0  ;;  %v2545_v46 = vsel %vm1778_vm9, %v2541_v44, %v2544_v10  ;;  %v2546_v47 = vrot.slane %v2521_v42, 4  ;;  %4442 = vmatprep.mubr.bf16.mxu0 %v20034_v48  ;;  %14534 = vmatpush3.bf16.msra.mxu0 %v17092_v54  ;;  %v20092_v54 = vld [vmem:[#allocation3 + $0x78] sm:$0xff]  ;;  %v17098_v24 = vld [vmem:[%s23894_s3 + $0x248] sm:$0xff]  }
 0x263   : > { %3247 = vrot.lane.b32.xlu0 %v3234_v56, %s17596_s23  ;;  %v3153_v34 = vmax.f32 %v3143_v37, 0.0  ;;  %v3154_v9 = vmax.f32 %v3144_v27, 0.0  ;;  %2586 = vst [vmem:[#allocation3 + $0x150] sm:$0xff] %v2545_v46  ;;  %v3038_v14 = vsel %vm1122_vm2, %v3035_v32, %v3037_v2  ;;  %v3074_v44 = vrot.slane %v19766_v1, 2  ;;  %v17094_v32 = vld [vmem:[%s23894_s3 + $0x1f8] sm:$0xff]   ;;  %14535 = vmatprep.subr.bf16.mxu0 %v17093_v8  ;;  %v17097_v37 = vld [vmem:[%s23894_s3 + $0x200] sm:$0xff]  }
 0x264   : > { %15646 = vmatmul.mubr.msk.bf16.gmra.mrb[100].mxu1 %vm389_vm1, %v3526_v25  ;;  %v3076_v12 = vrot.slane %v19768_v15, 2  ;;  %v3113_v41 = vrot.slane %v19766_v1, 3  ;;  %v2547_v55 = vsel %vm1778_vm9, %v2542_v26, %v2546_v47  ;;  %v20050_v60 = vsel %vm389_vm1, %v24133_v17, %v2448_v19  ;;  %v2491_v26 = vpop.permute.xlu0 %2490  ;;  %v20104_v42 = vld [vmem:[#allocation3 + $0x98] sm:$0xff]  ;;  %v24138_v19 = vld [vmem:[#allocation8_spill] sm:$0xff] }
 0x265   : > { %15649 = vmatprep.mubr.msk.bf16.mxu1 %vm17595_vm0, %v24041_v22  ;;  %v20057_v40 = vpack.c.bf16 %v3154_v9, %v3153_v34  ;;  %v3115_v7 = vrot.slane %v19768_v15, 3  ;;  %2587 = vst [vmem:[#allocation3 + $0x158] sm:$0xff] %v2547_v55  ;;  %v2550_v53 = vrot.slane %v20050_v60, 4  ;;  %v3058_v59 = vmax.f32 %v19766_v1, %v3038_v14  ;;  %v24140_v55 = vld [vmem:[#allocation23_spill] sm:$0xff] }
 0x266   : > { %v3075_v6 = vsel %vm1162_vm3, %v3072_v57, %v3074_v44  ;;  %v3077_v31 = vsel %vm1162_vm3, %v3074_v44, %v3076_v12  ;;  %v20073_v3 = vsel %vm389_vm1, %v24134_v63, %v2491_v26  ;;  %v3179_v16 = vor.u32 %v3177_v61, %v3175_v38  ;;  %14536 = vmatpush3.bf16.msra.mxu0 %v17094_v32  ;;  %v24136_v38 = vld [vmem:[#allocation9_spill] sm:$0xff]  ;;  %v17099_v60 = vld [vmem:[%s23894_s3 + $0x208] sm:$0xff]  }
 0x267   : > { %v3181_v18 = vshll.u32 %v20057_v40, 16  ;;  %v3185_v58 = vshrl.u32 %v20057_v40, 16  ;;  %v2551_v1 = vsel %vm1778_vm9, %v2544_v10, %v2550_v53  ;;  %v2552_v52 = vrot.slane %v20073_v3, 4  ;;  %14537 = vmatprep.subr.bf16.mxu0 %v17095_v51 }
 0x268   : > { %v3096_v57 = vmax.f32 %v3057_v39, %v3075_v6  ;;  %v3097_v5 = vmax.f32 %v3058_v59, %v3077_v31  ;;  %2589 = vst [vmem:[#allocation3 + $0x168] sm:$0xff] %v2551_v1  ;;  %v2465_v49 = vrot.slane %v24135_v33, 1  ;;  %v24137_v11 = vrot.slane %v24136_v38, 4  ;;  %v17100_v59 = vld [vmem:[%s23894_s3 + $0x250] sm:$0xff]   ;;  %v2493_v6 = vpop.permute.xlu0 %2492  ;;  %v2973_v1 = vld [vmem:[#allocation2 + $0x1c8] sm:$0x7f] }
 0x269   : > { %v3183_v25 = vrot.slane %v3181_v18, 1  ;;  %v3235_v0 = vrot.slane %v3185_v58, 1  ;;  %v3236_v50 = vrot.slane %v3181_v18, 2  ;;  %v2553_v61 = vsel %vm1778_vm9, %v2546_v47, %v2552_v52  ;;  %4443 = vmatmul.mubr.bf16.gmra.mrb[112].mxu0 %v20092_v54 }
 0x26a   : > { %v3532_v10 = vsel %vm1778_vm9, %v3525_v28, %v24137_v11  ;;  %v3114_v27 = vsel %vm1202_vm4, %v3111_v43, %v3113_v41  ;;  %v3116_v36 = vsel %vm1202_vm4, %v3113_v41, %v3115_v7  ;;  %2590 = vst [vmem:[#allocation3 + $0x170] sm:$0xff] %v2553_v61  ;;  %v3428_v28 = vld [vmem:[#allocation3 + $0xd0] sm:$0xf]  ;;  %4450 = vmatprep.mubr.bf16.mxu0 %v20104_v42  ;;  %v2450_v43 = vpop.permute.xlu1 %2449  ;;  %v24139_v44 = vrot.slane %v24138_v19, 1 }
 0x26b   : > { %v3184_v56 = vsel %vm1274_vm5, %v3179_v16, %v3183_v25  ;;  %v20107_v8 = vor.u32 %v3236_v50, %v3235_v0  ;;  %v3135_v39 = vmax.f32 %v3096_v57, %v3114_v27  ;;  %v3136_v46 = vmax.f32 %v3097_v5, %v3116_v36  ;;  %14538 = vmatpush3.bf16.msra.mxu0 %v17097_v37  ;;  %v2969_v16 = vld [vmem:[#allocation2 + $0x1b0] sm:$0x7f] }
 0x26c   : > { %15650 = vmatmul.mubr.msk.bf16.gmra.mrb[104].mxu1 %vm389_vm1, %v3532_v10  ;;  %3206 = vrot.lane.b32.xlu1 %v3184_v56, %s17596_s23  ;;  %v2512_v14 = vsel %vm389_vm1, %v24138_v19, %v2450_v43  ;;  %v2466_v41 = vsel %vm1122_vm2, %v24139_v44, %v2465_v49  ;;  %v3537_v17 = vrot.slane %v3428_v28, 4  ;;  %v24141_v50 = vmov %v24137_v11  ;;  %v20151_v11 = vld [vmem:[#allocation3 + $0x90] sm:$0xff]  ;;  %v17102_v28 = vld [vmem:[%s23894_s3 + $0x258] sm:$0xff]   ;;  %v2987_v56 = vld [vmem:[#allocation2 + $0x1e0] sm:$0x7f] }
 0x26d   : > { %15653 = vmatprep.mubr.msk.bf16.mxu1 %vm17595_vm0, %v24041_v22  ;;  %v3238_v47 = vsel %vm1339_vm6, %v20010_v30, %v20107_v8  ;;  %v3145_v34 = vadd.f32 %v20123_v35, %v3135_v39  ;;  %v3146_v9 = vadd.f32 %v20123_v35, %v3136_v46  ;;  %v2402_v30 = vpack.c.bf16 %v24140_v55, %v24140_v55  ;;  %v20153_v10 = vld [vmem:[#allocation3 + $0xb0] sm:$0xff]  ;;  %v2495_v46 = vpop.permute.xlu0 %2494  ;;  %v20193_v55 = vld [vmem:[#allocation3 + $0xa8] sm:$0xff] }
 0x26e   : > { %3249 = vrot.lane.b32.xlu0 %v3238_v47, %s17596_s23  ;;  %v2556_v32 = vrot.slane %v2512_v14, 4  ;;  %14539 = vmatprep.subr.bf16.mxu0 %v17098_v24  ;;  %v2527_v63 = vsel %vm389_vm1, %v2466_v41, %v2493_v6  ;;  %v2452_v18 = vpop.permute.xlu1 %2451  ;;  %v3538_v61 = vsel %vm1778_vm9, %v24141_v50, %v3537_v17  ;;  %v3187_v27 = vor.u32 %v3185_v58, %v3183_v25  ;;  %v17088_v41 = vld [vmem:[%s23894_s3 + $0x1c0] sm:$0xff]  }
 0x26f   : > { %v3155_v26 = vmax.f32 %v3145_v34, 0.0  ;;  %v3156_v51 = vmax.f32 %v3146_v9, 0.0  ;;  %v2558_v5 = vrot.slane %v2527_v63, 4  ;;  %v2515_v0 = vsel %vm389_vm1, %v2402_v30, %v2452_v18  ;;  %14540 = vmatpush3.bf16.msra.mxu0 %v17099_v60  ;;  %v17103_v9 = vld [vmem:[%s23894_s3 + $0x218] sm:$0xff]   ;;  %v17096_v18 = vld [vmem:[%s23894_s3 + $0x1c8] sm:$0xff]  }
 0x270   : > { %v2557_v31 = vsel %vm1778_vm9, %v2550_v53, %v2556_v32  ;;  %v17101_v53 = vld [vmem:[%s23894_s3 + $0x210] sm:$0xff]   ;;  %v2562_v37 = vrot.slane %v2515_v0, 4  ;;  %14541 = vmatprep.subr.bf16.mxu0 %v17100_v59  ;;  %v2983_v58 = vmax.f32 %v2969_v16, %v2973_v1  ;;  %v2530_v24 = vsel %vm389_vm1, %v2465_v49, %v2495_v46  ;;  %v20202_v59 = vld [vmem:[#allocation3 + $0xc8] sm:$0xff]  ;;  %v24142_v63 = vld [vmem:[#allocation6_spill] sm:$0xff] }
 0x271   : > { %v20145_v57 = vpack.c.bf16 %v3156_v51, %v3155_v26  ;;  %2592 = vst [vmem:[#allocation3 + $0x180] sm:$0xff] %v2557_v31  ;;  %4451 = vmatmul.mubr.bf16.gmra.mrb[116].mxu0 %v20151_v11  ;;  %v2559_v39 = vsel %vm1778_vm9, %v2552_v52, %v2558_v5  ;;  %v3001_v52 = vld [vmem:[#allocation2 + $0x1f8] sm:$0x7f]  ;;  %v2564_v47 = vrot.slane %v2530_v24, 4  ;;  %v17106_v26 = vld [vmem:[%s23894_s3 + $0x2c0] sm:$0xff]   ;;  %v3361_v51 = vld [vmem:[#allocation3 + $0x10] sm:$0xff] }
 0x272   : > { %4458 = vmatprep.mubr.bf16.mxu0 %v20153_v10  ;;  %2593 = vst [vmem:[#allocation3 + $0x188] sm:$0xff] %v2559_v39  ;;  %v2563_v25 = vsel %vm1778_vm9, %v2556_v32, %v2562_v37  ;;  %v2997_v33 = vmax.f32 %v2983_v58, %v2987_v56  ;;  %v2134_v16 = vrot.slane %v24142_v63, 2  ;;  %v24143_v0 = vld [vmem:[#allocation7_spill] sm:$0xff]  ;;  %v17104_v37 = vld [vmem:[%s23894_s3 + $0x1d0] sm:$0xff]   ;;  %v4587_v46 = vld [vmem:[#allocation3 + $0x68] sm:$0xf0] }
 0x273   : > { %v3189_v36 = vshll.u32 %v20145_v57, 16  ;;  %v3193_v38 = vshrl.u32 %v20145_v57, 16  ;;  %2595 = vst [vmem:[#allocation3 + $0x198] sm:$0xff] %v2563_v25  ;;  %14542 = vmatpush3.bf16.msra.mxu0 %v17101_v53  ;;  %v2565_v19 = vsel %vm1778_vm9, %v2558_v5, %v2564_v47  ;;  %v24144_v50 = vrot.slane %v24143_v0, 2  ;;  %v17105_v58 = vld [vmem:[%s23894_s3 + $0x1d8] sm:$0xff]  }
 0x274   : > { %15654 = vmatmul.mubr.msk.bf16.gmra.mrb[108].mxu1 %vm389_vm1, %v3538_v61  ;;  %14543 = vmatprep.subr.bf16.mxu0 %v17102_v28  ;;  %v3011_v44 = vmax.f32 %v2997_v33, %v3001_v52  ;;  %2596 = vst [vmem:[#allocation3 + $0x1a0] sm:$0xff] %v2565_v19  ;;  %v20236_v28 = vld [vmem:[#allocation3 + $0xe0] sm:$0xff]  ;;  %v3262_v24 = vrot.slane %v20145_v57, 2  ;;  %v4678_v47 = vrot.slane %v4587_v46, 4 }
 0x275   : > { %15665 = vmatprep.mubr.msk.bf16.mxu1 %vm17595_vm0, %v24041_v22  ;;  %v20177_v43 = vrot.slane %v3189_v36, 1  ;;  %v3239_v3 = vrot.slane %v3193_v38, 1  ;;  %v3240_v34 = vrot.slane %v3189_v36, 2  ;;  %v2136_v61 = vsel %vm1162_vm3, %v2134_v16, %v24144_v50  ;;  %v20231_v36 = vld [vmem:[#allocation3 + $0xc0] sm:$0xff] }
 0x276   : > { %v3039_v17 = vrot.slane %v3011_v44, 1  ;;  %v3078_v60 = vrot.slane %v3011_v44, 2  ;;  %v3117_v32 = vrot.slane %v3011_v44, 3  ;;  %2186 = vst.msk [vmem:[#allocation3 + $0xe8] sm:$0xff] %vm389_vm1, %v2136_v61  ;;  %v24145_v19 = vld [vmem:[#allocation14_spill] sm:$0xff]  ;;  %v4686_v61 = vrot.slane %v20104_v42, 4 }
 0x277   : > { %v3192_v49 = vsel %vm1274_vm5, %v3187_v27, %v20177_v43  ;;  %v20188_v14 = vor.u32 %v3240_v34, %v3239_v3  ;;  %14544 = vmatpush3.bf16.msra.mxu0 %v17103_v9  ;;  %v3260_v3 = vrot.slane %v20057_v40, 2  ;;  %v3195_v34 = vor.u32 %v3193_v38, %v20177_v43 }
 0x278   : > { %3208 = vrot.lane.b32.xlu1 %v3192_v49, %s17596_s23  ;;  %v3060_v6 = vmax.f32 %v3011_v44, %v3039_v17  ;;  %v3079_v31 = vsel %vm1162_vm3, %v3076_v12, %v3078_v60  ;;  %v3118_v5 = vsel %vm1202_vm4, %v3115_v7, %v3117_v32  ;;  %14598 = vmatprep.subr.bf16.mxu0 %v17106_v26  ;;  %v3364_v7 = vld [vmem:[#allocation3 + $0x28] sm:$0xff]  ;;  %v2548_v44 = vrot.slane %v24145_v19, 4  ;;  %v17564_v19 = vld [vmem:[#allocation3 + $0x58] sm:$0xff] }
 0x279   : > { %v3242_v30 = vsel %vm1339_vm6, %v20107_v8, %v20188_v14  ;;  %4459 = vmatmul.mubr.bf16.gmra.mrb[120].mxu0 %v20193_v55  ;;  %v3040_v8 = vsel %vm1122_vm2, %v3037_v2, %v3039_v17  ;;  %v20262_v33 = vsel %vm1162_vm3, %v3260_v3, %v3262_v24  ;;  %v20268_v17 = vld [vmem:[#allocation3 + $0xd8] sm:$0xff] }
 0x27a   : > { %3251 = vrot.lane.b32.xlu0 %v3242_v30, %s17596_s23  ;;  %4466 = vmatprep.mubr.bf16.mxu0 %v20202_v59  ;;  %v3059_v1 = vmax.f32 %v19768_v15, %v3040_v8  ;;  %v3099_v2 = vmax.f32 %v3060_v6, %v3078_v60  ;;  %v24147_v8 = vld [vmem:[#allocation18_spill] sm:$0xff] }
 0x27b   : > { %v2858_v6 = vrot.slane %v24147_v8, 1 }
 0x27c   : > { %15666 = vmatmul.mubr.msk.bf16.vlgmr.msra.gmra.mrb[84].mxu1 %vm389_vm1, %v3361_v51  ;;  %v3098_v12 = vmax.f32 %v3059_v1, %v3079_v31  ;;  %v3138_v53 = vmax.f32 %v3099_v2, %v3117_v32  ;;  %v17563_v51 = vld [vmem:[#allocation3 + $0x40] sm:$0xff]  ;;  %v3315_v31 = vrot.slane %v20262_v33, 4  ;;  %v4676_v1 = vrot.slane %v20092_v54, 4 }
 0x27d   : > { %15694 = vmatpush3.bf16.msra.mxu1 %v17088_v41  ;;  %15669 = vmatprep.mubr.msk.bf16.mxu1 %vm17595_vm0, %v24041_v22  ;;  %v24146_v41 = vld [vmem:[#allocation17_spill] sm:$0xff] }
 0x27e   : > { %15695 = vmatprep.subr.bf16.mxu1 %v24041_v22  ;;  %v3137_v27 = vmax.f32 %v3098_v12, %v3118_v5  ;;  %v3148_v15 = vadd.f32 %v20123_v35, %v3138_v53  ;;  %v2857_v30 = vrot.slane %v24146_v41, 1  ;;  %v24148_v53 = vld [vmem:[#allocation11_spill] sm:$0xff] }
 0x27f   : > { %v24149_v54 = vrot.slane %v24148_v53, 4  ;;  %v17118_v53 = vld [vmem:[%s23894_s3 + $0x2e8] sm:$0xff]  }
 0x280   : > { %v3147_v56 = vadd.f32 %v20123_v35, %v3137_v27  ;;  %v3158_v39 = vmax.f32 %v3148_v15, 0.0  ;;  %v4679_v35 = vrot.slane %v20034_v48, 4  ;;  %v24150_v27 = vld [vmem:[#allocation22_spill] sm:$0xff] }
 0x281   : > { %15696 = vmatpush3.bf16.msra.mxu1 %v17096_v18  ;;  %4467 = vmatmul.mubr.bf16.gmra.mrb[124].mxu0 %v20231_v36  ;;  %v4586_v18 = vld [vmem:[#allocation3 + $0x60] sm:$0xf0]  ;;  %v24151_v15 = vrot.slane %v24150_v27, 4  ;;  %v4696_v27 = vrot.slane %v20231_v36, 4 }
 0x282   : > { %15697 = vmatprep.subr.bf16.mxu1 %v24041_v22  ;;  %4474 = vmatprep.mubr.bf16.mxu0 %v20236_v28  ;;  %v20246_v25 = vmax.f32 %v3147_v56, 0.0  ;;  %v4680_v38 = vsel %vm1778_vm9, %v4678_v47, %v4679_v35  ;;  %v4675_v46 = vrot.slane %v4586_v18, 4  ;;  %v17107_v47 = vld [vmem:[%s23894_s3 + $0x280] sm:$0xff]  }
 0x283   : > { %v17115_v18 = vld [vmem:[%s23894_s3 + $0x2e0] sm:$0xff]  }
 0x284   : > { %15670 = vmatmul.mubr.msk.bf16.gmra.mrb[88].mxu1 %vm389_vm1, %v3364_v7  ;;  %v20253_v52 = vpack.c.bf16 %v3158_v39, %v20246_v25  ;;  %v2555_v7 = vsel %vm1778_vm9, %v2548_v44, %v24151_v15  ;;  %v2859_v39 = vsel %vm1122_vm2, %v2857_v30, %v2858_v6  ;;  %v4692_v30 = vrot.slane %v20153_v10, 4  ;;  %v17120_v15 = vld [vmem:[%s23894_s3 + $0x2f0] sm:$0xff]  }
 0x285   : > { %15673 = vmatprep.mubr.msk.bf16.mxu1 %vm17595_vm0, %v24041_v22  ;;  %15698 = vmatpush3.bf16.msra.mxu1 %v17104_v37  ;;  %v2549_v37 = vsel %vm1778_vm9, %v24149_v54, %v2548_v44  ;;  %2591 = vst.msk [vmem:[#allocation3 + $0x178] sm:$0xff] %vm389_vm1, %v2555_v7  ;;  %v17110_v44 = vld [vmem:[%s23894_s3 + $0x288] sm:$0xff]   ;;  %v4704_v7 = vrot.slane %v20236_v28, 4 }
 0x286   : > { %15699 = vmatprep.subr.bf16.mxu1 %v24041_v22  ;;  %v3197_v9 = vshll.u32 %v20253_v52, 16  ;;  %v3264_v48 = vrot.slane %v20253_v52, 2  ;;  %v3201_v49 = vshrl.u32 %v20253_v52, 16  ;;  %2588 = vst.msk [vmem:[#allocation3 + $0x160] sm:$0xff] %vm389_vm1, %v2549_v37  ;;  %v17119_v37 = vld [vmem:[%s23894_s3 + $0x2a8] sm:$0xff]  }
 0x288   : > { %v3199_v43 = vrot.slane %v3197_v9, 1  ;;  %v3265_v60 = vsel %vm1162_vm3, %v3262_v24, %v3264_v48  ;;  %v3327_v32 = vrot.slane %v3264_v48, 4  ;;  %v3243_v26 = vrot.slane %v3201_v49, 1 }
 0x289   : > { %15700 = vmatpush3.bf16.msra.mxu1 %v17105_v58  ;;  %4475 = vmatmul.mubr.bf16.gmra.mrb[128].mxu0 %v20268_v17  ;;  %v3321_v63 = vrot.slane %v3265_v60, 4  ;;  %v3244_v16 = vrot.slane %v3197_v9, 2  ;;  %v4677_v9 = vsel %vm1778_vm9, %v4675_v46, %v4676_v1  ;;  %v17113_v60 = vld [vmem:[%s23894_s3 + $0x2d8] sm:$0xff]  }
 0x28a   : > { %15729 = vmatprep.subr.bf16.mxu1 %v24041_v22  ;;  %4907 = vmatprep.mubr.bf16.mxu0 %v4680_v38  ;;  %v3200_v2 = vsel %vm1274_vm5, %v3195_v34, %v3199_v43  ;;  %v3203_v50 = vor.u32 %v3201_v49, %v3199_v43  ;;  %v2843_v56 = vpop.permute.xlu1 %2842  ;;  %v4687_v49 = vsel %vm1778_vm9, %v4679_v35, %v4686_v61  ;;  %v17111_v35 = vld [vmem:[%s23894_s3 + $0x2d0] sm:$0xff]  }
 0x28b   : > { %v3322_v5 = vsel %vm1778_vm9, %v3315_v31, %v3321_v63  ;;  %v3328_v12 = vsel %vm1778_vm9, %v3321_v63, %v3327_v32  ;;  %3210 = vrot.lane.b32.xlu1 %v3200_v2, %s17596_s23  ;;  %v3245_v0 = vor.u32 %v3244_v16, %v3243_v26  ;;  %v2910_v24 = vsel %vm389_vm1, %v24146_v41, %v2843_v56  ;;  %v17112_v38 = vld [vmem:[%s23894_s3 + $0x290] sm:$0xff]   ;;  %v17114_v63 = vld [vmem:[%s23894_s3 + $0x298] sm:$0xff]  }
 0x28c   : > { %15674 = vmatmul.mubr.msk.bf16.gmra.mrb[92].mxu1 %vm389_vm1, %v17563_v51  ;;  %3355 = vst.msk [vmem:[#allocation3 + $0x268] sm:$0xff] %vm389_vm1, %v3322_v5  ;;  %3358 = vst.msk [vmem:[#allocation3 + $0x280] sm:$0xff] %vm389_vm1, %v3328_v12  ;;  %v2886_v34 = vpop.permute.xlu0 %2885  ;;  %v4684_v41 = vrot.slane %v20151_v11, 4  ;;  %v4693_v32 = vsel %vm1778_vm9, %v4686_v61, %v4692_v30  ;;  %v2860_v26 = vrot.slane %v19543_v45, 1  ;;  %v17565_v51 = vld [vmem:[#allocation3 + $0x70] sm:$0xff]  ;;  %v4690_v16 = vrot.slane %v20193_v55, 4 }
 0x28d   : > { %15677 = vmatprep.mubr.msk.bf16.mxu1 %vm17595_vm0, %v24041_v22  ;;  %v3246_v58 = vsel %vm1339_vm6, %v20188_v14, %v3245_v0  ;;  %2945 = vst [vmem:[#allocation3 + $0x1b0] sm:$0xff] %v2910_v24  ;;  %v17109_v14 = vld [vmem:[%s23894_s3 + $0x2c8] sm:$0xff]   ;;  %v2927_v48 = vsel %vm389_vm1, %v2859_v39, %v2886_v34  ;;  %v17122_v39 = vld [vmem:[%s23894_s3 + $0x2f8] sm:$0xff]   ;;  %v17126_v34 = vld [vmem:[%s23894_s3 + $0xe0] sm:$0xff]  }
 0x28e   : > { %3253 = vrot.lane.b32.xlu0 %v3246_v58, %s17596_s23  ;;  %2946 = vst [vmem:[#allocation3 + $0x1b8] sm:$0xff] %v2927_v48  ;;  %v4685_v43 = vsel %vm1778_vm9, %v4676_v1, %v4684_v41  ;;  %v4698_v1 = vrot.slane %v20202_v59, 4  ;;  %v2861_v5 = vsel %vm1122_vm2, %v2858_v6, %v2860_v26  ;;  %v4691_v61 = vsel %vm1778_vm9, %v4684_v41, %v4690_v16  ;;  %v20385_v58 = vld [vmem:[#allocation3 + $0xf8] sm:$0xff]  ;;  %v17116_v41 = vld [vmem:[%s23894_s3 + $0x268] sm:$0xff]  }
 0x28f   : > { %3212 = vrot.lane.b32.xlu1 %v3203_v50, %s17596_s23  ;;  %v4697_v56 = vsel %vm1778_vm9, %v4690_v16, %v4696_v27  ;;  %v17123_v24 = vld [vmem:[%s23894_s3 + $0x2b8] sm:$0xff]  }
 0x290   : > { %v4699_v6 = vsel %vm1778_vm9, %v4692_v30, %v4698_v1  ;;  %v4705_v46 = vsel %vm1778_vm9, %v4698_v1, %v4704_v7  ;;  %v4193_v48 = vld [vmem:[#allocation3 + $0x58] sm:$0xff] }
 0x291   : > { %4908 = vmatmul.mubr.bf16.vlgmr.msra.gmra.mrb[132].mxu0 %v4677_v9  ;;  %v17108_v9 = vld [vmem:[%s23894_s3 + $0x260] sm:$0xff]  }
 0x292   : > { %4915 = vmatprep.mubr.bf16.mxu0 %v4687_v49  ;;  %14599 = vmatpush3.bf16.msra.mxu0 %v17107_v47  ;;  %v20393_v47 = vrot.slane %v20268_v17, 4 }
 0x293   : > { %14600 = vmatprep.subr.bf16.mxu0 %v17109_v14  ;;  %3255 = vrot.lane.b32.xlu0 %v3245_v0, %s17596_s23  ;;  %v17117_v0 = vld [vmem:[%s23894_s3 + $0x2a0] sm:$0xff]  }
 0x294   : > { %15678 = vmatmul.mubr.msk.bf16.gmra.mrb[96].mxu1 %vm389_vm1, %v17564_v19  ;;  %v4703_v14 = vsel %vm1778_vm9, %v4696_v27, %v20393_v47  ;;  %v20408_v19 = vld [vmem:[#allocation3 + $0xf0] sm:$0xff]  ;;  %v17127_v27 = vld [vmem:[%s23894_s3 + $0xa0] sm:$0xff]  }
 0x295   : > { %15681 = vmatprep.mubr.msk.bf16.mxu1 %vm17595_vm0, %v24041_v22 }
 0x296   : > { %14601 = vmatpush3.bf16.msra.mxu0 %v17110_v44  ;;  %v4608_v44 = vld [vmem:[#allocation3 + $0x110] sm:$0xf] }
 0x297   : > { %14602 = vmatprep.subr.bf16.mxu0 %v17111_v35  ;;  %v20417_v35 = vrot.slane %v20408_v19, 4  ;;  %v4716_v30 = vrot.slane %v4608_v44, 4 }
 0x299   : > { %4916 = vmatmul.mubr.bf16.gmra.mrb[136].mxu0 %v4685_v43  ;;  %v20426_v43 = vsel %vm1778_vm9, %v20393_v47, %v20417_v35 }
 0x29a   : > { %4923 = vmatprep.mubr.bf16.mxu0 %v4693_v32  ;;  %14603 = vmatpush3.bf16.msra.mxu0 %v17112_v38  ;;  %v17124_v38 = vld [vmem:[%s23894_s3 + $0x270] sm:$0xff]  }
 0x29b   : > { %14604 = vmatprep.subr.bf16.mxu0 %v17113_v60  ;;  %v2845_v2 = vpop.permute.xlu1 %2844  ;;  %v2862_v60 = vrot.slane %v19804_v62, 1  ;;  %v4196_v32 = vld [vmem:[#allocation3 + $0x70] sm:$0xff] }
 0x29c   : > { %15682 = vmatmul.mubr.msk.bf16.gmra.mrb[100].mxu1 %vm389_vm1, %v17565_v51  ;;  %v2913_v12 = vsel %vm389_vm1, %v24147_v8, %v2845_v2 }
 0x29d   : > { %15685 = vmatprep.mubr.msk.bf16.mxu1 %vm17595_vm0, %v24041_v22  ;;  %2948 = vst [vmem:[#allocation3 + $0x1c8] sm:$0xff] %v2913_v12  ;;  %v2888_v50 = vpop.permute.xlu0 %2887 }
 0x29e   : > { %14605 = vmatpush3.bf16.msra.mxu0 %v17114_v63  ;;  %v2931_v54 = vsel %vm389_vm1, %v2861_v5, %v2888_v50  ;;  %v4607_v63 = vld [vmem:[#allocation3 + $0x108] sm:$0xf]  ;;  %v2863_v5 = vsel %vm1122_vm2, %v2860_v26, %v2862_v60  ;;  %v2864_v26 = vrot.slane %v19885_v13, 1 }
 0x29f   : > { %14606 = vmatprep.subr.bf16.mxu0 %v17115_v18  ;;  %2949 = vst [vmem:[#allocation3 + $0x1d0] sm:$0xff] %v2931_v54  ;;  %v17125_v18 = vld [vmem:[%s23894_s3 + $0x278] sm:$0xff]   ;;  %v4714_v2 = vrot.slane %v4607_v63, 4  ;;  %v17129_v13 = vld [vmem:[%s23894_s3 + $0xe8] sm:$0xff]  }
 0x2a1   : > { %4924 = vmatmul.mubr.bf16.gmra.mrb[140].mxu0 %v4691_v61  ;;  %v4715_v50 = vsel %vm1778_vm9, %v20417_v35, %v4714_v2  ;;  %v20449_v61 = vld [vmem:[#allocation3 + $0x88] sm:$0xff]  ;;  %v3222_v2 = vrot.slane %v20057_v40, 1 }
 0x2a2   : > { %4931 = vmatprep.mubr.bf16.mxu0 %v4699_v6  ;;  %14607 = vmatpush3.bf16.msra.mxu0 %v17117_v0  ;;  %v2865_v6 = vsel %vm1122_vm2, %v2862_v60, %v2864_v26 }
 0x2a3   : > { %14608 = vmatprep.subr.bf16.mxu0 %v17118_v53 }
 0x2a4   : > { %15686 = vmatmul.mubr.msk.bf16.gmra.mrb[104].mxu1 %vm389_vm1, %v19758_v21  ;;  %v17121_v21 = vld [vmem:[%s23894_s3 + $0x2b0] sm:$0xff]  }
 0x2a5   : > { %15689 = vmatprep.mubr.msk.bf16.mxu1 %vm17595_vm0, %v24041_v22 }
 0x2a6   : > { %14609 = vmatpush3.bf16.msra.mxu0 %v17119_v37  ;;  %v2801_v37 = vpack.c.bf16 %v19868_v23, %v19868_v23 }
 0x2a7   : > { %14610 = vmatprep.subr.bf16.mxu0 %v17120_v15  ;;  %v20468_v15 = vld [vmem:[#allocation3 + $0xa0] sm:$0xff] }
 0x2a9   : > { %4932 = vmatmul.mubr.bf16.gmra.mrb[144].mxu0 %v4697_v56  ;;  %v3219_v56 = vrot.slane %v19959_v29, 1 }
 0x2aa   : > { %4939 = vmatprep.mubr.bf16.mxu0 %v4705_v46  ;;  %14611 = vmatpush3.bf16.msra.mxu0 %v17121_v21  ;;  %v17130_v21 = vld [vmem:[%s23894_s3 + $0xa8] sm:$0xff]  }
 0x2ab   : > { %14612 = vmatprep.subr.bf16.mxu0 %v17122_v39 }
 0x2ac   : > { %15690 = vmatmul.mubr.msk.bf16.gmra.mrb[108].mxu1 %vm389_vm1, %v19943_v20  ;;  %v20399_v20 = vrot.slane %v20385_v58, 4 }
 0x2ad   : > { %15701 = vmatprep.mubr.msk.bf16.mxu1 %vm17595_vm0, %v24041_v22 }
 0x2ae   : > { %14613 = vmatpush3.bf16.msra.mxu0 %v17123_v24  ;;  %v4711_v49 = vsel %vm1778_vm9, %v4704_v7, %v20399_v20  ;;  %v4717_v51 = vsel %vm1778_vm9, %v20399_v20, %v4716_v30  ;;  %v17132_v24 = vld [vmem:[%s23894_s3 + $0xb0] sm:$0xff]  }
 0x2af   : > { %14667 = vmatprep.subr.bf16.mxu0 %v17126_v34  ;;  %v17133_v34 = vld [vmem:[%s23894_s3 + $0xf8] sm:$0xff]  }
 0x2b1   : > { %4940 = vmatmul.mubr.bf16.gmra.mrb[148].mxu0 %v4703_v14 }
 0x2b2   : > { %4947 = vmatprep.mubr.bf16.mxu0 %v4711_v49 }
 0x2b4   : > { %15702 = vmatmul.mubr.msk.bf16.vlgmr.msra.gmra.mrb[84].mxu1 %vm389_vm1, %v4193_v48 }
 0x2b5   : > { %15730 = vmatpush3.bf16.msra.mxu1 %v17108_v9  ;;  %15705 = vmatprep.mubr.msk.bf16.mxu1 %vm17595_vm0, %v24041_v22  ;;  %v20493_v9 = vld [vmem:[#allocation3 + $0xb8] sm:$0xff] }
 0x2b6   : > { %15731 = vmatprep.subr.bf16.mxu1 %v24041_v22 }
 0x2b9   : > { %15732 = vmatpush3.bf16.msra.mxu1 %v17116_v41  ;;  %4948 = vmatmul.mubr.bf16.gmra.mrb[152].mxu0 %v20426_v43 }
 0x2ba   : > { %15733 = vmatprep.subr.bf16.mxu1 %v24041_v22  ;;  %4955 = vmatprep.mubr.bf16.mxu0 %v4717_v51  ;;  %v2847_v16 = vpop.permute.xlu1 %2846 }
 0x2bb   : > { %v2916_v1 = vsel %vm389_vm1, %v19543_v45, %v2847_v16 }
 0x2bc   : > { %15706 = vmatmul.mubr.msk.bf16.gmra.mrb[88].mxu1 %vm389_vm1, %v4196_v32  ;;  %2951 = vst [vmem:[#allocation3 + $0x1e0] sm:$0xff] %v2916_v1 }
 0x2bd   : > { %15709 = vmatprep.mubr.msk.bf16.mxu1 %vm17595_vm0, %v24041_v22  ;;  %15734 = vmatpush3.bf16.msra.mxu1 %v17124_v38  ;;  %v2890_v12 = vpop.permute.xlu0 %2889 }
 0x2be   : > { %15735 = vmatprep.subr.bf16.mxu1 %v24041_v22  ;;  %v2935_v0 = vsel %vm389_vm1, %v2863_v5, %v2890_v12  ;;  %v17138_v5 = vld [vmem:[%s23894_s3 + $0x108] sm:$0xff]   ;;  %v20522_v12 = vld [vmem:[#allocation3 + $0xd0] sm:$0xff] }
 0x2bf   : > { %2952 = vst [vmem:[#allocation3 + $0x1e8] sm:$0xff] %v2935_v0  ;;  %v17139_v0 = vld [vmem:[%s23894_s3 + $0xc8] sm:$0xff]  }
 0x2c1   : > { %15736 = vmatpush3.bf16.msra.mxu1 %v17125_v18  ;;  %4956 = vmatmul.mubr.bf16.gmra.mrb[156].mxu0 %v4715_v50  ;;  %v17137_v18 = vld [vmem:[%s23894_s3 + $0xc0] sm:$0xff]  }
 0x2c2   : > { %15765 = vmatprep.subr.bf16.mxu1 %v24041_v22  ;;  %5302 = vmatprep.mubr.bf16.mxu0 %v20104_v42 }
 0x2c4   : > { %15710 = vmatmul.mubr.msk.bf16.gmra.mrb[92].mxu1 %vm389_vm1, %v20449_v61 }
 0x2c5   : > { %15713 = vmatprep.mubr.msk.bf16.mxu1 %vm17595_vm0, %v24041_v22 }
 0x2c6   : > { %v2849_v53 = vpop.permute.xlu1 %2848 }
 0x2c7   : > { %v2919_v54 = vsel %vm389_vm1, %v19804_v62, %v2849_v53 }
 0x2c8   : > { %2954 = vst [vmem:[#allocation3 + $0x1f8] sm:$0xff] %v2919_v54 }
 0x2c9   : > { %v2892_v42 = vpop.permute.xlu0 %2891  ;;  %5303 = vmatmul.mubr.bf16.vlgmr.msra.gmra.mrb[160].mxu0 %v20151_v11  ;;  %v17131_v11 = vld [vmem:[%s23894_s3 + $0xf0] sm:$0xff]  }
 0x2ca   : > { %v2939_v62 = vsel %vm389_vm1, %v2865_v6, %v2892_v42  ;;  %v2851_v7 = vpop.permute.xlu1 %2850  ;;  %5310 = vmatprep.mubr.bf16.mxu0 %v20153_v10  ;;  %14668 = vmatpush3.bf16.msra.mxu0 %v17127_v27  ;;  %v3220_v10 = vrot.slane %v19973_v4, 1 }
 0x2cb   : > { %2955 = vst [vmem:[#allocation3 + $0x200] sm:$0xff] %v2939_v62  ;;  %v2923_v23 = vsel %vm389_vm1, %v2801_v37, %v2851_v7  ;;  %14669 = vmatprep.subr.bf16.mxu0 %v17129_v13  ;;  %v17141_v7 = vld [vmem:[%s23894_s3 + $0xd0] sm:$0xff]  }
 0x2cc   : > { %15714 = vmatmul.mubr.msk.bf16.gmra.mrb[96].mxu1 %vm389_vm1, %v20468_v15  ;;  %2957 = vst [vmem:[#allocation3 + $0x210] sm:$0xf] %v2923_v23  ;;  %v3221_v14 = vsel %vm1122_vm2, %v3219_v56, %v3220_v10  ;;  %v20550_v56 = vld [vmem:[#allocation3 + $0xe8] sm:$0xff] }
 0x2cd   : > { %15717 = vmatprep.mubr.msk.bf16.mxu1 %vm17595_vm0, %v24041_v22  ;;  %v2894_v39 = vpop.permute.xlu0 %2893 }
 0x2ce   : > { %14670 = vmatpush3.bf16.msra.mxu0 %v17130_v21  ;;  %v2943_v46 = vsel %vm389_vm1, %v2864_v26, %v2894_v39  ;;  %v14338_v41 = vpop.f32.mrb[56].mxu1  ;;  %v3223_v26 = vsel %vm1122_vm2, %v3220_v10, %v3222_v2  ;;  %v4588_v39 = vld [vmem:[#allocation3 + $0x70] sm:$0xf0] }
 0x2cf   : > { %14671 = vmatprep.subr.bf16.mxu0 %v17131_v11  ;;  %2958 = vst [vmem:[#allocation3 + $0x218] sm:$0xf] %v2943_v46  ;;  %v14339_v60 = vpop.f32.mrb[57].mxu1  ;;  %v17142_v11 = vld [vmem:[%s23894_s3 + $0x118] sm:$0xff]  }
 0x2d0   : > { %v20511_v51 = vadd.f32 %v14339_v60, %v14338_v41  ;;  %v14341_v63 = vpop.f32.mrb[58].mxu1 }
 0x2d1   : > { %5311 = vmatmul.mubr.bf16.gmra.mrb[164].mxu0 %v20193_v55  ;;  %v17134_v55 = vld [vmem:[%s23894_s3 + $0xb8] sm:$0xff]   ;;  %v14342_v16 = vpop.f32.mrb[59].mxu1 }
 0x2d2   : > { %5318 = vmatprep.mubr.bf16.mxu0 %v20202_v59  ;;  %14672 = vmatpush3.bf16.msra.mxu0 %v17132_v24  ;;  %v17135_v59 = vld [vmem:[%s23894_s3 + $0x100] sm:$0xff]   ;;  %v20516_v1 = vadd.f32 %v14342_v16, %v14341_v63 }
 0x2d3   : > { %v3205_v48 = vpop.permute.xlu1 %3204  ;;  %14673 = vmatprep.subr.bf16.mxu0 %v17133_v34  ;;  %v17146_v34 = vld [vmem:[%s23894_s3 + $0x40] sm:$0xff]  }
 0x2d4   : > { %15718 = vmatmul.mubr.msk.bf16.gmra.mrb[100].mxu1 %vm389_vm1, %v20493_v9  ;;  %v3267_v49 = vsel %vm389_vm1, %v19959_v29, %v3205_v48  ;;  %v4682_v48 = vrot.slane %v20449_v61, 4  ;;  %v20577_v61 = vld [vmem:[#allocation3 + $0x110] sm:$0xff] }
 0x2d5   : > { %15721 = vmatprep.mubr.msk.bf16.mxu1 %vm17595_vm0, %v24041_v22  ;;  %v3248_v44 = vpop.permute.xlu0 %3247  ;;  %v3302_v30 = vrot.slane %v3267_v49, 4 }
 0x2d6   : > { %v3279_v38 = vsel %vm389_vm1, %v3221_v14, %v3248_v44  ;;  %14674 = vmatpush3.bf16.msra.mxu0 %v17134_v55  ;;  %v14344_v50 = vpop.f32.mrb[60].mxu1  ;;  %v4681_v14 = vrot.slane %v4588_v39, 4  ;;  %v3224_v44 = vrot.slane %v20145_v57, 1 }
 0x2d7   : > { %v3303_v32 = vrot.slane %v3279_v38, 4  ;;  %3344 = vst [vmem:[#allocation3 + $0x210] sm:$0xf0] %v3302_v30  ;;  %14675 = vmatprep.subr.bf16.mxu0 %v17135_v59  ;;  %v14345_v53 = vpop.f32.mrb[61].mxu1 }
 0x2d8   : > { %v20537_v6 = vadd.f32 %v14345_v53, %v14344_v50  ;;  %v3225_v16 = vsel %vm1122_vm2, %v3222_v2, %v3224_v44 }
 0x2d9   : > { %3345 = vst [vmem:[#allocation3 + $0x218] sm:$0xf0] %v3303_v32  ;;  %5319 = vmatmul.mubr.bf16.gmra.mrb[168].mxu0 %v20231_v36  ;;  %v17140_v36 = vld [vmem:[%s23894_s3 + $0x110] sm:$0xff]  }
 0x2da   : > { %5326 = vmatprep.mubr.bf16.mxu0 %v20236_v28  ;;  %14676 = vmatpush3.bf16.msra.mxu0 %v17137_v18  ;;  %v14347_v28 = vpop.f32.mrb[62].mxu1 }
 0x2db   : > { %14677 = vmatprep.subr.bf16.mxu0 %v17138_v5  ;;  %v14348_v42 = vpop.f32.mrb[63].mxu1  ;;  %v17136_v5 = vld [vmem:[%s23894_s3 + $0x308] sm:$0xff]  }
 0x2dc   : > { %15722 = vmatmul.mubr.msk.bf16.gmra.mrb[104].mxu1 %vm389_vm1, %v20522_v12  ;;  %v20545_v23 = vadd.f32 %v14348_v42, %v14347_v28  ;;  %v20609_v28 = vld [vmem:[#allocation3 + $0x108] sm:$0xff]  ;;  %v20618_v42 = vld [vmem:[#allocation3 + $0xe0] sm:$0xff] }
 0x2dd   : > { %15725 = vmatprep.mubr.msk.bf16.mxu1 %vm17595_vm0, %v24041_v22  ;;  %v5615_v39 = vrot.slane %v20618_v42, 4 }
 0x2de   : > { %v3207_v54 = vpop.permute.xlu1 %3206  ;;  %14678 = vmatpush3.bf16.msra.mxu0 %v17139_v0 }
 0x2df   : > { %v3269_v37 = vsel %vm389_vm1, %v19973_v4, %v3207_v54  ;;  %14679 = vmatprep.subr.bf16.mxu0 %v17140_v36  ;;  %v17144_v54 = vld [vmem:[%s23894_s3 + $0x310] sm:$0xff]  }
 0x2e0   : > { %v3250_v27 = vpop.permute.xlu0 %3249  ;;  %v3305_v13 = vrot.slane %v3269_v37, 4  ;;  %v14350_v24 = vpop.f32.mrb[64].mxu1 }
 0x2e1   : > { %v3282_v62 = vsel %vm389_vm1, %v3223_v26, %v3250_v27  ;;  %5327 = vmatmul.mubr.bf16.gmra.mrb[172].mxu0 %v20268_v17  ;;  %v17143_v17 = vld [vmem:[%s23894_s3 + $0xd8] sm:$0xff]   ;;  %v14351_v49 = vpop.f32.mrb[65].mxu1  ;;  %v4688_v26 = vrot.slane %v20468_v15, 4  ;;  %v20614_v27 = vld [vmem:[#allocation3 + $0x128] sm:$0xff] }
 0x2e2   : > { %v3307_v21 = vrot.slane %v3282_v62, 4  ;;  %v3306_v10 = vsel %vm1778_vm9, %v3302_v30, %v3305_v13  ;;  %5334 = vmatprep.mubr.bf16.mxu0 %v20385_v58  ;;  %14680 = vmatpush3.bf16.msra.mxu0 %v17141_v7  ;;  %v20568_v55 = vadd.f32 %v14351_v49, %v14350_v24  ;;  %v14353_v41 = vpop.f32.mrb[66].mxu1  ;;  %v17128_v30 = vld [vmem:[%s23894_s3 + $0x300] sm:$0xff]   ;;  %v5539_v7 = vld [vmem:[#allocation3 + $0xc8] sm:$0xf0] }
 0x2e3   : > { %3347 = vst [vmem:[#allocation3 + $0x228] sm:$0xff] %v3306_v10  ;;  %14681 = vmatprep.subr.bf16.mxu0 %v17142_v11  ;;  %v14354_v38 = vpop.f32.mrb[67].mxu1  ;;  %v4689_v37 = vsel %vm1778_vm9, %v4682_v48, %v4688_v26  ;;  %v4694_v11 = vrot.slane %v20493_v9, 4  ;;  %v5614_v49 = vrot.slane %v5539_v7, 4 }
 0x2e4   : > { %15726 = vmatmul.mubr.msk.bf16.gmra.mrb[108].mxu1 %vm389_vm1, %v20550_v56  ;;  %v3308_v46 = vsel %vm1778_vm9, %v3303_v32, %v3307_v21  ;;  %v20573_v59 = vadd.f32 %v14354_v38, %v14353_v41  ;;  %v4683_v32 = vsel %vm1778_vm9, %v4681_v14, %v4682_v48 }
 0x2e5   : > { %15737 = vmatprep.mubr.msk.bf16.mxu1 %vm17595_vm0, %v24041_v22  ;;  %3348 = vst [vmem:[#allocation3 + $0x230] sm:$0xff] %v3308_v46 }
 0x2e6   : > { %14682 = vmatpush3.bf16.msra.mxu0 %v17143_v17 }
 0x2e7   : > { %14736 = vmatprep.subr.bf16.mxu0 %v17146_v34 }
 0x2e9   : > { %5335 = vmatmul.mubr.bf16.gmra.mrb[176].mxu0 %v20408_v19 }
 0x2ea   : > { %v3209_v60 = vpop.permute.xlu1 %3208  ;;  %5342 = vmatprep.mubr.bf16.mxu0 %v20577_v61 }
 0x2eb   : > { %v20581_v63 = vsel %vm389_vm1, %v20057_v40, %v3209_v60  ;;  %v20633_v60 = vld [vmem:[#allocation3 + $0x120] sm:$0xff] }
 0x2ec   : > { %15738 = vmatmul.mubr.msk.bf16.vlgmr.msra.gmra.mrb[84].mxu1 %vm389_vm1, %v4683_v32  ;;  %v3311_v18 = vrot.slane %v20581_v63, 4  ;;  %v3252_v0 = vpop.permute.xlu0 %3251 }
 0x2ed   : > { %15766 = vmatpush3.bf16.msra.mxu1 %v17128_v30  ;;  %15741 = vmatprep.mubr.msk.bf16.mxu1 %vm17595_vm0, %v24041_v22  ;;  %v20599_v50 = vsel %vm389_vm1, %v3225_v16, %v3252_v0  ;;  %v4695_v16 = vsel %vm1778_vm9, %v4688_v26, %v4694_v11 }
 0x2ee   : > { %15767 = vmatprep.subr.bf16.mxu1 %v24041_v22  ;;  %v3312_v2 = vsel %vm1778_vm9, %v3305_v13, %v3311_v18  ;;  %v3313_v36 = vrot.slane %v20599_v50, 4  ;;  %v17145_v13 = vld [vmem:[%s23894_s3 + $0x318] sm:$0xff]  }
 0x2ef   : > { %3350 = vst [vmem:[#allocation3 + $0x240] sm:$0xff] %v3312_v2  ;;  %v3226_v2 = vrot.slane %v20253_v52, 1 }
 0x2f0   : > { %v3314_v53 = vsel %vm1778_vm9, %v3307_v21, %v3313_v36 }
 0x2f1   : > { %15768 = vmatpush3.bf16.msra.mxu1 %v17136_v5  ;;  %3351 = vst [vmem:[#allocation3 + $0x248] sm:$0xff] %v3314_v53  ;;  %5343 = vmatmul.mubr.bf16.gmra.mrb[180].mxu0 %v20609_v28  ;;  %v5616_v5 = vsel %vm1778_vm9, %v5614_v49, %v5615_v39 }
 0x2f2   : > { %15769 = vmatprep.subr.bf16.mxu1 %v24041_v22  ;;  %5350 = vmatprep.mubr.bf16.mxu0 %v20614_v27  ;;  %v14407_v62 = vpop.f32.mrb[76].mxu0  ;;  %v14356_v21 = vpop.f32.mrb[68].mxu1 }
 0x2f3   : > { %v14408_v10 = vpop.f32.mrb[77].mxu0  ;;  %v14357_v46 = vpop.f32.mrb[69].mxu1 }
 0x2f4   : > { %15742 = vmatmul.mubr.msk.bf16.gmra.mrb[88].mxu1 %vm389_vm1, %v4689_v37  ;;  %v14409_v17 = vadd.f32 %v14408_v10, %v14407_v62  ;;  %v14410_v24 = vpop.f32.mrb[78].mxu0  ;;  %v20628_v34 = vadd.f32 %v14357_v46, %v14356_v21  ;;  %v14359_v14 = vpop.f32.mrb[70].mxu1 }
 0x2f5   : > { %15745 = vmatprep.mubr.msk.bf16.mxu1 %vm17595_vm0, %v24041_v22  ;;  %15770 = vmatpush3.bf16.msra.mxu1 %v17144_v54  ;;  %v14411_v48 = vpop.f32.mrb[79].mxu0  ;;  %v14360_v41 = vpop.f32.mrb[71].mxu1  ;;  %v4700_v54 = vrot.slane %v20522_v12, 4 }
 0x2f6   : > { %15771 = vmatprep.subr.bf16.mxu1 %v24041_v22  ;;  %v20631_v30 = vadd.f32 %v14409_v17, %v20511_v51  ;;  %v14412_v38 = vadd.f32 %v14411_v48, %v14410_v24  ;;  %v20636_v32 = vadd.f32 %v14360_v41, %v14359_v14  ;;  %v5538_v51 = vld [vmem:[#allocation3 + $0xc0] sm:$0xf0]  ;;  %v3227_v17 = vsel %vm1122_vm2, %v3224_v44, %v3226_v2  ;;  %v17149_v44 = vld [vmem:[%s23894_s3 + $0x48] sm:$0xff]  }
 0x2f7   : > { %v5611_v21 = vrot.slane %v5538_v51, 4  ;;  %v17147_v24 = vld [vmem:[%s23894_s3] sm:$0xff]   ;;  %v4701_v48 = vsel %vm1778_vm9, %v4694_v11, %v4700_v54  ;;  %v5623_v51 = vsel %vm1778_vm9, %v5615_v39, %v20399_v20  ;;  %v24153_v39 = vrot.slane %v24147_v8, 2  ;;  %v17151_v8 = vld [vmem:[%s23894_s3 + $0x50] sm:$0xff]  }
 0x2f8   : > { %v20643_v0 = vadd.f32 %v14412_v38, %v20516_v1 }
 0x2f9   : > { %15772 = vmatpush3.bf16.msra.mxu1 %v17145_v13  ;;  %5351 = vmatmul.mubr.bf16.gmra.mrb[184].mxu0 %v20633_v60  ;;  %v5613_v38 = vsel %vm1778_vm9, %v5611_v21, %v20393_v47 }
 0x2fa   : > { %15801 = vmatprep.subr.bf16.mxu1 %v24041_v22  ;;  %5843 = vmatprep.mubr.bf16.mxu0 %v5616_v5  ;;  %v14413_v53 = vpop.f32.mrb[80].mxu0  ;;  %v14362_v26 = vpop.f32.mrb[72].mxu1 }
 0x2fb   : > { %v14414_v37 = vpop.f32.mrb[81].mxu0  ;;  %v14363_v13 = vpop.f32.mrb[73].mxu1 }
 0x2fc   : > { %15746 = vmatmul.mubr.msk.bf16.gmra.mrb[92].mxu1 %vm389_vm1, %v4695_v16  ;;  %v14415_v62 = vadd.f32 %v14414_v37, %v14413_v53  ;;  %v14416_v7 = vpop.f32.mrb[82].mxu0  ;;  %v20649_v10 = vadd.f32 %v14363_v13, %v14362_v26  ;;  %v14365_v1 = vpop.f32.mrb[74].mxu1  ;;  %v3163_v53 = vpack.c.bf16 %v20246_v25, %v20246_v25  ;;  %v24152_v13 = vrot.slane %v19543_v45, 2  ;;  %v17150_v25 = vld [vmem:[%s23894_s3 + $0x8] sm:$0xff]  }
 0x2fd   : > { %15749 = vmatprep.mubr.msk.bf16.mxu1 %vm17595_vm0, %v24041_v22  ;;  %v14417_v46 = vpop.f32.mrb[83].mxu0  ;;  %v14366_v14 = vpop.f32.mrb[75].mxu1 }
 0x2fe   : > { %v20663_v49 = vadd.f32 %v14415_v62, %v20537_v6  ;;  %v14418_v41 = vadd.f32 %v14417_v46, %v14416_v7  ;;  %v3211_v16 = vpop.permute.xlu1 %3210  ;;  %v20670_v5 = vadd.f32 %v14366_v14, %v14365_v1  ;;  %v2899_v62 = vsel %vm1162_vm3, %v24153_v39, %v24152_v13 }
 0x2ff   : > { %v3273_v11 = vsel %vm389_vm1, %v20145_v57, %v3211_v16  ;;  %2950 = vst.msk [vmem:[#allocation3 + $0x1d8] sm:$0xff] %vm389_vm1, %v2899_v62  ;;  %v4706_v1 = vrot.slane %v20550_v56, 4 }
 0x300   : > { %v3254_v6 = vpop.permute.xlu0 %3253  ;;  %v20680_v47 = vadd.f32 %v14418_v41, %v20545_v23  ;;  %v3317_v26 = vrot.slane %v3273_v11, 4 }
 0x301   : > { %5844 = vmatmul.mubr.bf16.vlgmr.msra.gmra.mrb[188].mxu0 %v5613_v38  ;;  %v3288_v37 = vsel %vm389_vm1, %v3227_v17, %v3254_v6  ;;  %v5628_v17 = vrot.slane %v20577_v61, 4  ;;  %v4707_v39 = vsel %vm1778_vm9, %v4700_v54, %v4706_v1 }
 0x302   : > { %5851 = vmatprep.mubr.bf16.mxu0 %v5623_v51  ;;  %v3319_v57 = vrot.slane %v3288_v37, 4  ;;  %14737 = vmatpush3.bf16.msra.mxu0 %v17147_v24  ;;  %v14419_v23 = vpop.f32.mrb[84].mxu0  ;;  %v3318_v45 = vsel %vm1778_vm9, %v3311_v18, %v3317_v26  ;;  %v3213_v7 = vpop.permute.xlu1 %3212  ;;  %v17152_v51 = vld [vmem:[%s23894_s3 + $0x10] sm:$0xff]  }
 0x303   : > { %14738 = vmatprep.subr.bf16.mxu0 %v17149_v44  ;;  %v14368_v21 = vpop.f32.mrb[76].mxu1  ;;  %v14420_v46 = vpop.f32.mrb[85].mxu0  ;;  %3353 = vst [vmem:[#allocation3 + $0x258] sm:$0xff] %v3318_v45  ;;  %v3276_v63 = vsel %vm389_vm1, %v3163_v53, %v3213_v7  ;;  %v17153_v53 = vld [vmem:[%s23894_s3 + $0x58] sm:$0xff]   ;;  %v5634_v7 = vrot.slane %v20614_v27, 4 }
 0x304   : > { %15750 = vmatmul.mubr.msk.bf16.gmra.mrb[96].mxu1 %vm389_vm1, %v4701_v48  ;;  %v3320_v24 = vsel %vm1778_vm9, %v3313_v36, %v3319_v57  ;;  %v14369_v18 = vpop.f32.mrb[77].mxu1  ;;  %v14421_v14 = vadd.f32 %v14420_v46, %v14419_v23  ;;  %v14422_v48 = vpop.f32.mrb[86].mxu0  ;;  %v3323_v41 = vrot.slane %v3276_v63, 4 }
 0x305   : > { %15753 = vmatprep.mubr.msk.bf16.mxu1 %vm17595_vm0, %v24041_v22  ;;  %3354 = vst [vmem:[#allocation3 + $0x260] sm:$0xff] %v3320_v24  ;;  %v20706_v38 = vadd.f32 %v14369_v18, %v14368_v21  ;;  %v14371_v16 = vpop.f32.mrb[78].mxu1  ;;  %v14423_v44 = vpop.f32.mrb[87].mxu0 }
 0x306   : > { %14739 = vmatpush3.bf16.msra.mxu0 %v17150_v25  ;;  %v14372_v11 = vpop.f32.mrb[79].mxu1  ;;  %v20712_v50 = vadd.f32 %v14421_v14, %v20568_v55  ;;  %v14424_v36 = vadd.f32 %v14423_v44, %v14422_v48  ;;  %v3324_v6 = vsel %vm1778_vm9, %v3317_v26, %v3323_v41  ;;  %v3256_v37 = vpop.permute.xlu0 %3255  ;;  %v5629_v55 = vsel %vm1778_vm9, %v20399_v20, %v5628_v17  ;;  %v20737_v25 = vld [vmem:[#allocation3 + $0x100] sm:$0xff]  ;;  %v17154_v20 = vld [vmem:[%s23894_s3 + $0x18] sm:$0xff]  }
 0x307   : > { %14740 = vmatprep.subr.bf16.mxu0 %v17151_v8  ;;  %v20718_v13 = vadd.f32 %v14372_v11, %v14371_v16  ;;  %3356 = vst [vmem:[#allocation3 + $0x270] sm:$0xff] %v3324_v6  ;;  %v3291_v26 = vsel %vm389_vm1, %v3226_v2, %v3256_v37  ;;  %v20750_v45 = vrot.slane %v20737_v25, 4  ;;  %v4609_v6 = vld [vmem:[#allocation3 + $0x118] sm:$0xf] }
 0x308   : > { %v20735_v62 = vadd.f32 %v14424_v36, %v20573_v59  ;;  %v3325_v54 = vrot.slane %v3291_v26, 4  ;;  %v17155_v59 = vld [vmem:[%s23894_s3 + $0x60] sm:$0xff]  }
 0x309   : > { %5852 = vmatmul.mubr.bf16.gmra.mrb[192].mxu0 %v20426_v43  ;;  %v5626_v43 = vrot.slane %v20609_v28, 4  ;;  %v4713_v36 = vsel %vm1778_vm9, %v4706_v1, %v20750_v45  ;;  %v17159_v1 = vld [vmem:[%s23894_s3 + $0x28] sm:$0xff]  }
 0x30a   : > { %5859 = vmatprep.mubr.bf16.mxu0 %v5629_v55  ;;  %14741 = vmatpush3.bf16.msra.mxu0 %v17152_v51  ;;  %v14425_v52 = vpop.f32.mrb[88].mxu0  ;;  %v3326_v2 = vsel %vm1778_vm9, %v3319_v57, %v3325_v54  ;;  %v17157_v57 = vld [vmem:[%s23894_s3 + $0x20] sm:$0xff]   ;;  %v17158_v51 = vld [vmem:[%s23894_s3 + $0x68] sm:$0xff]  }
 0x30b   : > { %14742 = vmatprep.subr.bf16.mxu0 %v17153_v53  ;;  %v14374_v23 = vpop.f32.mrb[80].mxu1  ;;  %v14426_v8 = vpop.f32.mrb[89].mxu0  ;;  %3357 = vst [vmem:[#allocation3 + $0x278] sm:$0xff] %v3326_v2  ;;  %v5627_v44 = vsel %vm1778_vm9, %v20417_v35, %v5626_v43  ;;  %v20779_v53 = vld [vmem:[#allocation3 + $0x140] sm:$0xff]  ;;  %v17161_v2 = vld [vmem:[%s23894_s3 + $0x30] sm:$0xff]  }
 0x30c   : > { %15754 = vmatmul.mubr.msk.bf16.gmra.mrb[100].mxu1 %vm389_vm1, %v4707_v39  ;;  %v14375_v21 = vpop.f32.mrb[81].mxu1  ;;  %v14427_v46 = vadd.f32 %v14426_v8, %v14425_v52  ;;  %v14428_v24 = vpop.f32.mrb[90].mxu0  ;;  %v4718_v39 = vrot.slane %v4609_v6, 4  ;;  %v5640_v26 = vrot.slane %v20779_v53, 4 }
 0x30d   : > { %15757 = vmatprep.mubr.msk.bf16.mxu1 %vm17595_vm0, %v24041_v22  ;;  %v20753_v63 = vadd.f32 %v14375_v21, %v14374_v23  ;;  %v14377_v18 = vpop.f32.mrb[82].mxu1  ;;  %v14429_v14 = vpop.f32.mrb[91].mxu0  ;;  %v17162_v21 = vld [vmem:[%s23894_s3 + $0x78] sm:$0xff]  }
 0x30e   : > { %14743 = vmatpush3.bf16.msra.mxu0 %v17154_v20  ;;  %v14378_v48 = vpop.f32.mrb[83].mxu1  ;;  %v20759_v41 = vadd.f32 %v14427_v46, %v20628_v34  ;;  %v14430_v16 = vadd.f32 %v14429_v14, %v14428_v24  ;;  %v5635_v34 = vsel %vm1778_vm9, %v5628_v17, %v5634_v7  ;;  %v5632_v17 = vrot.slane %v20633_v60, 4  ;;  %v17163_v14 = vld [vmem:[%s23894_s3 + $0x38] sm:$0xff]  }
 0x30f   : > { %14744 = vmatprep.subr.bf16.mxu0 %v17155_v59  ;;  %v20766_v11 = vadd.f32 %v14378_v48, %v14377_v18  ;;  %v4719_v46 = vsel %vm1778_vm9, %v20750_v45, %v4718_v39  ;;  %v5641_v24 = vsel %vm1778_vm9, %v5634_v7, %v5640_v26  ;;  %v20804_v18 = vld [vmem:[#allocation3 + $0x138] sm:$0xff]  ;;  %v20833_v39 = vld [vmem:[#allocation3 + $0x150] sm:$0xff] }
 0x310   : > { %v20777_v35 = vadd.f32 %v14430_v16, %v20636_v32  ;;  %v17160_v32 = vld [vmem:[%s23894_s3 + $0x70] sm:$0xff]   ;;  %v5633_v8 = vsel %vm1778_vm9, %v5626_v43, %v5632_v17  ;;  %v20810_v43 = vld [vmem:[#allocation3 + $0x158] sm:$0xff]  ;;  %v5638_v7 = vrot.slane %v20804_v18, 4 }
 0x311   : > { %5860 = vmatmul.mubr.bf16.gmra.mrb[196].mxu0 %v5627_v44  ;;  %v20822_v16 = vrot.slane %v20810_v43, 4 }
 0x312   : > { %5867 = vmatprep.mubr.bf16.mxu0 %v5635_v34  ;;  %14745 = vmatpush3.bf16.msra.mxu0 %v17157_v57  ;;  %v14431_v37 = vpop.f32.mrb[92].mxu0 }
 0x313   : > { %14746 = vmatprep.subr.bf16.mxu0 %v17158_v51  ;;  %v14432_v55 = vpop.f32.mrb[93].mxu0 }
 0x314   : > { %15758 = vmatmul.mubr.msk.bf16.gmra.mrb[104].mxu1 %vm389_vm1, %v4713_v36  ;;  %v14433_v54 = vadd.f32 %v14432_v55, %v14431_v37  ;;  %v14434_v20 = vpop.f32.mrb[94].mxu0  ;;  %v17148_v36 = vld [vmem:[%s23894_s3 + $0x120] sm:$0xff]   ;;  %v5639_v37 = vsel %vm1778_vm9, %v5632_v17, %v5638_v7 }
 0x315   : > { %15761 = vmatprep.mubr.msk.bf16.mxu1 %vm17595_vm0, %v24041_v22  ;;  %v14435_v52 = vpop.f32.mrb[95].mxu0 }
 0x316   : > { %14747 = vmatpush3.bf16.msra.mxu0 %v17159_v1  ;;  %v20795_v59 = vadd.f32 %v14433_v54, %v20649_v10  ;;  %v14436_v23 = vadd.f32 %v14435_v52, %v14434_v20  ;;  %v5545_v54 = vld [vmem:[#allocation3 + $0x170] sm:$0xf] }
 0x317   : > { %14748 = vmatprep.subr.bf16.mxu0 %v17160_v32  ;;  %v5647_v32 = vsel %vm1778_vm9, %v5640_v26, %v20822_v16  ;;  %v20846_v26 = vrot.slane %v20833_v39, 4  ;;  %v5652_v20 = vrot.slane %v5545_v54, 4 }
 0x318   : > { %v20808_v10 = vadd.f32 %v14436_v23, %v20670_v5  ;;  %v17166_v5 = vld [vmem:[%s23894_s3 + $0x180] sm:$0xff]   ;;  %v17164_v23 = vld [vmem:[%s23894_s3 + $0x130] sm:$0xff]  }
 0x319   : > { %5868 = vmatmul.mubr.bf16.gmra.mrb[200].mxu0 %v5633_v8 }
 0x31a   : > { %5875 = vmatprep.mubr.bf16.mxu0 %v5641_v24  ;;  %14749 = vmatpush3.bf16.msra.mxu0 %v17161_v2  ;;  %v14437_v57 = vpop.f32.mrb[96].mxu0  ;;  %v5653_v24 = vsel %vm1778_vm9, %v20822_v16, %v5652_v20 }
 0x31b   : > { %14750 = vmatprep.subr.bf16.mxu0 %v17162_v21  ;;  %v14438_v48 = vpop.f32.mrb[97].mxu0 }
 0x31c   : > { %15762 = vmatmul.mubr.msk.bf16.gmra.mrb[108].mxu1 %vm389_vm1, %v4719_v46  ;;  %v14439_v44 = vadd.f32 %v14438_v48, %v14437_v57  ;;  %v14440_v51 = vpop.f32.mrb[98].mxu0  ;;  %v5645_v46 = vsel %vm1778_vm9, %v5638_v7, %v20846_v26 }
 0x31d   : > { %15773 = vmatprep.mubr.msk.bf16.mxu1 %vm17595_vm0, %v24041_v22  ;;  %v14441_v34 = vpop.f32.mrb[99].mxu0 }
 0x31e   : > { %14751 = vmatpush3.bf16.msra.mxu0 %v17163_v14  ;;  %v20828_v6 = vadd.f32 %v14439_v44, %v20706_v38  ;;  %v14442_v1 = vadd.f32 %v14441_v34, %v14440_v51  ;;  %v17156_v38 = vld [vmem:[%s23894_s3 + $0x128] sm:$0xff]  }
 0x31f   : > { %14805 = vmatprep.subr.bf16.mxu0 %v17166_v5  ;;  %v5544_v14 = vld [vmem:[#allocation3 + $0x168] sm:$0xf] }
 0x320   : > { %v20838_v55 = vadd.f32 %v14442_v1, %v20718_v13  ;;  %v5650_v5 = vrot.slane %v5544_v14, 4  ;;  %v5478_v1 = vld [vmem:[#allocation3 + $0xb0] sm:$0xff] }
 0x321   : > { %5876 = vmatmul.mubr.bf16.gmra.mrb[204].mxu0 %v5639_v37  ;;  %v17172_v14 = vld [vmem:[%s23894_s3 + $0x150] sm:$0xff]  }
 0x322   : > { %5883 = vmatprep.mubr.bf16.mxu0 %v5647_v32  ;;  %v14443_v17 = vpop.f32.mrb[100].mxu0  ;;  %v5651_v34 = vsel %vm1778_vm9, %v20846_v26, %v5650_v5  ;;  %v5480_v5 = vld [vmem:[#allocation3 + $0xc0] sm:$0xff] }
 0x324   : > { %15774 = vmatmul.mubr.msk.bf16.vlgmr.msra.gmra.mrb[84].mxu1 %vm389_vm1, %v20468_v15  ;;  %v14444_v15 = vpop.f32.mrb[101].mxu0 }
 0x325   : > { %15802 = vmatpush3.bf16.msra.mxu1 %v17148_v36  ;;  %15777 = vmatprep.mubr.msk.bf16.mxu1 %vm17595_vm0, %v24041_v22  ;;  %v14445_v13 = vadd.f32 %v14444_v15, %v14443_v17  ;;  %v14446_v52 = vpop.f32.mrb[102].mxu0  ;;  %v17167_v15 = vld [vmem:[%s23894_s3 + $0x140] sm:$0xff]  }
 0x326   : > { %15803 = vmatprep.subr.bf16.mxu1 %v24041_v22  ;;  %v14447_v2 = vpop.f32.mrb[103].mxu0 }
 0x327   : > { %v20853_v8 = vadd.f32 %v14445_v13, %v20753_v63  ;;  %v14448_v21 = vadd.f32 %v14447_v2, %v14446_v52  ;;  %v17165_v63 = vld [vmem:[%s23894_s3 + $0x138] sm:$0xff]   ;;  %v5477_v13 = vld [vmem:[#allocation3 + $0xa8] sm:$0xff] }
 0x328   : > { %v5481_v52 = vld [vmem:[#allocation3 + $0xc8] sm:$0xff] }
 0x329   : > { %15804 = vmatpush3.bf16.msra.mxu1 %v17156_v38  ;;  %5884 = vmatmul.mubr.bf16.gmra.mrb[208].mxu0 %v5645_v46  ;;  %v20863_v57 = vadd.f32 %v14448_v21, %v20766_v11  ;;  %v17171_v21 = vld [vmem:[%s23894_s3 + $0x190] sm:$0xff]  }
 0x32a   : > { %15805 = vmatprep.subr.bf16.mxu1 %v24041_v22  ;;  %5891 = vmatprep.mubr.bf16.mxu0 %v5653_v24 }
 0x32c   : > { %15778 = vmatmul.mubr.msk.bf16.gmra.mrb[88].mxu1 %vm389_vm1, %v20493_v9  ;;  %v14476_v7 = vpop.f32.mrb[104].mxu0 }
 0x32d   : > { %15781 = vmatprep.mubr.msk.bf16.mxu1 %vm17595_vm0, %v24041_v22  ;;  %15806 = vmatpush3.bf16.msra.mxu1 %v17164_v23  ;;  %v14477_v48 = vpop.f32.mrb[105].mxu0 }
 0x32e   : > { %15807 = vmatprep.subr.bf16.mxu1 %v24041_v22  ;;  %v14478_v44 = vadd.f32 %v14477_v48, %v14476_v7  ;;  %v14479_v51 = vpop.f32.mrb[106].mxu0  ;;  %v17173_v48 = vld [vmem:[%s23894_s3 + $0x198] sm:$0xff]  }
 0x32f   : > { %v14480_v9 = vpop.f32.mrb[107].mxu0 }
 0x330   : > { %v20872_v11 = vadd.f32 %v20631_v30, %v14478_v44  ;;  %v14481_v36 = vadd.f32 %v14480_v9, %v14479_v51  ;;  %v17175_v9 = vld [vmem:[%s23894_s3 + $0x1a0] sm:$0xff]  }
 0x331   : > { %15808 = vmatpush3.bf16.msra.mxu1 %v17165_v63  ;;  %5892 = vmatmul.mubr.bf16.gmra.mrb[212].mxu0 %v5651_v34 }
 0x332   : > { %15837 = vmatprep.subr.bf16.mxu1 %v24041_v22  ;;  %v20880_v37 = vadd.f32 %v20643_v0, %v14481_v36  ;;  %6162 = vmatprep.mubr.bf16.mxu0 %v5478_v1  ;;  %v17169_v0 = vld [vmem:[%s23894_s3 + $0x188] sm:$0xff]  }
 0x334   : > { %15782 = vmatmul.mubr.msk.bf16.gmra.mrb[92].mxu1 %vm389_vm1, %v20522_v12  ;;  %v14482_v30 = vpop.f32.mrb[108].mxu0 }
 0x335   : > { %15785 = vmatprep.mubr.msk.bf16.mxu1 %vm17595_vm0, %v24041_v22  ;;  %v14483_v32 = vpop.f32.mrb[109].mxu0 }
 0x336   : > { %v14484_v54 = vadd.f32 %v14483_v32, %v14482_v30  ;;  %v14485_v38 = vpop.f32.mrb[110].mxu0 }
 0x337   : > { %v14486_v17 = vpop.f32.mrb[111].mxu0 }
 0x338   : > { %v20888_v20 = vadd.f32 %v20663_v49, %v14484_v54  ;;  %v14487_v12 = vadd.f32 %v14486_v17, %v14485_v38  ;;  %v17170_v49 = vld [vmem:[%s23894_s3 + $0x148] sm:$0xff]   ;;  %v20938_v38 = vld [vmem:[#allocation3 + $0x118] sm:$0xff] }
 0x339   : > { %6163 = vmatmul.mubr.bf16.vlgmr.msra.gmra.mrb[216].mxu0 %v5477_v13  ;;  %v17178_v54 = vld [vmem:[%s23894_s3 + $0x1a8] sm:$0xff]   ;;  %v17566_v17 = vld [vmem:[#allocation3 + $0xd8] sm:$0xff]  ;;  %v17180_v13 = vld [vmem:[%s23894_s3 + $0x1b0] sm:$0xff]  }
 0x33a   : > { %v20896_v2 = vadd.f32 %v20680_v47, %v14487_v12  ;;  %6170 = vmatprep.mubr.bf16.mxu0 %v5481_v52  ;;  %14806 = vmatpush3.bf16.msra.mxu0 %v17167_v15 }
 0x33b   : > { %14807 = vmatprep.subr.bf16.mxu0 %v17169_v0 }
 0x33c   : > { %15786 = vmatmul.mubr.msk.bf16.gmra.mrb[96].mxu1 %vm389_vm1, %v20550_v56  ;;  %v14488_v23 = vpop.f32.mrb[112].mxu0 }
 0x33d   : > { %15789 = vmatprep.mubr.msk.bf16.mxu1 %vm17595_vm0, %v24041_v22  ;;  %v14489_v46 = vpop.f32.mrb[113].mxu0 }
 0x33e   : > { %v14490_v56 = vadd.f32 %v14489_v46, %v14488_v23  ;;  %v14491_v24 = vpop.f32.mrb[114].mxu0  ;;  %14808 = vmatpush3.bf16.msra.mxu0 %v17170_v49  ;;  %v17182_v46 = vld [vmem:[%s23894_s3 + $0x1b8] sm:$0xff]  }
 0x33f   : > { %v14492_v47 = vpop.f32.mrb[115].mxu0  ;;  %14809 = vmatprep.subr.bf16.mxu0 %v17171_v21 }
 0x340   : > { %v20910_v63 = vadd.f32 %v20712_v50, %v14490_v56  ;;  %v14493_v7 = vadd.f32 %v14492_v47, %v14491_v24  ;;  %v17174_v50 = vld [vmem:[%s23894_s3 + $0x158] sm:$0xff]   ;;  %v20963_v56 = vld [vmem:[#allocation3 + $0x130] sm:$0xff] }
 0x341   : > { %6171 = vmatmul.mubr.bf16.gmra.mrb[220].mxu0 %v5480_v5  ;;  %v5540_v47 = vld [vmem:[#allocation3 + $0xd0] sm:$0xf0] }
 0x342   : > { %v20918_v44 = vadd.f32 %v20735_v62, %v14493_v7  ;;  %6178 = vmatprep.mubr.bf16.mxu0 %v20618_v42  ;;  %14810 = vmatpush3.bf16.msra.mxu0 %v17172_v14  ;;  %v17177_v42 = vld [vmem:[%s23894_s3 + $0x160] sm:$0xff]   ;;  %v17183_v14 = vld [vmem:[%s23894_s3 + $0x178] sm:$0xff]   ;;  %v5617_v7 = vrot.slane %v5540_v47, 4 }
 0x343   : > { %14811 = vmatprep.subr.bf16.mxu0 %v17173_v48 }
 0x344   : > { %15790 = vmatmul.mubr.msk.bf16.gmra.mrb[100].mxu1 %vm389_vm1, %v20737_v25  ;;  %v14494_v51 = vpop.f32.mrb[116].mxu0 }
 0x345   : > { %15793 = vmatprep.mubr.msk.bf16.mxu1 %vm17595_vm0, %v24041_v22  ;;  %v14495_v36 = vpop.f32.mrb[117].mxu0 }
 0x346   : > { %v14496_v34 = vadd.f32 %v14495_v36, %v14494_v51  ;;  %v14497_v62 = vpop.f32.mrb[118].mxu0  ;;  %14812 = vmatpush3.bf16.msra.mxu0 %v17174_v50  ;;  %v17168_v51 = vld [vmem:[%s23894_s3 + $0x80] sm:$0xff]  }
 0x347   : > { %v14498_v1 = vpop.f32.mrb[119].mxu0  ;;  %14813 = vmatprep.subr.bf16.mxu0 %v17175_v9 }
 0x348   : > { %v20933_v30 = vadd.f32 %v20759_v41, %v14496_v34  ;;  %v14499_v32 = vadd.f32 %v14498_v1, %v14497_v62  ;;  %v17179_v41 = vld [vmem:[%s23894_s3 + $0x168] sm:$0xff]  }
 0x349   : > { %6179 = vmatmul.mubr.bf16.gmra.mrb[224].mxu0 %v17566_v17 }
 0x34a   : > { %v20943_v15 = vadd.f32 %v20777_v35, %v14499_v32  ;;  %6186 = vmatprep.mubr.bf16.mxu0 %v20385_v58  ;;  %14814 = vmatpush3.bf16.msra.mxu0 %v17177_v42  ;;  %v17181_v58 = vld [vmem:[%s23894_s3 + $0x170] sm:$0xff]  }
 0x34b   : > { %14815 = vmatprep.subr.bf16.mxu0 %v17178_v54 }
 0x34c   : > { %15794 = vmatmul.mubr.msk.bf16.gmra.mrb[104].mxu1 %vm389_vm1, %v20938_v38  ;;  %v14500_v12 = vpop.f32.mrb[120].mxu0 }
 0x34d   : > { %15797 = vmatprep.mubr.msk.bf16.mxu1 %vm17595_vm0, %v24041_v22  ;;  %v14501_v0 = vpop.f32.mrb[121].mxu0 }
 0x34e   : > { %v14502_v52 = vadd.f32 %v14501_v0, %v14500_v12  ;;  %v14503_v35 = vpop.f32.mrb[122].mxu0  ;;  %14816 = vmatpush3.bf16.msra.mxu0 %v17179_v41  ;;  %v3257_v12 = vrot.slane %v19959_v29, 2  ;;  %v17185_v29 = vld [vmem:[%s23894_s3 + $0x98] sm:$0xff]  }
 0x34f   : > { %v14504_v49 = vpop.f32.mrb[123].mxu0  ;;  %14817 = vmatprep.subr.bf16.mxu0 %v17180_v13  ;;  %v3258_v13 = vrot.slane %v19973_v4, 2 }
 0x350   : > { %v20958_v23 = vadd.f32 %v20795_v59, %v14502_v52  ;;  %v14505_v21 = vadd.f32 %v14504_v49, %v14503_v35  ;;  %v20972_v59 = vld [vmem:[#allocation3 + $0xe8] sm:$0xff] }
 0x351   : > { %6187 = vmatmul.mubr.bf16.gmra.mrb[228].mxu0 %v20408_v19  ;;  %v3259_v35 = vsel %vm1162_vm3, %v3257_v12, %v3258_v13 }
 0x352   : > { %v20969_v24 = vadd.f32 %v20808_v10, %v14505_v21  ;;  %6194 = vmatprep.mubr.bf16.mxu0 %v20577_v61  ;;  %14818 = vmatpush3.bf16.msra.mxu0 %v17181_v58  ;;  %v17186_v10 = vld [vmem:[%s23894_s3 + $0x220] sm:$0xff]   ;;  %v5618_v61 = vrot.slane %v20972_v59, 4  ;;  %v3304_v21 = vrot.slane %v3259_v35, 4  ;;  %v21077_v35 = vld [vmem:[#allocation3 + $0x128] sm:$0xff] }
 0x353   : > { %14819 = vmatprep.subr.bf16.mxu0 %v17182_v46 }
 0x354   : > { %15798 = vmatmul.mubr.msk.bf16.gmra.mrb[108].mxu1 %vm389_vm1, %v20963_v56  ;;  %v14506_v19 = vpop.f32.mrb[124].mxu0  ;;  %v5619_v62 = vsel %vm1778_vm9, %v5617_v7, %v5618_v61  ;;  %v5625_v0 = vsel %vm1778_vm9, %v5618_v61, %v20750_v45  ;;  %3346 = vst.msk [vmem:[#allocation3 + $0x220] sm:$0xf0] %vm1823_vm8, %v3304_v21 }
 0x355   : > { %15809 = vmatprep.mubr.msk.bf16.mxu1 %vm17595_vm0, %v24041_v22  ;;  %v14507_v5 = vpop.f32.mrb[125].mxu0 }
 0x356   : > { %v14508_v48 = vadd.f32 %v14507_v5, %v14506_v19  ;;  %v14509_v50 = vpop.f32.mrb[126].mxu0  ;;  %14820 = vmatpush3.bf16.msra.mxu0 %v17183_v14 }
 0x357   : > { %v14510_v9 = vpop.f32.mrb[127].mxu0  ;;  %14874 = vmatprep.subr.bf16.mxu0 %v17186_v10  ;;  %v6309_v10 = vld [vmem:[#allocation3 + $0xf8] sm:$0xff] }
 0x358   : > { %v20987_v36 = vadd.f32 %v20828_v6, %v14508_v48  ;;  %v14511_v34 = vadd.f32 %v14510_v9, %v14509_v50  ;;  %v17176_v6 = vld [vmem:[%s23894_s3 + $0x88] sm:$0xff]   ;;  %v17187_v50 = vld [vmem:[%s23894_s3 + $0x1e0] sm:$0xff]   ;;  %v6308_v9 = vld [vmem:[#allocation3 + $0xf0] sm:$0xff] }
 0x359   : > { %6195 = vmatmul.mubr.bf16.gmra.mrb[232].mxu0 %v20609_v28 }
 0x35a   : > { %v20993_v1 = vadd.f32 %v20838_v55, %v14511_v34  ;;  %6202 = vmatprep.mubr.bf16.mxu0 %v20614_v27  ;;  %v17184_v27 = vld [vmem:[%s23894_s3 + $0x90] sm:$0xff]   ;;  %v17189_v34 = vld [vmem:[%s23894_s3 + $0x228] sm:$0xff]  }
 0x35c   : > { %15810 = vmatmul.mubr.msk.bf16.vlgmr.msra.gmra.mrb[112].mxu1 %vm389_vm1, %v5619_v62  ;;  %v14512_v42 = vpop.f32.mrb[128].mxu0 }
 0x35d   : > { %15838 = vmatpush3.bf16.msra.mxu1 %v17168_v51  ;;  %15813 = vmatprep.mubr.msk.bf16.mxu1 %vm17595_vm0, %v24041_v22  ;;  %v14513_v32 = vpop.f32.mrb[129].mxu0 }
 0x35e   : > { %15839 = vmatprep.subr.bf16.mxu1 %v24041_v22  ;;  %v14514_v28 = vadd.f32 %v14513_v32, %v14512_v42  ;;  %v14515_v54 = vpop.f32.mrb[130].mxu0  ;;  %v21049_v42 = vld [vmem:[#allocation3 + $0x148] sm:$0xff] }
 0x35f   : > { %v14516_v17 = vpop.f32.mrb[131].mxu0  ;;  %v5642_v33 = vrot.slane %v21049_v42, 4 }
 0x360   : > { %v21006_v55 = vadd.f32 %v20853_v8, %v14514_v28  ;;  %v14517_v41 = vadd.f32 %v14516_v17, %v14515_v54  ;;  %v17190_v28 = vld [vmem:[%s23894_s3 + $0x1e8] sm:$0xff]   ;;  %v17191_v17 = vld [vmem:[%s23894_s3 + $0x230] sm:$0xff]  }
 0x361   : > { %15840 = vmatpush3.bf16.msra.mxu1 %v17176_v6  ;;  %6203 = vmatmul.mubr.bf16.gmra.mrb[236].mxu0 %v20633_v60  ;;  %v5630_v60 = vrot.slane %v20938_v38, 4  ;;  %v6312_v6 = vld [vmem:[#allocation3 + $0x110] sm:$0xff] }
 0x362   : > { %15841 = vmatprep.subr.bf16.mxu1 %v24041_v22  ;;  %v21016_v52 = vadd.f32 %v20863_v57, %v14517_v41  ;;  %6210 = vmatprep.mubr.bf16.mxu0 %v20779_v53  ;;  %v3261_v57 = vsel %vm1162_vm3, %v3258_v13, %v3260_v3  ;;  %v5636_v3 = vrot.slane %v20963_v56, 4 }
 0x363   : > { %v3309_v14 = vrot.slane %v3261_v57, 4  ;;  %v5631_v19 = vsel %vm1778_vm9, %v20750_v45, %v5630_v60  ;;  %v21081_v57 = vld [vmem:[#allocation3 + $0x160] sm:$0xff] }
 0x364   : > { %15814 = vmatmul.mubr.msk.bf16.gmra.mrb[116].mxu1 %vm389_vm1, %v5625_v0  ;;  %v14545_v4 = vpop.f32.mrb[132].mxu0  ;;  %v5637_v62 = vsel %vm1778_vm9, %v5630_v60, %v5636_v3  ;;  %v17192_v0 = vld [vmem:[%s23894_s3 + $0x1f0] sm:$0xff]   ;;  %v17193_v60 = vld [vmem:[%s23894_s3 + $0x238] sm:$0xff]  }
 0x365   : > { %15817 = vmatprep.mubr.msk.bf16.mxu1 %vm17595_vm0, %v24041_v22  ;;  %15842 = vmatpush3.bf16.msra.mxu1 %v17184_v27  ;;  %v14546_v8 = vpop.f32.mrb[133].mxu0  ;;  %v3310_v61 = vsel %vm1778_vm9, %v3304_v21, %v3309_v14  ;;  %v3316_v32 = vsel %vm1778_vm9, %v3309_v14, %v3315_v31  ;;  %v5648_v21 = vrot.slane %v21081_v57, 4 }
 0x366   : > { %15843 = vmatprep.subr.bf16.mxu1 %v24041_v22  ;;  %v14547_v49 = vadd.f32 %v14546_v8, %v14545_v4  ;;  %v14548_v58 = vpop.f32.mrb[134].mxu0  ;;  %3349 = vst.msk [vmem:[#allocation3 + $0x238] sm:$0xff] %vm389_vm1, %v3310_v61  ;;  %3352 = vst.msk [vmem:[#allocation3 + $0x250] sm:$0xff] %vm389_vm1, %v3316_v32  ;;  %v6311_v4 = vld [vmem:[#allocation3 + $0x108] sm:$0xff]  ;;  %v17201_v32 = vld [vmem:[%s23894_s3 + $0x210] sm:$0xff]  }
 0x367   : > { %v14549_v46 = vpop.f32.mrb[135].mxu0  ;;  %v17198_v61 = vld [vmem:[%s23894_s3 + $0x248] sm:$0xff]  }
 0x368   : > { %v14550_v47 = vadd.f32 %v14549_v46, %v14548_v58  ;;  %v21065_v31 = vadd.f32 %v20872_v11, %v14547_v49  ;;  %v5643_v11 = vsel %vm1778_vm9, %v5636_v3, %v5642_v33  ;;  %v17195_v58 = vld [vmem:[%s23894_s3 + $0x240] sm:$0xff]  }
 0x369   : > { %15844 = vmatpush3.bf16.msra.mxu1 %v17185_v29  ;;  %6211 = vmatmul.mubr.bf16.gmra.mrb[240].mxu0 %v20804_v18 }
 0x36a   : > { %15873 = vmatprep.subr.bf16.mxu1 %v24041_v22  ;;  %6542 = vmatprep.mubr.bf16.mxu0 %v6309_v10  ;;  %v21074_v8 = vadd.f32 %v20880_v37, %v14550_v47  ;;  %v17194_v37 = vld [vmem:[%s23894_s3 + $0x1f8] sm:$0xff]  }
 0x36c   : > { %15818 = vmatmul.mubr.msk.bf16.gmra.mrb[120].mxu1 %vm389_vm1, %v5631_v19  ;;  %v14551_v40 = vpop.f32.mrb[136].mxu0 }
 0x36d   : > { %15821 = vmatprep.mubr.msk.bf16.mxu1 %vm17595_vm0, %v24041_v22  ;;  %v14552_v7 = vpop.f32.mrb[137].mxu0 }
 0x36e   : > { %v14553_v5 = vadd.f32 %v14552_v7, %v14551_v40  ;;  %v14554_v48 = vpop.f32.mrb[138].mxu0  ;;  %v17197_v40 = vld [vmem:[%s23894_s3 + $0x200] sm:$0xff]  }
 0x36f   : > { %v14555_v45 = vpop.f32.mrb[139].mxu0  ;;  %v21098_v7 = vld [vmem:[#allocation3 + $0x120] sm:$0xff] }
 0x370   : > { %v14556_v51 = vadd.f32 %v14555_v45, %v14554_v48  ;;  %v21093_v47 = vadd.f32 %v20888_v20, %v14553_v5  ;;  %v5649_v20 = vsel %vm1778_vm9, %v5642_v33, %v5648_v21  ;;  %v5546_v5 = vld [vmem:[#allocation3 + $0x178] sm:$0xf]  ;;  %v17199_v45 = vld [vmem:[%s23894_s3 + $0x208] sm:$0xff]  }
 0x371   : > { %6543 = vmatmul.mubr.bf16.vlgmr.msra.gmra.mrb[244].mxu0 %v6308_v9  ;;  %v17203_v33 = vld [vmem:[%s23894_s3 + $0x218] sm:$0xff]  }
 0x372   : > { %6550 = vmatprep.mubr.bf16.mxu0 %v6312_v6  ;;  %14875 = vmatpush3.bf16.msra.mxu0 %v17187_v50  ;;  %v21104_v48 = vadd.f32 %v20896_v2, %v14556_v51  ;;  %v17200_v2 = vld [vmem:[%s23894_s3 + $0x250] sm:$0xff]   ;;  %v5654_v51 = vrot.slane %v5546_v5, 4  ;;  %v6794_v5 = vrot.slane %v21077_v35, 4 }
 0x373   : > { %14876 = vmatprep.subr.bf16.mxu0 %v17189_v34 }
 0x374   : > { %15822 = vmatmul.mubr.msk.bf16.gmra.mrb[124].mxu1 %vm389_vm1, %v5637_v62  ;;  %v14557_v54 = vpop.f32.mrb[140].mxu0 }
 0x375   : > { %15825 = vmatprep.mubr.msk.bf16.mxu1 %vm17595_vm0, %v24041_v22  ;;  %v14558_v27 = vpop.f32.mrb[141].mxu0 }
 0x376   : > { %v14559_v41 = vadd.f32 %v14558_v27, %v14557_v54  ;;  %v14560_v12 = vpop.f32.mrb[142].mxu0  ;;  %14877 = vmatpush3.bf16.msra.mxu0 %v17190_v28  ;;  %v17202_v54 = vld [vmem:[%s23894_s3 + $0x258] sm:$0xff]  }
 0x377   : > { %v14561_v13 = vpop.f32.mrb[143].mxu0  ;;  %14878 = vmatprep.subr.bf16.mxu0 %v17191_v17 }
 0x378   : > { %v14562_v29 = vadd.f32 %v14561_v13, %v14560_v12  ;;  %v21119_v34 = vadd.f32 %v20910_v63, %v14559_v41  ;;  %v5655_v63 = vsel %vm1778_vm9, %v5648_v21, %v5654_v51  ;;  %v17188_v13 = vld [vmem:[%s23894_s3 + $0x1c0] sm:$0xff]  }
 0x379   : > { %6551 = vmatmul.mubr.bf16.gmra.mrb[248].mxu0 %v6311_v4 }
 0x37a   : > { %6558 = vmatprep.mubr.bf16.mxu0 %v21077_v35  ;;  %14879 = vmatpush3.bf16.msra.mxu0 %v17192_v0  ;;  %v21128_v17 = vadd.f32 %v20918_v44, %v14562_v29  ;;  %v17206_v44 = vld [vmem:[%s23894_s3 + $0x2c0] sm:$0xff]  }
 0x37b   : > { %14880 = vmatprep.subr.bf16.mxu0 %v17193_v60  ;;  %v5479_v60 = vld [vmem:[#allocation3 + $0xb8] sm:$0xff]  ;;  %v21202_v35 = vld [vmem:[#allocation3 + $0x140] sm:$0xff] }
 0x37c   : > { %15826 = vmatmul.mubr.msk.bf16.gmra.mrb[128].mxu1 %vm389_vm1, %v5643_v11  ;;  %v14563_v49 = vpop.f32.mrb[144].mxu0  ;;  %v21152_v11 = vld [vmem:[#allocation3 + $0x170] sm:$0xff] }
 0x37d   : > { %15829 = vmatprep.mubr.msk.bf16.mxu1 %vm17595_vm0, %v24041_v22  ;;  %v14564_v46 = vpop.f32.mrb[145].mxu0 }
 0x37e   : > { %v14565_v14 = vadd.f32 %v14564_v46, %v14563_v49  ;;  %v14566_v19 = vpop.f32.mrb[146].mxu0  ;;  %14881 = vmatpush3.bf16.msra.mxu0 %v17194_v37  ;;  %v17204_v46 = vld [vmem:[%s23894_s3 + $0x1d0] sm:$0xff]  }
 0x37f   : > { %v14567_v10 = vpop.f32.mrb[147].mxu0  ;;  %14882 = vmatprep.subr.bf16.mxu0 %v17195_v58 }
 0x380   : > { %v14568_v3 = vadd.f32 %v14567_v10, %v14566_v19  ;;  %v21168_v19 = vld [vmem:[#allocation3 + $0x168] sm:$0xff] }
 0x381   : > { %6559 = vmatmul.mubr.bf16.gmra.mrb[252].mxu0 %v21098_v7 }
 0x382   : > { %6566 = vmatprep.mubr.bf16.mxu0 %v20779_v53  ;;  %14883 = vmatpush3.bf16.msra.mxu0 %v17197_v40  ;;  %v21149_v4 = vadd.f32 %v20943_v15, %v14568_v3  ;;  %v5482_v40 = vld [vmem:[#allocation3 + $0xd0] sm:$0xff]  ;;  %v17205_v3 = vld [vmem:[%s23894_s3 + $0x1d8] sm:$0xff]  }
 0x383   : > { %14884 = vmatprep.subr.bf16.mxu0 %v17198_v61 }
 0x384   : > { %15830 = vmatmul.mubr.msk.bf16.gmra.mrb[132].mxu1 %vm389_vm1, %v5649_v20  ;;  %v14569_v50 = vpop.f32.mrb[148].mxu0 }
 0x385   : > { %15833 = vmatprep.mubr.msk.bf16.mxu1 %vm17595_vm0, %v24041_v22  ;;  %v14570_v9 = vpop.f32.mrb[149].mxu0 }
 0x386   : > { %v14571_v53 = vadd.f32 %v14570_v9, %v14569_v50  ;;  %v14572_v62 = vpop.f32.mrb[150].mxu0  ;;  %14885 = vmatpush3.bf16.msra.mxu0 %v17199_v45 }
 0x387   : > { %v14573_v6 = vpop.f32.mrb[151].mxu0  ;;  %14886 = vmatprep.subr.bf16.mxu0 %v17200_v2 }
 0x388   : > { %v14574_v28 = vadd.f32 %v14573_v6, %v14572_v62  ;;  %v21189_v62 = vld [vmem:[#allocation3 + $0x180] sm:$0xff] }
 0x389   : > { %6567 = vmatmul.mubr.bf16.gmra.mrb[0].mxu0 %v20804_v18  ;;  %v21143_v18 = vadd.f32 %v20933_v30, %v14565_v14  ;;  %v17196_v30 = vld [vmem:[%s23894_s3 + $0x1c8] sm:$0xff]  }
 0x38a   : > { %6574 = vmatprep.mubr.bf16.mxu0 %v20810_v43  ;;  %14887 = vmatpush3.bf16.msra.mxu0 %v17201_v32  ;;  %v21172_v10 = vadd.f32 %v20969_v24, %v14574_v28  ;;  %v6703_v24 = vld [vmem:[#allocation3 + $0x110] sm:$0xf0] }
 0x38b   : > { %14888 = vmatprep.subr.bf16.mxu0 %v17202_v54  ;;  %v6793_v9 = vrot.slane %v6703_v24, 4 }
 0x38c   : > { %15834 = vmatmul.mubr.msk.bf16.gmra.mrb[136].mxu1 %vm389_vm1, %v5655_v63  ;;  %v14575_v27 = vpop.f32.mrb[152].mxu0 }
 0x38d   : > { %15845 = vmatprep.mubr.msk.bf16.mxu1 %vm17595_vm0, %v24041_v22  ;;  %v14576_v41 = vpop.f32.mrb[153].mxu0 }
 0x38e   : > { %v14577_v12 = vadd.f32 %v14576_v41, %v14575_v27  ;;  %v14578_v43 = vpop.f32.mrb[154].mxu0  ;;  %14889 = vmatpush3.bf16.msra.mxu0 %v17203_v33  ;;  %v6801_v33 = vrot.slane %v21202_v35, 4 }
 0x38f   : > { %v14579_v0 = vpop.f32.mrb[155].mxu0  ;;  %14943 = vmatprep.subr.bf16.mxu0 %v17206_v44 }
 0x390   : > { %v14580_v29 = vadd.f32 %v14579_v0, %v14578_v43  ;;  %v21187_v45 = vadd.f32 %v20987_v36, %v14577_v12  ;;  %v6795_v36 = vsel %vm1778_vm9, %v6793_v9, %v6794_v5 }
 0x391   : > { %6575 = vmatmul.mubr.bf16.gmra.mrb[4].mxu0 %v20833_v39  ;;  %v21163_v39 = vadd.f32 %v20958_v23, %v14571_v53  ;;  %v21175_v23 = vld [vmem:[#allocation3 + $0x188] sm:$0xff] }
 0x392   : > { %6582 = vmatprep.mubr.bf16.mxu0 %v21152_v11  ;;  %v21196_v32 = vadd.f32 %v20993_v1, %v14580_v29  ;;  %v6791_v1 = vrot.slane %v21098_v7, 4  ;;  %v17209_v7 = vld [vmem:[%s23894_s3 + $0x2c8] sm:$0xff]   ;;  %v6802_v29 = vsel %vm1778_vm9, %v6794_v5, %v6801_v33  ;;  %v17215_v5 = vld [vmem:[%s23894_s3 + $0x2e0] sm:$0xff]  }
 0x394   : > { %15846 = vmatmul.mubr.msk.bf16.vlgmr.msra.gmra.mrb[112].mxu1 %vm389_vm1, %v5479_v60  ;;  %v14581_v37 = vpop.f32.mrb[156].mxu0  ;;  %v21228_v60 = vld [vmem:[#allocation3 + $0x138] sm:$0xff] }
 0x395   : > { %15874 = vmatpush3.bf16.msra.mxu1 %v17188_v13  ;;  %15849 = vmatprep.mubr.msk.bf16.mxu1 %vm17595_vm0, %v24041_v22  ;;  %v14582_v15 = vpop.f32.mrb[157].mxu0 }
 0x396   : > { %15875 = vmatprep.subr.bf16.mxu1 %v24041_v22  ;;  %v14583_v49 = vadd.f32 %v14582_v15, %v14581_v37  ;;  %v14584_v58 = vpop.f32.mrb[158].mxu0  ;;  %v6799_v37 = vrot.slane %v21228_v60, 4 }
 0x397   : > { %v14585_v21 = vpop.f32.mrb[159].mxu0 }
 0x398   : > { %v14586_v14 = vadd.f32 %v14585_v21, %v14584_v58  ;;  %v21212_v27 = vadd.f32 %v21006_v55, %v14583_v49  ;;  %v17212_v21 = vld [vmem:[%s23894_s3 + $0x290] sm:$0xff]  }
 0x399   : > { %15876 = vmatpush3.bf16.msra.mxu1 %v17196_v30  ;;  %6583 = vmatmul.mubr.bf16.gmra.mrb[8].mxu0 %v21168_v19 }
 0x39a   : > { %15877 = vmatprep.subr.bf16.mxu1 %v24041_v22  ;;  %6590 = vmatprep.mubr.bf16.mxu0 %v21175_v23  ;;  %v21225_v55 = vadd.f32 %v21016_v52, %v14586_v14  ;;  %v17210_v52 = vld [vmem:[%s23894_s3 + $0x288] sm:$0xff]   ;;  %v6800_v14 = vsel %vm1778_vm9, %v6791_v1, %v6799_v37 }
 0x39c   : > { %15850 = vmatmul.mubr.msk.bf16.gmra.mrb[116].mxu1 %vm389_vm1, %v5482_v40  ;;  %v14614_v61 = vpop.f32.mrb[160].mxu0  ;;  %v17213_v40 = vld [vmem:[%s23894_s3 + $0x2d8] sm:$0xff]  }
 0x39d   : > { %15853 = vmatprep.mubr.msk.bf16.mxu1 %vm17595_vm0, %v24041_v22  ;;  %15878 = vmatpush3.bf16.msra.mxu1 %v17204_v46  ;;  %v14615_v20 = vpop.f32.mrb[161].mxu0 }
 0x39e   : > { %15879 = vmatprep.subr.bf16.mxu1 %v24041_v22  ;;  %v14616_v50 = vadd.f32 %v14615_v20, %v14614_v61  ;;  %v14617_v2 = vpop.f32.mrb[162].mxu0  ;;  %v6808_v61 = vsel %vm1778_vm9, %v6801_v33, %v20822_v16 }
 0x39f   : > { %v14618_v51 = vpop.f32.mrb[163].mxu0 }
 0x3a0   : > { %v14619_v53 = vadd.f32 %v14618_v51, %v14617_v2  ;;  %v21193_v6 = vadd.f32 %v21065_v31, %v14616_v50  ;;  %v6702_v31 = vld [vmem:[#allocation3 + $0x108] sm:$0xf0]  ;;  %v6813_v2 = vrot.slane %v21152_v11, 4 }
 0x3a1   : > { %15880 = vmatpush3.bf16.msra.mxu1 %v17205_v3  ;;  %6591 = vmatmul.mubr.bf16.gmra.mrb[12].mxu0 %v21189_v62  ;;  %v6790_v41 = vrot.slane %v6702_v31, 4  ;;  %v6806_v31 = vsel %vm1778_vm9, %v6799_v37, %v20846_v26 }
 0x3a2   : > { %15909 = vmatprep.subr.bf16.mxu1 %v24041_v22  ;;  %7022 = vmatprep.mubr.bf16.mxu0 %v6795_v36  ;;  %v21205_v28 = vadd.f32 %v21074_v8, %v14619_v53  ;;  %v17207_v8 = vld [vmem:[%s23894_s3 + $0x280] sm:$0xff]  }
 0x3a3   : > { %v6792_v13 = vsel %vm1778_vm9, %v6790_v41, %v6791_v1  ;;  %v17217_v53 = vld [vmem:[%s23894_s3 + $0x2a0] sm:$0xff]  }
 0x3a4   : > { %15854 = vmatmul.mubr.msk.bf16.gmra.mrb[120].mxu1 %vm389_vm1, %v20972_v59  ;;  %v14620_v54 = vpop.f32.mrb[164].mxu0 }
 0x3a5   : > { %15857 = vmatprep.mubr.msk.bf16.mxu1 %vm17595_vm0, %v24041_v22  ;;  %v14621_v63 = vpop.f32.mrb[165].mxu0 }
 0x3a6   : > { %v14622_v59 = vadd.f32 %v14621_v63, %v14620_v54  ;;  %v14623_v44 = vpop.f32.mrb[166].mxu0  ;;  %v17218_v54 = vld [vmem:[%s23894_s3 + $0x2e8] sm:$0xff]   ;;  %v6814_v63 = vsel %vm1778_vm9, %v20822_v16, %v6813_v2  ;;  %v17220_v16 = vld [vmem:[%s23894_s3 + $0x2f0] sm:$0xff]  }
 0x3a7   : > { %v14624_v12 = vpop.f32.mrb[167].mxu0 }
 0x3a8   : > { %v14625_v43 = vadd.f32 %v14624_v12, %v14623_v44  ;;  %v21222_v0 = vadd.f32 %v21093_v47, %v14622_v59  ;;  %v6811_v44 = vrot.slane %v21168_v19, 4 }
 0x3a9   : > { %7023 = vmatmul.mubr.bf16.vlgmr.msra.gmra.mrb[16].mxu0 %v6792_v13  ;;  %v17221_v13 = vld [vmem:[%s23894_s3 + $0x2b0] sm:$0xff]  }
 0x3aa   : > { %7030 = vmatprep.mubr.bf16.mxu0 %v6802_v29  ;;  %v21233_v30 = vadd.f32 %v21104_v48, %v14625_v43  ;;  %14944 = vmatpush3.bf16.msra.mxu0 %v17207_v8  ;;  %v6812_v29 = vsel %vm1778_vm9, %v20846_v26, %v6811_v44 }
 0x3ab   : > { %14945 = vmatprep.subr.bf16.mxu0 %v17209_v7 }
 0x3ac   : > { %15858 = vmatmul.mubr.msk.bf16.gmra.mrb[124].mxu1 %vm389_vm1, %v20737_v25  ;;  %v14626_v47 = vpop.f32.mrb[168].mxu0  ;;  %v17211_v25 = vld [vmem:[%s23894_s3 + $0x2d0] sm:$0xff]  }
 0x3ad   : > { %15861 = vmatprep.mubr.msk.bf16.mxu1 %vm17595_vm0, %v24041_v22  ;;  %v14627_v15 = vpop.f32.mrb[169].mxu0 }
 0x3ae   : > { %v14628_v49 = vadd.f32 %v14627_v15, %v14626_v47  ;;  %v14629_v48 = vpop.f32.mrb[170].mxu0  ;;  %14946 = vmatpush3.bf16.msra.mxu0 %v17210_v52  ;;  %v17222_v52 = vld [vmem:[%s23894_s3 + $0x2f8] sm:$0xff]  }
 0x3af   : > { %v14630_v58 = vpop.f32.mrb[171].mxu0  ;;  %14947 = vmatprep.subr.bf16.mxu0 %v17211_v25  ;;  %v21315_v25 = vld [vmem:[#allocation3 + $0x1a0] sm:$0xff] }
 0x3b0   : > { %v14631_v46 = vadd.f32 %v14630_v58, %v14629_v48  ;;  %v21252_v3 = vadd.f32 %v21119_v34, %v14628_v49  ;;  %v17214_v34 = vld [vmem:[%s23894_s3 + $0x298] sm:$0xff]   ;;  %v21326_v49 = vrot.slane %v21189_v62, 4  ;;  %v17226_v48 = vld [vmem:[%s23894_s3 + $0xe0] sm:$0xff]  }
 0x3b1   : > { %7031 = vmatmul.mubr.bf16.gmra.mrb[20].mxu0 %v6800_v14  ;;  %v17208_v14 = vld [vmem:[%s23894_s3 + $0x260] sm:$0xff]  }
 0x3b2   : > { %7038 = vmatprep.mubr.bf16.mxu0 %v6808_v61  ;;  %v21259_v24 = vadd.f32 %v21128_v17, %v14631_v46  ;;  %14948 = vmatpush3.bf16.msra.mxu0 %v17212_v21 }
 0x3b3   : > { %14949 = vmatprep.subr.bf16.mxu0 %v17213_v40 }
 0x3b4   : > { %15862 = vmatmul.mubr.msk.bf16.gmra.mrb[128].mxu1 %vm389_vm1, %v20938_v38  ;;  %v14632_v20 = vpop.f32.mrb[172].mxu0 }
 0x3b5   : > { %15865 = vmatprep.mubr.msk.bf16.mxu1 %vm17595_vm0, %v24041_v22  ;;  %v14633_v50 = vpop.f32.mrb[173].mxu0 }
 0x3b6   : > { %v14634_v51 = vadd.f32 %v14633_v50, %v14632_v20  ;;  %v14635_v17 = vpop.f32.mrb[174].mxu0  ;;  %14950 = vmatpush3.bf16.msra.mxu0 %v17214_v34  ;;  %v6818_v34 = vsel %vm1778_vm9, %v6811_v44, %v21326_v49 }
 0x3b7   : > { %v14636_v9 = vpop.f32.mrb[175].mxu0  ;;  %14951 = vmatprep.subr.bf16.mxu0 %v17215_v5  ;;  %v6310_v5 = vld [vmem:[#allocation3 + $0x100] sm:$0xff] }
 0x3b8   : > { %v14637_v36 = vadd.f32 %v14636_v9, %v14635_v17  ;;  %v21279_v1 = vadd.f32 %v21143_v18, %v14634_v51  ;;  %v17219_v18 = vld [vmem:[%s23894_s3 + $0x2a8] sm:$0xff]   ;;  %v6724_v51 = vld [vmem:[#allocation3 + $0x1b8] sm:$0xf] }
 0x3b9   : > { %7039 = vmatmul.mubr.bf16.gmra.mrb[24].mxu0 %v6806_v31  ;;  %v6831_v31 = vrot.slane %v6724_v51, 4 }
 0x3ba   : > { %7046 = vmatprep.mubr.bf16.mxu0 %v6814_v63  ;;  %v21286_v33 = vadd.f32 %v21149_v4, %v14637_v36  ;;  %14952 = vmatpush3.bf16.msra.mxu0 %v17217_v53  ;;  %v21298_v4 = vrot.slane %v21175_v23, 4 }
 0x3bb   : > { %14953 = vmatprep.subr.bf16.mxu0 %v17218_v54 }
 0x3bc   : > { %15866 = vmatmul.mubr.msk.bf16.gmra.mrb[132].mxu1 %vm389_vm1, %v20963_v56  ;;  %v14638_v59 = vpop.f32.mrb[176].mxu0  ;;  %v6820_v37 = vsel %vm1778_vm9, %v6813_v2, %v21298_v4  ;;  %v21347_v2 = vld [vmem:[#allocation3 + $0x198] sm:$0xff] }
 0x3bd   : > { %15869 = vmatprep.mubr.msk.bf16.mxu1 %vm17595_vm0, %v24041_v22  ;;  %v14639_v41 = vpop.f32.mrb[177].mxu0  ;;  %v21360_v53 = vrot.slane %v21347_v2, 4 }
 0x3be   : > { %v14640_v12 = vadd.f32 %v14639_v41, %v14638_v59  ;;  %v14641_v8 = vpop.f32.mrb[178].mxu0  ;;  %14954 = vmatpush3.bf16.msra.mxu0 %v17219_v18  ;;  %v17224_v18 = vld [vmem:[%s23894_s3 + $0x270] sm:$0xff]  }
 0x3bf   : > { %v14642_v43 = vpop.f32.mrb[179].mxu0  ;;  %14955 = vmatprep.subr.bf16.mxu0 %v17220_v16  ;;  %v21369_v44 = vsel %vm1778_vm9, %v21326_v49, %v21360_v53 }
 0x3c0   : > { %v14643_v7 = vadd.f32 %v14642_v43, %v14641_v8  ;;  %v21309_v47 = vadd.f32 %v21163_v39, %v14640_v12  ;;  %v17223_v39 = vld [vmem:[%s23894_s3 + $0x2b8] sm:$0xff]   ;;  %v6723_v12 = vld [vmem:[#allocation3 + $0x1b0] sm:$0xf] }
 0x3c1   : > { %7047 = vmatmul.mubr.bf16.gmra.mrb[28].mxu0 %v6812_v29 }
 0x3c2   : > { %7054 = vmatprep.mubr.bf16.mxu0 %v6820_v37  ;;  %v21318_v26 = vadd.f32 %v21172_v10, %v14643_v7  ;;  %14956 = vmatpush3.bf16.msra.mxu0 %v17221_v13  ;;  %v21332_v10 = vrot.slane %v21315_v25, 4  ;;  %v6829_v13 = vrot.slane %v6723_v12, 4 }
 0x3c3   : > { %14957 = vmatprep.subr.bf16.mxu0 %v17222_v52 }
 0x3c4   : > { %15870 = vmatmul.mubr.msk.bf16.gmra.mrb[136].mxu1 %vm389_vm1, %v21049_v42  ;;  %v14644_v15 = vpop.f32.mrb[180].mxu0  ;;  %v21345_v50 = vsel %vm1778_vm9, %v21298_v4, %v21332_v10  ;;  %v6832_v41 = vsel %vm1778_vm9, %v21332_v10, %v6831_v31  ;;  %v6830_v37 = vsel %vm1778_vm9, %v21360_v53, %v6829_v13  ;;  %v17233_v31 = vld [vmem:[%s23894_s3 + $0xf8] sm:$0xff]   ;;  %v17239_v13 = vld [vmem:[%s23894_s3 + $0xc8] sm:$0xff]  }
 0x3c5   : > { %15881 = vmatprep.mubr.msk.bf16.mxu1 %vm17595_vm0, %v24041_v22  ;;  %v14645_v58 = vpop.f32.mrb[181].mxu0 }
 0x3c6   : > { %v14646_v21 = vadd.f32 %v14645_v58, %v14644_v15  ;;  %v14647_v46 = vpop.f32.mrb[182].mxu0  ;;  %14958 = vmatpush3.bf16.msra.mxu0 %v17223_v39 }
 0x3c7   : > { %v14648_v40 = vpop.f32.mrb[183].mxu0  ;;  %15012 = vmatprep.subr.bf16.mxu0 %v17226_v48 }
 0x3c8   : > { %v14649_v61 = vadd.f32 %v14648_v40, %v14647_v46  ;;  %v21340_v20 = vadd.f32 %v21187_v45, %v14646_v21  ;;  %v17216_v45 = vld [vmem:[%s23894_s3 + $0x268] sm:$0xff]   ;;  %v17227_v46 = vld [vmem:[%s23894_s3 + $0xa0] sm:$0xff]  }
 0x3c9   : > { %7055 = vmatmul.mubr.bf16.gmra.mrb[32].mxu0 %v6818_v34  ;;  %v17230_v40 = vld [vmem:[%s23894_s3 + $0xa8] sm:$0xff]   ;;  %v17231_v34 = vld [vmem:[%s23894_s3 + $0xf0] sm:$0xff]  }
 0x3ca   : > { %7062 = vmatprep.mubr.bf16.mxu0 %v21345_v50  ;;  %v21352_v17 = vadd.f32 %v21196_v32, %v14649_v61 }
 0x3cc   : > { %15882 = vmatmul.mubr.msk.bf16.vlgmr.msra.gmra.mrb[112].mxu1 %vm389_vm1, %v6310_v5  ;;  %v14650_v9 = vpop.f32.mrb[184].mxu0 }
 0x3cd   : > { %15910 = vmatpush3.bf16.msra.mxu1 %v17208_v14  ;;  %15885 = vmatprep.mubr.msk.bf16.mxu1 %vm17595_vm0, %v24041_v22  ;;  %v14651_v36 = vpop.f32.mrb[185].mxu0 }
 0x3ce   : > { %15911 = vmatprep.subr.bf16.mxu1 %v24041_v22  ;;  %v14652_v54 = vadd.f32 %v14651_v36, %v14650_v9  ;;  %v14653_v63 = vpop.f32.mrb[186].mxu0  ;;  %v7185_v36 = vld [vmem:[#allocation3 + $0x150] sm:$0xff] }
 0x3cf   : > { %v14654_v32 = vpop.f32.mrb[187].mxu0 }
 0x3d0   : > { %v14655_v59 = vadd.f32 %v14654_v32, %v14653_v63  ;;  %v21373_v16 = vadd.f32 %v21212_v27, %v14652_v54  ;;  %v17225_v27 = vld [vmem:[%s23894_s3 + $0x278] sm:$0xff]   ;;  %v17235_v32 = vld [vmem:[%s23894_s3 + $0x100] sm:$0xff]  }
 0x3d1   : > { %15912 = vmatpush3.bf16.msra.mxu1 %v17216_v45  ;;  %7063 = vmatmul.mubr.bf16.gmra.mrb[36].mxu0 %v21369_v44  ;;  %v17232_v45 = vld [vmem:[%s23894_s3 + $0xb0] sm:$0xff]   ;;  %v17234_v54 = vld [vmem:[%s23894_s3 + $0xb8] sm:$0xff]  }
 0x3d2   : > { %15913 = vmatprep.subr.bf16.mxu1 %v24041_v22  ;;  %7070 = vmatprep.mubr.bf16.mxu0 %v6832_v41  ;;  %v21381_v8 = vadd.f32 %v21225_v55, %v14655_v59 }
 0x3d4   : > { %15886 = vmatmul.mubr.msk.bf16.gmra.mrb[116].mxu1 %vm389_vm1, %v20938_v38  ;;  %v14683_v43 = vpop.f32.mrb[188].mxu0 }
 0x3d5   : > { %15889 = vmatprep.mubr.msk.bf16.mxu1 %vm17595_vm0, %v24041_v22  ;;  %15914 = vmatpush3.bf16.msra.mxu1 %v17224_v18  ;;  %v14684_v7 = vpop.f32.mrb[189].mxu0 }
 0x3d6   : > { %15915 = vmatprep.subr.bf16.mxu1 %v24041_v22  ;;  %v21389_v29 = vadd.f32 %v14684_v7, %v14683_v43  ;;  %v14686_v38 = vpop.f32.mrb[190].mxu0  ;;  %v21453_v43 = vld [vmem:[#allocation3 + $0x178] sm:$0xff] }
 0x3d7   : > { %v14687_v52 = vpop.f32.mrb[191].mxu0 }
 0x3d8   : > { %v21391_v55 = vadd.f32 %v14687_v52, %v14686_v38  ;;  %v17240_v38 = vld [vmem:[%s23894_s3 + $0x110] sm:$0xff]  }
 0x3d9   : > { %15916 = vmatpush3.bf16.msra.mxu1 %v17225_v27  ;;  %7071 = vmatmul.mubr.bf16.gmra.mrb[40].mxu0 %v6830_v37  ;;  %v17238_v27 = vld [vmem:[%s23894_s3 + $0x108] sm:$0xff]  }
 0x3da   : > { %15945 = vmatprep.subr.bf16.mxu1 %v24041_v22  ;;  %7416 = vmatprep.mubr.bf16.mxu0 %v21202_v35  ;;  %v7186_v35 = vld [vmem:[#allocation3 + $0x158] sm:$0xff] }
 0x3dc   : > { %15890 = vmatmul.mubr.msk.bf16.gmra.mrb[120].mxu1 %vm389_vm1, %v20963_v56  ;;  %v14689_v39 = vpop.f32.mrb[192].mxu0  ;;  %v17229_v56 = vld [vmem:[%s23894_s3 + $0xe8] sm:$0xff]  }
 0x3dd   : > { %15893 = vmatprep.mubr.msk.bf16.mxu1 %vm17595_vm0, %v24041_v22  ;;  %v14690_v15 = vpop.f32.mrb[193].mxu0 }
 0x3de   : > { %v21401_v48 = vadd.f32 %v14690_v15, %v14689_v39  ;;  %v14692_v58 = vpop.f32.mrb[194].mxu0 }
 0x3df   : > { %v14693_v21 = vpop.f32.mrb[195].mxu0 }
 0x3e0   : > { %v21406_v14 = vadd.f32 %v14693_v21, %v14692_v58 }
 0x3e1   : > { %7417 = vmatmul.mubr.bf16.vlgmr.msra.gmra.mrb[44].mxu0 %v21228_v60 }
 0x3e2   : > { %7424 = vmatprep.mubr.bf16.mxu0 %v7186_v35  ;;  %15013 = vmatpush3.bf16.msra.mxu0 %v17227_v46  ;;  %v17241_v46 = vld [vmem:[%s23894_s3 + $0xd0] sm:$0xff]  }
 0x3e3   : > { %15014 = vmatprep.subr.bf16.mxu0 %v17229_v56 }
 0x3e4   : > { %15894 = vmatmul.mubr.msk.bf16.gmra.mrb[124].mxu1 %vm389_vm1, %v21049_v42  ;;  %v14695_v61 = vpop.f32.mrb[196].mxu0 }
 0x3e5   : > { %15897 = vmatprep.mubr.msk.bf16.mxu1 %vm17595_vm0, %v24041_v22  ;;  %v14696_v60 = vpop.f32.mrb[197].mxu0 }
 0x3e6   : > { %v21422_v5 = vadd.f32 %v14696_v60, %v14695_v61  ;;  %v14698_v51 = vpop.f32.mrb[198].mxu0  ;;  %15015 = vmatpush3.bf16.msra.mxu0 %v17230_v40  ;;  %v21480_v61 = vld [vmem:[#allocation3 + $0x190] sm:$0xff] }
 0x3e7   : > { %v14699_v42 = vpop.f32.mrb[199].mxu0  ;;  %15016 = vmatprep.subr.bf16.mxu0 %v17231_v34  ;;  %v17243_v34 = vld [vmem:[%s23894_s3 + $0xd8] sm:$0xff]  }
 0x3e8   : > { %v21427_v9 = vadd.f32 %v14699_v42, %v14698_v51  ;;  %v6704_v51 = vld [vmem:[#allocation3 + $0x118] sm:$0xf0] }
 0x3e9   : > { %7425 = vmatmul.mubr.bf16.gmra.mrb[48].mxu0 %v7185_v36 }
 0x3ea   : > { %7432 = vmatprep.mubr.bf16.mxu0 %v21152_v11  ;;  %15017 = vmatpush3.bf16.msra.mxu0 %v17232_v45  ;;  %v17237_v11 = vld [vmem:[%s23894_s3 + $0xc0] sm:$0xff]  }
 0x3eb   : > { %15018 = vmatprep.subr.bf16.mxu0 %v17233_v31 }
 0x3ec   : > { %15898 = vmatmul.mubr.msk.bf16.gmra.mrb[128].mxu1 %vm389_vm1, %v21081_v57  ;;  %v14701_v63 = vpop.f32.mrb[200].mxu0 }
 0x3ed   : > { %15901 = vmatprep.mubr.msk.bf16.mxu1 %vm17595_vm0, %v24041_v22  ;;  %v14702_v18 = vpop.f32.mrb[201].mxu0 }
 0x3ee   : > { %v21443_v59 = vadd.f32 %v14702_v18, %v14701_v63  ;;  %v14704_v57 = vpop.f32.mrb[202].mxu0  ;;  %15019 = vmatpush3.bf16.msra.mxu0 %v17234_v54  ;;  %v6796_v18 = vrot.slane %v6704_v51, 4  ;;  %v21536_v51 = vld [vmem:[#allocation3 + $0x1d0] sm:$0xff] }
 0x3ef   : > { %v14705_v41 = vpop.f32.mrb[203].mxu0  ;;  %15020 = vmatprep.subr.bf16.mxu0 %v17235_v32 }
 0x3f0   : > { %v21448_v12 = vadd.f32 %v14705_v41, %v14704_v57  ;;  %v17228_v57 = vld [vmem:[%s23894_s3 + $0x300] sm:$0xff]  }
 0x3f1   : > { %7433 = vmatmul.mubr.bf16.gmra.mrb[52].mxu0 %v21168_v19 }
 0x3f2   : > { %7440 = vmatprep.mubr.bf16.mxu0 %v21175_v23  ;;  %15021 = vmatpush3.bf16.msra.mxu0 %v17237_v11 }
 0x3f3   : > { %15022 = vmatprep.subr.bf16.mxu0 %v17238_v27 }
 0x3f4   : > { %15902 = vmatmul.mubr.msk.bf16.gmra.mrb[132].mxu1 %vm389_vm1, %v21453_v43  ;;  %v14707_v7 = vpop.f32.mrb[204].mxu0 }
 0x3f5   : > { %15905 = vmatprep.mubr.msk.bf16.mxu1 %vm17595_vm0, %v24041_v22  ;;  %v14708_v52 = vpop.f32.mrb[205].mxu0 }
 0x3f6   : > { %v21468_v39 = vadd.f32 %v14708_v52, %v14707_v7  ;;  %v14710_v15 = vpop.f32.mrb[206].mxu0  ;;  %15023 = vmatpush3.bf16.msra.mxu0 %v17239_v13  ;;  %v21507_v7 = vld [vmem:[#allocation3 + $0x1b8] sm:$0xff] }
 0x3f7   : > { %v5393_v19 = vpop.f32.mrb[84].mxu1  ;;  %v14711_v21 = vpop.f32.mrb[207].mxu0  ;;  %15024 = vmatprep.subr.bf16.mxu0 %v17240_v38  ;;  %v21512_v38 = vld [vmem:[#allocation3 + $0x148] sm:$0xff] }
 0x3f8   : > { %v16389_v37 = vadd.f32 %v21193_v6, %v5393_v19  ;;  %v15775_v23 = vpop.f32.mrb[85].mxu1  ;;  %v21475_v40 = vadd.f32 %v14711_v21, %v14710_v15  ;;  %v17242_v6 = vld [vmem:[%s23894_s3 + $0x118] sm:$0xff]   ;;  %v6803_v52 = vrot.slane %v21512_v38, 4 }
 0x3f9   : > { %v5396_v58 = vpop.f32.mrb[86].mxu1  ;;  %7441 = vmatmul.mubr.bf16.gmra.mrb[56].mxu0 %v21189_v62  ;;  %v17246_v62 = vld [vmem:[%s23894_s3 + $0x40] sm:$0xff]  }
 0x3fa   : > { %5463 = vst.msk [vmem:[#allocation4] sm:$0xff] %vm5462_vm10, %v16389_v37  ;;  %v16394_v56 = vadd.f32 %v21205_v28, %v5396_v58  ;;  %v15776_v35 = vpop.f32.mrb[87].mxu1  ;;  %7448 = vmatprep.mubr.bf16.mxu0 %v21315_v25  ;;  %v6707_v28 = vld [vmem:[#allocation3 + $0x130] sm:$0xff]  ;;  %15025 = vmatpush3.bf16.msra.mxu0 %v17241_v46 }
 0x3fb   : > { %15026 = vmatprep.subr.bf16.mxu0 %v17242_v6  ;;  %v6797_v45 = vrot.slane %v6707_v28, 4  ;;  %v17244_v35 = vld [vmem:[%s23894_s3 + $0x310] sm:$0xff]  }
 0x3fc   : > { %5464 = vst.msk [vmem:[#allocation4 + $0x8] sm:$0xff] %vm5462_vm10, %v16394_v56  ;;  %15906 = vmatmul.mubr.msk.bf16.gmra.mrb[136].mxu1 %vm389_vm1, %v21480_v61  ;;  %v14713_v60 = vpop.f32.mrb[208].mxu0 }
 0x3fd   : > { %15917 = vmatprep.mubr.msk.bf16.mxu1 %vm17595_vm0, %v24041_v22  ;;  %v14714_v36 = vpop.f32.mrb[209].mxu0 }
 0x3fe   : > { %v21496_v54 = vadd.f32 %v14714_v36, %v14713_v60  ;;  %v14716_v63 = vpop.f32.mrb[210].mxu0  ;;  %15027 = vmatpush3.bf16.msra.mxu0 %v17243_v34  ;;  %v21529_v34 = vld [vmem:[#allocation3 + $0x1b0] sm:$0xff]  ;;  %v6804_v60 = vsel %vm1778_vm9, %v6797_v45, %v6803_v52 }
 0x3ff   : > { %v5401_v42 = vpop.f32.mrb[88].mxu1  ;;  %v14717_v41 = vpop.f32.mrb[211].mxu0  ;;  %15081 = vmatprep.subr.bf16.mxu0 %v17246_v62  ;;  %v7652_v62 = vld [vmem:[#allocation3 + $0x170] sm:$0xf0] }
 0x400   : > { %v16399_v25 = vadd.f32 %v21222_v0, %v5401_v42  ;;  %v15779_v31 = vpop.f32.mrb[89].mxu1  ;;  %v21503_v13 = vadd.f32 %v14717_v41, %v14716_v63  ;;  %v6798_v0 = vsel %vm1778_vm9, %v6796_v18, %v6797_v45  ;;  %v17245_v42 = vld [vmem:[%s23894_s3 + $0x318] sm:$0xff]   ;;  %v7727_v63 = vrot.slane %v7652_v62, 4 }
 0x401   : > { %v5404_v32 = vpop.f32.mrb[90].mxu1  ;;  %7449 = vmatmul.mubr.bf16.gmra.mrb[60].mxu0 %v21347_v2 }
 0x402   : > { %5465 = vst.msk [vmem:[#allocation4 + $0x10] sm:$0xff] %vm5462_vm10, %v16399_v25  ;;  %v16404_v11 = vadd.f32 %v21233_v30, %v5404_v32  ;;  %v15780_v27 = vpop.f32.mrb[91].mxu1  ;;  %7456 = vmatprep.mubr.bf16.mxu0 %v21507_v7  ;;  %v17236_v30 = vld [vmem:[%s23894_s3 + $0x308] sm:$0xff]  }
 0x404   : > { %5466 = vst.msk [vmem:[#allocation4 + $0x18] sm:$0xff] %vm5462_vm10, %v16404_v11  ;;  %15918 = vmatmul.mubr.msk.bf16.vlgmr.msra.gmra.mrb[112].mxu1 %vm389_vm1, %v6798_v0  ;;  %v14719_v19 = vpop.f32.mrb[212].mxu0 }
 0x405   : > { %15946 = vmatpush3.bf16.msra.mxu1 %v17228_v57  ;;  %15921 = vmatprep.mubr.msk.bf16.mxu1 %vm17595_vm0, %v24041_v22  ;;  %v14720_v37 = vpop.f32.mrb[213].mxu0 }
 0x406   : > { %15947 = vmatprep.subr.bf16.mxu1 %v24041_v22  ;;  %v14722_v58 = vpop.f32.mrb[214].mxu0  ;;  %v21522_v21 = vadd.f32 %v14720_v37, %v14719_v19  ;;  %v21553_v19 = vld [vmem:[#allocation3 + $0x1c8] sm:$0xff] }
 0x407   : > { %v5409_v2 = vpop.f32.mrb[92].mxu1  ;;  %v14723_v56 = vpop.f32.mrb[215].mxu0 }
 0x408   : > { %v16409_v23 = vadd.f32 %v21252_v3, %v5409_v2  ;;  %v15783_v15 = vpop.f32.mrb[93].mxu1  ;;  %v21532_v3 = vadd.f32 %v14723_v56, %v14722_v58  ;;  %v7651_v2 = vld [vmem:[#allocation3 + $0x168] sm:$0xf0]  ;;  %v6815_v56 = vrot.slane %v21453_v43, 4 }
 0x409   : > { %v5412_v46 = vpop.f32.mrb[94].mxu1  ;;  %15948 = vmatpush3.bf16.msra.mxu1 %v17236_v30  ;;  %7457 = vmatmul.mubr.bf16.gmra.mrb[64].mxu0 %v21529_v34  ;;  %v7729_v15 = vsel %vm1778_vm9, %v7727_v63, %v21298_v4  ;;  %v9705_v4 = vld [vmem:[#allocation4 + $0x10] sm:$0xff] }
 0x40a   : > { %5467 = vst.msk [vmem:[#allocation4 + $0x20] sm:$0xff] %vm5462_vm10, %v16409_v23  ;;  %v16414_v6 = vadd.f32 %v21259_v24, %v5412_v46  ;;  %v15784_v28 = vpop.f32.mrb[95].mxu1  ;;  %15949 = vmatprep.subr.bf16.mxu1 %v24041_v22  ;;  %7464 = vmatprep.mubr.bf16.mxu0 %v21536_v51  ;;  %v21541_v24 = vld [vmem:[#allocation3 + $0x160] sm:$0xff] }
 0x40b   : > { %v6809_v25 = vrot.slane %v21541_v24, 4 }
 0x40c   : > { %5468 = vst.msk [vmem:[#allocation4 + $0x28] sm:$0xff] %vm5462_vm10, %v16414_v6  ;;  %15922 = vmatmul.mubr.msk.bf16.gmra.mrb[116].mxu1 %vm389_vm1, %v6804_v60  ;;  %v14752_v45 = vpop.f32.mrb[216].mxu0 }
 0x40d   : > { %15925 = vmatprep.mubr.msk.bf16.mxu1 %vm17595_vm0, %v24041_v22  ;;  %15950 = vmatpush3.bf16.msra.mxu1 %v17244_v35  ;;  %v14753_v31 = vpop.f32.mrb[217].mxu0  ;;  %v6810_v23 = vsel %vm1778_vm9, %v6803_v52, %v6809_v25 }
 0x40e   : > { %15951 = vmatprep.subr.bf16.mxu1 %v24041_v22  ;;  %v14755_v57 = vpop.f32.mrb[218].mxu0  ;;  %v14754_v41 = vadd.f32 %v14753_v31, %v14752_v45  ;;  %v9706_v31 = vld [vmem:[#allocation4 + $0x18] sm:$0xff] }
 0x40f   : > { %v5417_v36 = vpop.f32.mrb[96].mxu1  ;;  %v14756_v27 = vpop.f32.mrb[219].mxu0 }
 0x410   : > { %v16419_v32 = vadd.f32 %v21279_v1, %v5417_v36  ;;  %v15787_v18 = vpop.f32.mrb[97].mxu1  ;;  %v21557_v37 = vadd.f32 %v14754_v41, %v21389_v29  ;;  %v14757_v1 = vadd.f32 %v14756_v27, %v14755_v57  ;;  %v7724_v29 = vrot.slane %v7651_v2, 4 }
 0x411   : > { %v5420_v11 = vpop.f32.mrb[98].mxu1  ;;  %15952 = vmatpush3.bf16.msra.mxu1 %v17245_v42  ;;  %7465 = vmatmul.mubr.bf16.gmra.mrb[68].mxu0 %v21553_v19  ;;  %v6816_v27 = vsel %vm1778_vm9, %v6809_v25, %v6815_v56  ;;  %v17250_v25 = vld [vmem:[%s23894_s3 + $0x8] sm:$0xff]  }
 0x412   : > { %5469 = vst.msk [vmem:[#allocation4 + $0x30] sm:$0xff] %vm5462_vm10, %v16419_v32  ;;  %v16424_v0 = vadd.f32 %v21286_v33, %v5420_v11  ;;  %v15788_v30 = vpop.f32.mrb[99].mxu1  ;;  %15981 = vmatprep.subr.bf16.mxu1 %v24041_v22  ;;  %7956 = vmatprep.mubr.bf16.mxu0 %v7729_v15  ;;  %v21566_v33 = vadd.f32 %v14757_v1, %v21391_v55  ;;  %v17247_v32 = vld [vmem:[%s23894_s3] sm:$0xff]   ;;  %v17251_v15 = vld [vmem:[%s23894_s3 + $0x50] sm:$0xff]  }
 0x413   : > { %v21570_v58 = vld [vmem:[#allocation4 + $0x28] sm:$0xff]  ;;  %v7726_v36 = vsel %vm1778_vm9, %v7724_v29, %v21326_v49  ;;  %v17249_v49 = vld [vmem:[%s23894_s3 + $0x48] sm:$0xff]  }
 0x414   : > { %5470 = vst.msk [vmem:[#allocation4 + $0x38] sm:$0xff] %vm5462_vm10, %v16424_v0  ;;  %15926 = vmatmul.mubr.msk.bf16.gmra.mrb[120].mxu1 %vm389_vm1, %v6810_v23  ;;  %v14758_v52 = vpop.f32.mrb[220].mxu0  ;;  %v21575_v55 = vmax.f32 %v9705_v4, %v21570_v58  ;;  %v9707_v0 = vld [vmem:[#allocation4 + $0x20] sm:$0xff] }
 0x415   : > { %15929 = vmatprep.mubr.msk.bf16.mxu1 %vm17595_vm0, %v24041_v22  ;;  %v14759_v35 = vpop.f32.mrb[221].mxu0 }
 0x416   : > { %v14760_v60 = vadd.f32 %v14759_v35, %v14758_v52  ;;  %v14761_v62 = vpop.f32.mrb[222].mxu0  ;;  %v23983_v2 = vrot.slane %v21575_v55, 1  ;;  %v6821_v52 = vrot.slane %v21480_v61, 4  ;;  %v7741_v35 = vrot.slane %v21507_v7, 4 }
 0x417   : > { %v5425_v46 = vpop.f32.mrb[100].mxu1  ;;  %v14762_v45 = vpop.f32.mrb[223].mxu0 }
 0x418   : > { %v16429_v6 = vadd.f32 %v21309_v47, %v5425_v46  ;;  %v15791_v28 = vpop.f32.mrb[101].mxu1  ;;  %v21587_v57 = vadd.f32 %v14760_v60, %v21401_v48  ;;  %v14763_v41 = vadd.f32 %v14762_v45, %v14761_v62 }
 0x419   : > { %v5428_v42 = vpop.f32.mrb[102].mxu1  ;;  %v21579_v63 = vld [vmem:[#allocation4 + $0x30] sm:$0xff]  ;;  %7957 = vmatmul.mubr.bf16.vlgmr.msra.gmra.mrb[72].mxu0 %v7726_v36 }
 0x41a   : > { %5471 = vst.msk [vmem:[#allocation4 + $0x40] sm:$0xff] %vm5462_vm10, %v16429_v6  ;;  %v16434_v47 = vadd.f32 %v21318_v26, %v5428_v42  ;;  %v15792_v18 = vpop.f32.mrb[103].mxu1  ;;  %v9724_v11 = vmax.f32 %v9706_v31, %v21579_v63  ;;  %v21601_v26 = vadd.f32 %v14763_v41, %v21406_v14  ;;  %7964 = vmatprep.mubr.bf16.mxu0 %v21345_v50  ;;  %v21627_v42 = vld [vmem:[%s23895_s4] ss:$0 sm:$0xff] }
 0x41b   : > { %v21596_v30 = vld [vmem:[#allocation4 + $0x38] sm:$0xff]  ;;  %15082 = vmatpush3.bf16.msra.mxu0 %v17247_v32 }
 0x41c   : > { %5472 = vst.msk [vmem:[#allocation4 + $0x48] sm:$0xff] %vm5462_vm10, %v16434_v47  ;;  %15930 = vmatmul.mubr.msk.bf16.gmra.mrb[124].mxu1 %vm389_vm1, %v6816_v27  ;;  %v21605_v48 = vmax.f32 %v9707_v0, %v21596_v30  ;;  %v9754_v1 = vrot.slane %v9724_v11, 1  ;;  %v14764_v23 = vpop.f32.mrb[224].mxu0  ;;  %15083 = vmatprep.subr.bf16.mxu0 %v17249_v49  ;;  %v21638_v0 = vld [vmem:[#allocation3 + $0x1a8] sm:$0xff] }
 0x41d   : > { %15933 = vmatprep.mubr.msk.bf16.mxu1 %vm17595_vm0, %v24041_v22  ;;  %v14765_v46 = vpop.f32.mrb[225].mxu0 }
 0x41e   : > { %v9755_v14 = vsel %vm1122_vm2, %v23983_v2, %v9754_v1  ;;  %v9756_v50 = vrot.slane %v21605_v48, 1  ;;  %v14766_v60 = vadd.f32 %v14765_v46, %v14764_v23  ;;  %v14767_v62 = vpop.f32.mrb[226].mxu0  ;;  %v6822_v23 = vsel %vm1778_vm9, %v6815_v56, %v6821_v52  ;;  %v21824_v2 = vld [vmem:[#allocation3 + $0x1f8] sm:$0xff] }
 0x41f   : > { %v5433_v29 = vpop.f32.mrb[104].mxu1  ;;  %v9792_v4 = vmax.f32 %v21575_v55, %v9755_v14  ;;  %v14768_v31 = vpop.f32.mrb[227].mxu0  ;;  %15084 = vmatpush3.bf16.msra.mxu0 %v17250_v25 }
 0x420   : > { %v16439_v6 = vadd.f32 %v21340_v20, %v5433_v29  ;;  %v15795_v28 = vpop.f32.mrb[105].mxu1  ;;  %v9757_v45 = vsel %vm1122_vm2, %v9754_v1, %v9756_v50  ;;  %v17252_v20 = vld [vmem:[%s23894_s3 + $0x10] sm:$0xff]   ;;  %v14769_v27 = vadd.f32 %v14768_v31, %v14767_v62  ;;  %15085 = vmatprep.subr.bf16.mxu0 %v17251_v15  ;;  %v21646_v25 = vadd.f32 %v14766_v60, %v21422_v5 }
 0x421   : > { %v5436_v36 = vpop.f32.mrb[106].mxu1  ;;  %v21630_v32 = vld [vmem:[#allocation4 + $0x40] sm:$0xff]  ;;  %v9793_v47 = vmax.f32 %v9724_v11, %v9757_v45  ;;  %v9812_v18 = vadd.f32 %v21627_v42, %v9792_v4  ;;  %v17253_v11 = vld [vmem:[%s23894_s3 + $0x58] sm:$0xff]   ;;  %7965 = vmatmul.mubr.bf16.gmra.mrb[76].mxu0 %v21369_v44  ;;  %v7739_v15 = vrot.slane %v21529_v34, 4  ;;  %v17255_v28 = vld [vmem:[%s23894_s3 + $0x60] sm:$0xff]   ;;  %v7747_v45 = vrot.slane %v21536_v51, 4 }
 0x422   : > { %5473 = vst.msk [vmem:[#allocation4 + $0x50] sm:$0xff] %vm5462_vm10, %v16439_v6  ;;  %v16444_v41 = vadd.f32 %v21352_v17, %v5436_v36  ;;  %v15796_v49 = vpop.f32.mrb[107].mxu1  ;;  %v9726_v1 = vmax.f32 %v21570_v58, %v21630_v32  ;;  %v7742_v17 = vsel %vm1778_vm9, %v21332_v10, %v7741_v35  ;;  %v21666_v44 = vadd.f32 %v14769_v27, %v21427_v9  ;;  %v6725_v36 = vld [vmem:[#allocation3 + $0x1c0] sm:$0xf] }
 0x423   : > { %v21656_v58 = vld [vmem:[#allocation4 + $0x48] sm:$0xff]  ;;  %v9813_v14 = vadd.f32 %v21627_v42, %v9793_v47  ;;  %7972 = vmatprep.mubr.bf16.mxu0 %v7742_v17  ;;  %v21671_v10 = vrot.slane %v21638_v0, 4  ;;  %v9826_v29 = vmax.f32 %v9812_v18, 0.0  ;;  %15086 = vmatpush3.bf16.msra.mxu0 %v17252_v20  ;;  %v7740_v17 = vsel %vm1778_vm9, %v21360_v53, %v7739_v15 }
 0x424   : > { %5474 = vst.msk [vmem:[#allocation4 + $0x58] sm:$0xff] %vm5462_vm10, %v16444_v41  ;;  %15934 = vmatmul.mubr.msk.bf16.gmra.mrb[128].mxu1 %vm389_vm1, %v6822_v23  ;;  %v21663_v5 = vmax.f32 %v21579_v63, %v21656_v58  ;;  %v9758_v56 = vrot.slane %v9726_v1, 1  ;;  %v17254_v63 = vld [vmem:[%s23894_s3 + $0x18] sm:$0xff]   ;;  %v14770_v4 = vpop.f32.mrb[228].mxu0  ;;  %15087 = vmatprep.subr.bf16.mxu0 %v17253_v11 }
 0x425   : > { %15937 = vmatprep.mubr.msk.bf16.mxu1 %vm17595_vm0, %v24041_v22  ;;  %v9827_v46 = vmax.f32 %v9813_v14, 0.0  ;;  %v14771_v62 = vpop.f32.mrb[229].mxu0  ;;  %v6828_v11 = vsel %vm1778_vm9, %v6821_v52, %v21671_v10 }
 0x426   : > { %v9759_v6 = vsel %vm1122_vm2, %v9756_v50, %v9758_v56  ;;  %v9760_v9 = vrot.slane %v21663_v5, 1  ;;  %v14772_v50 = vadd.f32 %v14771_v62, %v14770_v4  ;;  %v14773_v41 = vpop.f32.mrb[230].mxu0  ;;  %v6833_v4 = vrot.slane %v6725_v36, 4 }
 0x427   : > { %v5441_v60 = vpop.f32.mrb[108].mxu1  ;;  %v9794_v31 = vmax.f32 %v21605_v48, %v9759_v6  ;;  %v21684_v47 = vpack.c.bf16 %v9827_v46, %v9826_v29  ;;  %v14774_v23 = vpop.f32.mrb[231].mxu0  ;;  %15088 = vmatpush3.bf16.msra.mxu0 %v17254_v63  ;;  %v7748_v63 = vsel %vm1778_vm9, %v7741_v35, %v7747_v45 }
 0x428   : > { %v16449_v18 = vadd.f32 %v21373_v16, %v5441_v60  ;;  %v15799_v20 = vpop.f32.mrb[109].mxu1  ;;  %v9761_v49 = vsel %vm1122_vm2, %v9758_v56, %v9760_v9  ;;  %v17257_v16 = vld [vmem:[%s23894_s3 + $0x20] sm:$0xff]   ;;  %v14775_v46 = vadd.f32 %v14774_v23, %v14773_v41  ;;  %15089 = vmatprep.subr.bf16.mxu0 %v17255_v28  ;;  %v21715_v62 = vadd.f32 %v14772_v50, %v21443_v59  ;;  %v21722_v28 = vld [vmem:[#allocation3 + $0x1e8] sm:$0xff] }
 0x429   : > { %v5444_v27 = vpop.f32.mrb[110].mxu1  ;;  %v9795_v48 = vmax.f32 %v9726_v1, %v9761_v49  ;;  %v9814_v14 = vadd.f32 %v21627_v42, %v9794_v31  ;;  %v21695_v29 = vld [vmem:[#allocation4 + $0x50] sm:$0xff]  ;;  %v17258_v1 = vld [vmem:[%s23894_s3 + $0x68] sm:$0xff]   ;;  %7973 = vmatmul.mubr.bf16.gmra.mrb[80].mxu0 %v7740_v17  ;;  %v9854_v60 = vshll.u32 %v21684_v47, 16  ;;  %v7745_v50 = vrot.slane %v21553_v19, 4  ;;  %v17260_v49 = vld [vmem:[%s23894_s3 + $0x70] sm:$0xff]  }
 0x42a   : > { %5475 = vst.msk [vmem:[#allocation4 + $0x60] sm:$0xff] %vm5462_vm10, %v16449_v18  ;;  %v16454_v52 = vadd.f32 %v21381_v8, %v5444_v27  ;;  %v15800_v56 = vpop.f32.mrb[111].mxu1  ;;  %v9728_v53 = vmax.f32 %v21596_v30, %v21695_v29  ;;  %7980 = vmatprep.mubr.bf16.mxu0 %v7748_v63  ;;  %v21725_v35 = vadd.f32 %v14775_v46, %v21448_v12  ;;  %v17259_v18 = vld [vmem:[%s23894_s3 + $0x28] sm:$0xff]   ;;  %v7753_v17 = vrot.slane %v21722_v28, 4 }
 0x42b   : > { %v9714_v6 = vld [vmem:[#allocation4 + $0x58] sm:$0xff]  ;;  %v9815_v8 = vadd.f32 %v21627_v42, %v9795_v48  ;;  %v9828_v31 = vmax.f32 %v9814_v14, 0.0  ;;  %15090 = vmatpush3.bf16.msra.mxu0 %v17257_v16  ;;  %v21742_v23 = vrot.slane %v9854_v60, 1  ;;  %v23982_v14 = vrot.slane %v21684_v47, 1 }
 0x42c   : > { %5476 = vst.msk [vmem:[#allocation4 + $0x68] sm:$0xff] %vm5462_vm10, %v16454_v52  ;;  %15938 = vmatmul.mubr.msk.bf16.gmra.mrb[132].mxu1 %vm389_vm1, %v6828_v11  ;;  %v21720_v30 = vmax.f32 %v21630_v32, %v9714_v6  ;;  %v9762_v36 = vrot.slane %v9728_v53, 1  ;;  %v14776_v20 = vpop.f32.mrb[232].mxu0  ;;  %v6834_v32 = vsel %vm1778_vm9, %v21671_v10, %v6833_v4  ;;  %15091 = vmatprep.subr.bf16.mxu0 %v17258_v1 }
 0x42d   : > { %15941 = vmatprep.mubr.msk.bf16.mxu1 %vm17595_vm0, %v24041_v22  ;;  %v9829_v59 = vmax.f32 %v9815_v8, 0.0  ;;  %v14777_v11 = vpop.f32.mrb[233].mxu0 }
 0x42e   : > { %v9763_v41 = vsel %vm1122_vm2, %v9760_v9, %v9762_v36  ;;  %v9764_v12 = vrot.slane %v21720_v30, 1  ;;  %v14779_v16 = vpop.f32.mrb[234].mxu0  ;;  %v9858_v9 = vshrl.u32 %v21684_v47, 16  ;;  %v14778_v56 = vadd.f32 %v14777_v11, %v14776_v20 }
 0x42f   : > { %v21740_v27 = vpack.c.bf16 %v9829_v59, %v9828_v31  ;;  %v9796_v48 = vmax.f32 %v21663_v5, %v9763_v41  ;;  %v14780_v1 = vpop.f32.mrb[235].mxu0  ;;  %15092 = vmatpush3.bf16.msra.mxu0 %v17259_v18  ;;  %v7746_v5 = vsel %vm1778_vm9, %v7739_v15, %v7745_v50  ;;  %v21769_v41 = vld [vmem:[#allocation3 + $0x1e0] sm:$0xff] }
 0x430   : > { %v9765_v52 = vsel %vm1122_vm2, %v9762_v36, %v9764_v12  ;;  %15093 = vmatprep.subr.bf16.mxu0 %v17260_v49  ;;  %v17261_v36 = vld [vmem:[%s23894_s3 + $0x30] sm:$0xff]   ;;  %v21762_v31 = vadd.f32 %v14778_v56, %v21468_v39  ;;  %v9860_v18 = vor.u32 %v9858_v9, %v21742_v23  ;;  %v17262_v49 = vld [vmem:[%s23894_s3 + $0x78] sm:$0xff]   ;;  %v7754_v39 = vsel %vm1778_vm9, %v7747_v45, %v7753_v17  ;;  %v21790_v56 = vld [vmem:[#allocation3 + $0x200] sm:$0xff] }
 0x431   : > { %v9925_v46 = vrot.slane %v21740_v27, 1  ;;  %v9862_v4 = vshll.u32 %v21740_v27, 16  ;;  %v9797_v63 = vmax.f32 %v9728_v53, %v9765_v52  ;;  %v9816_v6 = vadd.f32 %v21627_v42, %v9796_v48  ;;  %v9715_v8 = vld [vmem:[#allocation4 + $0x60] sm:$0xff]  ;;  %7981 = vmatmul.mubr.bf16.gmra.mrb[84].mxu0 %v7746_v5  ;;  %v17266_v5 = vld [vmem:[%s23894_s3 + $0x180] sm:$0xff]  }
 0x432   : > { %v9730_v60 = vmax.f32 %v21656_v58, %v9715_v8  ;;  %v14781_v53 = vadd.f32 %v14780_v1, %v14779_v16  ;;  %7988 = vmatprep.mubr.bf16.mxu0 %v7754_v39  ;;  %v17263_v1 = vld [vmem:[%s23894_s3 + $0x38] sm:$0xff]  }
 0x433   : > { %v9926_v59 = vsel %vm1122_vm2, %v23982_v14, %v9925_v46  ;;  %v9864_v20 = vrot.slane %v9862_v4, 1  ;;  %v9717_v15 = vld [vmem:[#allocation4 + $0x68] sm:$0xff]  ;;  %v9817_v58 = vadd.f32 %v21627_v42, %v9797_v63  ;;  %15094 = vmatpush3.bf16.msra.mxu0 %v17261_v36 }
 0x434   : > { %15942 = vmatmul.mubr.msk.bf16.gmra.mrb[136].mxu1 %vm389_vm1, %v6834_v32  ;;  %9937 = vrot.lane.b32.xlu1 %v9926_v59, %s17596_s23  ;;  %v21782_v11 = vmax.f32 %v21695_v29, %v9717_v15  ;;  %v9766_v48 = vrot.slane %v9730_v60, 1  ;;  %v21785_v16 = vadd.f32 %v14781_v53, %v21475_v40  ;;  %v9830_v32 = vmax.f32 %v9816_v6, 0.0  ;;  %v14782_v45 = vpop.f32.mrb[236].mxu0  ;;  %v17248_v15 = vld [vmem:[%s23894_s3 + $0x120] sm:$0xff]  }
 0x435   : > { %v9865_v9 = vsel %vm1274_vm5, %v9860_v18, %v9864_v20  ;;  %15953 = vmatprep.mubr.msk.bf16.mxu1 %vm17595_vm0, %v24041_v22  ;;  %v9831_v52 = vmax.f32 %v9817_v58, 0.0  ;;  %v7751_v29 = vrot.slane %v21769_v41, 4  ;;  %v14783_v6 = vpop.f32.mrb[237].mxu0  ;;  %15095 = vmatprep.subr.bf16.mxu0 %v17262_v49  ;;  %v7759_v59 = vrot.slane %v21790_v56, 4 }
 0x436   : > { %9903 = vrot.lane.b32.xlu0 %v9865_v9, %s17597_s30  ;;  %v9767_v4 = vsel %vm1122_vm2, %v9764_v12, %v9766_v48  ;;  %v9768_v40 = vrot.slane %v21782_v11, 1  ;;  %v14785_v53 = vpop.f32.mrb[238].mxu0  ;;  %v9866_v12 = vshrl.u32 %v21740_v27, 16  ;;  %v14784_v18 = vadd.f32 %v14783_v6, %v14782_v45 }
 0x437   : > { %v21799_v63 = vpack.c.bf16 %v9831_v52, %v9830_v32  ;;  %v9798_v8 = vmax.f32 %v21720_v30, %v9767_v4  ;;  %v14786_v49 = vpop.f32.mrb[239].mxu0  ;;  %v7752_v32 = vsel %vm1778_vm9, %v7745_v50, %v7751_v29  ;;  %15096 = vmatpush3.bf16.msra.mxu0 %v17263_v1 }
 0x438   : > { %v9769_v36 = vsel %vm1122_vm2, %v9766_v48, %v9768_v40  ;;  %v21820_v48 = vadd.f32 %v14784_v18, %v21496_v54  ;;  %v14787_v52 = vadd.f32 %v14786_v49, %v14785_v53  ;;  %v9868_v4 = vor.u32 %v9866_v12, %v9864_v20  ;;  %15150 = vmatprep.subr.bf16.mxu0 %v17266_v5  ;;  %v7658_v20 = vld [vmem:[#allocation3 + $0x218] sm:$0xf] }
 0x439   : > { %v9927_v30 = vrot.slane %v21799_v63, 1  ;;  %v9870_v58 = vshll.u32 %v21799_v63, 16  ;;  %v9799_v39 = vmax.f32 %v9730_v60, %v9769_v36  ;;  %v9818_v9 = vadd.f32 %v21627_v42, %v9798_v8  ;;  %7989 = vmatmul.mubr.bf16.gmra.mrb[88].mxu0 %v7752_v32 }
 0x43a   : > { %v7760_v54 = vsel %vm1778_vm9, %v7753_v17, %v7759_v59  ;;  %v21833_v50 = vadd.f32 %v14787_v52, %v21503_v13  ;;  %v7757_v13 = vrot.slane %v21824_v2, 4  ;;  %v7765_v53 = vrot.slane %v7658_v20, 4 }
 0x43b   : > { %v9928_v45 = vsel %vm1122_vm2, %v9925_v46, %v9927_v30  ;;  %v9872_v6 = vrot.slane %v9870_v58, 1  ;;  %v9819_v14 = vadd.f32 %v21627_v42, %v9799_v39  ;;  %7996 = vmatprep.mubr.bf16.mxu0 %v7760_v54  ;;  %v9832_v42 = vmax.f32 %v9818_v9, 0.0  ;;  %v17264_v39 = vld [vmem:[%s23894_s3 + $0x130] sm:$0xff]  }
 0x43c   : > { %15954 = vmatmul.mubr.msk.bf16.vlgmr.msra.gmra.mrb[112].mxu1 %vm389_vm1, %v21512_v38  ;;  %9939 = vrot.lane.b32.xlu0 %v9928_v45, %s17596_s23  ;;  %v17256_v38 = vld [vmem:[%s23894_s3 + $0x128] sm:$0xff]   ;;  %v14788_v17 = vpop.f32.mrb[240].mxu0  ;;  %v9874_v36 = vshrl.u32 %v21799_v63, 16  ;;  %v7758_v49 = vsel %vm1778_vm9, %v7751_v29, %v7757_v13  ;;  %v7766_v29 = vsel %vm1778_vm9, %v7759_v59, %v7765_v53 }
 0x43d   : > { %15982 = vmatpush3.bf16.msra.mxu1 %v17248_v15  ;;  %v9873_v46 = vsel %vm1274_vm5, %v9868_v4, %v9872_v6  ;;  %v9833_v60 = vmax.f32 %v9819_v14, 0.0  ;;  %15957 = vmatprep.mubr.msk.bf16.mxu1 %vm17595_vm0, %v24041_v22  ;;  %v14789_v8 = vpop.f32.mrb[241].mxu0  ;;  %v7657_v4 = vld [vmem:[#allocation3 + $0x210] sm:$0xf] }
 0x43e   : > { %9905 = vrot.lane.b32.xlu1 %v9873_v46, %s17597_s30  ;;  %15983 = vmatprep.subr.bf16.mxu1 %v24041_v22  ;;  %v14790_v5 = vadd.f32 %v14789_v8, %v14788_v17  ;;  %v14791_v14 = vpop.f32.mrb[242].mxu0  ;;  %v9876_v52 = vor.u32 %v9874_v36, %v9872_v6  ;;  %v7763_v6 = vrot.slane %v7657_v4, 4  ;;  %v7591_v17 = vld [vmem:[#allocation3 + $0x158] sm:$0xff]  ;;  %v17267_v36 = vld [vmem:[%s23894_s3 + $0x140] sm:$0xff]  }
 0x43f   : > { %v21843_v1 = vpack.c.bf16 %v9833_v60, %v9832_v42  ;;  %v14792_v15 = vpop.f32.mrb[243].mxu0 }
 0x440   : > { %v14793_v58 = vadd.f32 %v14792_v15, %v14791_v14  ;;  %v21855_v9 = vadd.f32 %v14790_v5, %v21522_v21  ;;  %v7764_v20 = vsel %vm1778_vm9, %v7757_v13, %v7763_v6  ;;  %v7590_v15 = vld [vmem:[#allocation3 + $0x150] sm:$0xff]  ;;  %v7593_v6 = vld [vmem:[#allocation3 + $0x168] sm:$0xff] }
 0x441   : > { %v23984_v12 = vrot.slane %v21843_v1, 1  ;;  %v9878_v18 = vshll.u32 %v21843_v1, 16  ;;  %15984 = vmatpush3.bf16.msra.mxu1 %v17256_v38  ;;  %7997 = vmatmul.mubr.bf16.gmra.mrb[92].mxu0 %v7758_v49 }
 0x442   : > { %15985 = vmatprep.subr.bf16.mxu1 %v24041_v22  ;;  %v21867_v54 = vadd.f32 %v14793_v58, %v21532_v3  ;;  %8004 = vmatprep.mubr.bf16.mxu0 %v7766_v29  ;;  %v7594_v58 = vld [vmem:[#allocation3 + $0x170] sm:$0xff] }
 0x443   : > { %v9930_v32 = vsel %vm1122_vm2, %v9927_v30, %v23984_v12  ;;  %v21860_v45 = vrot.slane %v9878_v18, 1  ;;  %v9314_v12 = vld [vmem:[#allocation3 + $0x278] sm:$0xff] }
 0x444   : > { %15958 = vmatmul.mubr.msk.bf16.gmra.mrb[116].mxu1 %vm389_vm1, %v21541_v24  ;;  %9941 = vrot.lane.b32.xlu1 %v9930_v32, %s17596_s23  ;;  %v14821_v30 = vpop.f32.mrb[244].mxu0  ;;  %v17265_v24 = vld [vmem:[%s23894_s3 + $0x138] sm:$0xff]  }
 0x445   : > { %v9881_v21 = vsel %vm1274_vm5, %v9876_v52, %v21860_v45  ;;  %15961 = vmatprep.mubr.msk.bf16.mxu1 %vm17595_vm0, %v24041_v22  ;;  %15986 = vmatpush3.bf16.msra.mxu1 %v17264_v39  ;;  %v14822_v59 = vpop.f32.mrb[245].mxu0  ;;  %v17270_v39 = vld [vmem:[%s23894_s3 + $0x148] sm:$0xff]  }
 0x446   : > { %9907 = vrot.lane.b32.xlu0 %v9881_v21, %s17597_s30  ;;  %15987 = vmatprep.subr.bf16.mxu1 %v24041_v22  ;;  %v14823_v3 = vadd.f32 %v14822_v59, %v14821_v30  ;;  %v14824_v46 = vpop.f32.mrb[246].mxu0 }
 0x447   : > { %v14825_v42 = vpop.f32.mrb[247].mxu0 }
 0x448   : > { %v14826_v60 = vadd.f32 %v14825_v42, %v14824_v46  ;;  %v21880_v38 = vadd.f32 %v21557_v37, %v14823_v3  ;;  %v17567_v3 = vld [vmem:[#allocation3 + $0x188] sm:$0xff]  ;;  %v17275_v42 = vld [vmem:[%s23894_s3 + $0x1a0] sm:$0xff]  }
 0x449   : > { %15988 = vmatpush3.bf16.msra.mxu1 %v17265_v24  ;;  %8005 = vmatmul.mubr.bf16.gmra.mrb[96].mxu0 %v7764_v20  ;;  %v17273_v24 = vld [vmem:[%s23894_s3 + $0x198] sm:$0xff]  }
 0x44a   : > { %16017 = vmatprep.subr.bf16.mxu1 %v24041_v22  ;;  %8275 = vmatprep.mubr.bf16.mxu0 %v7591_v17  ;;  %v21886_v8 = vadd.f32 %v21566_v33, %v14826_v60  ;;  %v17277_v17 = vld [vmem:[%s23894_s3 + $0x160] sm:$0xff]  }
 0x44c   : > { %15962 = vmatmul.mubr.msk.bf16.gmra.mrb[120].mxu1 %vm389_vm1, %v21453_v43  ;;  %v14827_v5 = vpop.f32.mrb[248].mxu0  ;;  %v17269_v43 = vld [vmem:[%s23894_s3 + $0x188] sm:$0xff]  }
 0x44d   : > { %15965 = vmatprep.mubr.msk.bf16.mxu1 %vm17595_vm0, %v24041_v22  ;;  %v14828_v13 = vpop.f32.mrb[249].mxu0 }
 0x44e   : > { %v14829_v14 = vadd.f32 %v14828_v13, %v14827_v5  ;;  %v14830_v53 = vpop.f32.mrb[250].mxu0 }
 0x44f   : > { %v14831_v37 = vpop.f32.mrb[251].mxu0 }
 0x450   : > { %v14832_v18 = vadd.f32 %v14831_v37, %v14830_v53  ;;  %v21897_v33 = vadd.f32 %v21587_v57, %v14829_v14  ;;  %v17271_v57 = vld [vmem:[%s23894_s3 + $0x190] sm:$0xff]   ;;  %v17278_v14 = vld [vmem:[%s23894_s3 + $0x1a8] sm:$0xff]   ;;  %v21943_v53 = vld [vmem:[#allocation3 + $0x1c0] sm:$0xff] }
 0x451   : > { %8276 = vmatmul.mubr.bf16.vlgmr.msra.gmra.mrb[100].mxu0 %v7590_v15  ;;  %v17568_v37 = vld [vmem:[#allocation3 + $0x180] sm:$0xff] }
 0x452   : > { %8283 = vmatprep.mubr.bf16.mxu0 %v7594_v58  ;;  %v21902_v49 = vadd.f32 %v21601_v26, %v14832_v18  ;;  %15151 = vmatpush3.bf16.msra.mxu0 %v17267_v36  ;;  %v17272_v26 = vld [vmem:[%s23894_s3 + $0x150] sm:$0xff]   ;;  %v17569_v18 = vld [vmem:[#allocation3 + $0x1a0] sm:$0xff] }
 0x453   : > { %15152 = vmatprep.subr.bf16.mxu0 %v17269_v43  ;;  %v17280_v43 = vld [vmem:[%s23894_s3 + $0x1b0] sm:$0xff]  }
 0x454   : > { %15966 = vmatmul.mubr.msk.bf16.gmra.mrb[124].mxu1 %vm389_vm1, %v21480_v61  ;;  %v14833_v32 = vpop.f32.mrb[252].mxu0 }
 0x455   : > { %15969 = vmatprep.mubr.msk.bf16.mxu1 %vm17595_vm0, %v24041_v22  ;;  %v14834_v52 = vpop.f32.mrb[253].mxu0 }
 0x456   : > { %v14835_v61 = vadd.f32 %v14834_v52, %v14833_v32  ;;  %v14836_v4 = vpop.f32.mrb[254].mxu0  ;;  %15153 = vmatpush3.bf16.msra.mxu0 %v17270_v39 }
 0x457   : > { %v14837_v29 = vpop.f32.mrb[255].mxu0  ;;  %15154 = vmatprep.subr.bf16.mxu0 %v17271_v57  ;;  %v17281_v57 = vld [vmem:[%s23894_s3 + $0x170] sm:$0xff]  }
 0x458   : > { %v21916_v21 = vadd.f32 %v21646_v25, %v14835_v61  ;;  %v14838_v30 = vadd.f32 %v14837_v29, %v14836_v4  ;;  %v17274_v25 = vld [vmem:[%s23894_s3 + $0x158] sm:$0xff]  }
 0x459   : > { %8284 = vmatmul.mubr.bf16.gmra.mrb[104].mxu0 %v7593_v6  ;;  %v17282_v4 = vld [vmem:[%s23894_s3 + $0x1b8] sm:$0xff]  }
 0x45a   : > { %v21924_v59 = vadd.f32 %v21666_v44, %v14838_v30  ;;  %8291 = vmatprep.mubr.bf16.mxu0 %v17567_v3  ;;  %15155 = vmatpush3.bf16.msra.mxu0 %v17272_v26  ;;  %v21967_v29 = vld [vmem:[#allocation3 + $0x1d8] sm:$0xff] }
 0x45b   : > { %15156 = vmatprep.subr.bf16.mxu0 %v17273_v24  ;;  %v17570_v26 = vld [vmem:[#allocation3 + $0x198] sm:$0xff] }
 0x45c   : > { %15970 = vmatmul.mubr.msk.bf16.gmra.mrb[128].mxu1 %vm389_vm1, %v21638_v0  ;;  %v14839_v46 = vpop.f32.mrb[0].mxu0  ;;  %v7653_v6 = vld [vmem:[#allocation3 + $0x178] sm:$0xf0] }
 0x45d   : > { %15973 = vmatprep.mubr.msk.bf16.mxu1 %vm17595_vm0, %v24041_v22  ;;  %v14840_v0 = vpop.f32.mrb[1].mxu0  ;;  %v17283_v24 = vld [vmem:[%s23894_s3 + $0x178] sm:$0xff]  }
 0x45e   : > { %v14841_v60 = vadd.f32 %v14840_v0, %v14839_v46  ;;  %v14842_v44 = vpop.f32.mrb[2].mxu0  ;;  %15157 = vmatpush3.bf16.msra.mxu0 %v17274_v25  ;;  %v7730_v25 = vrot.slane %v7653_v6, 4 }
 0x45f   : > { %v14843_v20 = vpop.f32.mrb[3].mxu0  ;;  %15158 = vmatprep.subr.bf16.mxu0 %v17275_v42 }
 0x460   : > { %v21938_v5 = vadd.f32 %v21715_v62, %v14841_v60  ;;  %v14844_v13 = vadd.f32 %v14843_v20, %v14842_v44  ;;  %v17279_v62 = vld [vmem:[%s23894_s3 + $0x168] sm:$0xff]   ;;  %v17268_v60 = vld [vmem:[%s23894_s3 + $0x80] sm:$0xff]  }
 0x461   : > { %8292 = vmatmul.mubr.bf16.gmra.mrb[108].mxu0 %v17568_v37 }
 0x462   : > { %v21948_v36 = vadd.f32 %v21725_v35, %v14844_v13  ;;  %8299 = vmatprep.mubr.bf16.mxu0 %v17569_v18  ;;  %15159 = vmatpush3.bf16.msra.mxu0 %v17277_v17 }
 0x463   : > { %15160 = vmatprep.subr.bf16.mxu0 %v17278_v14 }
 0x464   : > { %15974 = vmatmul.mubr.msk.bf16.gmra.mrb[132].mxu1 %vm389_vm1, %v21943_v53  ;;  %v14845_v15 = vpop.f32.mrb[4].mxu0 }
 0x465   : > { %15977 = vmatprep.mubr.msk.bf16.mxu1 %vm17595_vm0, %v24041_v22  ;;  %v14846_v58 = vpop.f32.mrb[5].mxu0 }
 0x466   : > { %v14847_v39 = vadd.f32 %v14846_v58, %v14845_v15  ;;  %v14848_v35 = vpop.f32.mrb[6].mxu0  ;;  %15161 = vmatpush3.bf16.msra.mxu0 %v17279_v62 }
 0x467   : > { %v14849_v32 = vpop.f32.mrb[7].mxu0  ;;  %15162 = vmatprep.subr.bf16.mxu0 %v17280_v43 }
 0x468   : > { %v21962_v52 = vadd.f32 %v21762_v31, %v14847_v39  ;;  %v14850_v61 = vadd.f32 %v14849_v32, %v14848_v35  ;;  %v21975_v31 = vld [vmem:[#allocation3 + $0x190] sm:$0xff] }
 0x469   : > { %8300 = vmatmul.mubr.bf16.gmra.mrb[112].mxu0 %v17570_v26 }
 0x46a   : > { %v21972_v30 = vadd.f32 %v21785_v16, %v14850_v61  ;;  %8307 = vmatprep.mubr.bf16.mxu0 %v21507_v7  ;;  %15163 = vmatpush3.bf16.msra.mxu0 %v17281_v57  ;;  %v17286_v16 = vld [vmem:[%s23894_s3 + $0x220] sm:$0xff]   ;;  %v7731_v7 = vrot.slane %v21975_v31, 4 }
 0x46b   : > { %15164 = vmatprep.subr.bf16.mxu0 %v17282_v4 }
 0x46c   : > { %15978 = vmatmul.mubr.msk.bf16.gmra.mrb[136].mxu1 %vm389_vm1, %v21967_v29  ;;  %v14851_v3 = vpop.f32.mrb[8].mxu0  ;;  %v7732_v13 = vsel %vm1778_vm9, %v7730_v25, %v7731_v7  ;;  %v7738_v58 = vsel %vm1778_vm9, %v7731_v7, %v21671_v10 }
 0x46d   : > { %15989 = vmatprep.mubr.msk.bf16.mxu1 %vm17595_vm0, %v24041_v22  ;;  %v14852_v46 = vpop.f32.mrb[9].mxu0 }
 0x46e   : > { %v14853_v42 = vadd.f32 %v14852_v46, %v14851_v3  ;;  %v14854_v0 = vpop.f32.mrb[10].mxu0  ;;  %15165 = vmatpush3.bf16.msra.mxu0 %v17283_v24  ;;  %v8422_v24 = vld [vmem:[#allocation3 + $0x1a0] sm:$0xff] }
 0x46f   : > { %v14855_v44 = vpop.f32.mrb[11].mxu0  ;;  %15219 = vmatprep.subr.bf16.mxu0 %v17286_v16  ;;  %v7749_v16 = vrot.slane %v21967_v29, 4 }
 0x470   : > { %v21990_v20 = vadd.f32 %v21820_v48, %v14853_v42  ;;  %v14856_v17 = vadd.f32 %v14855_v44, %v14854_v0  ;;  %v17276_v48 = vld [vmem:[%s23894_s3 + $0x88] sm:$0xff]  }
 0x471   : > { %8308 = vmatmul.mubr.bf16.gmra.mrb[116].mxu0 %v21529_v34  ;;  %v17289_v44 = vld [vmem:[%s23894_s3 + $0x228] sm:$0xff]  }
 0x472   : > { %v21996_v14 = vadd.f32 %v21833_v50, %v14856_v17  ;;  %8315 = vmatprep.mubr.bf16.mxu0 %v21536_v51  ;;  %v17284_v51 = vld [vmem:[%s23894_s3 + $0x90] sm:$0xff]  }
 0x474   : > { %15990 = vmatmul.mubr.msk.bf16.vlgmr.msra.gmra.mrb[140].mxu1 %vm389_vm1, %v7732_v13  ;;  %v14857_v37 = vpop.f32.mrb[12].mxu0  ;;  %v8425_v13 = vld [vmem:[#allocation3 + $0x1b8] sm:$0xff] }
 0x475   : > { %16018 = vmatpush3.bf16.msra.mxu1 %v17268_v60  ;;  %15993 = vmatprep.mubr.msk.bf16.mxu1 %vm17595_vm0, %v24041_v22  ;;  %v14858_v18 = vpop.f32.mrb[13].mxu0  ;;  %v8421_v60 = vld [vmem:[#allocation3 + $0x198] sm:$0xff] }
 0x476   : > { %16019 = vmatprep.subr.bf16.mxu1 %v24041_v22  ;;  %v14859_v34 = vadd.f32 %v14858_v18, %v14857_v37  ;;  %v14860_v62 = vpop.f32.mrb[14].mxu0  ;;  %v22055_v37 = vld [vmem:[#allocation3 + $0x1f0] sm:$0xff] }
 0x477   : > { %v14861_v15 = vpop.f32.mrb[15].mxu0 }
 0x478   : > { %v22009_v50 = vadd.f32 %v21855_v9, %v14859_v34  ;;  %v14862_v43 = vadd.f32 %v14861_v15, %v14860_v62  ;;  %v17285_v9 = vld [vmem:[%s23894_s3 + $0x98] sm:$0xff]   ;;  %v17291_v34 = vld [vmem:[%s23894_s3 + $0x230] sm:$0xff]  }
 0x479   : > { %16020 = vmatpush3.bf16.msra.mxu1 %v17276_v48  ;;  %8316 = vmatmul.mubr.bf16.gmra.mrb[120].mxu0 %v21553_v19  ;;  %v7743_v19 = vrot.slane %v21943_v53, 4 }
 0x47a   : > { %16021 = vmatprep.subr.bf16.mxu1 %v24041_v22  ;;  %v22017_v39 = vadd.f32 %v21867_v54, %v14862_v43  ;;  %8323 = vmatprep.mubr.bf16.mxu0 %v21722_v28 }
 0x47b   : > { %v7744_v6 = vsel %vm1778_vm9, %v21671_v10, %v7743_v19  ;;  %v17287_v10 = vld [vmem:[%s23894_s3 + $0x1e0] sm:$0xff]   ;;  %v7750_v17 = vsel %vm1778_vm9, %v7743_v19, %v7749_v16  ;;  %v8424_v19 = vld [vmem:[#allocation3 + $0x1b0] sm:$0xff] }
 0x47c   : > { %15994 = vmatmul.mubr.msk.bf16.gmra.mrb[144].mxu1 %vm389_vm1, %v7738_v58  ;;  %v14890_v35 = vpop.f32.mrb[16].mxu0  ;;  %v17292_v58 = vld [vmem:[%s23894_s3 + $0x1f0] sm:$0xff]  }
 0x47d   : > { %15997 = vmatprep.mubr.msk.bf16.mxu1 %vm17595_vm0, %v24041_v22  ;;  %16022 = vmatpush3.bf16.msra.mxu1 %v17284_v51  ;;  %v14891_v32 = vpop.f32.mrb[17].mxu0 }
 0x47e   : > { %16023 = vmatprep.subr.bf16.mxu1 %v24041_v22  ;;  %v14892_v57 = vadd.f32 %v14891_v32, %v14890_v35  ;;  %v14893_v61 = vpop.f32.mrb[18].mxu0  ;;  %v17293_v32 = vld [vmem:[%s23894_s3 + $0x238] sm:$0xff]  }
 0x47f   : > { %v14894_v54 = vpop.f32.mrb[19].mxu0 }
 0x480   : > { %v22028_v4 = vadd.f32 %v21880_v38, %v14892_v57  ;;  %v14895_v26 = vadd.f32 %v14894_v54, %v14893_v61  ;;  %v22076_v61 = vld [vmem:[#allocation3 + $0x1d0] sm:$0xff] }
 0x481   : > { %16024 = vmatpush3.bf16.msra.mxu1 %v17285_v9  ;;  %8324 = vmatmul.mubr.bf16.gmra.mrb[124].mxu0 %v21769_v41 }
 0x482   : > { %16053 = vmatprep.subr.bf16.mxu1 %v24041_v22  ;;  %v22036_v3 = vadd.f32 %v21886_v8, %v14895_v26  ;;  %8655 = vmatprep.mubr.bf16.mxu0 %v8422_v24  ;;  %v17294_v26 = vld [vmem:[%s23894_s3 + $0x1f8] sm:$0xff]   ;;  %v17295_v24 = vld [vmem:[%s23894_s3 + $0x240] sm:$0xff]  }
 0x484   : > { %15998 = vmatmul.mubr.msk.bf16.gmra.mrb[148].mxu1 %vm389_vm1, %v7744_v6  ;;  %v14896_v38 = vpop.f32.mrb[20].mxu0 }
 0x485   : > { %16001 = vmatprep.mubr.msk.bf16.mxu1 %vm17595_vm0, %v24041_v22  ;;  %v14897_v25 = vpop.f32.mrb[21].mxu0 }
 0x486   : > { %v14898_v7 = vadd.f32 %v14897_v25, %v14896_v38  ;;  %v14899_v46 = vpop.f32.mrb[22].mxu0 }
 0x487   : > { %v14900_v42 = vpop.f32.mrb[23].mxu0 }
 0x488   : > { %v22045_v0 = vadd.f32 %v21897_v33, %v14898_v7  ;;  %v14901_v8 = vadd.f32 %v14900_v42, %v14899_v46  ;;  %v17290_v33 = vld [vmem:[%s23894_s3 + $0x1e8] sm:$0xff]   ;;  %v17297_v46 = vld [vmem:[%s23894_s3 + $0x200] sm:$0xff]  }
 0x489   : > { %8656 = vmatmul.mubr.bf16.vlgmr.msra.gmra.mrb[128].mxu0 %v8421_v60  ;;  %v17298_v60 = vld [vmem:[%s23894_s3 + $0x248] sm:$0xff]  }
 0x48a   : > { %v22053_v48 = vadd.f32 %v21902_v49, %v14901_v8  ;;  %8663 = vmatprep.mubr.bf16.mxu0 %v8425_v13  ;;  %15220 = vmatpush3.bf16.msra.mxu0 %v17287_v10  ;;  %v7755_v49 = vrot.slane %v22055_v37, 4  ;;  %v22100_v8 = vld [vmem:[#allocation3 + $0x1c8] sm:$0xff] }
 0x48b   : > { %15221 = vmatprep.subr.bf16.mxu0 %v17289_v44  ;;  %v17299_v13 = vld [vmem:[%s23894_s3 + $0x208] sm:$0xff]  }
 0x48c   : > { %16002 = vmatmul.mubr.msk.bf16.gmra.mrb[152].mxu1 %vm389_vm1, %v7750_v17  ;;  %v14902_v18 = vpop.f32.mrb[24].mxu0  ;;  %v7756_v57 = vsel %vm1778_vm9, %v7749_v16, %v7755_v49 }
 0x48d   : > { %16005 = vmatprep.mubr.msk.bf16.mxu1 %vm17595_vm0, %v24041_v22  ;;  %v14903_v62 = vpop.f32.mrb[25].mxu0 }
 0x48e   : > { %v14904_v15 = vadd.f32 %v14903_v62, %v14902_v18  ;;  %v14905_v51 = vpop.f32.mrb[26].mxu0  ;;  %15222 = vmatpush3.bf16.msra.mxu0 %v17290_v33  ;;  %v17300_v18 = vld [vmem:[%s23894_s3 + $0x250] sm:$0xff]  }
 0x48f   : > { %v14906_v43 = vpop.f32.mrb[27].mxu0  ;;  %15223 = vmatprep.subr.bf16.mxu0 %v17291_v34 }
 0x490   : > { %v22070_v9 = vadd.f32 %v21916_v21, %v14904_v15  ;;  %v14907_v35 = vadd.f32 %v14906_v43, %v14905_v51  ;;  %v22083_v21 = vld [vmem:[#allocation3 + $0x208] sm:$0xff]  ;;  %v17301_v15 = vld [vmem:[%s23894_s3 + $0x210] sm:$0xff]  }
 0x491   : > { %8664 = vmatmul.mubr.bf16.gmra.mrb[132].mxu0 %v8424_v19 }
 0x492   : > { %v22080_v54 = vadd.f32 %v21924_v59, %v14907_v35  ;;  %8671 = vmatprep.mubr.bf16.mxu0 %v22076_v61  ;;  %15224 = vmatpush3.bf16.msra.mxu0 %v17292_v58  ;;  %v7761_v59 = vrot.slane %v22083_v21, 4  ;;  %v17302_v58 = vld [vmem:[%s23894_s3 + $0x258] sm:$0xff]  }
 0x493   : > { %15225 = vmatprep.subr.bf16.mxu0 %v17293_v32 }
 0x494   : > { %16006 = vmatmul.mubr.msk.bf16.gmra.mrb[156].mxu1 %vm389_vm1, %v7756_v57  ;;  %v14908_v6 = vpop.f32.mrb[28].mxu0  ;;  %v7762_v44 = vsel %vm1778_vm9, %v7755_v49, %v7761_v59 }
 0x495   : > { %16009 = vmatprep.mubr.msk.bf16.mxu1 %vm17595_vm0, %v24041_v22  ;;  %v14909_v38 = vpop.f32.mrb[29].mxu0 }
 0x496   : > { %v14910_v16 = vadd.f32 %v14909_v38, %v14908_v6  ;;  %v14911_v25 = vpop.f32.mrb[30].mxu0  ;;  %15226 = vmatpush3.bf16.msra.mxu0 %v17294_v26 }
 0x497   : > { %v14912_v7 = vpop.f32.mrb[31].mxu0  ;;  %15227 = vmatprep.subr.bf16.mxu0 %v17295_v24 }
 0x498   : > { %v22098_v42 = vadd.f32 %v21938_v5, %v14910_v16  ;;  %v14913_v10 = vadd.f32 %v14912_v7, %v14911_v25  ;;  %v7659_v5 = vld [vmem:[#allocation3 + $0x220] sm:$0xf] }
 0x499   : > { %8672 = vmatmul.mubr.bf16.gmra.mrb[136].mxu0 %v22100_v8  ;;  %v7767_v34 = vrot.slane %v7659_v5, 4 }
 0x49a   : > { %v22109_v17 = vadd.f32 %v21948_v36, %v14913_v10  ;;  %8679 = vmatprep.mubr.bf16.mxu0 %v21722_v28  ;;  %15228 = vmatpush3.bf16.msra.mxu0 %v17297_v46 }
 0x49b   : > { %15229 = vmatprep.subr.bf16.mxu0 %v17298_v60  ;;  %v7768_v35 = vsel %vm1778_vm9, %v7761_v59, %v7767_v34  ;;  %v17288_v59 = vld [vmem:[%s23894_s3 + $0x1c0] sm:$0xff]  }
 0x49c   : > { %16010 = vmatmul.mubr.msk.bf16.gmra.mrb[160].mxu1 %vm389_vm1, %v7762_v44  ;;  %v14914_v33 = vpop.f32.mrb[32].mxu0  ;;  %v7592_v60 = vld [vmem:[#allocation3 + $0x160] sm:$0xff]  ;;  %v22154_v44 = vld [vmem:[#allocation3 + $0x218] sm:$0xff] }
 0x49d   : > { %16013 = vmatprep.mubr.msk.bf16.mxu1 %vm17595_vm0, %v24041_v22  ;;  %v14915_v36 = vpop.f32.mrb[33].mxu0 }
 0x49e   : > { %v14916_v49 = vadd.f32 %v14915_v36, %v14914_v33  ;;  %v14917_v62 = vpop.f32.mrb[34].mxu0  ;;  %15230 = vmatpush3.bf16.msra.mxu0 %v17299_v13 }
 0x49f   : > { %v14918_v28 = vpop.f32.mrb[35].mxu0  ;;  %15231 = vmatprep.subr.bf16.mxu0 %v17300_v18 }
 0x4a0   : > { %v22124_v51 = vadd.f32 %v21962_v52, %v14916_v49  ;;  %v14919_v43 = vadd.f32 %v14918_v28, %v14917_v62  ;;  %v17303_v52 = vld [vmem:[%s23894_s3 + $0x218] sm:$0xff]   ;;  %v17304_v62 = vld [vmem:[%s23894_s3 + $0x1d0] sm:$0xff]  }
 0x4a1   : > { %8680 = vmatmul.mubr.bf16.gmra.mrb[140].mxu0 %v21769_v41  ;;  %v17306_v41 = vld [vmem:[%s23894_s3 + $0x2c0] sm:$0xff]  }
 0x4a2   : > { %v22133_v19 = vadd.f32 %v21972_v30, %v14919_v43  ;;  %8687 = vmatprep.mubr.bf16.mxu0 %v21790_v56  ;;  %15232 = vmatpush3.bf16.msra.mxu0 %v17301_v15 }
 0x4a3   : > { %15233 = vmatprep.subr.bf16.mxu0 %v17302_v58  ;;  %v22178_v58 = vld [vmem:[#allocation3 + $0x210] sm:$0xff] }
 0x4a4   : > { %16014 = vmatmul.mubr.msk.bf16.gmra.mrb[164].mxu1 %vm389_vm1, %v7768_v35  ;;  %v14920_v32 = vpop.f32.mrb[36].mxu0 }
 0x4a5   : > { %16025 = vmatprep.mubr.msk.bf16.mxu1 %vm17595_vm0, %v24041_v22  ;;  %v14921_v57 = vpop.f32.mrb[37].mxu0 }
 0x4a6   : > { %v14922_v30 = vadd.f32 %v14921_v57, %v14920_v32  ;;  %v14923_v6 = vpop.f32.mrb[38].mxu0  ;;  %v9938_v24 = vpop.permute.xlu1 %9937  ;;  %15234 = vmatpush3.bf16.msra.mxu0 %v17303_v52  ;;  %v7595_v32 = vld [vmem:[#allocation3 + $0x178] sm:$0xff] }
 0x4a7   : > { %v14924_v38 = vpop.f32.mrb[39].mxu0  ;;  %15288 = vmatprep.subr.bf16.mxu0 %v17306_v41  ;;  %v17305_v57 = vld [vmem:[%s23894_s3 + $0x1d8] sm:$0xff]  }
 0x4a8   : > { %v9904_v26 = vpop.permute.xlu0 %9903  ;;  %v22151_v25 = vadd.f32 %v21990_v20, %v14922_v30  ;;  %v14925_v7 = vadd.f32 %v14924_v38, %v14923_v6  ;;  %v8907_v6 = vrot.slane %v22076_v61, 4 }
 0x4a9   : > { %v9952_v56 = vsel %vm5462_vm10, %v21684_v47, %v9904_v26  ;;  %8688 = vmatmul.mubr.bf16.gmra.mrb[144].mxu0 %v21824_v2  ;;  %v17296_v2 = vld [vmem:[%s23894_s3 + $0x1c8] sm:$0xff]  }
 0x4aa   : > { %v9967_v16 = vsel %vm389_vm1, %v9952_v56, %v9938_v24  ;;  %v22158_v5 = vadd.f32 %v21996_v14, %v14925_v7  ;;  %8695 = vmatprep.mubr.bf16.mxu0 %v22154_v44 }
 0x4ab   : > { %v13848_v46 = vcombine.low %v9967_v16, %v9967_v16  ;;  %v13849_v10 = vcombine.high %v9967_v16, %v9967_v16 }
 0x4ac   : > { %16026 = vmatmul.mubr.msk.bf16.vlgmr.msra.gmra.mrb[140].mxu1 %vm389_vm1, %v7592_v60  ;;  %v14926_v20 = vpop.f32.mrb[40].mxu0  ;;  %v22201_v60 = vld [vmem:[#allocation3 + $0x228] sm:$0xff] }
 0x4ad   : > { %10027 = vst.msk [vmem:[#allocation5 + $0x8] sm:$0xf] %vm10024_vm11, %v13848_v46  ;;  %10028 = vst.msk [vmem:[#allocation5 + $0xc] sm:$0xf] %vm10024_vm11, %v13849_v10  ;;  %16054 = vmatpush3.bf16.msra.mxu1 %v17288_v59  ;;  %16029 = vmatprep.mubr.msk.bf16.mxu1 %vm17595_vm0, %v24041_v22  ;;  %v14927_v13 = vpop.f32.mrb[41].mxu0 }
 0x4ae   : > { %16055 = vmatprep.subr.bf16.mxu1 %v24041_v22  ;;  %v14928_v33 = vadd.f32 %v14927_v13, %v14926_v20  ;;  %v14929_v18 = vpop.f32.mrb[42].mxu0  ;;  %v9940_v34 = vpop.permute.xlu0 %9939 }
 0x4af   : > { %v14930_v49 = vpop.f32.mrb[43].mxu0 }
 0x4b0   : > { %v9906_v14 = vpop.permute.xlu1 %9905  ;;  %v22176_v15 = vadd.f32 %v22009_v50, %v14928_v33  ;;  %v14931_v43 = vadd.f32 %v14930_v49, %v14929_v18  ;;  %v8816_v50 = vld [vmem:[#allocation3 + $0x1b8] sm:$0xf0] }
 0x4b1   : > { %v9954_v36 = vsel %vm5462_vm10, %v21740_v27, %v9906_v14  ;;  %16056 = vmatpush3.bf16.msra.mxu1 %v17296_v2  ;;  %8696 = vmatmul.mubr.bf16.gmra.mrb[148].mxu0 %v22178_v58  ;;  %v22182_v27 = vld [vmem:[#allocation3 + $0x230] sm:$0xff]  ;;  %v8906_v30 = vrot.slane %v8816_v50, 4  ;;  %v22233_v50 = vld [vmem:[#allocation3 + $0x1e0] sm:$0xff] }
 0x4b2   : > { %v9969_v28 = vsel %vm389_vm1, %v9954_v36, %v9940_v34  ;;  %16057 = vmatprep.subr.bf16.mxu1 %v24041_v22  ;;  %v22186_v41 = vadd.f32 %v22017_v39, %v14931_v43  ;;  %8703 = vmatprep.mubr.bf16.mxu0 %v22182_v27  ;;  %v8815_v14 = vld [vmem:[#allocation3 + $0x1b0] sm:$0xf0]  ;;  %v8904_v34 = vrot.slane %v22100_v8, 4 }
 0x4b3   : > { %v13850_v35 = vcombine.low %v9969_v28, %v9969_v28  ;;  %v13851_v52 = vcombine.high %v9969_v28, %v9969_v28  ;;  %v8908_v13 = vsel %vm1778_vm9, %v8906_v30, %v8907_v6  ;;  %v8903_v18 = vrot.slane %v8815_v14, 4  ;;  %v22262_v14 = vld [vmem:[#allocation3 + $0x1f8] sm:$0xff] }
 0x4b4   : > { %16030 = vmatmul.mubr.msk.bf16.gmra.mrb[144].mxu1 %vm389_vm1, %v7595_v32  ;;  %v14959_v26 = vpop.f32.mrb[44].mxu0 }
 0x4b5   : > { %10029 = vst.msk [vmem:[#allocation5 + $0x10] sm:$0xf] %vm10024_vm11, %v13850_v35  ;;  %10030 = vst.msk [vmem:[#allocation5 + $0x14] sm:$0xf] %vm10024_vm11, %v13851_v52  ;;  %16033 = vmatprep.mubr.msk.bf16.mxu1 %vm17595_vm0, %v24041_v22  ;;  %16058 = vmatpush3.bf16.msra.mxu1 %v17304_v62  ;;  %v14960_v39 = vpop.f32.mrb[45].mxu0  ;;  %v8905_v35 = vsel %vm1778_vm9, %v8903_v18, %v8904_v34  ;;  %v17309_v52 = vld [vmem:[%s23894_s3 + $0x2c8] sm:$0xff]  }
 0x4b6   : > { %16059 = vmatprep.subr.bf16.mxu1 %v24041_v22  ;;  %v14961_v56 = vadd.f32 %v14960_v39, %v14959_v26  ;;  %v14962_v59 = vpop.f32.mrb[46].mxu0  ;;  %v9942_v38 = vpop.permute.xlu1 %9941  ;;  %v22236_v26 = vld [vmem:[#allocation3 + $0x200] sm:$0xff] }
 0x4b7   : > { %v14963_v7 = vpop.f32.mrb[47].mxu0 }
 0x4b8   : > { %v9908_v24 = vpop.permute.xlu0 %9907  ;;  %v14964_v10 = vadd.f32 %v14963_v7, %v14962_v59  ;;  %v22205_v2 = vadd.f32 %v22028_v4, %v14961_v56  ;;  %v17312_v7 = vld [vmem:[%s23894_s3 + $0x290] sm:$0xff]  }
 0x4b9   : > { %v9956_v16 = vsel %vm5462_vm10, %v21799_v63, %v9908_v24  ;;  %16060 = vmatpush3.bf16.msra.mxu1 %v17305_v57  ;;  %8704 = vmatmul.mubr.bf16.gmra.mrb[152].mxu0 %v22201_v60  ;;  %v22211_v63 = vld [vmem:[#allocation3 + $0x1e8] sm:$0xff]  ;;  %v17311_v24 = vld [vmem:[%s23894_s3 + $0x2d0] sm:$0xff]  }
 0x4ba   : > { %v9971_v46 = vsel %vm389_vm1, %v9956_v16, %v9942_v38  ;;  %16089 = vmatprep.subr.bf16.mxu1 %v24041_v22  ;;  %9135 = vmatprep.mubr.bf16.mxu0 %v8908_v13  ;;  %v22214_v33 = vadd.f32 %v22036_v3, %v14964_v10  ;;  %v17307_v3 = vld [vmem:[%s23894_s3 + $0x280] sm:$0xff]   ;;  %v17571_v57 = vld [vmem:[#allocation3 + $0x1a8] sm:$0xff] }
 0x4bb   : > { %v13852_v61 = vcombine.low %v9971_v46, %v9971_v46  ;;  %v13853_v20 = vcombine.high %v9971_v46, %v9971_v46 }
 0x4bc   : > { %16034 = vmatmul.mubr.msk.bf16.gmra.mrb[148].mxu1 %vm389_vm1, %v21975_v31  ;;  %v14965_v4 = vpop.f32.mrb[48].mxu0  ;;  %v8914_v31 = vrot.slane %v22211_v63, 4 }
 0x4bd   : > { %10031 = vst.msk [vmem:[#allocation5 + $0x18] sm:$0xf] %vm10024_vm11, %v13852_v61  ;;  %10032 = vst.msk [vmem:[#allocation5 + $0x1c] sm:$0xf] %vm10024_vm11, %v13853_v20  ;;  %16037 = vmatprep.mubr.msk.bf16.mxu1 %vm17595_vm0, %v24041_v22  ;;  %v14966_v36 = vpop.f32.mrb[49].mxu0  ;;  %v17313_v61 = vld [vmem:[%s23894_s3 + $0x2d8] sm:$0xff]  }
 0x4be   : > { %v14967_v49 = vadd.f32 %v14966_v36, %v14965_v4  ;;  %v14968_v62 = vpop.f32.mrb[50].mxu0  ;;  %v8915_v8 = vsel %vm1778_vm9, %v8907_v6, %v8914_v31  ;;  %v8912_v6 = vrot.slane %v22233_v50, 4 }
 0x4bf   : > { %v14969_v28 = vpop.f32.mrb[51].mxu0 }
 0x4c0   : > { %v14970_v43 = vadd.f32 %v14969_v28, %v14968_v62  ;;  %v22230_v32 = vadd.f32 %v22045_v0, %v14967_v49  ;;  %v17310_v0 = vld [vmem:[%s23894_s3 + $0x288] sm:$0xff]   ;;  %v8913_v10 = vsel %vm1778_vm9, %v8904_v34, %v8912_v6  ;;  %v8918_v34 = vrot.slane %v22262_v14, 4  ;;  %v17317_v28 = vld [vmem:[%s23894_s3 + $0x2a0] sm:$0xff]  }
 0x4c1   : > { %9136 = vmatmul.mubr.bf16.vlgmr.msra.gmra.mrb[156].mxu0 %v8905_v35  ;;  %v17318_v35 = vld [vmem:[%s23894_s3 + $0x2e8] sm:$0xff]  }
 0x4c2   : > { %9143 = vmatprep.mubr.bf16.mxu0 %v8915_v8  ;;  %v22239_v39 = vadd.f32 %v22053_v48, %v14970_v43  ;;  %15289 = vmatpush3.bf16.msra.mxu0 %v17307_v3  ;;  %v8920_v48 = vrot.slane %v22236_v26, 4  ;;  %v8919_v43 = vsel %vm1778_vm9, %v8912_v6, %v8918_v34 }
 0x4c3   : > { %15290 = vmatprep.subr.bf16.mxu0 %v17309_v52 }
 0x4c4   : > { %16038 = vmatmul.mubr.msk.bf16.gmra.mrb[152].mxu1 %vm389_vm1, %v17571_v57  ;;  %v14971_v30 = vpop.f32.mrb[52].mxu0  ;;  %v8921_v13 = vsel %vm1778_vm9, %v8914_v31, %v8920_v48 }
 0x4c5   : > { %16041 = vmatprep.mubr.msk.bf16.mxu1 %vm17595_vm0, %v24041_v22  ;;  %v14972_v56 = vpop.f32.mrb[53].mxu0 }
 0x4c6   : > { %v14973_v59 = vadd.f32 %v14972_v56, %v14971_v30  ;;  %v14974_v38 = vpop.f32.mrb[54].mxu0  ;;  %15291 = vmatpush3.bf16.msra.mxu0 %v17310_v0  ;;  %v17319_v0 = vld [vmem:[%s23894_s3 + $0x2a8] sm:$0xff]   ;;  %v8924_v30 = vrot.slane %v22178_v58, 4 }
 0x4c7   : > { %v14975_v16 = vpop.f32.mrb[55].mxu0  ;;  %15292 = vmatprep.subr.bf16.mxu0 %v17311_v24 }
 0x4c8   : > { %v14976_v46 = vadd.f32 %v14975_v16, %v14974_v38  ;;  %v22259_v20 = vadd.f32 %v22070_v9, %v14973_v59  ;;  %v17314_v9 = vld [vmem:[%s23894_s3 + $0x298] sm:$0xff]   ;;  %v17321_v59 = vld [vmem:[%s23894_s3 + $0x2b0] sm:$0xff]   ;;  %v8925_v16 = vsel %vm1778_vm9, %v8918_v34, %v8924_v30 }
 0x4c9   : > { %9144 = vmatmul.mubr.bf16.gmra.mrb[160].mxu0 %v8913_v10  ;;  %v22332_v34 = vld [vmem:[%s23896_s5 + $0x30] sm:$0xff]  }
 0x4ca   : > { %9151 = vmatprep.mubr.bf16.mxu0 %v8921_v13  ;;  %v22267_v4 = vadd.f32 %v22080_v54, %v14976_v46  ;;  %15293 = vmatpush3.bf16.msra.mxu0 %v17312_v7  ;;  %v8926_v54 = vrot.slane %v22154_v44, 4  ;;  %v17322_v7 = vld [vmem:[%s23894_s3 + $0x2f8] sm:$0xff]  }
 0x4cb   : > { %15294 = vmatprep.subr.bf16.mxu0 %v17313_v61  ;;  %v22318_v61 = vld [vmem:[#allocation3 + $0x248] sm:$0xff] }
 0x4cc   : > { %16042 = vmatmul.mubr.msk.bf16.gmra.mrb[156].mxu1 %vm389_vm1, %v21943_v53  ;;  %v14977_v18 = vpop.f32.mrb[56].mxu0  ;;  %v17315_v53 = vld [vmem:[%s23894_s3 + $0x2e0] sm:$0xff]   ;;  %v8927_v8 = vsel %vm1778_vm9, %v8920_v48, %v8926_v54 }
 0x4cd   : > { %16045 = vmatprep.mubr.msk.bf16.mxu1 %vm17595_vm0, %v24041_v22  ;;  %v14978_v36 = vpop.f32.mrb[57].mxu0 }
 0x4ce   : > { %v14979_v31 = vadd.f32 %v14978_v36, %v14977_v18  ;;  %v14980_v49 = vpop.f32.mrb[58].mxu0  ;;  %15295 = vmatpush3.bf16.msra.mxu0 %v17314_v9  ;;  %v8930_v18 = vrot.slane %v22201_v60, 4 }
 0x4cf   : > { %v14981_v62 = vpop.f32.mrb[59].mxu0  ;;  %15296 = vmatprep.subr.bf16.mxu0 %v17315_v53 }
 0x4d0   : > { %v14982_v3 = vadd.f32 %v14981_v62, %v14980_v49  ;;  %v22287_v52 = vadd.f32 %v22098_v42, %v14979_v31  ;;  %v17308_v31 = vld [vmem:[%s23894_s3 + $0x260] sm:$0xff]  }
 0x4d1   : > { %9152 = vmatmul.mubr.bf16.gmra.mrb[164].mxu0 %v8919_v43  ;;  %v8423_v43 = vld [vmem:[#allocation3 + $0x1a8] sm:$0xff] }
 0x4d2   : > { %9159 = vmatprep.mubr.bf16.mxu0 %v8927_v8  ;;  %v22293_v57 = vadd.f32 %v22109_v17, %v14982_v3  ;;  %15297 = vmatpush3.bf16.msra.mxu0 %v17317_v28  ;;  %v8932_v17 = vrot.slane %v22182_v27, 4  ;;  %v8931_v28 = vsel %vm1778_vm9, %v8924_v30, %v8930_v18  ;;  %v22344_v8 = vld [vmem:[#allocation3 + $0x240] sm:$0xff] }
 0x4d3   : > { %15298 = vmatprep.subr.bf16.mxu0 %v17318_v35 }
 0x4d4   : > { %16046 = vmatmul.mubr.msk.bf16.gmra.mrb[160].mxu1 %vm389_vm1, %v21967_v29  ;;  %v14983_v42 = vpop.f32.mrb[60].mxu0  ;;  %v17320_v29 = vld [vmem:[%s23894_s3 + $0x2f0] sm:$0xff]   ;;  %v8933_v10 = vsel %vm1778_vm9, %v8926_v54, %v8932_v17 }
 0x4d5   : > { %16049 = vmatprep.mubr.msk.bf16.mxu1 %vm17595_vm0, %v24041_v22  ;;  %v14984_v6 = vpop.f32.mrb[61].mxu0 }
 0x4d6   : > { %v14985_v24 = vadd.f32 %v14984_v6, %v14983_v42  ;;  %v14986_v56 = vpop.f32.mrb[62].mxu0  ;;  %15299 = vmatpush3.bf16.msra.mxu0 %v17319_v0  ;;  %v8837_v0 = vld [vmem:[#allocation3 + $0x260] sm:$0xf] }
 0x4d7   : > { %v14987_v48 = vpop.f32.mrb[63].mxu0  ;;  %15300 = vmatprep.subr.bf16.mxu0 %v17320_v29  ;;  %v8936_v29 = vrot.slane %v22344_v8, 4 }
 0x4d8   : > { %v14988_v38 = vadd.f32 %v14987_v48, %v14986_v56  ;;  %v22313_v46 = vadd.f32 %v22124_v51, %v14985_v24  ;;  %v17323_v51 = vld [vmem:[%s23894_s3 + $0x2b8] sm:$0xff]  }
 0x4d9   : > { %9160 = vmatmul.mubr.bf16.gmra.mrb[168].mxu0 %v8925_v16 }
 0x4da   : > { %9167 = vmatprep.mubr.bf16.mxu0 %v8933_v10  ;;  %v22321_v13 = vadd.f32 %v22133_v19, %v14988_v38  ;;  %15301 = vmatpush3.bf16.msra.mxu0 %v17321_v59  ;;  %v8938_v19 = vrot.slane %v22318_v61, 4  ;;  %v8937_v38 = vsel %vm1778_vm9, %v8930_v18, %v8936_v29 }
 0x4db   : > { %15302 = vmatprep.subr.bf16.mxu0 %v17322_v7  ;;  %v8426_v7 = vld [vmem:[#allocation3 + $0x1c0] sm:$0xff] }
 0x4dc   : > { %16050 = vmatmul.mubr.msk.bf16.gmra.mrb[164].mxu1 %vm389_vm1, %v22055_v37  ;;  %v14989_v9 = vpop.f32.mrb[64].mxu0  ;;  %v8939_v35 = vsel %vm1778_vm9, %v8932_v17, %v8938_v19  ;;  %v8944_v17 = vrot.slane %v8837_v0, 4 }
 0x4dd   : > { %16061 = vmatprep.mubr.msk.bf16.mxu1 %vm17595_vm0, %v24041_v22  ;;  %v14990_v53 = vpop.f32.mrb[65].mxu0 }
 0x4de   : > { %v14991_v36 = vadd.f32 %v14990_v53, %v14989_v9  ;;  %v14992_v54 = vpop.f32.mrb[66].mxu0  ;;  %15303 = vmatpush3.bf16.msra.mxu0 %v17323_v51  ;;  %v8945_v10 = vsel %vm1778_vm9, %v8938_v19, %v8944_v17  ;;  %v8836_v51 = vld [vmem:[#allocation3 + $0x258] sm:$0xf] }
 0x4df   : > { %v14993_v49 = vpop.f32.mrb[67].mxu0  ;;  %16161 = vmatprep.subr.bf16.mxu0 %v22332_v34  ;;  %v8942_v53 = vrot.slane %v8836_v51, 4 }
 0x4e0   : > { %v14994_v62 = vadd.f32 %v14993_v49, %v14992_v54  ;;  %v22341_v3 = vadd.f32 %v22151_v25, %v14991_v36  ;;  %v17316_v25 = vld [vmem:[%s23894_s3 + $0x268] sm:$0xff]  }
 0x4e1   : > { %9168 = vmatmul.mubr.bf16.gmra.mrb[172].mxu0 %v8931_v28  ;;  %v8943_v49 = vsel %vm1778_vm9, %v8936_v29, %v8942_v53  ;;  %v17328_v29 = vld [vmem:[%s23896_s5 + $0x38] sm:$0xff]  }
 0x4e2   : > { %9175 = vmatprep.mubr.bf16.mxu0 %v8939_v35  ;;  %v22348_v42 = vadd.f32 %v22158_v5, %v14994_v62  ;;  %v17324_v5 = vld [vmem:[%s23894_s3 + $0x270] sm:$0xff]   ;;  %v22382_v62 = vld [vmem:[#allocation3 + $0x1d8] sm:$0xff] }
 0x4e4   : > { %16062 = vmatmul.mubr.msk.bf16.vlgmr.msra.gmra.mrb[140].mxu1 %vm389_vm1, %v8423_v43  ;;  %v14995_v30 = vpop.f32.mrb[68].mxu0 }
 0x4e5   : > { %16090 = vmatpush3.bf16.msra.mxu1 %v17308_v31  ;;  %16065 = vmatprep.mubr.msk.bf16.mxu1 %vm17595_vm0, %v24041_v22  ;;  %v14996_v6 = vpop.f32.mrb[69].mxu0 }
 0x4e6   : > { %16091 = vmatprep.subr.bf16.mxu1 %v24041_v22  ;;  %v14997_v24 = vadd.f32 %v14996_v6, %v14995_v30  ;;  %v14998_v56 = vpop.f32.mrb[70].mxu0  ;;  %v17329_v6 = vld [vmem:[%s23896_s5 + $0x40] sm:$0xff]  }
 0x4e7   : > { %v14999_v48 = vpop.f32.mrb[71].mxu0 }
 0x4e8   : > { %v15000_v59 = vadd.f32 %v14999_v48, %v14998_v56  ;;  %v22363_v16 = vadd.f32 %v22176_v15, %v14997_v24  ;;  %v17325_v15 = vld [vmem:[%s23894_s3 + $0x278] sm:$0xff]   ;;  %v17332_v48 = vld [vmem:[%s23896_s5 + $0x50] sm:$0xff]  }
 0x4e9   : > { %16092 = vmatpush3.bf16.msra.mxu1 %v17316_v25  ;;  %9176 = vmatmul.mubr.bf16.gmra.mrb[176].mxu0 %v8937_v38 }
 0x4ea   : > { %16093 = vmatprep.subr.bf16.mxu1 %v24041_v22  ;;  %9183 = vmatprep.mubr.bf16.mxu0 %v8945_v10  ;;  %v22368_v9 = vadd.f32 %v22186_v41, %v15000_v59 }
 0x4ec   : > { %16066 = vmatmul.mubr.msk.bf16.gmra.mrb[144].mxu1 %vm389_vm1, %v8426_v7  ;;  %v15028_v18 = vpop.f32.mrb[72].mxu0 }
 0x4ed   : > { %16069 = vmatprep.mubr.msk.bf16.mxu1 %vm17595_vm0, %v24041_v22  ;;  %16094 = vmatpush3.bf16.msra.mxu1 %v17324_v5  ;;  %v15029_v19 = vpop.f32.mrb[73].mxu0 }
 0x4ee   : > { %16095 = vmatprep.subr.bf16.mxu1 %v24041_v22  ;;  %v22376_v36 = vadd.f32 %v15029_v19, %v15028_v18  ;;  %v15031_v54 = vpop.f32.mrb[74].mxu0 }
 0x4ef   : > { %v15032_v31 = vpop.f32.mrb[75].mxu0 }
 0x4f0   : > { %v22378_v41 = vadd.f32 %v15032_v31, %v15031_v54 }
 0x4f1   : > { %16096 = vmatpush3.bf16.msra.mxu1 %v17325_v15  ;;  %9184 = vmatmul.mubr.bf16.gmra.mrb[180].mxu0 %v8943_v49 }
 0x4f2   : > { %16125 = vmatprep.subr.bf16.mxu1 %v24041_v22  ;;  %9529 = vmatprep.mubr.bf16.mxu0 %v22211_v63 }
 0x4f4   : > { %16070 = vmatmul.mubr.msk.bf16.gmra.mrb[148].mxu1 %vm389_vm1, %v22382_v62  ;;  %v15034_v28 = vpop.f32.mrb[76].mxu0 }
 0x4f5   : > { %16073 = vmatprep.mubr.msk.bf16.mxu1 %vm17595_vm0, %v24041_v22  ;;  %v15035_v43 = vpop.f32.mrb[77].mxu0 }
 0x4f6   : > { %v22389_v35 = vadd.f32 %v15035_v43, %v15034_v28  ;;  %v15037_v0 = vpop.f32.mrb[78].mxu0  ;;  %v22444_v43 = vld [vmem:[#allocation3 + $0x238] sm:$0xff] }
 0x4f7   : > { %v15038_v25 = vpop.f32.mrb[79].mxu0 }
 0x4f8   : > { %v22391_v30 = vadd.f32 %v15038_v25, %v15037_v0 }
 0x4f9   : > { %9530 = vmatmul.mubr.bf16.vlgmr.msra.gmra.mrb[184].mxu0 %v22233_v50 }
 0x4fa   : > { %9537 = vmatprep.mubr.bf16.mxu0 %v22236_v26  ;;  %16162 = vmatpush3.bf16.msra.mxu0 %v22332_v34  ;;  %v17331_v26 = vld [vmem:[%s23896_s5 + $0x48] sm:$0xff]  }
 0x4fb   : > { %16163 = vmatprep.subr.bf16.mxu0 %v17328_v29 }
 0x4fc   : > { %16074 = vmatmul.mubr.msk.bf16.gmra.mrb[152].mxu1 %vm389_vm1, %v22055_v37  ;;  %v15040_v63 = vpop.f32.mrb[80].mxu0 }
 0x4fd   : > { %16077 = vmatprep.mubr.msk.bf16.mxu1 %vm17595_vm0, %v24041_v22  ;;  %v15041_v17 = vpop.f32.mrb[81].mxu0 }
 0x4fe   : > { %v22406_v24 = vadd.f32 %v15041_v17, %v15040_v63  ;;  %v15043_v50 = vpop.f32.mrb[82].mxu0  ;;  %16164 = vmatpush3.bf16.msra.mxu0 %v17328_v29  ;;  %v8910_v29 = vrot.slane %v22382_v62, 4 }
 0x4ff   : > { %v15044_v56 = vpop.f32.mrb[83].mxu0  ;;  %16165 = vmatprep.subr.bf16.mxu0 %v17329_v6 }
 0x500   : > { %v22408_v37 = vadd.f32 %v15044_v56, %v15043_v50 }
 0x501   : > { %9538 = vmatmul.mubr.bf16.gmra.mrb[188].mxu0 %v22262_v14 }
 0x502   : > { %9545 = vmatprep.mubr.bf16.mxu0 %v22154_v44  ;;  %16166 = vmatpush3.bf16.msra.mxu0 %v17329_v6  ;;  %v22429_v44 = vld [vmem:[#allocation3 + $0x220] sm:$0xff] }
 0x503   : > { %16167 = vmatprep.subr.bf16.mxu0 %v17331_v26 }
 0x504   : > { %16078 = vmatmul.mubr.msk.bf16.gmra.mrb[156].mxu1 %vm389_vm1, %v22083_v21  ;;  %v15046_v34 = vpop.f32.mrb[84].mxu0  ;;  %v17335_v21 = vld [vmem:[%s23896_s5 + $0x58] sm:$0xff]  }
 0x505   : > { %16081 = vmatprep.mubr.msk.bf16.mxu1 %vm17595_vm0, %v24041_v22  ;;  %v15047_v5 = vpop.f32.mrb[85].mxu0 }
 0x506   : > { %v22422_v59 = vadd.f32 %v15047_v5, %v15046_v34  ;;  %v15049_v38 = vpop.f32.mrb[86].mxu0  ;;  %16168 = vmatpush3.bf16.msra.mxu0 %v17331_v26 }
 0x507   : > { %v15050_v14 = vpop.f32.mrb[87].mxu0  ;;  %16169 = vmatprep.subr.bf16.mxu0 %v17332_v48 }
 0x508   : > { %v22424_v7 = vadd.f32 %v15050_v14, %v15049_v38 }
 0x509   : > { %9546 = vmatmul.mubr.bf16.gmra.mrb[192].mxu0 %v22178_v58 }
 0x50a   : > { %9553 = vmatprep.mubr.bf16.mxu0 %v22182_v27  ;;  %16170 = vmatpush3.bf16.msra.mxu0 %v17332_v48  ;;  %v9704_v48 = vld [vmem:[#allocation4 + $0x8] sm:$0xff] }
 0x50b   : > { %16171 = vmatprep.subr.bf16.mxu0 %v17335_v21 }
 0x50c   : > { %16082 = vmatmul.mubr.msk.bf16.gmra.mrb[160].mxu1 %vm389_vm1, %v22429_v44  ;;  %v15052_v10 = vpop.f32.mrb[88].mxu0 }
 0x50d   : > { %16085 = vmatprep.mubr.msk.bf16.mxu1 %vm17595_vm0, %v24041_v22  ;;  %v15053_v15 = vpop.f32.mrb[89].mxu0 }
 0x50e   : > { %v22438_v19 = vadd.f32 %v15053_v15, %v15052_v10  ;;  %v15055_v54 = vpop.f32.mrb[90].mxu0  ;;  %16172 = vmatpush3.bf16.msra.mxu0 %v17335_v21  ;;  %v17573_v10 = vld [vmem:[#allocation4 + $0x20] sm:$0xff] }
 0x50f   : > { %v7507_v51 = vpop.f32.mrb[112].mxu1  ;;  %v15056_v31 = vpop.f32.mrb[91].mxu0 }
 0x510   : > { %v16459_v18 = vadd.f32 %v22205_v2, %v7507_v51  ;;  %v15955_v53 = vpop.f32.mrb[113].mxu1  ;;  %v22442_v28 = vadd.f32 %v15056_v31, %v15055_v54  ;;  %v8817_v2 = vld [vmem:[#allocation3 + $0x1c0] sm:$0xf0]  ;;  %v22467_v51 = vmax.f32 %v9704_v48, %v17573_v10  ;;  %v9703_v54 = vld [vmem:[#allocation4] sm:$0xff]  ;;  %v9716_v10 = vld [vmem:[#allocation4 + $0x68] sm:$0x7] }
 0x511   : > { %v7510_v58 = vpop.f32.mrb[114].mxu1  ;;  %9554 = vmatmul.mubr.bf16.gmra.mrb[196].mxu0 %v22201_v60  ;;  %v8909_v25 = vrot.slane %v8817_v2, 4  ;;  %v17574_v31 = vld [vmem:[#allocation4 + $0x60] sm:$0xff]  ;;  %v17575_v2 = vld [vmem:[#allocation4 + $0x18] sm:$0xff] }
 0x512   : > { %7576 = vst.msk [vmem:[#allocation4 + $0x70] sm:$0xff] %vm5462_vm10, %v16459_v18  ;;  %v16464_v27 = vadd.f32 %v22214_v33, %v7510_v58  ;;  %v15956_v49 = vpop.f32.mrb[115].mxu1  ;;  %9561 = vmatprep.mubr.bf16.mxu0 %v22318_v61  ;;  %v17326_v61 = vld [vmem:[%s23894_s3 + $0x300] sm:$0xff]   ;;  %v22479_v58 = vld [vmem:[#allocation3 + $0x208] sm:$0xff] }
 0x513   : > { %v8911_v15 = vsel %vm1778_vm9, %v8909_v25, %v8910_v29  ;;  %v9311_v18 = vld [vmem:[#allocation3 + $0x260] sm:$0xff] }
 0x514   : > { %7577 = vst.msk [vmem:[#allocation4 + $0x78] sm:$0xff] %vm5462_vm10, %v16464_v27  ;;  %16086 = vmatmul.mubr.msk.bf16.gmra.mrb[164].mxu1 %vm389_vm1, %v22444_v43  ;;  %v15058_v0 = vpop.f32.mrb[92].mxu0 }
 0x515   : > { %16097 = vmatprep.mubr.msk.bf16.mxu1 %vm17595_vm0, %v24041_v22  ;;  %v15059_v63 = vpop.f32.mrb[93].mxu0 }
 0x516   : > { %v22455_v17 = vadd.f32 %v15059_v63, %v15058_v0  ;;  %v15061_v50 = vpop.f32.mrb[94].mxu0  ;;  %v17330_v0 = vld [vmem:[%s23894_s3 + $0x308] sm:$0xff]  }
 0x517   : > { %v7515_v33 = vpop.f32.mrb[116].mxu1  ;;  %v15062_v26 = vpop.f32.mrb[95].mxu0 }
 0x518   : > { %v16469_v6 = vadd.f32 %v22230_v32, %v7515_v33  ;;  %v15959_v60 = vpop.f32.mrb[117].mxu1  ;;  %v22464_v14 = vadd.f32 %v15062_v26, %v15061_v50  ;;  %v17572_v32 = vld [vmem:[#allocation4 + $0x58] sm:$0xff] }
 0x519   : > { %v7518_v56 = vpop.f32.mrb[118].mxu1  ;;  %v22460_v34 = vld [vmem:[#allocation4 + $0x70] sm:$0xff]  ;;  %9562 = vmatmul.mubr.bf16.gmra.mrb[200].mxu0 %v22344_v8  ;;  %v22484_v8 = vmax.f32 %v9703_v54, %v17575_v2  ;;  %v22508_v2 = vld [vmem:[%s23895_s4] ss:$0 sm:$0xff] }
 0x51a   : > { %7578 = vst.msk [vmem:[#allocation4 + $0x80] sm:$0xff] %vm5462_vm10, %v16469_v6  ;;  %v16474_v5 = vadd.f32 %v22239_v39, %v7518_v56  ;;  %v15960_v38 = vpop.f32.mrb[119].mxu1  ;;  %v9732_v21 = vmax.f32 %v17572_v32, %v22460_v34  ;;  %9569 = vmatprep.mubr.bf16.mxu0 %v9311_v18  ;;  %v22477_v39 = vld [vmem:[#allocation3 + $0x1f0] sm:$0xff]  ;;  %v9750_v6 = vrot.slane %v22467_v51, 1 }
 0x51b   : > { %v22473_v53 = vld [vmem:[#allocation4 + $0x78] sm:$0xff]  ;;  %v8916_v50 = vrot.slane %v22477_v39, 4 }
 0x51c   : > { %7579 = vst.msk [vmem:[#allocation4 + $0x88] sm:$0xff] %vm5462_vm10, %v16474_v5  ;;  %16098 = vmatmul.mubr.msk.bf16.vlgmr.msra.gmra.mrb[140].mxu1 %vm389_vm1, %v8911_v15  ;;  %v22482_v27 = vmax.f32 %v17574_v31, %v22473_v53  ;;  %v9770_v49 = vrot.slane %v9732_v21, 1  ;;  %v15064_v33 = vpop.f32.mrb[96].mxu0  ;;  %v9749_v15 = vrot.slane %v22484_v8, 1 }
 0x51d   : > { %16126 = vmatpush3.bf16.msra.mxu1 %v17326_v61  ;;  %16101 = vmatprep.mubr.msk.bf16.mxu1 %vm17595_vm0, %v24041_v22  ;;  %v15065_v56 = vpop.f32.mrb[97].mxu0  ;;  %v23985_v61 = vrot.slane %v22479_v58, 4 }
 0x51e   : > { %16127 = vmatprep.subr.bf16.mxu1 %v24041_v22  ;;  %v9771_v25 = vsel %vm1122_vm2, %v9768_v40, %v9770_v49  ;;  %v9772_v63 = vrot.slane %v22482_v27, 1  ;;  %v22501_v38 = vadd.f32 %v15065_v56, %v15064_v33  ;;  %v15067_v32 = vpop.f32.mrb[98].mxu0  ;;  %v17336_v33 = vld [vmem:[%s23894_s3 + $0x310] sm:$0xff]  }
 0x51f   : > { %v7523_v60 = vpop.f32.mrb[120].mxu1  ;;  %v9800_v26 = vmax.f32 %v21782_v11, %v9771_v25  ;;  %v15068_v54 = vpop.f32.mrb[99].mxu0  ;;  %v8923_v62 = vsel %vm1778_vm9, %v8916_v50, %v23985_v61  ;;  %v22567_v61 = vld [vmem:[#allocation5 + $0xc] sm:$0xf] }
 0x520   : > { %v16479_v48 = vadd.f32 %v22259_v20, %v7523_v60  ;;  %v15963_v5 = vpop.f32.mrb[121].mxu1  ;;  %v9773_v40 = vsel %vm1122_vm2, %v9770_v49, %v9772_v63  ;;  %v9310_v60 = vld [vmem:[#allocation3 + $0x258] sm:$0xff]  ;;  %24155 = vst [vmem:[#allocation15_spill] sm:$0xff] %v22567_v61 }
 0x521   : > { %v7526_v18 = vpop.f32.mrb[122].mxu1  ;;  %16128 = vmatpush3.bf16.msra.mxu1 %v17330_v0  ;;  %v9801_v31 = vmax.f32 %v9732_v21, %v9773_v40  ;;  %v9820_v11 = vadd.f32 %v22508_v2, %v9800_v26  ;;  %v9720_v20 = vld [vmem:[#allocation4 + $0x80] sm:$0x7]  ;;  %v22518_v21 = vadd.f32 %v15068_v54, %v15067_v32  ;;  %v10038_v5 = vld [vmem:[#allocation4 + $0x68] sm:$0xff]  ;;  %v22522_v26 = vsel %vm1122_vm2, %v9749_v15, %v9750_v6 }
 0x522   : > { %v22514_v49 = vld [vmem:[#allocation4 + $0x80] sm:$0xff]  ;;  %7580 = vst.msk [vmem:[#allocation4 + $0x90] sm:$0xff] %vm5462_vm10, %v16479_v48  ;;  %v16484_v25 = vadd.f32 %v22267_v4, %v7526_v18  ;;  %v15964_v0 = vpop.f32.mrb[123].mxu1  ;;  %v9734_v56 = vmax.f32 %v9716_v10, %v9720_v20  ;;  %16129 = vmatprep.subr.bf16.mxu1 %v24041_v22  ;;  %v8917_v40 = vsel %vm1778_vm9, %v8910_v29, %v8916_v50  ;;  %v24154_v10 = vrot.slane %v21575_v55, 1 }
 0x523   : > { %9570 = vmatmul.mubr.bf16.gmra.mrb[204].mxu0 %v9310_v60  ;;  %v9821_v48 = vadd.f32 %v22508_v2, %v9801_v31  ;;  %v22528_v4 = vld [vmem:[#allocation4 + $0x88] sm:$0xff]  ;;  %v22531_v32 = vmax.f32 %v10038_v5, %v22514_v49  ;;  %v9834_v55 = vmax.f32 %v9820_v11, 0.0  ;;  %v9882_v31 = vshrl.u32 %v21843_v1, 16 }
 0x524   : > { %v22536_v18 = vsel %vm1122_vm2, %v9750_v6, %v24154_v10  ;;  %7581 = vst.msk [vmem:[#allocation4 + $0x98] sm:$0xff] %vm5462_vm10, %v16484_v25  ;;  %16102 = vmatmul.mubr.msk.bf16.gmra.mrb[144].mxu1 %vm389_vm1, %v8917_v40  ;;  %9577 = vmatprep.mubr.bf16.mxu0 %v9314_v12  ;;  %v9774_v15 = vrot.slane %v9734_v56, 1  ;;  %v22546_v54 = vmax.f32 %v22460_v34, %v22528_v4  ;;  %v17337_v12 = vld [vmem:[%s23894_s3 + $0x318] sm:$0xff]   ;;  %v15097_v20 = vpop.f32.mrb[100].mxu0  ;;  %v10698_v25 = vld [vmem:[#allocation5 + $0x10] sm:$0xf] }
 0x525   : > { %16105 = vmatprep.mubr.msk.bf16.mxu1 %vm17595_vm0, %v24041_v22  ;;  %v9835_v6 = vmax.f32 %v9821_v48, 0.0  ;;  %16130 = vmatpush3.bf16.msra.mxu1 %v17336_v33  ;;  %v9790_v50 = vmax.f32 %v22484_v8, %v22522_v26  ;;  %v9791_v11 = vmax.f32 %v22467_v51, %v22536_v18  ;;  %v15098_v5 = vpop.f32.mrb[101].mxu0  ;;  %v9884_v48 = vor.u32 %v9882_v31, %v21860_v45 }
 0x526   : > { %v9775_v34 = vsel %vm1122_vm2, %v9772_v63, %v9774_v15  ;;  %v9803_v0 = vmax.f32 %v9734_v56, %v9774_v15  ;;  %v10085_v60 = vrot.slane %v22546_v54, 1  ;;  %16131 = vmatprep.subr.bf16.mxu1 %v24041_v22  ;;  %v10084_v26 = vrot.slane %v22531_v32, 1  ;;  %v15100_v15 = vpop.f32.mrb[102].mxu0 }
 0x527   : > { %v7531_v33 = vpop.f32.mrb[124].mxu1  ;;  %v22561_v40 = vpack.c.bf16 %v9835_v6, %v9834_v55  ;;  %v9802_v8 = vmax.f32 %v22482_v27, %v9775_v34  ;;  %v15099_v10 = vadd.f32 %v15098_v5, %v15097_v20  ;;  %v15101_v6 = vpop.f32.mrb[103].mxu0  ;;  %v13897_v45 = vcombine.low %v22567_v61, %v10698_v25  ;;  %v9313_v5 = vld [vmem:[#allocation3 + $0x270] sm:$0xff] }
 0x528   : > { %v16489_v63 = vadd.f32 %v22287_v52, %v7531_v33  ;;  %v15967_v56 = vpop.f32.mrb[125].mxu1  ;;  %v9823_v51 = vadd.f32 %v22508_v2, %v9803_v0  ;;  %v10086_v52 = vsel %vm1122_vm2, %v10084_v26, %v10085_v60  ;;  %v15102_v33 = vadd.f32 %v15101_v6, %v15100_v15 }
 0x529   : > { %v7534_v18 = vpop.f32.mrb[126].mxu1  ;;  %v9886_v55 = vshll.u32 %v22561_v40, 16  ;;  %v9822_v27 = vadd.f32 %v22508_v2, %v9802_v8  ;;  %v22573_v31 = vld [vmem:[#allocation4 + $0x90] sm:$0xff]  ;;  %16132 = vmatpush3.bf16.msra.mxu1 %v17337_v12  ;;  %v22581_v0 = vadd.f32 %v15099_v10, %v22376_v36  ;;  %v23989_v29 = vrot.slane %v22561_v40, 1 }
 0x52a   : > { %7582 = vst.msk [vmem:[#allocation4 + $0xa0] sm:$0xff] %vm5462_vm10, %v16489_v63  ;;  %v16494_v20 = vadd.f32 %v22293_v57, %v7534_v18  ;;  %v15968_v34 = vpop.f32.mrb[127].mxu1  ;;  %v9837_v25 = vmax.f32 %v9823_v51, 0.0  ;;  %v10700_v56 = vld [vmem:[#allocation5 + $0x18] sm:$0xf]  ;;  %v22590_v12 = vmax.f32 %v22473_v53, %v22573_v31  ;;  %v22595_v57 = vadd.f32 %v15102_v33, %v22378_v41 }
 0x52b   : > { %v9888_v8 = vrot.slane %v9886_v55, 1  ;;  %9578 = vmatmul.mubr.bf16.gmra.mrb[208].mxu0 %v9313_v5  ;;  %v22584_v61 = vmax.f32 %v9822_v27, 0.0  ;;  %v22586_v26 = vld [vmem:[#allocation4 + $0x98] sm:$0xff]  ;;  %v24157_v36 = vrot.slane %v22429_v44, 4  ;;  %v24158_v63 = vrot.slane %v22479_v58, 4 }
 0x52c   : > { %7583 = vst.msk [vmem:[#allocation4 + $0xa8] sm:$0xff] %vm5462_vm10, %v16494_v20  ;;  %16106 = vmatmul.mubr.msk.bf16.gmra.mrb[148].mxu1 %vm389_vm1, %v8923_v62  ;;  %16173 = vmatprep.mubr.msk.bf16.mxu0 %vm10797_vm12, %v13897_v45  ;;  %v9890_v15 = vshrl.u32 %v22561_v40, 16  ;;  %v22606_v53 = vmax.f32 %v22514_v49, %v22586_v26  ;;  %v22608_v51 = vld [vmem:[#allocation5 + $0x14] sm:$0xf]  ;;  %v10087_v18 = vrot.slane %v22590_v12, 1  ;;  %v10125_v55 = vmax.f32 %v22531_v32, %v10086_v52  ;;  %v15103_v49 = vpop.f32.mrb[104].mxu0 }
 0x52d   : > { %24156 = vst [vmem:[#allocation20_spill] sm:$0xff] %v22584_v61  ;;  %v8929_v10 = vsel %vm1778_vm9, %v24158_v63, %v24157_v36  ;;  %24159 = vst [vmem:[#allocation19_spill] sm:$0xff] %v22608_v51  ;;  %v9889_v62 = vsel %vm1274_vm5, %v9884_v48, %v9888_v8  ;;  %16109 = vmatprep.mubr.msk.bf16.mxu1 %vm17595_vm0, %v24041_v22  ;;  %v22614_v41 = vpack.c.bf16 %v9837_v25, %v22584_v61  ;;  %v15104_v5 = vpop.f32.mrb[105].mxu0 }
 0x52e   : > { %v13898_v6 = vcombine.low %v22608_v51, %v10700_v56  ;;  %9909 = vrot.lane.b32.xlu0 %v9889_v62, %s17597_s30  ;;  %v10089_v45 = vrot.slane %v22606_v53, 1  ;;  %v22622_v27 = vadd.f32 %v22508_v2, %v9790_v50  ;;  %v22625_v48 = vadd.f32 %v22508_v2, %v9791_v11  ;;  %v15106_v36 = vpop.f32.mrb[106].mxu0 }
 0x52f   : > { %v7539_v20 = vpop.f32.mrb[128].mxu1  ;;  %v24160_v34 = vrot.slane %v21843_v1, 1  ;;  %v9892_v52 = vor.u32 %v9890_v15, %v9888_v8  ;;  %v9894_v33 = vshll.u32 %v22614_v41, 16  ;;  %v10088_v25 = vsel %vm1122_vm2, %v10085_v60, %v10087_v18  ;;  %v15107_v15 = vpop.f32.mrb[107].mxu0 }
 0x530   : > { %v16499_v50 = vadd.f32 %v22313_v46, %v7539_v20  ;;  %v15971_v56 = vpop.f32.mrb[129].mxu1  ;;  %v15105_v11 = vadd.f32 %v15104_v5, %v15103_v49  ;;  %v10090_v63 = vsel %vm1122_vm2, %v10087_v18, %v10089_v45  ;;  %v10126_v62 = vmax.f32 %v22546_v54, %v10088_v25 }
 0x531   : > { %v9932_v32 = vsel %vm1122_vm2, %v24160_v34, %v23989_v29  ;;  %v7542_v51 = vpop.f32.mrb[130].mxu1  ;;  %v9896_v61 = vrot.slane %v9894_v33, 1  ;;  %v9898_v8 = vshrl.u32 %v22614_v41, 16  ;;  %v9933_v34 = vrot.slane %v22614_v41, 1  ;;  %v22641_v29 = vld [vmem:[#allocation4 + $0xa0] sm:$0xff] }
 0x532   : > { %v10139_v60 = vadd.f32 %v22508_v2, %v10125_v55  ;;  %7584 = vst.msk [vmem:[#allocation4 + $0xb0] sm:$0xff] %vm5462_vm10, %v16499_v50  ;;  %v16504_v46 = vadd.f32 %v22321_v13, %v7542_v51  ;;  %v15972_v49 = vpop.f32.mrb[131].mxu1  ;;  %9943 = vrot.lane.b32.xlu0 %v9932_v32, %s17596_s23  ;;  %v22648_v54 = vadd.f32 %v15105_v11, %v22389_v35  ;;  %v22658_v51 = vld [vmem:[#allocation3 + $0x250] sm:$0xff] }
 0x533   : > { %v15108_v18 = vadd.f32 %v15107_v15, %v15106_v36  ;;  %v22652_v20 = vmax.f32 %v22528_v4, %v22641_v29  ;;  %v9897_v33 = vsel %vm1274_vm5, %v9892_v52, %v9896_v61  ;;  %v9900_v5 = vor.u32 %v9898_v8, %v9896_v61  ;;  %16174 = vmatmul.mubr.msk.bf16.vlgmr.msra.gmra.mrb[212].mxu0 %vm10797_vm12, %v13898_v6  ;;  %v22660_v32 = vld [vmem:[#allocation4 + $0xa8] sm:$0xff]  ;;  %v17340_v6 = vld [vmem:[%s23896_s5] sm:$0xff]  }
 0x534   : > { %v10127_v55 = vmax.f32 %v22590_v12, %v10090_v63  ;;  %v10140_v13 = vadd.f32 %v22508_v2, %v10126_v62  ;;  %7585 = vst.msk [vmem:[#allocation4 + $0xb8] sm:$0xff] %vm5462_vm10, %v16504_v46  ;;  %16110 = vmatmul.mubr.msk.bf16.gmra.mrb[152].mxu1 %vm389_vm1, %v8929_v10  ;;  %9911 = vrot.lane.b32.xlu1 %v9897_v33, %s17597_s30  ;;  %v9825_v4 = vmax.f32 %v22625_v48, 0.0  ;;  %v8934_v10 = vrot.slane %v22444_v43, 4  ;;  %v15109_v25 = vpop.f32.mrb[108].mxu0 }
 0x535   : > { %v22666_v35 = vadd.f32 %v15108_v18, %v22391_v30  ;;  %v10091_v61 = vrot.slane %v22652_v20, 1  ;;  %v22672_v12 = vmax.f32 %v22573_v31, %v22660_v32  ;;  %16113 = vmatprep.mubr.msk.bf16.mxu1 %vm17595_vm0, %v24041_v22  ;;  %v10153_v52 = vmax.f32 %v10139_v60, 0.0  ;;  %16185 = vmatprep.subr.bf16.mxu0 %v17340_v6  ;;  %v15110_v62 = vpop.f32.mrb[109].mxu0 }
 0x536   : > { %v10154_v30 = vmax.f32 %v10140_v13, 0.0  ;;  %9913 = vrot.lane.b32.xlu0 %v9900_v5, %s17597_s30  ;;  %v23990_v50 = vrot.slane %v22658_v51, 4  ;;  %v9824_v31 = vmax.f32 %v22622_v27, 0.0  ;;  %v24161_v36 = vrot.slane %v22561_v40, 1  ;;  %16186 = vmatpush3.bf16.msra.mxu0 %v17340_v6  ;;  %v15112_v49 = vpop.f32.mrb[110].mxu0 }
 0x537   : > { %v10092_v48 = vsel %vm1122_vm2, %v10089_v45, %v10091_v61  ;;  %v10093_v56 = vrot.slane %v22672_v12, 1  ;;  %v7547_v11 = vpop.f32.mrb[132].mxu1  ;;  %v10141_v15 = vadd.f32 %v22508_v2, %v10127_v55  ;;  %v15111_v46 = vadd.f32 %v15110_v62, %v15109_v25  ;;  %v15113_v55 = vpop.f32.mrb[111].mxu0 }
 0x538   : > { %v9934_v63 = vsel %vm1122_vm2, %v24161_v36, %v9933_v34  ;;  %v10128_v8 = vmax.f32 %v22606_v53, %v10092_v48  ;;  %v22692_v45 = vpack.c.bf16 %v10154_v30, %v10153_v52  ;;  %v16509_v27 = vadd.f32 %v22341_v3, %v7547_v11  ;;  %v15975_v60 = vpop.f32.mrb[133].mxu1 }
 0x539   : > { %9945 = vrot.lane.b32.xlu1 %v9934_v63, %s17596_s23  ;;  %v22696_v18 = vpack.c.bf16 %v9825_v4, %v9824_v31  ;;  %v10094_v33 = vsel %vm1122_vm2, %v10091_v61, %v10093_v56  ;;  %v7550_v5 = vpop.f32.mrb[134].mxu1  ;;  %v24163_v13 = vrot.slane %v22429_v44, 4  ;;  %v22702_v52 = vld [vmem:[#allocation4 + $0xb0] sm:$0xff]  ;;  %v22709_v25 = vadd.f32 %v15111_v46, %v22406_v24 }
 0x53a   : > { %v10142_v6 = vadd.f32 %v22508_v2, %v10128_v8  ;;  %v10178_v3 = vshll.u32 %v22692_v45, 16  ;;  %7586 = vst.msk [vmem:[#allocation4 + $0xc0] sm:$0xff] %vm5462_vm10, %v16509_v27  ;;  %v16514_v30 = vadd.f32 %v22348_v42, %v7550_v5  ;;  %v15976_v4 = vpop.f32.mrb[135].mxu1  ;;  %v15114_v61 = vadd.f32 %v15113_v55, %v15112_v49  ;;  %v17342_v42 = vld [vmem:[%s23896_s5 + $0x8] sm:$0xff]  }
 0x53b   : > { %24162 = vst [vmem:[#allocation12_spill] sm:$0xff] %v22696_v18  ;;  %v8935_v53 = vsel %vm1778_vm9, %v24163_v13, %v8934_v10  ;;  %v22713_v48 = vmax.f32 %v22586_v26, %v22702_v52  ;;  %v10155_v31 = vmax.f32 %v10141_v15, 0.0  ;;  %v8941_v36 = vsel %vm1778_vm9, %v8934_v10, %v23990_v50  ;;  %v22719_v62 = vld [vmem:[#allocation4 + $0xb8] sm:$0xff]  ;;  %16187 = vmatprep.subr.bf16.mxu0 %v17342_v42 }
 0x53c   : > { %v10156_v11 = vmax.f32 %v10142_v6, 0.0  ;;  %v10129_v63 = vmax.f32 %v22652_v20, %v10094_v33  ;;  %7587 = vst.msk [vmem:[#allocation4 + $0xc8] sm:$0xff] %vm5462_vm10, %v16514_v30  ;;  %16114 = vmatmul.mubr.msk.bf16.gmra.mrb[156].mxu1 %vm389_vm1, %v8935_v53  ;;  %v22730_v24 = vadd.f32 %v15114_v61, %v22408_v37  ;;  %v9849_v26 = vshll.u32 %v22696_v18, 16  ;;  %v15115_v27 = vpop.f32.mrb[112].mxu0  ;;  %16188 = vmatpush3.bf16.msra.mxu0 %v17342_v42  ;;  %v17344_v6 = vld [vmem:[%s23896_s5 + $0x10] sm:$0xff]  }
 0x53d   : > { %9947 = vrot.lane.b32.xlu1 %v9933_v34, %s17596_s23  ;;  %v10095_v20 = vrot.slane %v22713_v48, 1  ;;  %v22736_v10 = vmax.f32 %v22641_v29, %v22719_v62  ;;  %16117 = vmatprep.mubr.msk.bf16.mxu1 %vm17595_vm0, %v24041_v22  ;;  %v10180_v15 = vrot.slane %v10178_v3, 1  ;;  %v9922_v41 = vrot.slane %v22696_v18, 1  ;;  %v15116_v13 = vpop.f32.mrb[113].mxu0 }
 0x53e   : > { %v22738_v8 = vpack.c.bf16 %v10156_v11, %v10155_v31  ;;  %v9847_v34 = vshrl.u32 %v22696_v18, 16  ;;  %v10251_v37 = vrot.slane %v22692_v45, 1  ;;  %v10176_v60 = vshrl.u32 %v22692_v45, 16  ;;  %v15118_v4 = vpop.f32.mrb[114].mxu0  ;;  %16189 = vmatprep.subr.bf16.mxu0 %v17344_v6 }
 0x53f   : > { %v10096_v46 = vsel %vm1122_vm2, %v10093_v56, %v10095_v20  ;;  %v10097_v29 = vrot.slane %v22736_v10, 1  ;;  %v7555_v49 = vpop.f32.mrb[136].mxu1  ;;  %v10143_v55 = vadd.f32 %v22508_v2, %v10129_v63  ;;  %v15117_v30 = vadd.f32 %v15116_v13, %v15115_v27  ;;  %v15119_v63 = vpop.f32.mrb[115].mxu0 }
 0x540   : > { %v10252_v33 = vrot.slane %v22738_v8, 1  ;;  %v10183_v5 = vshll.u32 %v22738_v8, 16  ;;  %v10130_v53 = vmax.f32 %v22672_v12, %v10096_v46  ;;  %v16519_v3 = vadd.f32 %v22363_v16, %v7555_v49  ;;  %v15979_v56 = vpop.f32.mrb[137].mxu1  ;;  %16190 = vmatpush3.bf16.msra.mxu0 %v17344_v6  ;;  %v17349_v6 = vld [vmem:[%s23896_s5 + $0x20] sm:$0xff]  }
 0x541   : > { %v9851_v61 = vrot.slane %v9849_v26, 1  ;;  %v10098_v31 = vsel %vm1122_vm2, %v10095_v20, %v10097_v29  ;;  %v7558_v11 = vpop.f32.mrb[138].mxu1  ;;  %v10181_v12 = vor.u32 %v10180_v15, %v10176_v60  ;;  %v22760_v50 = vld [vmem:[#allocation4 + $0xc0] sm:$0xff]  ;;  %v22767_v20 = vadd.f32 %v15117_v30, %v22422_v59  ;;  %v17346_v59 = vld [vmem:[%s23896_s5 + $0x18] sm:$0xff]  }
 0x542   : > { %v10253_v42 = vsel %vm1122_vm2, %v10251_v37, %v10252_v33  ;;  %v10185_v46 = vrot.slane %v10183_v5, 1  ;;  %v10144_v18 = vadd.f32 %v22508_v2, %v10130_v53  ;;  %7588 = vst.msk [vmem:[#allocation4 + $0xd0] sm:$0xff] %vm5462_vm10, %v16519_v3  ;;  %v16524_v16 = vadd.f32 %v22368_v9, %v7558_v11  ;;  %v15980_v26 = vpop.f32.mrb[139].mxu1  ;;  %v8838_v37 = vld [vmem:[#allocation3 + $0x268] sm:$0xf]  ;;  %v22780_v9 = vld [vmem:[%s23896_s5 + $0x30] sm:$0xff]   ;;  %16191 = vmatprep.subr.bf16.mxu0 %v17346_v59 }
 0x543   : > { %10264 = vrot.lane.b32.xlu1 %v10253_v42, %s17596_s23  ;;  %v15120_v27 = vadd.f32 %v15119_v63, %v15118_v4  ;;  %v22771_v15 = vmax.f32 %v22660_v32, %v22760_v50  ;;  %v10157_v49 = vmax.f32 %v10143_v55, 0.0  ;;  %v10131_v13 = vmax.f32 %v22713_v48, %v10098_v31  ;;  %v22775_v53 = vld [vmem:[#allocation4 + $0xc8] sm:$0xff]  ;;  %16233 = vmatprep.subr.bf16.mxu1 %v22780_v9 }
 0x544   : > { %v10186_v60 = vsel %vm1274_vm5, %v10181_v12, %v10185_v46  ;;  %v10158_v5 = vmax.f32 %v10144_v18, 0.0  ;;  %7589 = vst.msk [vmem:[#allocation4 + $0xd8] sm:$0xff] %vm5462_vm10, %v16524_v16  ;;  %16118 = vmatmul.mubr.msk.bf16.gmra.mrb[160].mxu1 %vm389_vm1, %v8941_v36  ;;  %v9852_v18 = vor.u32 %v9851_v61, %v9847_v34  ;;  %v22794_v55 = vmax.f32 %v22702_v52, %v22775_v53  ;;  %v15121_v34 = vpop.f32.mrb[116].mxu0 }
 0x545   : > { %10230 = vrot.lane.b32.xlu0 %v10186_v60, %s17597_s30  ;;  %v22789_v32 = vadd.f32 %v15120_v27, %v22424_v7  ;;  %v10099_v48 = vrot.slane %v22771_v15, 1  ;;  %v24164_v3 = vrot.slane %v21684_v47, 1  ;;  %16121 = vmatprep.mubr.msk.bf16.mxu1 %vm17595_vm0, %v24041_v22  ;;  %v8946_v7 = vrot.slane %v8838_v37, 4  ;;  %v15122_v31 = vpop.f32.mrb[117].mxu0 }
 0x546   : > { %v22802_v56 = vpack.c.bf16 %v10158_v5, %v10157_v49  ;;  %v9857_v52 = vsel %vm1274_vm5, %v9852_v18, %v21742_v23  ;;  %v10187_v30 = vshrl.u32 %v22738_v8, 16  ;;  %v10145_v42 = vadd.f32 %v22508_v2, %v10131_v13  ;;  %16192 = vmatpush3.bf16.msra.mxu0 %v17346_v59  ;;  %v15124_v12 = vpop.f32.mrb[118].mxu0 }
 0x547   : > { %v9924_v36 = vsel %vm1122_vm2, %v9922_v41, %v24164_v3  ;;  %v10100_v47 = vsel %vm1122_vm2, %v10097_v29, %v10099_v48  ;;  %v10101_v41 = vrot.slane %v22794_v55, 1  ;;  %v15123_v23 = vadd.f32 %v15122_v31, %v15121_v34  ;;  %16193 = vmatprep.subr.bf16.mxu0 %v17349_v6  ;;  %v15125_v27 = vpop.f32.mrb[119].mxu0 }
 0x548   : > { %9935 = vrot.lane.b32.xlu1 %v9924_v36, %s17596_s23  ;;  %v10254_v4 = vrot.slane %v22802_v56, 1  ;;  %v10191_v61 = vshll.u32 %v22802_v56, 16  ;;  %v10132_v11 = vmax.f32 %v22736_v10, %v10100_v47  ;;  %v10189_v16 = vor.u32 %v10187_v30, %v10185_v46 }
 0x549   : > { %9901 = vrot.lane.b32.xlu0 %v9857_v52, %s17597_s30  ;;  %v10102_v63 = vsel %vm1122_vm2, %v10099_v48, %v10101_v41  ;;  %v10052_v37 = vld [vmem:[#allocation4 + $0xd0] sm:$0xff]  ;;  %v24165_v60 = vrot.slane %v22658_v51, 4  ;;  %v22828_v5 = vadd.f32 %v15123_v23, %v22438_v19  ;;  %v15126_v13 = vadd.f32 %v15125_v27, %v15124_v12 }
 0x54a   : > { %v10255_v29 = vsel %vm1122_vm2, %v10252_v33, %v10254_v4  ;;  %v10193_v26 = vrot.slane %v10191_v61, 1  ;;  %v10146_v10 = vadd.f32 %v22508_v2, %v10132_v11  ;;  %v22831_v59 = vmax.f32 %v22719_v62, %v10052_v37  ;;  %16194 = vmatpush3.bf16.msra.mxu0 %v17349_v6  ;;  %v17351_v62 = vld [vmem:[%s23896_s5 + $0x28] sm:$0xff]  }
 0x54b   : > { %v8947_v49 = vsel %vm1778_vm9, %v24165_v60, %v8946_v7  ;;  %v10159_v46 = vmax.f32 %v10145_v42, 0.0  ;;  %v10133_v48 = vmax.f32 %v22771_v15, %v10102_v63  ;;  %v22838_v3 = vadd.f32 %v15126_v13, %v22442_v28  ;;  %v22851_v15 = vld [vmem:[%s23896_s5 + $0x60] sm:$0xff]   ;;  %16195 = vmatprep.subr.bf16.mxu0 %v17351_v62 }
 0x54c   : > { %10266 = vrot.lane.b32.xlu1 %v10255_v29, %s17596_s23  ;;  %v10194_v33 = vsel %vm1274_vm5, %v10189_v16, %v10193_v26  ;;  %v10160_v18 = vmax.f32 %v10146_v10, 0.0  ;;  %16122 = vmatmul.mubr.msk.bf16.gmra.mrb[164].mxu1 %vm389_vm1, %v8947_v49  ;;  %v10103_v19 = vrot.slane %v22831_v59, 1  ;;  %v15127_v6 = vpop.f32.mrb[120].mxu0  ;;  %v10195_v42 = vshrl.u32 %v22802_v56, 16  ;;  %v17347_v29 = vld [vmem:[%s23896_s5 + $0x38] sm:$0xff]  }
 0x54d   : > { %10232 = vrot.lane.b32.xlu0 %v10194_v33, %s17597_s30  ;;  %16133 = vmatprep.mubr.msk.bf16.mxu1 %vm17595_vm0, %v24041_v22  ;;  %v15128_v52 = vpop.f32.mrb[121].mxu0  ;;  %v10147_v47 = vadd.f32 %v22508_v2, %v10133_v48 }
 0x54e   : > { %v22841_v36 = vpack.c.bf16 %v10160_v18, %v10159_v46  ;;  %v10104_v28 = vsel %vm1122_vm2, %v10101_v41, %v10103_v19  ;;  %v15129_v61 = vadd.f32 %v15128_v52, %v15127_v6  ;;  %v15130_v31 = vpop.f32.mrb[122].mxu0  ;;  %16196 = vmatpush3.bf16.msra.mxu0 %v17351_v62  ;;  %v10197_v16 = vor.u32 %v10195_v42, %v10193_v26 }
 0x54f   : > { %v10134_v30 = vmax.f32 %v22794_v55, %v10104_v28  ;;  %v15131_v12 = vpop.f32.mrb[123].mxu0  ;;  %16209 = vmatprep.subr.bf16.mxu0 %v22851_v15  ;;  %v17353_v28 = vld [vmem:[%s23896_s5 + $0x48] sm:$0xff]  }
 0x550   : > { %v10256_v7 = vrot.slane %v22841_v36, 1  ;;  %v10199_v34 = vshll.u32 %v22841_v36, 16  ;;  %v22866_v55 = vadd.f32 %v15129_v61, %v22455_v17  ;;  %v15132_v63 = vadd.f32 %v15131_v12, %v15130_v31 }
 0x551   : > { %v10148_v41 = vadd.f32 %v22508_v2, %v10134_v30  ;;  %v10203_v26 = vshrl.u32 %v22841_v36, 16 }
 0x552   : > { %v10257_v11 = vsel %vm1122_vm2, %v10254_v4, %v10256_v7  ;;  %v10201_v23 = vrot.slane %v10199_v34, 1  ;;  %v10161_v4 = vmax.f32 %v10147_v47, 0.0  ;;  %v22874_v2 = vadd.f32 %v15132_v63, %v22464_v14  ;;  %v17357_v34 = vld [vmem:[%s23896_s5 + $0x50] sm:$0xff]  }
 0x553   : > { %10268 = vrot.lane.b32.xlu0 %v10257_v11, %s17596_s23  ;;  %v10162_v27 = vmax.f32 %v10148_v41, 0.0  ;;  %v17359_v11 = vld [vmem:[%s23896_s5 + $0x58] sm:$0xff]  }
 0x554   : > { %16134 = vmatmul.mubr.msk.bf16.vlgmr.msra.gmra.mrb[140].mxu1 %vm389_vm1, %v22477_v39  ;;  %v10202_v37 = vsel %vm1274_vm5, %v10197_v16, %v10201_v23  ;;  %v15133_v17 = vpop.f32.mrb[124].mxu0  ;;  %v17350_v39 = vld [vmem:[%s23896_s5 + $0x40] sm:$0xff]   ;;  %v10205_v46 = vor.u32 %v10203_v26, %v10201_v23 }
 0x555   : > { %v22877_v10 = vpack.c.bf16 %v10162_v27, %v10161_v4  ;;  %16137 = vmatprep.mubr.msk.bf16.mxu1 %vm17595_vm0, %v24041_v22  ;;  %16234 = vmatpush3.bf16.msra.mxu1 %v22780_v9  ;;  %v15134_v49 = vpop.f32.mrb[125].mxu0 }
 0x556   : > { %16235 = vmatprep.subr.bf16.mxu1 %v17347_v29  ;;  %v15135_v13 = vadd.f32 %v15134_v49, %v15133_v17  ;;  %v15136_v33 = vpop.f32.mrb[126].mxu0 }
 0x557   : > { %10234 = vrot.lane.b32.xlu0 %v10202_v37, %s17597_s30  ;;  %v10258_v14 = vrot.slane %v22877_v10, 1  ;;  %v10207_v60 = vshll.u32 %v22877_v10, 16  ;;  %v15137_v48 = vpop.f32.mrb[127].mxu0 }
 0x558   : > { %v22896_v62 = vadd.f32 %v15135_v13, %v22501_v38  ;;  %v15138_v6 = vadd.f32 %v15137_v48, %v15136_v33 }
 0x559   : > { %v10259_v9 = vsel %vm1122_vm2, %v10256_v7, %v10258_v14  ;;  %v22892_v18 = vrot.slane %v10207_v60, 1  ;;  %16236 = vmatpush3.bf16.msra.mxu1 %v17347_v29 }
 0x55a   : > { %10270 = vrot.lane.b32.xlu1 %v10259_v9, %s17596_s23  ;;  %16237 = vmatprep.subr.bf16.mxu1 %v17350_v39  ;;  %v22907_v7 = vadd.f32 %v15138_v6, %v22518_v21  ;;  %v9312_v9 = vld [vmem:[#allocation3 + $0x268] sm:$0xff] }
 0x55b   : > { %v10210_v52 = vsel %vm1274_vm5, %v10205_v46, %v22892_v18 }
 0x55c   : > { %16138 = vmatmul.mubr.msk.bf16.gmra.mrb[144].mxu1 %vm389_vm1, %v22479_v58  ;;  %10236 = vrot.lane.b32.xlu0 %v10210_v52, %s17597_s30  ;;  %v15166_v38 = vpop.f32.mrb[128].mxu0 }
 0x55d   : > { %16141 = vmatprep.mubr.msk.bf16.mxu1 %vm17595_vm0, %v24041_v22  ;;  %16238 = vmatpush3.bf16.msra.mxu1 %v17350_v39  ;;  %v15167_v30 = vpop.f32.mrb[129].mxu0 }
 0x55e   : > { %16239 = vmatprep.subr.bf16.mxu1 %v17353_v28  ;;  %v15168_v47 = vadd.f32 %v15167_v30, %v15166_v38  ;;  %v15169_v61 = vpop.f32.mrb[130].mxu0  ;;  %v9315_v38 = vld [vmem:[#allocation3 + $0x280] sm:$0xff] }
 0x55f   : > { %v15170_v31 = vpop.f32.mrb[131].mxu0 }
 0x560   : > { %v22915_v58 = vadd.f32 %v22581_v0, %v15168_v47  ;;  %v15171_v21 = vadd.f32 %v15170_v31, %v15169_v61 }
 0x561   : > { %16240 = vmatpush3.bf16.msra.mxu1 %v17353_v28 }
 0x562   : > { %16241 = vmatprep.subr.bf16.mxu1 %v17357_v34  ;;  %v22923_v42 = vadd.f32 %v22595_v57, %v15171_v21 }
 0x564   : > { %16142 = vmatmul.mubr.msk.bf16.gmra.mrb[148].mxu1 %vm389_vm1, %v22429_v44  ;;  %v15172_v23 = vpop.f32.mrb[132].mxu0 }
 0x565   : > { %16145 = vmatprep.mubr.msk.bf16.mxu1 %vm17595_vm0, %v24041_v22  ;;  %16242 = vmatpush3.bf16.msra.mxu1 %v17357_v34  ;;  %v15173_v0 = vpop.f32.mrb[133].mxu0 }
 0x566   : > { %16243 = vmatprep.subr.bf16.mxu1 %v17359_v11  ;;  %v15174_v12 = vadd.f32 %v15173_v0, %v15172_v23  ;;  %v15175_v41 = vpop.f32.mrb[134].mxu0 }
 0x567   : > { %v15176_v63 = vpop.f32.mrb[135].mxu0 }
 0x568   : > { %v22928_v29 = vadd.f32 %v22648_v54, %v15174_v12  ;;  %v15177_v16 = vadd.f32 %v15176_v63, %v15175_v41 }
 0x569   : > { %16244 = vmatpush3.bf16.msra.mxu1 %v17359_v11 }
 0x56a   : > { %v22933_v44 = vadd.f32 %v22666_v35, %v15177_v16 }
 0x56c   : > { %16146 = vmatmul.mubr.msk.bf16.gmra.mrb[152].mxu1 %vm389_vm1, %v22444_v43  ;;  %v15178_v57 = vpop.f32.mrb[136].mxu0 }
 0x56d   : > { %16149 = vmatprep.mubr.msk.bf16.mxu1 %vm17595_vm0, %v24041_v22  ;;  %v15179_v4 = vpop.f32.mrb[137].mxu0 }
 0x56e   : > { %v15180_v27 = vadd.f32 %v15179_v4, %v15178_v57  ;;  %v15181_v37 = vpop.f32.mrb[138].mxu0 }
 0x56f   : > { %v15182_v17 = vpop.f32.mrb[139].mxu0 }
 0x570   : > { %v22938_v39 = vadd.f32 %v22709_v25, %v15180_v27  ;;  %v15183_v54 = vadd.f32 %v15182_v17, %v15181_v37 }
 0x572   : > { %v22943_v43 = vadd.f32 %v22730_v24, %v15183_v54 }
 0x574   : > { %16150 = vmatmul.mubr.msk.bf16.gmra.mrb[156].mxu1 %vm389_vm1, %v22658_v51  ;;  %v15184_v35 = vpop.f32.mrb[140].mxu0 }
 0x575   : > { %16153 = vmatprep.mubr.msk.bf16.mxu1 %vm17595_vm0, %v24041_v22  ;;  %v15185_v26 = vpop.f32.mrb[141].mxu0 }
 0x576   : > { %v15186_v60 = vadd.f32 %v15185_v26, %v15184_v35  ;;  %v15187_v49 = vpop.f32.mrb[142].mxu0 }
 0x577   : > { %v15188_v13 = vpop.f32.mrb[143].mxu0 }
 0x578   : > { %v22948_v33 = vadd.f32 %v22767_v20, %v15186_v60  ;;  %v15189_v25 = vadd.f32 %v15188_v13, %v15187_v49 }
 0x57a   : > { %v22952_v51 = vadd.f32 %v22789_v32, %v15189_v25 }
 0x57c   : > { %16154 = vmatmul.mubr.msk.bf16.gmra.mrb[160].mxu1 %vm389_vm1, %v9312_v9  ;;  %v15190_v24 = vpop.f32.mrb[144].mxu0 }
 0x57d   : > { %16157 = vmatprep.mubr.msk.bf16.mxu1 %vm17595_vm0, %v24041_v22  ;;  %v15191_v46 = vpop.f32.mrb[145].mxu0 }
 0x57e   : > { %v15192_v48 = vadd.f32 %v15191_v46, %v15190_v24  ;;  %v15193_v6 = vpop.f32.mrb[146].mxu0 }
 0x57f   : > { %v15194_v28 = vpop.f32.mrb[147].mxu0 }
 0x580   : > { %v22957_v52 = vadd.f32 %v22828_v5, %v15192_v48  ;;  %v15195_v20 = vadd.f32 %v15194_v28, %v15193_v6 }
 0x582   : > { %v22961_v34 = vadd.f32 %v22838_v3, %v15195_v20 }
 0x584   : > { %16158 = vmatmul.mubr.msk.bf16.gmra.mrb[164].mxu1 %vm389_vm1, %v9315_v38  ;;  %v15196_v32 = vpop.f32.mrb[148].mxu0 }
 0x585   : > { %v15197_v30 = vpop.f32.mrb[149].mxu0 }
 0x586   : > { %v15198_v47 = vadd.f32 %v15197_v30, %v15196_v32  ;;  %v15199_v61 = vpop.f32.mrb[150].mxu0 }
 0x587   : > { %v15200_v22 = vpop.f32.mrb[151].mxu0 }
 0x588   : > { %v22964_v31 = vadd.f32 %v22866_v55, %v15198_v47  ;;  %v15201_v21 = vadd.f32 %v15200_v22, %v15199_v61 }
 0x58a   : > { %v22967_v11 = vadd.f32 %v22874_v2, %v15201_v21  ;;  %v24166_v21 = vld [vmem:[#allocation20_spill] sm:$0xff] }
 0x58c   : > { %v15202_v5 = vpop.f32.mrb[152].mxu0 }
 0x58d   : > { %v15203_v23 = vpop.f32.mrb[153].mxu0 }
 0x58e   : > { %v15204_v0 = vadd.f32 %v15203_v23, %v15202_v5  ;;  %v15205_v12 = vpop.f32.mrb[154].mxu0  ;;  %v9844_v5 = vpack.c.bf16 %v24166_v21, %v24166_v21 }
 0x58f   : > { %v15206_v41 = vpop.f32.mrb[155].mxu0 }
 0x590   : > { %v22970_v3 = vadd.f32 %v22896_v62, %v15204_v0  ;;  %v15207_v63 = vadd.f32 %v15206_v41, %v15205_v12 }
 0x592   : > { %v22973_v16 = vadd.f32 %v22907_v7, %v15207_v63 }
 0x594   : > { %v15235_v57 = vpop.f32.mrb[156].mxu0 }
 0x595   : > { %v15236_v4 = vpop.f32.mrb[157].mxu0 }
 0x596   : > { %v15237_v55 = vadd.f32 %v15236_v4, %v15235_v57  ;;  %v15238_v27 = vpop.f32.mrb[158].mxu0 }
 0x597   : > { %v15239_v37 = vpop.f32.mrb[159].mxu0 }
 0x598   : > { %v22976_v2 = vadd.f32 %v22915_v58, %v15237_v55  ;;  %v15240_v17 = vadd.f32 %v15239_v37, %v15238_v27  ;;  %v23007_v55 = vld [vmem:[#allocation5 + $0x1c] sm:$0xf] }
 0x59a   : > { %v22979_v54 = vadd.f32 %v22923_v42, %v15240_v17 }
 0x59c   : > { %v15241_v35 = vpop.f32.mrb[160].mxu0 }
 0x59d   : > { %v15242_v26 = vpop.f32.mrb[161].mxu0 }
 0x59e   : > { %v15243_v60 = vadd.f32 %v15242_v26, %v15241_v35  ;;  %v15244_v49 = vpop.f32.mrb[162].mxu0 }
 0x59f   : > { %v15245_v13 = vpop.f32.mrb[163].mxu0 }
 0x5a0   : > { %v9910_v62 = vpop.permute.xlu0 %9909  ;;  %v22982_v7 = vadd.f32 %v22928_v29, %v15243_v60  ;;  %v15246_v25 = vadd.f32 %v15245_v13, %v15244_v49 }
 0x5a1   : > { %v9958_v9 = vsel %vm5462_vm10, %v21843_v1, %v9910_v62 }
 0x5a2   : > { %v22987_v58 = vadd.f32 %v22933_v44, %v15246_v25 }
 0x5a4   : > { %v9944_v24 = vpop.permute.xlu0 %9943  ;;  %v15247_v28 = vpop.f32.mrb[164].mxu0 }
 0x5a5   : > { %v9973_v42 = vsel %vm389_vm1, %v9958_v9, %v9944_v24  ;;  %v15248_v20 = vpop.f32.mrb[165].mxu0 }
 0x5a6   : > { %v13854_v46 = vcombine.low %v9973_v42, %v9973_v42  ;;  %v13855_v48 = vcombine.high %v9973_v42, %v9973_v42  ;;  %v9912_v6 = vpop.permute.xlu1 %9911  ;;  %v15249_v29 = vadd.f32 %v15248_v20, %v15247_v28  ;;  %v15250_v38 = vpop.f32.mrb[166].mxu0 }
 0x5a7   : > { %v15251_v32 = vpop.f32.mrb[167].mxu0  ;;  %v9960_v1 = vsel %vm5462_vm10, %v22561_v40, %v9912_v6 }
 0x5a8   : > { %10033 = vst.msk [vmem:[#allocation5 + $0x20] sm:$0xf] %vm10024_vm11, %v13854_v46  ;;  %10034 = vst.msk [vmem:[#allocation5 + $0x24] sm:$0xf] %vm10024_vm11, %v13855_v48  ;;  %v22995_v44 = vadd.f32 %v22938_v39, %v15249_v29  ;;  %v15252_v47 = vadd.f32 %v15251_v32, %v15250_v38  ;;  %v9914_v61 = vpop.permute.xlu0 %9913 }
 0x5a9   : > { %v9963_v41 = vsel %vm5462_vm10, %v9844_v5, %v9914_v61 }
 0x5aa   : > { %v23001_v12 = vadd.f32 %v22943_v43, %v15252_v47 }
 0x5ab   : > { %v9946_v30 = vpop.permute.xlu1 %9945 }
 0x5ac   : > { %v9975_v22 = vsel %vm389_vm1, %v9960_v1, %v9946_v30  ;;  %v15253_v39 = vpop.f32.mrb[168].mxu0 }
 0x5ad   : > { %v13856_v23 = vcombine.low %v9975_v22, %v9975_v22  ;;  %v13857_v0 = vcombine.high %v9975_v22, %v9975_v22  ;;  %v15254_v57 = vpop.f32.mrb[169].mxu0 }
 0x5ae   : > { %v15255_v37 = vadd.f32 %v15254_v57, %v15253_v39  ;;  %v15256_v17 = vpop.f32.mrb[170].mxu0 }
 0x5af   : > { %10035 = vst.msk [vmem:[#allocation5 + $0x28] sm:$0xf] %vm10024_vm11, %v13856_v23  ;;  %10036 = vst.msk [vmem:[#allocation5 + $0x2c] sm:$0xf] %vm10024_vm11, %v13857_v0  ;;  %v9948_v40 = vpop.permute.xlu1 %9947  ;;  %v23009_v27 = vld [vmem:[#allocation5 + $0x20] sm:$0xf] }
 0x5b0   : > { %v9977_v63 = vsel %vm389_vm1, %v9963_v41, %v9948_v40  ;;  %v13899_v43 = vcombine.low %v23007_v55, %v23009_v27  ;;  %v15257_v35 = vpop.f32.mrb[171].mxu0  ;;  %v23015_v26 = vadd.f32 %v22948_v33, %v15255_v37  ;;  %v23021_v13 = vld [vmem:[#allocation5 + $0x24] sm:$0xf] }
 0x5b1   : > { %v13858_v4 = vcombine.low %v9977_v63, %v9977_v63  ;;  %v15258_v62 = vadd.f32 %v15257_v35, %v15256_v17 }
 0x5b2   : > { %16177 = vmatprep.mubr.msk.bf16.mxu0 %vm10797_vm12, %v13899_v43 }
 0x5b3   : > { %10037 = vst.msk [vmem:[#allocation5 + $0x30] sm:$0xf] %vm10024_vm11, %v13858_v4  ;;  %v23019_v49 = vadd.f32 %v22952_v51, %v15258_v62 }
 0x5b4   : > { %v15259_v42 = vpop.f32.mrb[172].mxu0 }
 0x5b5   : > { %v10265_v60 = vpop.permute.xlu1 %10264  ;;  %v15260_v46 = vpop.f32.mrb[173].mxu0 }
 0x5b6   : > { %v23023_v25 = vld [vmem:[#allocation5 + $0x28] sm:$0xf]  ;;  %v15261_v6 = vadd.f32 %v15260_v46, %v15259_v42  ;;  %v15262_v51 = vpop.f32.mrb[174].mxu0 }
 0x5b7   : > { %v10231_v9 = vpop.permute.xlu0 %10230  ;;  %v13900_v24 = vcombine.low %v23021_v13, %v23023_v25  ;;  %v15263_v32 = vpop.f32.mrb[175].mxu0  ;;  %v10696_v42 = vld [vmem:[#allocation5 + $0x8] sm:$0xf] }
 0x5b8   : > { %v10279_v33 = vsel %vm5462_vm10, %v22692_v45, %v10231_v9  ;;  %v23032_v30 = vadd.f32 %v22957_v52, %v15261_v6  ;;  %v15264_v47 = vadd.f32 %v15263_v32, %v15262_v51  ;;  %v24167_v45 = vld [vmem:[#allocation12_spill] sm:$0xff] }
 0x5b9   : > { %v10294_v48 = vsel %vm389_vm1, %v10279_v33, %v10265_v60  ;;  %16178 = vmatmul.mubr.msk.bf16.gmra.mrb[216].mxu0 %vm10797_vm12, %v13900_v24 }
 0x5ba   : > { %v13859_v28 = vcombine.low %v10294_v48, %v10294_v48  ;;  %v13860_v20 = vcombine.high %v10294_v48, %v10294_v48  ;;  %v9936_v29 = vpop.permute.xlu1 %9935  ;;  %v17343_v38 = vld [vmem:[#allocation5 + $0x2c] sm:$0xff]   ;;  %v23041_v21 = vadd.f32 %v22961_v34, %v15264_v47 }
 0x5bb   : > { %v9902_v1 = vpop.permute.xlu0 %9901  ;;  %16181 = vmatprep.mubr.msk.bf16.mxu0 %vm10797_vm12, %v17343_v38 }
 0x5bc   : > { %10353 = vst.msk [vmem:[#allocation5 + $0x34] sm:$0xf] %vm10024_vm11, %v13859_v28  ;;  %10354 = vst.msk [vmem:[#allocation5 + $0x38] sm:$0xf] %vm10024_vm11, %v13860_v20  ;;  %v9950_v61 = vsel %vm5462_vm10, %v24167_v45, %v9902_v1  ;;  %v15265_v52 = vpop.f32.mrb[176].mxu0  ;;  %v24168_v28 = vld [vmem:[#allocation15_spill] sm:$0xff] }
 0x5bd   : > { %v9965_v22 = vsel %vm389_vm1, %v9950_v61, %v9936_v29  ;;  %v15266_v39 = vpop.f32.mrb[177].mxu0  ;;  %v13916_v20 = vcombine.low %v10696_v42, %v24168_v28 }
 0x5be   : > { %v13846_v5 = vcombine.low %v9965_v22, %v9965_v22  ;;  %v13847_v23 = vcombine.high %v9965_v22, %v9965_v22  ;;  %v10267_v41 = vpop.permute.xlu1 %10266  ;;  %v15267_v57 = vadd.f32 %v15266_v39, %v15265_v52  ;;  %v15268_v4 = vpop.f32.mrb[178].mxu0  ;;  %v17577_v22 = vld [vmem:[#allocation5 + $0x10] sm:$0xf] }
 0x5bf   : > { %v10233_v0 = vpop.permute.xlu0 %10232  ;;  %v15269_v17 = vpop.f32.mrb[179].mxu0 }
 0x5c0   : > { %10025 = vst.msk [vmem:[#allocation5] sm:$0xf] %vm10024_vm11, %v13846_v5  ;;  %10026 = vst.msk [vmem:[#allocation5 + $0x4] sm:$0xf] %vm10024_vm11, %v13847_v23  ;;  %v10281_v40 = vsel %vm5462_vm10, %v22738_v8, %v10233_v0  ;;  %v23049_v43 = vadd.f32 %v22964_v31, %v15267_v57  ;;  %v15270_v62 = vadd.f32 %v15269_v17, %v15268_v4  ;;  %v24169_v5 = vld [vmem:[#allocation19_spill] sm:$0xff] }
 0x5c1   : > { %v10296_v63 = vsel %vm389_vm1, %v10281_v40, %v10267_v41  ;;  %v13917_v23 = vcombine.low %v17577_v22, %v24169_v5 }
 0x5c2   : > { %v13861_v37 = vcombine.low %v10296_v63, %v10296_v63  ;;  %v13862_v34 = vcombine.high %v10296_v63, %v10296_v63  ;;  %v23055_v8 = vadd.f32 %v22967_v11, %v15270_v62 }
 0x5c3   : > { %v17348_v35 = vld [vmem:[#allocation5 + $0x34] ss:$0 sps:$4 sm:$0xff]   ;;  %v11414_v38 = vld [vmem:[#allocation5 + $0x38] sm:$0xf] }
 0x5c4   : > { %10355 = vst.msk [vmem:[#allocation5 + $0x3c] sm:$0xf] %vm10024_vm11, %v13861_v37  ;;  %10356 = vst.msk [vmem:[#allocation5 + $0x40] sm:$0xf] %vm10024_vm11, %v13862_v34  ;;  %16182 = vmatmul.mubr.msk.bf16.gmra.mrb[220].mxu0 %vm10797_vm12, %v17348_v35  ;;  %v15271_v24 = vpop.f32.mrb[180].mxu0 }
 0x5c5   : > { %v10269_v60 = vpop.permute.xlu0 %10268  ;;  %v15272_v33 = vpop.f32.mrb[181].mxu0 }
 0x5c6   : > { %v15273_v31 = vadd.f32 %v15272_v33, %v15271_v24  ;;  %v15274_v48 = vpop.f32.mrb[182].mxu0 }
 0x5c7   : > { %v17352_v9 = vld [vmem:[#allocation5] sm:$0xff]   ;;  %v15275_v51 = vpop.f32.mrb[183].mxu0 }
 0x5c8   : > { %16197 = vmatprep.mubr.msk.bf16.mxu0 %vm10797_vm12, %v17352_v9  ;;  %v23063_v11 = vadd.f32 %v22970_v3, %v15273_v31  ;;  %v15276_v1 = vadd.f32 %v15275_v51, %v15274_v48  ;;  %v17362_v9 = vld [vmem:[%s23896_s5 + $0x78] sm:$0xff]  }
 0x5c9   : > { %v10235_v46 = vpop.permute.xlu0 %10234 }
 0x5ca   : > { %v10283_v6 = vsel %vm5462_vm10, %v22802_v56, %v10235_v46  ;;  %v17358_v56 = vld [vmem:[%s23896_s5 + $0x68] sm:$0xff]   ;;  %v23071_v0 = vadd.f32 %v22973_v16, %v15276_v1  ;;  %v17360_v16 = vld [vmem:[%s23896_s5 + $0x70] sm:$0xff]  }
 0x5cb   : > { %v10298_v29 = vsel %vm389_vm1, %v10283_v6, %v10269_v60  ;;  %v11415_v32 = vld [vmem:[#allocation5 + $0x3c] sm:$0xf]  ;;  %v13919_v60 = vcombine.low %v23009_v27, %v23021_v13  ;;  %v17363_v13 = vld [vmem:[%s23896_s5 + $0x80] sm:$0xff]  }
 0x5cc   : > { %v13863_v47 = vcombine.low %v10298_v29, %v10298_v29  ;;  %v13864_v45 = vcombine.high %v10298_v29, %v10298_v29  ;;  %v13987_v61 = vcombine.low %v11414_v38, %v11415_v32  ;;  %16198 = vmatmul.mubr.msk.bf16.vlgmr.msra.gmra.mrb[212].mxu0 %vm10797_vm12, %v13916_v20  ;;  %v15304_v52 = vpop.f32.mrb[184].mxu0  ;;  %v10271_v41 = vpop.permute.xlu1 %10270  ;;  %v17365_v38 = vld [vmem:[#allocation5 + $0x18] sm:$0xff]   ;;  %v17366_v32 = vld [vmem:[%s23896_s5 + $0x88] sm:$0xff]  }
 0x5cd   : > { %16201 = vmatprep.mubr.msk.bf16.mxu0 %vm10797_vm12, %v13917_v23  ;;  %16210 = vmatpush3.bf16.msra.mxu0 %v22851_v15  ;;  %v15305_v39 = vpop.f32.mrb[185].mxu0  ;;  %v17578_v15 = vld [vmem:[#allocation5 + $0x18] sm:$0xf]  ;;  %v17338_v23 = vld [vmem:[#allocation5 + $0x20] sm:$0xff]  }
 0x5ce   : > { %10357 = vst.msk [vmem:[#allocation5 + $0x44] sm:$0xf] %vm10024_vm11, %v13863_v47  ;;  %10358 = vst.msk [vmem:[#allocation5 + $0x48] sm:$0xf] %vm10024_vm11, %v13864_v45  ;;  %16245 = vmatprep.mubr.msk.bf16.mxu1 %vm10797_vm12, %v13987_v61  ;;  %v10237_v3 = vpop.permute.xlu0 %10236  ;;  %16211 = vmatprep.subr.bf16.mxu0 %v17358_v56  ;;  %v15306_v57 = vadd.f32 %v15305_v39, %v15304_v52  ;;  %v15307_v4 = vpop.f32.mrb[186].mxu0  ;;  %v13918_v35 = vcombine.low %v17578_v15, %v23007_v55 }
 0x5cf   : > { %v10285_v40 = vsel %vm5462_vm10, %v22841_v36, %v10237_v3  ;;  %v15308_v17 = vpop.f32.mrb[187].mxu0  ;;  %v11416_v55 = vld [vmem:[#allocation5 + $0x40] sm:$0xf] }
 0x5d0   : > { %v10300_v63 = vsel %vm389_vm1, %v10285_v40, %v10271_v41  ;;  %v15309_v62 = vadd.f32 %v15308_v17, %v15307_v4  ;;  %v23086_v36 = vadd.f32 %v22976_v2, %v15306_v57  ;;  %v17369_v57 = vld [vmem:[#allocation5 + $0x38] sm:$0xff]  }
 0x5d1   : > { %v13865_v37 = vcombine.low %v10300_v63, %v10300_v63  ;;  %v13866_v34 = vcombine.high %v10300_v63, %v10300_v63  ;;  %16212 = vmatpush3.bf16.msra.mxu0 %v17358_v56  ;;  %v17367_v56 = vld [vmem:[#allocation5 + $0x28] sm:$0xff]  }
 0x5d2   : > { %16213 = vmatprep.subr.bf16.mxu0 %v17360_v16  ;;  %v23097_v42 = vadd.f32 %v22979_v54, %v15309_v62  ;;  %v13920_v54 = vcombine.low %v23023_v25, %v23023_v25 }
 0x5d3   : > { %10359 = vst.msk [vmem:[#allocation5 + $0x4c] sm:$0xf] %vm10024_vm11, %v13865_v37  ;;  %10360 = vst.msk [vmem:[#allocation5 + $0x50] sm:$0xf] %vm10024_vm11, %v13866_v34 }
 0x5d4   : > { %16202 = vmatmul.mubr.msk.bf16.gmra.mrb[216].mxu0 %vm10797_vm12, %v13918_v35  ;;  %v15310_v33 = vpop.f32.mrb[188].mxu0 }
 0x5d5   : > { %v11417_v24 = vld [vmem:[#allocation5 + $0x44] sm:$0xf]  ;;  %16205 = vmatprep.mubr.msk.bf16.mxu0 %vm10797_vm12, %v13919_v60  ;;  %16214 = vmatpush3.bf16.msra.mxu0 %v17360_v16  ;;  %v15311_v27 = vpop.f32.mrb[189].mxu0  ;;  %v11418_v48 = vld [vmem:[#allocation5 + $0x48] sm:$0xf] }
 0x5d6   : > { %v13988_v2 = vcombine.low %v11416_v55, %v11417_v24  ;;  %16215 = vmatprep.subr.bf16.mxu0 %v17362_v9  ;;  %v15312_v46 = vadd.f32 %v15311_v27, %v15310_v33  ;;  %v15313_v31 = vpop.f32.mrb[190].mxu0 }
 0x5d7   : > { %v15314_v6 = vpop.f32.mrb[191].mxu0 }
 0x5d8   : > { %16246 = vmatmul.mubr.msk.bf16.vlgmr.msra.gmra.mrb[168].mxu1 %vm10797_vm12, %v13988_v2  ;;  %v15315_v28 = vadd.f32 %v15314_v6, %v15313_v31  ;;  %v23107_v20 = vadd.f32 %v22982_v7, %v15312_v46 }
 0x5d9   : > { %16216 = vmatpush3.bf16.msra.mxu0 %v17362_v9 }
 0x5da   : > { %v11419_v51 = vld [vmem:[#allocation5 + $0x4c] sm:$0xf]  ;;  %16217 = vmatprep.subr.bf16.mxu0 %v17363_v13  ;;  %v23114_v1 = vadd.f32 %v22987_v58, %v15315_v28  ;;  %v10053_v28 = vld [vmem:[#allocation4 + $0xd8] sm:$0xff] }
 0x5db   : > { %v13989_v29 = vcombine.low %v11418_v48, %v11419_v51 }
 0x5dc   : > { %16206 = vmatmul.mubr.msk.bf16.gmra.mrb[224].mxu0 %vm10797_vm12, %v13920_v54  ;;  %v15316_v25 = vpop.f32.mrb[192].mxu0 }
 0x5dd   : > { %16249 = vmatprep.mubr.msk.bf16.mxu1 %vm10797_vm12, %v13989_v29  ;;  %16221 = vmatprep.mubr.msk.bf16.mxu0 %vm10797_vm12, %v17365_v38  ;;  %v15317_v7 = vpop.f32.mrb[193].mxu0 }
 0x5de   : > { %16218 = vmatpush3.bf16.msra.mxu0 %v17363_v13  ;;  %v15318_v47 = vadd.f32 %v15317_v7, %v15316_v25  ;;  %v15319_v45 = vpop.f32.mrb[194].mxu0 }
 0x5df   : > { %16219 = vmatprep.subr.bf16.mxu0 %v17366_v32  ;;  %v15320_v61 = vpop.f32.mrb[195].mxu0 }
 0x5e0   : > { %v15321_v22 = vadd.f32 %v15320_v61, %v15319_v45  ;;  %v23119_v5 = vadd.f32 %v22995_v44, %v15318_v47  ;;  %v17368_v44 = vld [vmem:[#allocation5 + $0x30] sm:$0xff]  }
 0x5e2   : > { %16220 = vmatpush3.bf16.msra.mxu0 %v17366_v32  ;;  %v23122_v58 = vadd.f32 %v23001_v12, %v15321_v22 }
 0x5e4   : > { %v15322_v3 = vpop.f32.mrb[196].mxu0 }
 0x5e5   : > { %16222 = vmatmul.mubr.msk.bf16.vlgmr.msra.gmra.mrb[212].mxu0 %vm10797_vm12, %v17338_v23  ;;  %v15323_v52 = vpop.f32.mrb[197].mxu0 }
 0x5e6   : > { %16225 = vmatprep.mubr.msk.bf16.mxu0 %vm10797_vm12, %v17367_v56  ;;  %v15324_v41 = vadd.f32 %v15323_v52, %v15322_v3  ;;  %v15325_v40 = vpop.f32.mrb[198].mxu0  ;;  %v10051_v56 = vld [vmem:[#allocation4 + $0xd0] sm:$0x7] }
 0x5e7   : > { %v15326_v39 = vpop.f32.mrb[199].mxu0 }
 0x5e8   : > { %v15327_v16 = vadd.f32 %v15326_v39, %v15325_v40  ;;  %v23127_v63 = vadd.f32 %v23015_v26, %v15324_v41  ;;  %v17370_v26 = vld [vmem:[#allocation5 + $0x40] ss:$0 sps:$4 sm:$0xff]  }
 0x5ea   : > { %v23130_v4 = vadd.f32 %v23019_v49, %v15327_v16 }
 0x5ec   : > { %v15328_v12 = vpop.f32.mrb[200].mxu0 }
 0x5ed   : > { %16226 = vmatmul.mubr.msk.bf16.gmra.mrb[216].mxu0 %vm10797_vm12, %v17368_v44  ;;  %v15329_v37 = vpop.f32.mrb[201].mxu0 }
 0x5ee   : > { %16229 = vmatprep.mubr.msk.bf16.mxu0 %vm10797_vm12, %v17369_v57  ;;  %v15330_v34 = vadd.f32 %v15329_v37, %v15328_v12  ;;  %v15331_v17 = vpop.f32.mrb[202].mxu0  ;;  %v10366_v57 = vld [vmem:[#allocation4 + $0xd0] sm:$0xff] }
 0x5ef   : > { %v15332_v15 = vpop.f32.mrb[203].mxu0 }
 0x5f0   : > { %v15333_v35 = vadd.f32 %v15332_v15, %v15331_v17  ;;  %v23135_v62 = vadd.f32 %v23032_v30, %v15330_v34 }
 0x5f2   : > { %v23138_v60 = vadd.f32 %v23041_v21, %v15333_v35 }
 0x5f5   : > { %16230 = vmatmul.mubr.msk.bf16.gmra.mrb[228].mxu0 %vm10797_vm12, %v17370_v26 }
 0x5f6   : > { %v15334_v49 = vpop.f32.mrb[204].mxu0 }
 0x5f7   : > { %v15335_v9 = vpop.f32.mrb[205].mxu0 }
 0x5f8   : > { %v15336_v55 = vadd.f32 %v15335_v9, %v15334_v49  ;;  %v15337_v24 = vpop.f32.mrb[206].mxu0 }
 0x5f9   : > { %v15338_v2 = vpop.f32.mrb[207].mxu0 }
 0x5fa   : > { %v15339_v33 = vadd.f32 %v15338_v2, %v15337_v24  ;;  %v23142_v27 = vadd.f32 %v23049_v43, %v15336_v55 }
 0x5fc   : > { %v23145_v13 = vadd.f32 %v23055_v8, %v15339_v33  ;;  %v10067_v8 = vmax.f32 %v22760_v50, %v10053_v28 }
 0x5fe   : > { %v15340_v30 = vpop.f32.mrb[208].mxu0 }
 0x5ff   : > { %v15341_v46 = vpop.f32.mrb[209].mxu0 }
 0x600   : > { %v15342_v31 = vadd.f32 %v15341_v46, %v15340_v30  ;;  %v15343_v48 = vpop.f32.mrb[210].mxu0 }
 0x601   : > { %v15344_v21 = vpop.f32.mrb[211].mxu0 }
 0x602   : > { %v15345_v6 = vadd.f32 %v15344_v21, %v15343_v48  ;;  %v23148_v54 = vadd.f32 %v23063_v11, %v15342_v31  ;;  %v10105_v11 = vrot.slane %v10067_v8, 1 }
 0x604   : > { %v23151_v51 = vadd.f32 %v23071_v0, %v15345_v6 }
 0x627   : > { %v9620_v29 = vpop.f32.mrb[140].mxu1 }
 0x628   : > { %v16529_v43 = vadd.f32 %v23086_v36, %v9620_v29  ;;  %v16135_v38 = vpop.f32.mrb[141].mxu1  ;;  %v10106_v36 = vsel %vm1122_vm2, %v10103_v19, %v10105_v11 }
 0x629   : > { %v9623_v32 = vpop.f32.mrb[142].mxu1  ;;  %v10135_v52 = vmax.f32 %v22831_v59, %v10106_v36 }
 0x62a   : > { %9689 = vst.msk [vmem:[#allocation4 + $0xe0] sm:$0xff] %vm5462_vm10, %v16529_v43  ;;  %v16534_v25 = vadd.f32 %v23097_v42, %v9623_v32  ;;  %v16136_v7 = vpop.f32.mrb[143].mxu1  ;;  %v10211_v32 = vshrl.u32 %v22877_v10, 16 }
 0x62c   : > { %9690 = vst.msk [vmem:[#allocation4 + $0xe8] sm:$0xff] %vm5462_vm10, %v16534_v25 }
 0x62f   : > { %v9628_v47 = vpop.f32.mrb[144].mxu1 }
 0x630   : > { %v16539_v0 = vadd.f32 %v23107_v20, %v9628_v47  ;;  %v16139_v45 = vpop.f32.mrb[145].mxu1 }
 0x631   : > { %v9631_v61 = vpop.f32.mrb[146].mxu1  ;;  %v10054_v22 = vld [vmem:[#allocation4 + $0xe0] sm:$0xff] }
 0x632   : > { %9691 = vst.msk [vmem:[#allocation4 + $0xf0] sm:$0xff] %vm5462_vm10, %v16539_v0  ;;  %v16544_v50 = vadd.f32 %v23114_v1, %v9631_v61  ;;  %v16140_v23 = vpop.f32.mrb[147].mxu1  ;;  %v10068_v42 = vmax.f32 %v22775_v53, %v10054_v22  ;;  %v23171_v1 = vld [vmem:[%s23895_s4] ss:$0 sm:$0xff]  ;;  %v10213_v61 = vor.u32 %v10211_v32, %v22892_v18 }
 0x633   : > { %v10055_v3 = vld [vmem:[#allocation4 + $0xe8] sm:$0x7]  ;;  %v10149_v53 = vadd.f32 %v23171_v1, %v10135_v52 }
 0x634   : > { %9692 = vst.msk [vmem:[#allocation4 + $0xf8] sm:$0xff] %vm5462_vm10, %v16544_v50  ;;  %v10069_v20 = vmax.f32 %v10051_v56, %v10055_v3  ;;  %v10107_v41 = vrot.slane %v10068_v42, 1  ;;  %v10369_v40 = vld [vmem:[#allocation4 + $0xe8] sm:$0xff] }
 0x635   : > { %v10384_v17 = vmax.f32 %v10366_v57, %v10369_v40  ;;  %v10163_v33 = vmax.f32 %v10149_v53, 0.0 }
 0x636   : > { %v10109_v39 = vrot.slane %v10069_v20, 1  ;;  %v10108_v19 = vsel %vm1122_vm2, %v10105_v11, %v10107_v41 }
 0x637   : > { %v9636_v16 = vpop.f32.mrb[148].mxu1  ;;  %v10136_v44 = vmax.f32 %v10067_v8, %v10108_v19  ;;  %v10412_v21 = vrot.slane %v10384_v17, 1 }
 0x638   : > { %v16549_v59 = vadd.f32 %v23119_v5, %v9636_v16  ;;  %v16143_v12 = vpop.f32.mrb[149].mxu1  ;;  %v10110_v37 = vsel %vm1122_vm2, %v10107_v41, %v10109_v39  ;;  %v10138_v34 = vmax.f32 %v10069_v20, %v10109_v39 }
 0x639   : > { %v9639_v15 = vpop.f32.mrb[150].mxu1  ;;  %v10137_v35 = vmax.f32 %v10068_v42, %v10110_v37  ;;  %v10150_v26 = vadd.f32 %v23171_v1, %v10136_v44  ;;  %v10370_v49 = vld [vmem:[#allocation4 + $0xf0] sm:$0xff] }
 0x63a   : > { %9693 = vst.msk [vmem:[#allocation4 + $0x100] sm:$0xff] %vm5462_vm10, %v16549_v59  ;;  %v16554_v9 = vadd.f32 %v23122_v58, %v9639_v15  ;;  %v16144_v55 = vpop.f32.mrb[151].mxu1  ;;  %v10152_v24 = vadd.f32 %v23171_v1, %v10138_v34  ;;  %v10385_v2 = vmax.f32 %v10053_v28, %v10370_v49  ;;  %v17371_v59 = vld [vmem:[%s23896_s5 + $0x30] sm:$0xff]  }
 0x63b   : > { %v10151_v5 = vadd.f32 %v23171_v1, %v10137_v35  ;;  %v10164_v30 = vmax.f32 %v10150_v26, 0.0  ;;  %v23181_v46 = vld [vmem:[#allocation4 + $0xf8] sm:$0xff]  ;;  %16305 = vmatprep.subr.bf16.mxu0 %v17371_v59 }
 0x63c   : > { %9694 = vst.msk [vmem:[#allocation4 + $0x108] sm:$0xff] %vm5462_vm10, %v16554_v9  ;;  %v10166_v31 = vmax.f32 %v10152_v24, 0.0  ;;  %v10386_v48 = vmax.f32 %v10054_v22, %v23181_v46  ;;  %v10413_v6 = vrot.slane %v10385_v2, 1  ;;  %16306 = vmatpush3.bf16.msra.mxu0 %v17371_v59  ;;  %v17372_v59 = vld [vmem:[%s23896_s5 + $0x38] sm:$0xff]  }
 0x63d   : > { %v23185_v29 = vmax.f32 %v10151_v5, 0.0  ;;  %v23187_v58 = vpack.c.bf16 %v10164_v30, %v10163_v33  ;;  %16307 = vmatprep.subr.bf16.mxu0 %v17372_v59 }
 0x63e   : > { %v10414_v43 = vsel %vm1122_vm2, %v10412_v21, %v10413_v6  ;;  %v10415_v28 = vrot.slane %v10386_v48, 1 }
 0x63f   : > { %v9644_v38 = vpop.f32.mrb[152].mxu1  ;;  %v23191_v8 = vpack.c.bf16 %v10166_v31, %v23185_v29  ;;  %v10215_v25 = vshll.u32 %v23187_v58, 16  ;;  %v10453_v7 = vmax.f32 %v10384_v17, %v10414_v43 }
 0x640   : > { %v16559_v11 = vadd.f32 %v23127_v63, %v9644_v38  ;;  %v16147_v47 = vpop.f32.mrb[153].mxu1  ;;  %v10416_v0 = vsel %vm1122_vm2, %v10413_v6, %v10415_v28  ;;  %16308 = vmatpush3.bf16.msra.mxu0 %v17372_v59 }
 0x641   : > { %v9647_v45 = vpop.f32.mrb[154].mxu1  ;;  %v10262_v36 = vrot.slane %v23191_v8, 1  ;;  %v23199_v22 = vrot.slane %v10215_v25, 1  ;;  %v10223_v50 = vshll.u32 %v23191_v8, 16  ;;  %v10372_v23 = vld [vmem:[#allocation4 + $0x100] sm:$0xff]  ;;  %v10454_v63 = vmax.f32 %v10385_v2, %v10416_v0 }
 0x642   : > { %9695 = vst.msk [vmem:[#allocation4 + $0x110] sm:$0xff] %vm5462_vm10, %v16559_v11  ;;  %v16564_v42 = vadd.f32 %v23130_v4, %v9647_v45  ;;  %v16148_v56 = vpop.f32.mrb[155].mxu1  ;;  %v10387_v3 = vmax.f32 %v10369_v40, %v10372_v23  ;;  %v10227_v20 = vshrl.u32 %v23191_v8, 16  ;;  %v10467_v39 = vadd.f32 %v23171_v1, %v10453_v7 }
 0x643   : > { %10276 = vrot.lane.b32.xlu1 %v10262_v36, %s17596_s23  ;;  %v10218_v52 = vsel %vm1274_vm5, %v10213_v61, %v23199_v22  ;;  %v23209_v18 = vrot.slane %v10223_v50, 1  ;;  %v10373_v41 = vld [vmem:[#allocation4 + $0x108] sm:$0xff]  ;;  %v10468_v19 = vadd.f32 %v23171_v1, %v10454_v63 }
 0x644   : > { %9696 = vst.msk [vmem:[#allocation4 + $0x118] sm:$0xff] %vm5462_vm10, %v16564_v42  ;;  %10238 = vrot.lane.b32.xlu0 %v10218_v52, %s17597_s30  ;;  %v10388_v4 = vmax.f32 %v10370_v49, %v10373_v41  ;;  %v10417_v40 = vrot.slane %v10387_v3, 1  ;;  %v10481_v34 = vmax.f32 %v10467_v39, 0.0 }
 0x645   : > { %v10229_v16 = vor.u32 %v10227_v20, %v23209_v18  ;;  %v10482_v57 = vmax.f32 %v10468_v19, 0.0 }
 0x646   : > { %v10418_v44 = vsel %vm1122_vm2, %v10415_v28, %v10417_v40  ;;  %v10419_v53 = vrot.slane %v10388_v4, 1 }
 0x647   : > { %v9652_v12 = vpop.f32.mrb[156].mxu1  ;;  %v10455_v37 = vmax.f32 %v10386_v48, %v10418_v44  ;;  %v23225_v55 = vpack.c.bf16 %v10482_v57, %v10481_v34 }
 0x648   : > { %v16569_v17 = vadd.f32 %v23135_v62, %v9652_v12  ;;  %v16151_v15 = vpop.f32.mrb[157].mxu1  ;;  %10242 = vrot.lane.b32.xlu0 %v10229_v16, %s17597_s30  ;;  %v10420_v35 = vsel %vm1122_vm2, %v10417_v40, %v10419_v53  ;;  %v17373_v12 = vld [vmem:[%s23896_s5 + $0x40] sm:$0xff]  }
 0x649   : > { %v9655_v26 = vpop.f32.mrb[158].mxu1  ;;  %v10456_v49 = vmax.f32 %v10387_v3, %v10420_v35  ;;  %v10469_v9 = vadd.f32 %v23171_v1, %v10455_v37  ;;  %v10374_v24 = vld [vmem:[#allocation4 + $0x110] sm:$0xff]  ;;  %v10506_v6 = vshll.u32 %v23225_v55, 16  ;;  %v10504_v20 = vshrl.u32 %v23225_v55, 16  ;;  %16309 = vmatprep.subr.bf16.mxu0 %v17373_v12 }
 0x64a   : > { %9697 = vst.msk [vmem:[#allocation4 + $0x120] sm:$0xff] %vm5462_vm10, %v16569_v17  ;;  %v16574_v2 = vadd.f32 %v23138_v60, %v9655_v26  ;;  %v16152_v5 = vpop.f32.mrb[159].mxu1  ;;  %v10389_v30 = vmax.f32 %v23181_v46, %v10374_v24  ;;  %v10579_v46 = vrot.slane %v23225_v55, 1  ;;  %16310 = vmatpush3.bf16.msra.mxu0 %v17373_v12 }
 0x64b   : > { %v23229_v62 = vld [vmem:[#allocation4 + $0x118] sm:$0xff]  ;;  %v10470_v33 = vadd.f32 %v23171_v1, %v10456_v49  ;;  %v10483_v48 = vmax.f32 %v10469_v9, 0.0  ;;  %v10508_v61 = vrot.slane %v10506_v6, 1 }
 0x64c   : > { %9698 = vst.msk [vmem:[#allocation4 + $0x128] sm:$0xff] %vm5462_vm10, %v16574_v2  ;;  %v10390_v31 = vmax.f32 %v10372_v23, %v23229_v62  ;;  %v10421_v43 = vrot.slane %v10389_v30, 1 }
 0x64d   : > { %v10484_v21 = vmax.f32 %v10470_v33, 0.0  ;;  %v10509_v16 = vor.u32 %v10508_v61, %v10504_v20 }
 0x64e   : > { %v10423_v28 = vrot.slane %v10390_v31, 1  ;;  %v10422_v60 = vsel %vm1122_vm2, %v10419_v53, %v10421_v43 }
 0x64f   : > { %v9660_v38 = vpop.f32.mrb[160].mxu1  ;;  %v23236_v32 = vpack.c.bf16 %v10484_v21, %v10483_v48  ;;  %v10457_v47 = vmax.f32 %v10388_v4, %v10422_v60 }
 0x650   : > { %v16579_v25 = vadd.f32 %v23142_v27, %v9660_v38  ;;  %v16155_v7 = vpop.f32.mrb[161].mxu1  ;;  %v10424_v11 = vsel %vm1122_vm2, %v10421_v43, %v10423_v28 }
 0x651   : > { %v9663_v0 = vpop.f32.mrb[162].mxu1  ;;  %v10580_v45 = vrot.slane %v23236_v32, 1  ;;  %v10511_v50 = vshll.u32 %v23236_v32, 16  ;;  %v10458_v23 = vmax.f32 %v10389_v30, %v10424_v11  ;;  %v10376_v42 = vld [vmem:[#allocation4 + $0x120] sm:$0xff]  ;;  %v10471_v27 = vadd.f32 %v23171_v1, %v10457_v47  ;;  %v10383_v7 = vld [vmem:[#allocation4 + $0x150] sm:$0x7] }
 0x652   : > { %9699 = vst.msk [vmem:[#allocation4 + $0x130] sm:$0xff] %vm5462_vm10, %v16579_v25  ;;  %v16584_v56 = vadd.f32 %v23145_v13, %v9663_v0  ;;  %v16156_v3 = vpop.f32.mrb[163].mxu1  ;;  %v10391_v63 = vmax.f32 %v10373_v41, %v10376_v42  ;;  %v10515_v49 = vshrl.u32 %v23236_v32, 16 }
 0x653   : > { %v10581_v52 = vsel %vm1122_vm2, %v10579_v46, %v10580_v45  ;;  %v10513_v39 = vrot.slane %v10511_v50, 1  ;;  %v23249_v4 = vld [vmem:[#allocation4 + $0x128] sm:$0xff]  ;;  %v10472_v40 = vadd.f32 %v23171_v1, %v10458_v23  ;;  %v10485_v44 = vmax.f32 %v10471_v27, 0.0 }
 0x654   : > { %9700 = vst.msk [vmem:[#allocation4 + $0x138] sm:$0xff] %vm5462_vm10, %v16584_v56  ;;  %10592 = vrot.lane.b32.xlu1 %v10581_v52, %s17596_s23  ;;  %v10392_v19 = vmax.f32 %v10374_v24, %v23249_v4  ;;  %v10425_v13 = vrot.slane %v10391_v63, 1  ;;  %v10260_v46 = vrot.slane %v23187_v58, 1 }
 0x655   : > { %v10486_v53 = vmax.f32 %v10472_v40, 0.0  ;;  %v10514_v34 = vsel %vm1274_vm5, %v10509_v16, %v10513_v39  ;;  %v10517_v43 = vor.u32 %v10515_v49, %v10513_v39  ;;  %v17378_v49 = vld [vmem:[%s23896_s5 + $0x58] sm:$0xff]  }
 0x656   : > { %v10426_v41 = vsel %vm1122_vm2, %v10423_v28, %v10425_v13  ;;  %v10427_v57 = vrot.slane %v10392_v19, 1  ;;  %v10261_v27 = vsel %vm1122_vm2, %v10258_v14, %v10260_v46 }
 0x657   : > { %v9668_v37 = vpop.f32.mrb[164].mxu1  ;;  %v23263_v17 = vpack.c.bf16 %v10486_v53, %v10485_v44  ;;  %v10459_v15 = vmax.f32 %v10390_v31, %v10426_v41 }
 0x658   : > { %v16589_v35 = vadd.f32 %v23148_v54, %v9668_v37  ;;  %v16159_v26 = vpop.f32.mrb[165].mxu1  ;;  %10558 = vrot.lane.b32.xlu1 %v10514_v34, %s17597_s30  ;;  %v10428_v9 = vsel %vm1122_vm2, %v10425_v13, %v10427_v57 }
 0x659   : > { %v9671_v24 = vpop.f32.mrb[166].mxu1  ;;  %v10582_v2 = vrot.slane %v23263_v17, 1  ;;  %v10519_v5 = vshll.u32 %v23263_v17, 16  ;;  %v10460_v33 = vmax.f32 %v10391_v63, %v10428_v9  ;;  %v10473_v30 = vadd.f32 %v23171_v1, %v10459_v15  ;;  %v10378_v48 = vld [vmem:[#allocation4 + $0x130] sm:$0xff]  ;;  %v17380_v9 = vld [vmem:[%s23896_s5] sm:$0xff]  }
 0x65a   : > { %9701 = vst.msk [vmem:[#allocation4 + $0x140] sm:$0xff] %vm5462_vm10, %v16589_v35  ;;  %v16594_v54 = vadd.f32 %v23151_v51, %v9671_v24  ;;  %v16160_v31 = vpop.f32.mrb[167].mxu1  ;;  %v10393_v21 = vmax.f32 %v23229_v62, %v10378_v48  ;;  %v10523_v14 = vshrl.u32 %v23263_v17, 16  ;;  %16257 = vmatprep.subr.bf16.mxu1 %v17380_v9 }
 0x65b   : > { %v10583_v6 = vsel %vm1122_vm2, %v10580_v45, %v10582_v2  ;;  %v10521_v28 = vrot.slane %v10519_v5, 1  ;;  %v10380_v38 = vld [vmem:[#allocation4 + $0x138] sm:$0xff]  ;;  %v10474_v60 = vadd.f32 %v23171_v1, %v10460_v33  ;;  %v10487_v47 = vmax.f32 %v10473_v30, 0.0  ;;  %v17374_v45 = vld [vmem:[%s23896_s5 + $0x48] sm:$0xff]   ;;  %16258 = vmatpush3.bf16.msra.mxu1 %v17380_v9 }
 0x65c   : > { %v10379_v25 = vld [vmem:[#allocation4 + $0x138] sm:$0x7]  ;;  %9702 = vst.msk [vmem:[#allocation4 + $0x148] sm:$0xff] %vm5462_vm10, %v16594_v54  ;;  %10594 = vrot.lane.b32.xlu1 %v10583_v6, %s17596_s23  ;;  %v10394_v51 = vmax.f32 %v10376_v42, %v10380_v38  ;;  %v10429_v11 = vrot.slane %v10393_v21, 1  ;;  %v17375_v42 = vld [vmem:[%s23896_s5 + $0x50] sm:$0xff]   ;;  %16311 = vmatprep.subr.bf16.mxu0 %v17374_v45 }
 0x65d   : > { %v10522_v62 = vsel %vm1274_vm5, %v10517_v43, %v10521_v28  ;;  %v10488_v0 = vmax.f32 %v10474_v60, 0.0  ;;  %v10397_v23 = vmax.f32 %v10379_v25, %v10383_v7  ;;  %16312 = vmatpush3.bf16.msra.mxu0 %v17374_v45  ;;  %v10525_v37 = vor.u32 %v10523_v14, %v10521_v28 }
 0x65e   : > { %10560 = vrot.lane.b32.xlu0 %v10522_v62, %s17597_s30  ;;  %v10430_v61 = vsel %vm1122_vm2, %v10427_v57, %v10429_v11  ;;  %v10431_v50 = vrot.slane %v10394_v51, 1  ;;  %16313 = vmatprep.subr.bf16.mxu0 %v17375_v42  ;;  %v10219_v43 = vshrl.u32 %v23187_v58, 16 }
 0x65f   : > { %v23289_v56 = vpack.c.bf16 %v10488_v0, %v10487_v47  ;;  %v10461_v3 = vmax.f32 %v10392_v19, %v10430_v61  ;;  %v10437_v16 = vrot.slane %v10397_v23, 1 }
 0x660   : > { %v10432_v63 = vsel %vm1122_vm2, %v10429_v11, %v10431_v50  ;;  %v10221_v47 = vor.u32 %v10219_v43, %v23199_v22 }
 0x661   : > { %v10584_v52 = vrot.slane %v23289_v56, 1  ;;  %v10527_v20 = vshll.u32 %v23289_v56, 16  ;;  %v10462_v39 = vmax.f32 %v10393_v21, %v10432_v63  ;;  %v10475_v40 = vadd.f32 %v23171_v1, %v10461_v3  ;;  %v10381_v13 = vld [vmem:[#allocation4 + $0x140] sm:$0xff]  ;;  %16314 = vmatpush3.bf16.msra.mxu0 %v17375_v42 }
 0x662   : > { %10272 = vrot.lane.b32.xlu0 %v10261_v27, %s17596_s23  ;;  %v10395_v19 = vmax.f32 %v23249_v4, %v10381_v13  ;;  %v10466_v26 = vmax.f32 %v10397_v23, %v10437_v16  ;;  %v10531_v33 = vshrl.u32 %v23289_v56, 16  ;;  %16315 = vmatprep.subr.bf16.mxu0 %v17378_v49  ;;  %v10226_v3 = vsel %vm1274_vm5, %v10221_v47, %v23209_v18 }
 0x663   : > { %v10585_v44 = vsel %vm1122_vm2, %v10582_v2, %v10584_v52  ;;  %v10529_v53 = vrot.slane %v10527_v20, 1  ;;  %v10382_v41 = vld [vmem:[#allocation4 + $0x148] sm:$0xff]  ;;  %v10476_v57 = vadd.f32 %v23171_v1, %v10462_v39  ;;  %v10489_v34 = vmax.f32 %v10475_v40, 0.0  ;;  %v17382_v39 = vld [vmem:[%s23896_s5 + $0x8] sm:$0xff]   ;;  %v23349_v40 = vld [vmem:[%s23896_s5] sm:$0xff]  }
 0x664   : > { %10596 = vrot.lane.b32.xlu1 %v10585_v44, %s17596_s23  ;;  %v10396_v59 = vmax.f32 %v10378_v48, %v10382_v41  ;;  %v10433_v12 = vrot.slane %v10395_v19, 1  ;;  %v10480_v38 = vadd.f32 %v23171_v1, %v10466_v26  ;;  %v10263_v13 = vsel %vm1122_vm2, %v10260_v46, %v10262_v36  ;;  %v17384_v44 = vld [vmem:[%s23896_s5 + $0x10] sm:$0xff]   ;;  %16259 = vmatprep.subr.bf16.mxu1 %v17382_v39 }
 0x665   : > { %v10490_v15 = vmax.f32 %v10476_v57, 0.0  ;;  %v10530_v24 = vsel %vm1274_vm5, %v10525_v37, %v10529_v53  ;;  %16316 = vmatpush3.bf16.msra.mxu0 %v17378_v49  ;;  %v10533_v25 = vor.u32 %v10531_v33, %v10529_v53  ;;  %16260 = vmatpush3.bf16.msra.mxu1 %v17382_v39  ;;  %v17387_v53 = vld [vmem:[%s23896_s5 + $0x18] sm:$0xff]   ;;  %v17394_v37 = vld [vmem:[%s23896_s5 + $0x28] sm:$0xff]  }
 0x666   : > { %v10434_v4 = vsel %vm1122_vm2, %v10431_v50, %v10433_v12  ;;  %v10435_v35 = vrot.slane %v10396_v59, 1  ;;  %v10494_v50 = vmax.f32 %v10480_v38, 0.0  ;;  %16329 = vmatprep.subr.bf16.mxu0 %v23349_v40  ;;  %16261 = vmatprep.subr.bf16.mxu1 %v17384_v44 }
 0x667   : > { %v23314_v2 = vpack.c.bf16 %v10490_v15, %v10489_v34  ;;  %v10463_v5 = vmax.f32 %v10394_v51, %v10434_v4  ;;  %v23384_v34 = vld [vmem:[%s23896_s5 + $0x60] sm:$0xff]  }
 0x668   : > { %10562 = vrot.lane.b32.xlu1 %v10530_v24, %s17597_s30  ;;  %v10436_v30 = vsel %vm1122_vm2, %v10433_v12, %v10435_v35  ;;  %v10438_v48 = vsel %vm1122_vm2, %v10435_v35, %v10437_v16  ;;  %v17390_v12 = vld [vmem:[%s23896_s5 + $0x20] sm:$0xff]  }
 0x669   : > { %v10586_v54 = vrot.slane %v23314_v2, 1  ;;  %v10535_v31 = vshll.u32 %v23314_v2, 16  ;;  %v10464_v21 = vmax.f32 %v10395_v19, %v10436_v30  ;;  %v10477_v6 = vadd.f32 %v23171_v1, %v10463_v5  ;;  %16262 = vmatpush3.bf16.msra.mxu1 %v17384_v44 }
 0x66a   : > { %v10465_v28 = vmax.f32 %v10396_v59, %v10438_v48  ;;  %16263 = vmatprep.subr.bf16.mxu1 %v17387_v53 }
 0x66b   : > { %v10587_v60 = vsel %vm1122_vm2, %v10584_v52, %v10586_v54  ;;  %v10537_v7 = vrot.slane %v10535_v31, 1  ;;  %v10478_v51 = vadd.f32 %v23171_v1, %v10464_v21  ;;  %v10491_v0 = vmax.f32 %v10477_v6, 0.0  ;;  %v23390_v31 = vld [vmem:[%s23897_s6] ss:$0 sm:$0xff] }
 0x66c   : > { %10598 = vrot.lane.b32.xlu1 %v10587_v60, %s17596_s23  ;;  %v10479_v11 = vadd.f32 %v23171_v1, %v10465_v28  ;;  %v10539_v1 = vshrl.u32 %v23314_v2, 16  ;;  %v10173_v28 = vpack.c.bf16 %v23185_v29, %v23185_v29 }
 0x66d   : > { %v10538_v62 = vsel %vm1274_vm5, %v10533_v25, %v10537_v7  ;;  %v10492_v45 = vmax.f32 %v10478_v51, 0.0  ;;  %16264 = vmatpush3.bf16.msra.mxu1 %v17387_v53 }
 0x66e   : > { %10564 = vrot.lane.b32.xlu0 %v10538_v62, %s17597_s30  ;;  %v23332_v61 = vmax.f32 %v10479_v11, 0.0  ;;  %v10541_v22 = vor.u32 %v10539_v1, %v10537_v7  ;;  %16265 = vmatprep.subr.bf16.mxu1 %v17390_v12 }
 0x66f   : > { %v23334_v23 = vpack.c.bf16 %v10492_v45, %v10491_v0 }
 0x670   : > { %v10502_v42 = vpack.c.bf16 %v10494_v50, %v23332_v61 }
 0x671   : > { %v10543_v27 = vshll.u32 %v23334_v23, 16  ;;  %v10547_v52 = vshrl.u32 %v23334_v23, 16  ;;  %v10588_v19 = vrot.slane %v23334_v23, 1  ;;  %16266 = vmatpush3.bf16.msra.mxu1 %v17390_v12 }
 0x672   : > { %10240 = vrot.lane.b32.xlu0 %v10226_v3, %s17597_s30  ;;  %v10551_v20 = vshll.u32 %v10502_v42, 16  ;;  %v10590_v46 = vrot.slane %v10502_v42, 1  ;;  %v10555_v41 = vshrl.u32 %v10502_v42, 16  ;;  %16267 = vmatprep.subr.bf16.mxu1 %v17394_v37 }
 0x673   : > { %v10545_v63 = vrot.slane %v10543_v27, 1  ;;  %v10589_v8 = vsel %vm1122_vm2, %v10586_v54, %v10588_v19 }
 0x674   : > { %v10553_v14 = vrot.slane %v10551_v20, 1  ;;  %v10591_v59 = vsel %vm1122_vm2, %v10588_v19, %v10590_v46 }
 0x675   : > { %v10546_v18 = vsel %vm1274_vm5, %v10541_v22, %v10545_v63  ;;  %v10549_v16 = vor.u32 %v10547_v52, %v10545_v63  ;;  %16268 = vmatpush3.bf16.msra.mxu1 %v17394_v37 }
 0x676   : > { %10566 = vrot.lane.b32.xlu1 %v10546_v18, %s17597_s30  ;;  %10274 = vrot.lane.b32.xlu0 %v10263_v13, %s17596_s23  ;;  %v10557_v57 = vor.u32 %v10555_v41, %v10553_v14 }
 0x677   : > { %v10554_v36 = vsel %vm1274_vm5, %v10549_v16, %v10553_v14  ;;  %16281 = vmatprep.subr.bf16.mxu1 %v23384_v34 }
 0x67a   : > { %10600 = vrot.lane.b32.xlu1 %v10589_v8, %s17596_s23  ;;  %10568 = vrot.lane.b32.xlu0 %v10554_v36, %s17597_s30 }
 0x67e   : > { %10570 = vrot.lane.b32.xlu1 %v10557_v57, %s17597_s30  ;;  %10602 = vrot.lane.b32.xlu0 %v10591_v59, %s17596_s23 }
 0x682   : > { %10604 = vrot.lane.b32.xlu1 %v10590_v46, %s17596_s23 }
 0x697   : > { %v16183_v15 = vpop.f32.mrb[220].mxu0 }
 0x698   : > { %v10882_v4 = vpop.f32.mrb[221].mxu0 }
 0x699   : > { %v16184_v35 = vpop.f32.mrb[222].mxu0 }
 0x69a   : > { %v10885_v26 = vpop.f32.mrb[223].mxu0 }
 0x6af   : > { %v16207_v49 = vpop.f32.mrb[224].mxu0 }
 0x6b0   : > { %v11037_v9 = vadd.f32 %v16207_v49, %v16183_v15  ;;  %v11028_v24 = vpop.f32.mrb[225].mxu0 }
 0x6b1   : > { %v11029_v5 = vadd.f32 %v11028_v24, %v10882_v4  ;;  %v16208_v33 = vpop.f32.mrb[226].mxu0 }
 0x6b2   : > { %v11031_v30 = vpop.f32.mrb[227].mxu0 }
 0x6b3   : > { %v11032_v48 = vadd.f32 %v11031_v30, %v10885_v26 }
 0x6b5   : > { %v10277_v25 = vpop.permute.xlu1 %10276 }
 0x6b6   : > { %v10239_v54 = vpop.permute.xlu0 %10238 }
 0x6b7   : > { %v10287_v26 = vsel %vm5462_vm10, %v22877_v10, %v10239_v54 }
 0x6b8   : > { %v16223_v21 = vpop.f32.mrb[212].mxu0 }
 0x6b9   : > { %v23393_v6 = vadd.f32 %v16223_v21, %v23390_v31  ;;  %v11182_v43 = vpop.f32.mrb[213].mxu0 }
 0x6ba   : > { %v16224_v38 = vpop.f32.mrb[214].mxu0  ;;  %v10243_v60 = vpop.permute.xlu0 %10242  ;;  %v23404_v47 = vadd.f32 %v23390_v31, %v11182_v43 }
 0x6bb   : > { %v10292_v7 = vsel %vm5462_vm10, %v10173_v28, %v10243_v60  ;;  %11260 = vmax.xlane.f32.xlu0 %v23393_v6  ;;  %v11185_v51 = vpop.f32.mrb[215].mxu0  ;;  %v23410_v45 = vadd.f32 %v16224_v38, %v23390_v31 }
 0x6bc   : > { %v10306_v11 = vsel %vm389_vm1, %v10292_v7, %v10277_v25  ;;  %v23401_v62 = vadd.f32 %v23390_v31, %v11185_v51  ;;  %v17386_v7 = vld [vmem:[%s23896_s5 + $0x8] sm:$0xff]   ;;  %v23475_v51 = vld [vmem:[#allocation5 + $0x50] sm:$0xf] }
 0x6bd   : > { %v13871_v0 = vcombine.low %v10306_v11, %v10306_v11 }
 0x6be   : > { %11258 = vmax.xlane.f32.xlu1 %v23401_v62 }
 0x6bf   : > { %10365 = vst.msk [vmem:[#allocation5 + $0x64] sm:$0xf] %vm10024_vm11, %v13871_v0  ;;  %11256 = vmax.xlane.f32.xlu0 %v23404_v47 }
 0x6c0   : > { %v16227_v29 = vpop.f32.mrb[216].mxu0 }
 0x6c1   : > { %v23413_v50 = vadd.f32 %v16227_v29, %v23390_v31  ;;  %v11198_v42 = vpop.f32.mrb[217].mxu0 }
 0x6c2   : > { %v16228_v3 = vpop.f32.mrb[218].mxu0  ;;  %v23418_v27 = vadd.f32 %v23390_v31, %v11198_v42 }
 0x6c3   : > { %11262 = vmax.xlane.f32.xlu0 %v23410_v45  ;;  %11268 = vmax.xlane.f32.xlu1 %v23413_v50  ;;  %v11201_v1 = vpop.f32.mrb[219].mxu0  ;;  %v23421_v22 = vadd.f32 %v16228_v3, %v23390_v31  ;;  %v17388_v3 = vld [vmem:[%s23896_s5 + $0x10] sm:$0xff]  }
 0x6c4   : > { %v23426_v20 = vadd.f32 %v23390_v31, %v11201_v1 }
 0x6c6   : > { %v10593_v63 = vpop.permute.xlu1 %10592 }
 0x6c7   : > { %11264 = vmax.xlane.f32.xlu1 %v23418_v27  ;;  %11270 = vmax.xlane.f32.xlu0 %v23421_v22 }
 0x6c8   : > { %v16231_v52 = vpop.f32.mrb[228].mxu0 }
 0x6c9   : > { %v11238_v39 = vadd.f32 %v16231_v52, %v11037_v9  ;;  %v11214_v18 = vpop.f32.mrb[229].mxu0 }
 0x6ca   : > { %v11236_v13 = vadd.f32 %v11214_v18, %v11029_v5  ;;  %v10559_v19 = vpop.permute.xlu1 %10558  ;;  %v16232_v16 = vpop.f32.mrb[230].mxu0 }
 0x6cb   : > { %v23429_v44 = vadd.f32 %v23390_v31, %v11238_v39  ;;  %v10607_v14 = vsel %vm5462_vm10, %v23225_v55, %v10559_v19  ;;  %11266 = vmax.xlane.f32.xlu0 %v23426_v20  ;;  %v11217_v8 = vpop.f32.mrb[231].mxu0 }
 0x6cc   : > { %v10622_v36 = vsel %vm389_vm1, %v10607_v14, %v10593_v63  ;;  %v11237_v46 = vadd.f32 %v11217_v8, %v11032_v48  ;;  %v23440_v59 = vadd.f32 %v23390_v31, %v11236_v13 }
 0x6cd   : > { %v13872_v53 = vcombine.low %v10622_v36, %v10622_v36  ;;  %v13873_v41 = vcombine.high %v10622_v36, %v10622_v36  ;;  %11276 = vmax.xlane.f32.xlu1 %v23429_v44  ;;  %v17397_v36 = vld [vmem:[%s23896_s5 + $0x20] sm:$0xff]  }
 0x6ce   : > { %v23437_v57 = vadd.f32 %v23390_v31, %v11237_v46  ;;  %v10595_v12 = vpop.permute.xlu1 %10594 }
 0x6cf   : > { %10681 = vst.msk [vmem:[#allocation5 + $0x68] sm:$0xf] %vm10024_vm11, %v13872_v53  ;;  %10682 = vst.msk [vmem:[#allocation5 + $0x6c] sm:$0xf] %vm10024_vm11, %v13873_v41 }
 0x6d0   : > { %11274 = vmax.xlane.f32.xlu0 %v23437_v57  ;;  %v10561_v55 = vpop.permute.xlu0 %10560 }
 0x6d1   : > { %v10609_v37 = vsel %vm5462_vm10, %v23236_v32, %v10561_v55  ;;  %11272 = vmax.xlane.f32.xlu1 %v23440_v59  ;;  %v23454_v32 = vld [vmem:[#allocation5 + $0x64] sm:$0xf] }
 0x6d2   : > { %v10624_v15 = vsel %vm389_vm1, %v10609_v37, %v10595_v12 }
 0x6d3   : > { %v13874_v4 = vcombine.low %v10624_v15, %v10624_v15  ;;  %v13875_v35 = vcombine.high %v10624_v15, %v10624_v15 }
 0x6d4   : > { %v10273_v49 = vpop.permute.xlu0 %10272 }
 0x6d5   : > { %10683 = vst.msk [vmem:[#allocation5 + $0x70] sm:$0xf] %vm10024_vm11, %v13874_v4  ;;  %10684 = vst.msk [vmem:[#allocation5 + $0x74] sm:$0xf] %vm10024_vm11, %v13875_v35  ;;  %v10302_v9 = vsel %vm389_vm1, %v10287_v26, %v10273_v49  ;;  %v17400_v35 = vld [vmem:[%s23896_s5 + $0x28] sm:$0xff]  }
 0x6d6   : > { %v13867_v24 = vcombine.low %v10302_v9, %v10302_v9  ;;  %v13868_v5 = vcombine.high %v10302_v9, %v10302_v9  ;;  %v10597_v33 = vpop.permute.xlu1 %10596  ;;  %v23456_v30 = vld [vmem:[#allocation5 + $0x68] sm:$0xf]  ;;  %v23465_v21 = vld [vmem:[#allocation5 + $0x6c] sm:$0xf] }
 0x6d7   : > { %v14076_v48 = vcombine.low %v23454_v32, %v23456_v30 }
 0x6d8   : > { %10361 = vst.msk [vmem:[#allocation5 + $0x54] sm:$0xf] %vm10024_vm11, %v13867_v24  ;;  %10362 = vst.msk [vmem:[#allocation5 + $0x58] sm:$0xf] %vm10024_vm11, %v13868_v5 }
 0x6d9   : > { %16317 = vmatprep.mubr.msk.bf16.mxu0 %vm10797_vm12, %v14076_v48  ;;  %v10501_v48 = vpack.c.bf16 %v23332_v61, %v23332_v61 }
 0x6da   : > { %v10563_v10 = vpop.permute.xlu1 %10562 }
 0x6db   : > { %v10611_v54 = vsel %vm5462_vm10, %v23263_v17, %v10563_v10 }
 0x6dc   : > { %v23467_v43 = vld [vmem:[#allocation5 + $0x70] sm:$0xf]  ;;  %v10626_v28 = vsel %vm389_vm1, %v10611_v54, %v10597_v33  ;;  %v17402_v33 = vld [vmem:[%s23896_s5 + $0x60] sm:$0xff]  }
 0x6dd   : > { %v14077_v38 = vcombine.low %v23465_v21, %v23467_v43  ;;  %v13876_v60 = vcombine.low %v10626_v28, %v10626_v28  ;;  %v13877_v25 = vcombine.high %v10626_v28, %v10626_v28 }
 0x6de   : > { %v10599_v29 = vpop.permute.xlu1 %10598 }
 0x6df   : > { %10685 = vst.msk [vmem:[#allocation5 + $0x78] sm:$0xf] %vm10024_vm11, %v13876_v60  ;;  %10686 = vst.msk [vmem:[#allocation5 + $0x7c] sm:$0xf] %vm10024_vm11, %v13877_v25  ;;  %16318 = vmatmul.mubr.msk.bf16.vlgmr.msra.gmra.mrb[232].mxu0 %vm10797_vm12, %v14077_v38  ;;  %v23480_v17 = vld [vmem:[#allocation5 + $0x54] sm:$0xf] }
 0x6e0   : > { %v10565_v11 = vpop.permute.xlu0 %10564  ;;  %v13990_v0 = vcombine.low %v23475_v51, %v23480_v17  ;;  %16330 = vmatpush3.bf16.msra.mxu0 %v23349_v40  ;;  %v23497_v40 = vld [vmem:[#allocation5 + $0x74] sm:$0xf] }
 0x6e1   : > { %v10613_v42 = vsel %vm5462_vm10, %v23289_v56, %v10565_v11  ;;  %16331 = vmatprep.subr.bf16.mxu0 %v17386_v7  ;;  %v17392_v56 = vld [vmem:[%s23896_s5 + $0x18] sm:$0xff]  }
 0x6e2   : > { %v10628_v1 = vsel %vm389_vm1, %v10613_v42, %v10599_v29  ;;  %16250 = vmatmul.mubr.msk.bf16.gmra.mrb[172].mxu1 %vm10797_vm12, %v13990_v0  ;;  %v11413_v29 = vld [vmem:[#allocation5 + $0x34] sm:$0xf] }
 0x6e3   : > { %v13878_v63 = vcombine.low %v10628_v1, %v10628_v1  ;;  %v13879_v52 = vcombine.high %v10628_v1, %v10628_v1 }
 0x6e4   : > { %v10241_v39 = vpop.permute.xlu0 %10240  ;;  %16332 = vmatpush3.bf16.msra.mxu0 %v17386_v7  ;;  %v17393_v7 = vld [vmem:[#allocation5 + $0x2c] sm:$0xff]  }
 0x6e5   : > { %10687 = vst.msk [vmem:[#allocation5 + $0x80] sm:$0xf] %vm10024_vm11, %v13878_v63  ;;  %10688 = vst.msk [vmem:[#allocation5 + $0x84] sm:$0xf] %vm10024_vm11, %v13879_v52  ;;  %16333 = vmatprep.subr.bf16.mxu0 %v17388_v3  ;;  %v10289_v13 = vsel %vm5462_vm10, %v23187_v58, %v10241_v39  ;;  %v17401_v63 = vld [vmem:[%s23896_s5 + $0x68] sm:$0xff]  }
 0x6e6   : > { %v23499_v18 = vld [vmem:[#allocation5 + $0x78] sm:$0xf]  ;;  %v23510_v41 = vld [vmem:[#allocation5 + $0x7c] sm:$0xf] }
 0x6e7   : > { %v14078_v14 = vcombine.low %v23497_v40, %v23499_v18  ;;  %v17581_v39 = vld [vmem:[#allocation5 + $0x3c] sm:$0xf] }
 0x6e8   : > { %v10567_v19 = vpop.permute.xlu1 %10566  ;;  %v10275_v16 = vpop.permute.xlu0 %10274  ;;  %16334 = vmatpush3.bf16.msra.mxu0 %v17388_v3  ;;  %v17580_v3 = vld [vmem:[#allocation5 + $0x38] sm:$0xf] }
 0x6e9   : > { %v10304_v8 = vsel %vm389_vm1, %v10289_v13, %v10275_v16  ;;  %16335 = vmatprep.subr.bf16.mxu0 %v17392_v56  ;;  %16321 = vmatprep.mubr.msk.bf16.mxu0 %vm10797_vm12, %v14078_v14  ;;  %v10615_v58 = vsel %vm5462_vm10, %v23314_v2, %v10567_v19  ;;  %v14006_v1 = vcombine.low %v11413_v29, %v17580_v3  ;;  %v17403_v16 = vld [vmem:[%s23896_s5 + $0x70] sm:$0xff]  }
 0x6ea   : > { %v13869_v46 = vcombine.low %v10304_v8, %v10304_v8  ;;  %v13870_v53 = vcombine.high %v10304_v8, %v10304_v8  ;;  %v14096_v14 = vcombine.low %v23456_v30, %v23465_v21  ;;  %v17404_v8 = vld [vmem:[%s23896_s5 + $0x68] sm:$0xff]  }
 0x6eb   : > { %v17585_v30 = vld [vmem:[#allocation5 + $0x4c] sm:$0xf] }
 0x6ec   : > { %10363 = vst.msk [vmem:[#allocation5 + $0x5c] sm:$0xf] %vm10024_vm11, %v13869_v46  ;;  %10364 = vst.msk [vmem:[#allocation5 + $0x60] sm:$0xf] %vm10024_vm11, %v13870_v53  ;;  %v10601_v55 = vpop.permute.xlu1 %10600  ;;  %v10569_v12 = vpop.permute.xlu0 %10568  ;;  %v23516_v37 = vld [vmem:[#allocation5 + $0x80] sm:$0xf]  ;;  %16336 = vmatpush3.bf16.msra.mxu0 %v17392_v56  ;;  %v14009_v21 = vcombine.low %v17585_v30, %v23475_v51  ;;  %v14098_v51 = vcombine.low %v23499_v18, %v23510_v41 }
 0x6ed   : > { %v10630_v15 = vsel %vm389_vm1, %v10615_v58, %v10601_v55  ;;  %v14079_v4 = vcombine.low %v23510_v41, %v23516_v37  ;;  %16337 = vmatprep.subr.bf16.mxu0 %v17397_v36  ;;  %v10617_v49 = vsel %vm5462_vm10, %v23334_v23, %v10569_v12  ;;  %v17582_v56 = vld [vmem:[#allocation5 + $0x40] sm:$0xf]  ;;  %v17405_v46 = vld [vmem:[%s23896_s5 + $0x78] sm:$0xff]   ;;  %v17406_v53 = vld [vmem:[%s23896_s5 + $0x70] sm:$0xff]   ;;  %v14097_v58 = vcombine.low %v23467_v43, %v23497_v40 }
 0x6ee   : > { %v13880_v2 = vcombine.low %v10630_v15, %v10630_v15  ;;  %v13881_v26 = vcombine.high %v10630_v15, %v10630_v15  ;;  %v14007_v13 = vcombine.low %v17581_v39, %v17582_v56  ;;  %v17407_v55 = vld [vmem:[%s23896_s5 + $0x80] sm:$0xff]   ;;  %v17408_v12 = vld [vmem:[%s23896_s5 + $0x78] sm:$0xff]   ;;  %v14010_v43 = vcombine.low %v23480_v17, %v23480_v17  ;;  %v17410_v40 = vld [vmem:[%s23896_s5 + $0x88] sm:$0xff]  }
 0x6ef   : > { %16322 = vmatmul.mubr.msk.bf16.gmra.mrb[236].mxu0 %vm10797_vm12, %v14079_v4  ;;  %v17409_v18 = vld [vmem:[#allocation5 + $0x44] sm:$0xff]   ;;  %v14099_v17 = vcombine.low %v23516_v37, %v23516_v37  ;;  %v17412_v15 = vld [vmem:[#allocation5 + $0x70] sm:$0xff]   ;;  %v17377_v37 = vld [vmem:[#allocation5 + $0x78] sm:$0xff]  }
 0x6f0   : > { %10689 = vst.msk [vmem:[#allocation5 + $0x88] sm:$0xf] %vm10024_vm11, %v13880_v2  ;;  %10690 = vst.msk [vmem:[#allocation5 + $0x8c] sm:$0xf] %vm10024_vm11, %v13881_v26  ;;  %v10571_v9 = vpop.permute.xlu1 %10570  ;;  %v10603_v24 = vpop.permute.xlu0 %10602  ;;  %16338 = vmatpush3.bf16.msra.mxu0 %v17397_v36  ;;  %v17411_v41 = vld [vmem:[%s23896_s5 + $0x80] sm:$0xff]   ;;  %v17414_v4 = vld [vmem:[%s23896_s5 + $0x88] sm:$0xff]  }
 0x6f1   : > { %v10632_v5 = vsel %vm389_vm1, %v10617_v49, %v10603_v24  ;;  %16339 = vmatprep.subr.bf16.mxu0 %v17400_v35  ;;  %v10620_v38 = vsel %vm5462_vm10, %v10501_v48, %v10571_v9  ;;  %v17415_v2 = vld [vmem:[#allocation5 + $0x54] sm:$0xff]   ;;  %v17416_v26 = vld [vmem:[#allocation5 + $0x80] sm:$0xff]  }
 0x6f2   : > { %v13882_v10 = vcombine.low %v10632_v5, %v10632_v5  ;;  %v13883_v54 = vcombine.high %v10632_v5, %v10632_v5  ;;  %v17418_v9 = vld [vmem:[#allocation5 + $0x64] sm:$0xff]  }
 0x6f3   : > { %v17389_v28 = vld [vmem:[#allocation5 + $0x58] sm:$0xff]   ;;  %v17391_v60 = vld [vmem:[#allocation5 + $0x60] ss:$0 sps:$4 sm:$0xff]  }
 0x6f4   : > { %10691 = vst.msk [vmem:[#allocation5 + $0x90] sm:$0xf] %vm10024_vm11, %v13882_v10  ;;  %10692 = vst.msk [vmem:[#allocation5 + $0x94] sm:$0xf] %vm10024_vm11, %v13883_v54  ;;  %v10605_v23 = vpop.permute.xlu1 %10604  ;;  %16340 = vmatpush3.bf16.msra.mxu0 %v17400_v35  ;;  %16253 = vmatprep.mubr.msk.bf16.mxu1 %vm10797_vm12, %v17389_v28  ;;  %v17398_v42 = vld [vmem:[#allocation5 + $0x58] sm:$0xff]   ;;  %v17413_v35 = vld [vmem:[#allocation5 + $0x4c] sm:$0xff]  }
 0x6f5   : > { %v10634_v25 = vsel %vm389_vm1, %v10620_v38, %v10605_v23  ;;  %16353 = vmatprep.subr.bf16.mxu0 %v17402_v33  ;;  %16254 = vmatmul.mubr.msk.bf16.gmra.mrb[176].mxu1 %vm10797_vm12, %v17391_v60  ;;  %v12121_v52 = vld [vmem:[#allocation5 + $0x60] sm:$0xf] }
 0x6f6   : > { %v13884_v11 = vcombine.low %v10634_v25, %v10634_v25  ;;  %16269 = vmatprep.mubr.msk.bf16.mxu1 %vm10797_vm12, %v17393_v7  ;;  %v14095_v19 = vcombine.low %v12121_v52, %v23454_v32  ;;  %v17584_v32 = vld [vmem:[#allocation5 + $0x48] sm:$0xf]  ;;  %v17417_v49 = vld [vmem:[#allocation5 + $0x5c] sm:$0xff]  }
 0x6f7   : > { %v17395_v61 = vld [vmem:[#allocation5 + $0x84] sm:$0xff]   ;;  %v17396_v0 = vld [vmem:[#allocation5 + $0x8c] ss:$0 sps:$4 sm:$0xff]  }
 0x6f8   : > { %10693 = vst.msk [vmem:[#allocation5 + $0x98] sm:$0xf] %vm10024_vm11, %v13884_v11  ;;  %16325 = vmatprep.mubr.msk.bf16.mxu0 %vm10797_vm12, %v17395_v61  ;;  %v17419_v24 = vld [vmem:[#allocation5 + $0x88] sm:$0xff]  }
 0x6f9   : > { %16326 = vmatmul.mubr.msk.bf16.gmra.mrb[240].mxu0 %vm10797_vm12, %v17396_v0 }
 0x6fa   : > { %16341 = vmatprep.mubr.msk.bf16.mxu0 %vm10797_vm12, %v17398_v42 }
 0x6fb   : > { %v17420_v5 = vld [vmem:[#allocation5 + $0x90] sm:$0xff]  }
 0x6fd   : > { %16270 = vmatmul.mubr.msk.bf16.vlgmr.msra.gmra.mrb[168].mxu1 %vm10797_vm12, %v14006_v1 }
 0x6fe   : > { %16282 = vmatpush3.bf16.msra.mxu1 %v23384_v34  ;;  %16273 = vmatprep.mubr.msk.bf16.mxu1 %vm10797_vm12, %v14007_v13  ;;  %v17583_v34 = vld [vmem:[#allocation5 + $0x44] sm:$0xf] }
 0x6ff   : > { %16283 = vmatprep.subr.bf16.mxu1 %v17401_v63  ;;  %v14008_v36 = vcombine.low %v17583_v34, %v17584_v32  ;;  %v17422_v48 = vld [vmem:[#allocation5 + $0x98] ss:$0 sps:$4 sm:$0xff]  }
 0x701   : > { %16342 = vmatmul.mubr.msk.bf16.vlgmr.msra.gmra.mrb[232].mxu0 %vm10797_vm12, %v14095_v19 }
 0x702   : > { %16284 = vmatpush3.bf16.msra.mxu1 %v17401_v63  ;;  %16345 = vmatprep.mubr.msk.bf16.mxu0 %vm10797_vm12, %v14096_v14 }
 0x703   : > { %16354 = vmatpush3.bf16.msra.mxu0 %v17402_v33  ;;  %16285 = vmatprep.subr.bf16.mxu1 %v17403_v16  ;;  %v17421_v33 = vld [vmem:[#allocation5 + $0x6c] ss:$0 sps:$4 sm:$0xff]  }
 0x704   : > { %16355 = vmatprep.subr.bf16.mxu0 %v17404_v8 }
 0x705   : > { %16274 = vmatmul.mubr.msk.bf16.gmra.mrb[172].mxu1 %vm10797_vm12, %v14008_v36 }
 0x706   : > { %16286 = vmatpush3.bf16.msra.mxu1 %v17403_v16  ;;  %16277 = vmatprep.mubr.msk.bf16.mxu1 %vm10797_vm12, %v14009_v21 }
 0x707   : > { %16356 = vmatpush3.bf16.msra.mxu0 %v17404_v8  ;;  %16287 = vmatprep.subr.bf16.mxu1 %v17405_v46 }
 0x708   : > { %16357 = vmatprep.subr.bf16.mxu0 %v17406_v53 }
 0x709   : > { %16346 = vmatmul.mubr.msk.bf16.gmra.mrb[236].mxu0 %vm10797_vm12, %v14097_v58 }
 0x70a   : > { %16288 = vmatpush3.bf16.msra.mxu1 %v17405_v46  ;;  %16349 = vmatprep.mubr.msk.bf16.mxu0 %vm10797_vm12, %v14098_v51 }
 0x70b   : > { %16358 = vmatpush3.bf16.msra.mxu0 %v17406_v53  ;;  %16289 = vmatprep.subr.bf16.mxu1 %v17407_v55 }
 0x70c   : > { %16359 = vmatprep.subr.bf16.mxu0 %v17408_v12 }
 0x70d   : > { %16278 = vmatmul.mubr.msk.bf16.gmra.mrb[180].mxu1 %vm10797_vm12, %v14010_v43 }
 0x70e   : > { %16290 = vmatpush3.bf16.msra.mxu1 %v17407_v55  ;;  %16293 = vmatprep.mubr.msk.bf16.mxu1 %vm10797_vm12, %v17409_v18 }
 0x70f   : > { %16360 = vmatpush3.bf16.msra.mxu0 %v17408_v12  ;;  %16291 = vmatprep.subr.bf16.mxu1 %v17410_v40 }
 0x710   : > { %16361 = vmatprep.subr.bf16.mxu0 %v17411_v41 }
 0x711   : > { %16350 = vmatmul.mubr.msk.bf16.gmra.mrb[244].mxu0 %vm10797_vm12, %v14099_v17 }
 0x712   : > { %16292 = vmatpush3.bf16.msra.mxu1 %v17410_v40  ;;  %16365 = vmatprep.mubr.msk.bf16.mxu0 %vm10797_vm12, %v17412_v15 }
 0x713   : > { %16362 = vmatpush3.bf16.msra.mxu0 %v17411_v41 }
 0x714   : > { %16363 = vmatprep.subr.bf16.mxu0 %v17414_v4 }
 0x715   : > { %16294 = vmatmul.mubr.msk.bf16.vlgmr.msra.gmra.mrb[168].mxu1 %vm10797_vm12, %v17413_v35 }
 0x716   : > { %16297 = vmatprep.mubr.msk.bf16.mxu1 %vm10797_vm12, %v17415_v2 }
 0x717   : > { %16364 = vmatpush3.bf16.msra.mxu0 %v17414_v4 }
 0x71a   : > { %16366 = vmatmul.mubr.msk.bf16.vlgmr.msra.gmra.mrb[232].mxu0 %vm10797_vm12, %v17377_v37 }
 0x71b   : > { %16369 = vmatprep.mubr.msk.bf16.mxu0 %vm10797_vm12, %v17416_v26 }
 0x71d   : > { %16298 = vmatmul.mubr.msk.bf16.gmra.mrb[172].mxu1 %vm10797_vm12, %v17417_v49 }
 0x71e   : > { %16301 = vmatprep.mubr.msk.bf16.mxu1 %vm10797_vm12, %v17418_v9 }
 0x722   : > { %16370 = vmatmul.mubr.msk.bf16.gmra.mrb[236].mxu0 %vm10797_vm12, %v17419_v24 }
 0x723   : > { %16373 = vmatprep.mubr.msk.bf16.mxu0 %vm10797_vm12, %v17420_v5 }
 0x725   : > { %16302 = vmatmul.mubr.msk.bf16.gmra.mrb[184].mxu1 %vm10797_vm12, %v17421_v33 }
 0x72a   : > { %16374 = vmatmul.mubr.msk.bf16.gmra.mrb[248].mxu0 %vm10797_vm12, %v17422_v48 }
 0x748   : > { %v11261_v35 = vpop.xlane.xlu0 %11260 }
 0x7c8   : > { %v16255_v10 = vpop.f32.mrb[176].mxu1 }
 0x7c9   : > { %v11597_v54 = vpop.f32.mrb[177].mxu1 }
 0x7ca   : > { %v16256_v28 = vpop.f32.mrb[178].mxu1 }
 0x7cb   : > { %v11600_v38 = vpop.f32.mrb[179].mxu1  ;;  %v11257_v28 = vpop.xlane.xlu0 %11256 }
 0x7cc   : > { %v16327_v23 = vpop.f32.mrb[240].mxu0 }
 0x7cd   : > { %v12305_v60 = vpop.f32.mrb[241].mxu0 }
 0x7ce   : > { %v16328_v25 = vpop.f32.mrb[242].mxu0 }
 0x7cf   : > { %v12308_v7 = vpop.f32.mrb[243].mxu0 }
 0x7e0   : > { %v16279_v11 = vpop.f32.mrb[180].mxu1 }
 0x7e1   : > { %v11752_v61 = vadd.f32 %v16279_v11, %v16255_v10  ;;  %v11743_v0 = vpop.f32.mrb[181].mxu1 }
 0x7e2   : > { %v11744_v29 = vadd.f32 %v11743_v0, %v11597_v54  ;;  %v16280_v42 = vpop.f32.mrb[182].mxu1 }
 0x7e3   : > { %v11746_v3 = vpop.f32.mrb[183].mxu1 }
 0x7e4   : > { %v11747_v1 = vadd.f32 %v11746_v3, %v11600_v38  ;;  %v16351_v63 = vpop.f32.mrb[244].mxu0 }
 0x7e5   : > { %v12460_v52 = vadd.f32 %v16351_v63, %v16327_v23  ;;  %v12451_v39 = vpop.f32.mrb[245].mxu0  ;;  %v11259_v23 = vpop.xlane.xlu1 %11258 }
 0x7e6   : > { %v12452_v56 = vadd.f32 %v12451_v39, %v12305_v60  ;;  %v16352_v13 = vpop.f32.mrb[246].mxu0 }
 0x7e7   : > { %v12454_v19 = vpop.f32.mrb[247].mxu0 }
 0x7e8   : > { %v12455_v16 = vadd.f32 %v12454_v19, %v12308_v7  ;;  %v16295_v14 = vpop.f32.mrb[168].mxu1 }
 0x7e9   : > { %v23612_v8 = vadd.f32 %v16295_v14, %v23390_v31  ;;  %v11896_v34 = vpop.f32.mrb[169].mxu1  ;;  %v11269_v39 = vpop.xlane.xlu1 %11268  ;;  %v11279_v14 = vsub.f32 %v23401_v62, %v11259_v23 }
 0x7ea   : > { %v16296_v32 = vpop.f32.mrb[170].mxu1  ;;  %v23619_v30 = vadd.f32 %v23390_v31, %v11896_v34 }
 0x7eb   : > { %v23615_v36 = vadd.f32 %v16296_v32, %v23390_v31  ;;  %11968 = vmax.xlane.f32.xlu0 %v23612_v8  ;;  %v11899_v46 = vpop.f32.mrb[171].mxu1  ;;  %v11280_v32 = vsub.f32 %v23393_v6, %v11261_v35 }
 0x7ec   : > { %v23623_v58 = vadd.f32 %v23390_v31, %v11899_v46 }
 0x7ed   : > { %v16367_v21 = vpop.f32.mrb[232].mxu0  ;;  %11970 = vmax.xlane.f32.xlu1 %v23615_v36  ;;  %v11265_v34 = vpop.xlane.xlu1 %11264  ;;  %v11293_v62 = vmul.f32 1.442695, %v11280_v32 }
 0x7ee   : > { %v12604_v53 = vpop.f32.mrb[233].mxu0  ;;  %v23656_v63 = vadd.f32 %v16367_v21, %v23390_v31 }
 0x7ef   : > { %v16368_v55 = vpop.f32.mrb[234].mxu0  ;;  %11964 = vmax.xlane.f32.xlu0 %v23619_v30 }
 0x7f0   : > { %v12607_v51 = vpop.f32.mrb[235].mxu0  ;;  %v16299_v12 = vpop.f32.mrb[172].mxu1  ;;  %v23659_v13 = vadd.f32 %v16368_v55, %v23390_v31 }
 0x7f1   : > { %v23627_v43 = vadd.f32 %v16299_v12, %v23390_v31  ;;  %11966 = vmax.xlane.f32.xlu1 %v23623_v58  ;;  %v11912_v40 = vpop.f32.mrb[173].mxu1  ;;  %v23668_v19 = vadd.f32 %v23390_v31, %v12607_v51  ;;  %v11277_v51 = vpop.xlane.xlu1 %11276  ;;  %v11282_v12 = vsub.f32 %v23418_v27, %v11265_v34 }
 0x7f2   : > { %v16300_v18 = vpop.f32.mrb[174].mxu1  ;;  %v23635_v15 = vadd.f32 %v23390_v31, %v11912_v40 }
 0x7f3   : > { %v23631_v41 = vadd.f32 %v16300_v18, %v23390_v31  ;;  %11976 = vmax.xlane.f32.xlu0 %v23627_v43  ;;  %v11915_v17 = vpop.f32.mrb[175].mxu1  ;;  %v11297_v35 = vmul.f32 1.442695, %v11282_v12 }
 0x7f4   : > { %v23639_v37 = vadd.f32 %v23390_v31, %v11915_v17 }
 0x7f5   : > { %v16371_v4 = vpop.f32.mrb[236].mxu0  ;;  %11978 = vmax.xlane.f32.xlu1 %v23631_v41 }
 0x7f6   : > { %v12620_v2 = vpop.f32.mrb[237].mxu0  ;;  %v23675_v21 = vadd.f32 %v16371_v4, %v23390_v31  ;;  %v11284_v4 = vsub.f32 %v23413_v50, %v11269_v39 }
 0x7f7   : > { %v16372_v26 = vpop.f32.mrb[238].mxu0  ;;  %11972 = vmax.xlane.f32.xlu0 %v23635_v15  ;;  %v23685_v40 = vadd.f32 %v23390_v31, %v12620_v2  ;;  %v11273_v2 = vpop.xlane.xlu1 %11272 }
 0x7f8   : > { %v12623_v49 = vpop.f32.mrb[239].mxu0  ;;  %v16303_v9 = vpop.f32.mrb[184].mxu1  ;;  %v11286_v50 = vsub.f32 %v23440_v59, %v11273_v2 }
 0x7f9   : > { %v11952_v24 = vadd.f32 %v16303_v9, %v11752_v61  ;;  %11974 = vmax.xlane.f32.xlu1 %v23639_v37  ;;  %v11928_v5 = vpop.f32.mrb[185].mxu1  ;;  %v23688_v18 = vadd.f32 %v23390_v31, %v12623_v49 }
 0x7fa   : > { %v11950_v33 = vadd.f32 %v11928_v5, %v11744_v29  ;;  %v16304_v48 = vpop.f32.mrb[186].mxu1 }
 0x7fb   : > { %v23644_v10 = vadd.f32 %v23390_v31, %v11952_v24  ;;  %v11931_v54 = vpop.f32.mrb[187].mxu1 }
 0x7fc   : > { %v11951_v38 = vadd.f32 %v11931_v54, %v11747_v1  ;;  %v23651_v61 = vadd.f32 %v23390_v31, %v11950_v33  ;;  %v11263_v1 = vpop.xlane.xlu0 %11262 }
 0x7fd   : > { %v16375_v60 = vpop.f32.mrb[248].mxu0  ;;  %11984 = vmax.xlane.f32.xlu0 %v23644_v10  ;;  %v11281_v55 = vsub.f32 %v23410_v45, %v11263_v1 }
 0x7fe   : > { %v23648_v25 = vadd.f32 %v23390_v31, %v11951_v38  ;;  %v12660_v7 = vadd.f32 %v16375_v60, %v12460_v52  ;;  %v12636_v11 = vpop.f32.mrb[249].mxu0  ;;  %v11278_v52 = vsub.f32 %v23404_v47, %v11257_v28  ;;  %v23678_v47 = vadd.f32 %v16372_v26, %v23390_v31 }
 0x7ff   : > { %v12658_v0 = vadd.f32 %v12636_v11, %v12452_v56  ;;  %v16376_v29 = vpop.f32.mrb[250].mxu0  ;;  %v23665_v56 = vadd.f32 %v23390_v31, %v12604_v53  ;;  %v11291_v53 = vmul.f32 1.442695, %v11279_v14  ;;  %v11295_v17 = vmul.f32 1.442695, %v11281_v55 }
 0x800   : > { %v12639_v42 = vpop.f32.mrb[251].mxu0  ;;  %11982 = vmax.xlane.f32.xlu1 %v23648_v25  ;;  %v11289_v46 = vmul.f32 1.442695, %v11278_v52  ;;  %v23705_v5 = vadd.f32 %v23390_v31, %v12660_v7  ;;  %v11305_v28 = vmul.f32 1.442695, %v11286_v50 }
 0x801   : > { %v12659_v3 = vadd.f32 %v12639_v42, %v12455_v16  ;;  %11980 = vmax.xlane.f32.xlu0 %v23651_v61  ;;  %v11271_v16 = vpop.xlane.xlu0 %11270  ;;  %v23695_v27 = vadd.f32 %v23390_v31, %v12658_v0 }
 0x802   : > { %17423 = vpow2.f32 %v11289_v46  ;;  %v11285_v49 = vsub.f32 %v23421_v22, %v11271_v16  ;;  %v11288_v22 = vsub.f32 %v23429_v44, %v11277_v51 }
 0x803   : > { %17425 = vpow2.f32 %v11291_v53  ;;  %v23698_v26 = vadd.f32 %v23390_v31, %v12659_v3 }
 0x804   : > { %12676 = vmax.xlane.f32.xlu1 %v23656_v63  ;;  %17427 = vpow2.f32 %v11293_v62  ;;  %v11303_v48 = vmul.f32 1.442695, %v11285_v49  ;;  %v11309_v23 = vmul.f32 1.442695, %v11288_v22 }
 0x805   : > { %12678 = vmax.xlane.f32.xlu0 %v23659_v13  ;;  %v11267_v6 = vpop.xlane.xlu0 %11266  ;;  %17429 = vpow2.f32 %v11295_v17 }
 0x806   : > { %v11283_v45 = vsub.f32 %v23426_v20, %v11267_v6  ;;  %v11301_v20 = vmul.f32 1.442695, %v11284_v4  ;;  %17431 = vpow2.f32 %v11297_v35 }
 0x808   : > { %12672 = vmax.xlane.f32.xlu1 %v23665_v56  ;;  %v11299_v9 = vmul.f32 1.442695, %v11283_v45 }
 0x809   : > { %12674 = vmax.xlane.f32.xlu0 %v23668_v19  ;;  %v11275_v24 = vpop.xlane.xlu0 %11274 }
 0x80a   : > { %17433 = vpow2.f32 %v11299_v9  ;;  %v11287_v54 = vsub.f32 %v23437_v57, %v11275_v24 }
 0x80b   : > { %17435 = vpow2.f32 %v11301_v20 }
 0x80c   : > { %12684 = vmax.xlane.f32.xlu1 %v23675_v21  ;;  %v23707_v33 = vpop.eup %17423  ;;  %17437 = vpow2.f32 %v11303_v48  ;;  %v11307_v31 = vmul.f32 1.442695, %v11287_v54 }
 0x80d   : > { %12686 = vmax.xlane.f32.xlu0 %v23678_v47  ;;  %v23713_v38 = vpop.eup %17425  ;;  %17439 = vpow2.f32 %v11305_v28 }
 0x80e   : > { %v23715_v59 = vpop.eup %17427  ;;  %17441 = vpow2.f32 %v11307_v31 }
 0x80f   : > { %v23719_v60 = vpop.eup %17429  ;;  %17443 = vpow2.f32 %v11309_v23 }
 0x810   : > { %12680 = vmax.xlane.f32.xlu1 %v23685_v40  ;;  %v23721_v57 = vpop.eup %17431 }
 0x811   : > { %12682 = vmax.xlane.f32.xlu0 %v23688_v18 }
 0x814   : > { %12688 = vmax.xlane.f32.xlu1 %v23695_v27  ;;  %v23725_v44 = vpop.eup %17433 }
 0x815   : > { %12690 = vmax.xlane.f32.xlu0 %v23698_v26  ;;  %v23727_v7 = vpop.eup %17435 }
 0x816   : > { %v23731_v11 = vpop.eup %17437 }
 0x817   : > { %v23733_v0 = vpop.eup %17439 }
 0x818   : > { %12692 = vmax.xlane.f32.xlu1 %v23705_v5  ;;  %v23737_v29 = vpop.eup %17441 }
 0x819   : > { %11311 = vadd.xlane.f32.xlu0 %v23707_v33  ;;  %v23739_v42 = vpop.eup %17443 }
 0x81c   : > { %11313 = vadd.xlane.f32.xlu1 %v23713_v38 }
 0x81d   : > { %11315 = vadd.xlane.f32.xlu0 %v23715_v59 }
 0x820   : > { %11317 = vadd.xlane.f32.xlu1 %v23719_v60 }
 0x821   : > { %11319 = vadd.xlane.f32.xlu0 %v23721_v57 }
 0x824   : > { %11321 = vadd.xlane.f32.xlu1 %v23725_v44 }
 0x825   : > { %11323 = vadd.xlane.f32.xlu0 %v23727_v7 }
 0x828   : > { %11325 = vadd.xlane.f32.xlu1 %v23731_v11 }
 0x829   : > { %11327 = vadd.xlane.f32.xlu0 %v23733_v0 }
 0x82c   : > { %11329 = vadd.xlane.f32.xlu1 %v23737_v29 }
 0x82d   : > { %11331 = vadd.xlane.f32.xlu0 %v23739_v42 }
 0x878   : > { %v11969_v3 = vpop.xlane.xlu0 %11968 }
 0x879   : > { %v11988_v1 = vsub.f32 %v23612_v8, %v11969_v3 }
 0x87a   : > { %v11971_v39 = vpop.xlane.xlu1 %11970 }
 0x87b   : > { %v12001_v52 = vmul.f32 1.442695, %v11988_v1  ;;  %v11989_v16 = vsub.f32 %v23615_v36, %v11971_v39 }
 0x87c   : > { %v11965_v14 = vpop.xlane.xlu0 %11964 }
 0x87d   : > { %17445 = vpow2.f32 %v12001_v52  ;;  %v12003_v34 = vmul.f32 1.442695, %v11989_v16  ;;  %v11986_v32 = vsub.f32 %v23619_v30, %v11965_v14 }
 0x87e   : > { %v11967_v46 = vpop.xlane.xlu1 %11966 }
 0x87f   : > { %17447 = vpow2.f32 %v12003_v34  ;;  %v11997_v53 = vmul.f32 1.442695, %v11986_v32  ;;  %v11987_v55 = vsub.f32 %v23623_v58, %v11967_v46 }
 0x880   : > { %v11977_v51 = vpop.xlane.xlu0 %11976 }
 0x881   : > { %17449 = vpow2.f32 %v11997_v53  ;;  %v11999_v62 = vmul.f32 1.442695, %v11987_v55  ;;  %v11992_v12 = vsub.f32 %v23627_v43, %v11977_v51 }
 0x882   : > { %v11979_v8 = vpop.xlane.xlu1 %11978 }
 0x883   : > { %17451 = vpow2.f32 %v11999_v62  ;;  %v12009_v6 = vmul.f32 1.442695, %v11992_v12  ;;  %v11993_v36 = vsub.f32 %v23631_v41, %v11979_v8 }
 0x884   : > { %v11973_v17 = vpop.xlane.xlu0 %11972 }
 0x885   : > { %17453 = vpow2.f32 %v12009_v6  ;;  %v12011_v45 = vmul.f32 1.442695, %v11993_v36  ;;  %v11990_v30 = vsub.f32 %v23635_v15, %v11973_v17 }
 0x886   : > { %v11975_v4 = vpop.xlane.xlu1 %11974 }
 0x887   : > { %v23750_v35 = vpop.eup %17445  ;;  %17455 = vpow2.f32 %v12011_v45  ;;  %v12005_v58 = vmul.f32 1.442695, %v11990_v30  ;;  %v11991_v2 = vsub.f32 %v23639_v37, %v11975_v4 }
 0x888   : > { %12023 = vadd.xlane.f32.xlu1 %v23750_v35 }
 0x889   : > { %v23754_v43 = vpop.eup %17447  ;;  %17457 = vpow2.f32 %v12005_v58  ;;  %v12007_v49 = vmul.f32 1.442695, %v11991_v2 }
 0x88a   : > { %12025 = vadd.xlane.f32.xlu0 %v23754_v43  ;;  %v11985_v41 = vpop.xlane.xlu0 %11984 }
 0x88b   : > { %v23757_v9 = vpop.eup %17449  ;;  %17459 = vpow2.f32 %v12007_v49  ;;  %v11996_v15 = vsub.f32 %v23644_v10, %v11985_v41 }
 0x88c   : > { %12019 = vadd.xlane.f32.xlu1 %v23757_v9 }
 0x88d   : > { %v23761_v20 = vpop.eup %17451  ;;  %v12017_v24 = vmul.f32 1.442695, %v11996_v15  ;;  %v11983_v37 = vpop.xlane.xlu1 %11982 }
 0x88e   : > { %v11995_v50 = vsub.f32 %v23648_v25, %v11983_v37  ;;  %12021 = vadd.xlane.f32.xlu0 %v23761_v20  ;;  %v11981_v48 = vpop.xlane.xlu0 %11980 }
 0x88f   : > { %v23765_v54 = vpop.eup %17453  ;;  %17461 = vpow2.f32 %v12017_v24  ;;  %v11994_v22 = vsub.f32 %v23651_v61, %v11981_v48 }
 0x890   : > { %v12015_v28 = vmul.f32 1.442695, %v11995_v50  ;;  %12031 = vadd.xlane.f32.xlu1 %v23765_v54 }
 0x891   : > { %v23769_v10 = vpop.eup %17455  ;;  %v12013_v31 = vmul.f32 1.442695, %v11994_v22  ;;  %v12677_v23 = vpop.xlane.xlu1 %12676 }
 0x892   : > { %17463 = vpow2.f32 %v12015_v28  ;;  %v12696_v3 = vsub.f32 %v23656_v63, %v12677_v23  ;;  %12033 = vadd.xlane.f32.xlu0 %v23769_v10  ;;  %v12679_v25 = vpop.xlane.xlu0 %12678 }
 0x893   : > { %v23773_v1 = vpop.eup %17457  ;;  %17465 = vpow2.f32 %v12013_v31  ;;  %v12697_v39 = vsub.f32 %v23659_v13, %v12679_v25 }
 0x894   : > { %v12709_v52 = vmul.f32 1.442695, %v12696_v3  ;;  %12027 = vadd.xlane.f32.xlu1 %v23773_v1 }
 0x895   : > { %v23777_v61 = vpop.eup %17459  ;;  %v12711_v16 = vmul.f32 1.442695, %v12697_v39  ;;  %v12673_v14 = vpop.xlane.xlu1 %12672 }
 0x896   : > { %17467 = vpow2.f32 %v12709_v52  ;;  %v12694_v34 = vsub.f32 %v23665_v56, %v12673_v14  ;;  %12029 = vadd.xlane.f32.xlu0 %v23777_v61  ;;  %v12675_v63 = vpop.xlane.xlu0 %12674 }
 0x897   : > { %17469 = vpow2.f32 %v12711_v16  ;;  %v12695_v32 = vsub.f32 %v23668_v19, %v12675_v63 }
 0x898   : > { %v12705_v46 = vmul.f32 1.442695, %v12694_v34 }
 0x899   : > { %v23782_v53 = vpop.eup %17461  ;;  %v12707_v13 = vmul.f32 1.442695, %v12695_v32  ;;  %v12685_v55 = vpop.xlane.xlu1 %12684 }
 0x89a   : > { %17471 = vpow2.f32 %v12705_v46  ;;  %v12700_v51 = vsub.f32 %v23675_v21, %v12685_v55  ;;  %12039 = vadd.xlane.f32.xlu1 %v23782_v53  ;;  %v12687_v62 = vpop.xlane.xlu0 %12686 }
 0x89b   : > { %17473 = vpow2.f32 %v12707_v13  ;;  %v12701_v56 = vsub.f32 %v23678_v47, %v12687_v62 }
 0x89c   : > { %v23787_v12 = vpop.eup %17463  ;;  %v12717_v8 = vmul.f32 1.442695, %v12700_v51 }
 0x89d   : > { %v23789_v6 = vpop.eup %17465  ;;  %v12719_v19 = vmul.f32 1.442695, %v12701_v56  ;;  %v12681_v36 = vpop.xlane.xlu1 %12680  ;;  %12037 = vadd.xlane.f32.xlu0 %v23787_v12 }
 0x89e   : > { %17475 = vpow2.f32 %v12717_v8  ;;  %v12698_v17 = vsub.f32 %v23685_v40, %v12681_v36  ;;  %12035 = vadd.xlane.f32.xlu1 %v23789_v6  ;;  %v12683_v21 = vpop.xlane.xlu0 %12682 }
 0x89f   : > { %17477 = vpow2.f32 %v12719_v19  ;;  %v12699_v45 = vsub.f32 %v23688_v18, %v12683_v21 }
 0x8a0   : > { %v23795_v30 = vpop.eup %17467  ;;  %v12713_v47 = vmul.f32 1.442695, %v12698_v17 }
 0x8a1   : > { %v23797_v4 = vpop.eup %17469  ;;  %v12715_v58 = vmul.f32 1.442695, %v12699_v45  ;;  %v12689_v2 = vpop.xlane.xlu1 %12688  ;;  %12731 = vadd.xlane.f32.xlu0 %v23795_v30 }
 0x8a2   : > { %17479 = vpow2.f32 %v12713_v47  ;;  %v12702_v49 = vsub.f32 %v23695_v27, %v12689_v2  ;;  %12733 = vadd.xlane.f32.xlu1 %v23797_v4  ;;  %v12691_v40 = vpop.xlane.xlu0 %12690 }
 0x8a3   : > { %17481 = vpow2.f32 %v12715_v58  ;;  %v12703_v41 = vsub.f32 %v23698_v26, %v12691_v40 }
 0x8a4   : > { %v23803_v15 = vpop.eup %17471  ;;  %v12721_v18 = vmul.f32 1.442695, %v12702_v49 }
 0x8a5   : > { %v23805_v24 = vpop.eup %17473  ;;  %v12723_v37 = vmul.f32 1.442695, %v12703_v41  ;;  %v12693_v50 = vpop.xlane.xlu1 %12692  ;;  %12727 = vadd.xlane.f32.xlu0 %v23803_v15 }
 0x8a6   : > { %17483 = vpow2.f32 %v12721_v18  ;;  %v12704_v48 = vsub.f32 %v23705_v5, %v12693_v50  ;;  %12729 = vadd.xlane.f32.xlu1 %v23805_v24  ;;  %v11312_v27 = vpop.xlane.xlu0 %11311 }
 0x8a7   : > { %17485 = vpow2.f32 %v12723_v37 }
 0x8a8   : > { %v23810_v22 = vpop.eup %17475  ;;  %v12725_v28 = vmul.f32 1.442695, %v12704_v48  ;;  %17487 = vrcp.f32 %v11312_v27 }
 0x8a9   : > { %v23812_v26 = vpop.eup %17477  ;;  %v11314_v31 = vpop.xlane.xlu1 %11313  ;;  %12739 = vadd.xlane.f32.xlu0 %v23810_v22 }
 0x8aa   : > { %17489 = vpow2.f32 %v12725_v28  ;;  %12741 = vadd.xlane.f32.xlu1 %v23812_v26  ;;  %v11316_v23 = vpop.xlane.xlu0 %11315 }
 0x8ab   : > { %17491 = vrcp.f32 %v11314_v31 }
 0x8ac   : > { %v23816_v3 = vpop.eup %17479  ;;  %17493 = vrcp.f32 %v11316_v23 }
 0x8ad   : > { %v23818_v5 = vpop.eup %17481  ;;  %12735 = vadd.xlane.f32.xlu0 %v23816_v3  ;;  %v11318_v25 = vpop.xlane.xlu1 %11317 }
 0x8ae   : > { %17495 = vrcp.f32 %v11318_v25  ;;  %12737 = vadd.xlane.f32.xlu1 %v23818_v5  ;;  %v11320_v39 = vpop.xlane.xlu0 %11319 }
 0x8af   : > { %17497 = vrcp.f32 %v11320_v39 }
 0x8b0   : > { %v23822_v52 = vpop.eup %17483 }
 0x8b1   : > { %v23824_v16 = vpop.eup %17485  ;;  %12743 = vadd.xlane.f32.xlu0 %v23822_v52  ;;  %v11322_v14 = vpop.xlane.xlu1 %11321 }
 0x8b2   : > { %17499 = vrcp.f32 %v11322_v14  ;;  %12745 = vadd.xlane.f32.xlu1 %v23824_v16  ;;  %v11324_v34 = vpop.xlane.xlu0 %11323  ;;  %v17488_v63 = vpop.eup %17487 }
 0x8b3   : > { %17501 = vrcp.f32 %v11324_v34  ;;  %v11344_v51 = vmul.f32 %v17488_v63, %v23707_v33 }
 0x8b4   : > { %v23829_v32 = vpop.eup %17489 }
 0x8b5   : > { %v17492_v46 = vpop.eup %17491  ;;  %12747 = vadd.xlane.f32.xlu0 %v23829_v32  ;;  %v11326_v13 = vpop.xlane.xlu1 %11325 }
 0x8b6   : > { %v17494_v55 = vpop.eup %17493  ;;  %v11345_v62 = vmul.f32 %v17492_v46, %v23713_v38  ;;  %17503 = vrcp.f32 %v11326_v13  ;;  %v11328_v56 = vpop.xlane.xlu0 %11327 }
 0x8b7   : > { %17505 = vrcp.f32 %v11328_v56  ;;  %v11346_v36 = vmul.f32 %v17494_v55, %v23715_v59 }
 0x8b8   : > { %v17496_v8 = vpop.eup %17495  ;;  %v14191_v19 = vpack.c.bf16 %v11345_v62, %v11344_v51 }
 0x8b9   : > { %v11347_v17 = vmul.f32 %v17496_v8, %v23719_v60  ;;  %v11330_v33 = vpop.xlane.xlu1 %11329  ;;  %v17498_v21 = vpop.eup %17497 }
 0x8ba   : > { %14192 = vst [vmem:[%s23837_s12] sm:$0xff] %v14191_v19   ;;  %17507 = vrcp.f32 %v11330_v33  ;;  %v11332_v38 = vpop.xlane.xlu0 %11331  ;;  %v11348_v58 = vmul.f32 %v17498_v21, %v23721_v57 }
 0x8bb   : > { %v14196_v45 = vpack.c.bf16 %v11347_v17, %v11346_v36  ;;  %17509 = vrcp.f32 %v11332_v38 }
 0x8bc   : > { %v17500_v47 = vpop.eup %17499 }
 0x8bd   : > { %14263 = vst [vmem:[%s23837_s12 + $0x8] sm:$0xff] %v14196_v45   ;;  %v11349_v2 = vmul.f32 %v17500_v47, %v23725_v44  ;;  %v17502_v49 = vpop.eup %17501 }
 0x8be   : > { %v11350_v60 = vmul.f32 %v17502_v49, %v23727_v7 }
 0x8bf   : > { %v14201_v59 = vpack.c.bf16 %v11349_v2, %v11348_v58 }
 0x8c0   : > { %v17504_v40 = vpop.eup %17503 }
 0x8c1   : > { %14264 = vst [vmem:[%s23837_s12 + $0x10] sm:$0xff] %v14201_v59   ;;  %v11351_v41 = vmul.f32 %v17504_v40, %v23731_v11  ;;  %v17506_v18 = vpop.eup %17505 }
 0x8c2   : > { %v11352_v27 = vmul.f32 %v17506_v18, %v23733_v0 }
 0x8c3   : > { %v14206_v37 = vpack.c.bf16 %v11351_v41, %v11350_v60 }
 0x8c4   : > { %v17508_v50 = vpop.eup %17507 }
 0x8c5   : > { %v17510_v48 = vpop.eup %17509  ;;  %14265 = vst [vmem:[%s23837_s12 + $0x18] sm:$0xff] %v14206_v37   ;;  %v11353_v57 = vmul.f32 %v17508_v50, %v23737_v29 }
 0x8c6   : > { %v11354_v44 = vmul.f32 %v17510_v48, %v23739_v42 }
 0x8c7   : > { %v14211_v28 = vpack.c.bf16 %v11353_v57, %v11352_v27 }
 0x8c8   : > { %v14165_v31 = vpack.c.bf16 %v11354_v44, %v11354_v44 }
 0x8c9   : > { %14266 = vst [vmem:[%s23837_s12 + $0x20] sm:$0xff] %v14211_v28  }
 0x8ca   : > { %11410 = vst [vmem:[%s23837_s12 + $0x28] sm:$0xf] %v14165_v31 }
 0x915   : > { %v12024_v23 = vpop.xlane.xlu1 %12023 }
 0x916   : > { %17511 = vrcp.f32 %v12024_v23 }
 0x917   : > { %v12026_v25 = vpop.xlane.xlu0 %12025 }
 0x919   : > { %v12020_v7 = vpop.xlane.xlu1 %12019 }
 0x91a   : > { %17513 = vrcp.f32 %v12020_v7 }
 0x91b   : > { %v12022_v11 = vpop.xlane.xlu0 %12021 }
 0x91c   : > { %17515 = vrcp.f32 %v12022_v11 }
 0x91d   : > { %v12032_v39 = vpop.xlane.xlu1 %12031  ;;  %17517 = vrcp.f32 %v12026_v25 }
 0x91e   : > { %17519 = vrcp.f32 %v12032_v39 }
 0x91f   : > { %v12034_v14 = vpop.xlane.xlu0 %12033 }
 0x920   : > { %v17512_v29 = vpop.eup %17511 }
 0x921   : > { %v12028_v0 = vpop.xlane.xlu1 %12027  ;;  %v12054_v13 = vmul.f32 %v17512_v29, %v23750_v35 }
 0x922   : > { %17521 = vrcp.f32 %v12028_v0 }
 0x923   : > { %v12030_v42 = vpop.xlane.xlu0 %12029 }
 0x924   : > { %v17514_v34 = vpop.eup %17513  ;;  %17523 = vrcp.f32 %v12030_v42 }
 0x925   : > { %v12052_v63 = vmul.f32 %v17514_v34, %v23757_v9 }
 0x926   : > { %v17516_v46 = vpop.eup %17515 }
 0x927   : > { %v14166_v55 = vpack.c.bf16 %v12052_v63, %v12052_v63  ;;  %v12053_v51 = vmul.f32 %v17516_v46, %v23761_v20  ;;  %v12040_v62 = vpop.xlane.xlu1 %12039  ;;  %v17518_v8 = vpop.eup %17517 }
 0x928   : > { %17525 = vrcp.f32 %v12040_v62  ;;  %v17520_v36 = vpop.eup %17519  ;;  %v12055_v35 = vmul.f32 %v17518_v8, %v23754_v43 }
 0x929   : > { %12108 = vst [vmem:[%s23837_s12 + $0x2c] sm:$0xf] %v14166_v55  ;;  %v14216_v56 = vpack.c.bf16 %v12054_v13, %v12053_v51  ;;  %17527 = vrcp.f32 %v12034_v14  ;;  %v12058_v38 = vmul.f32 %v17520_v36, %v23765_v54 }
 0x92a   : > { %v12038_v19 = vpop.xlane.xlu0 %12037 }
 0x92b   : > { %14267 = vst [vmem:[%s23837_s12 + $0x30] sm:$0xff] %v14216_v56   ;;  %17529 = vrcp.f32 %v12038_v19  ;;  %v12036_v17 = vpop.xlane.xlu1 %12035 }
 0x92c   : > { %v17522_v33 = vpop.eup %17521  ;;  %17531 = vrcp.f32 %v12036_v17 }
 0x92d   : > { %v12056_v9 = vmul.f32 %v17522_v33, %v23773_v1 }
 0x92e   : > { %v17524_v20 = vpop.eup %17523  ;;  %v12732_v21 = vpop.xlane.xlu0 %12731 }
 0x92f   : > { %v14221_v45 = vpack.c.bf16 %v12056_v9, %v12055_v35  ;;  %v12057_v47 = vmul.f32 %v17524_v20, %v23777_v61  ;;  %17533 = vrcp.f32 %v12732_v21  ;;  %v12734_v58 = vpop.xlane.xlu1 %12733 }
 0x930   : > { %17535 = vrcp.f32 %v12734_v58 }
 0x931   : > { %14268 = vst [vmem:[%s23837_s12 + $0x38] sm:$0xff] %v14221_v45   ;;  %v14226_v2 = vpack.c.bf16 %v12058_v38, %v12057_v47 }
 0x932   : > { %v12728_v49 = vpop.xlane.xlu0 %12727  ;;  %v17526_v59 = vpop.eup %17525 }
 0x933   : > { %14269 = vst [vmem:[%s23837_s12 + $0x40] sm:$0xff] %v14226_v2   ;;  %17537 = vrcp.f32 %v12728_v49  ;;  %v12730_v40 = vpop.xlane.xlu1 %12729  ;;  %v17528_v43 = vpop.eup %17527  ;;  %v12062_v54 = vmul.f32 %v17526_v59, %v23782_v53 }
 0x934   : > { %17539 = vrcp.f32 %v12730_v40  ;;  %v12059_v18 = vmul.f32 %v17528_v43, %v23769_v10 }
 0x935   : > { %v17530_v1 = vpop.eup %17529 }
 0x936   : > { %v17532_v60 = vpop.eup %17531  ;;  %v12061_v61 = vmul.f32 %v17530_v1, %v23787_v12  ;;  %v12740_v41 = vpop.xlane.xlu0 %12739 }
 0x937   : > { %v12060_v37 = vmul.f32 %v17532_v60, %v23789_v6  ;;  %17541 = vrcp.f32 %v12740_v41  ;;  %v12742_v50 = vpop.xlane.xlu1 %12741 }
 0x938   : > { %v14236_v48 = vpack.c.bf16 %v12062_v54, %v12061_v61  ;;  %17543 = vrcp.f32 %v12742_v50 }
 0x939   : > { %v17534_v27 = vpop.eup %17533  ;;  %v14231_v57 = vpack.c.bf16 %v12060_v37, %v12059_v18 }
 0x93a   : > { %v17536_v44 = vpop.eup %17535  ;;  %14271 = vst [vmem:[%s23837_s12 + $0x50] sm:$0xff] %v14236_v48   ;;  %v12762_v28 = vmul.f32 %v17534_v27, %v23795_v30  ;;  %v12736_v31 = vpop.xlane.xlu0 %12735 }
 0x93b   : > { %14270 = vst [vmem:[%s23837_s12 + $0x48] sm:$0xff] %v14231_v57   ;;  %v12763_v53 = vmul.f32 %v17536_v44, %v23797_v4  ;;  %17545 = vrcp.f32 %v12736_v31  ;;  %v12738_v12 = vpop.xlane.xlu1 %12737 }
 0x93c   : > { %17547 = vrcp.f32 %v12738_v12 }
 0x93d   : > { %v17538_v10 = vpop.eup %17537  ;;  %v14246_v6 = vpack.c.bf16 %v12763_v53, %v12762_v28 }
 0x93e   : > { %v17540_v23 = vpop.eup %17539  ;;  %v12760_v25 = vmul.f32 %v17538_v10, %v23803_v15  ;;  %v12744_v7 = vpop.xlane.xlu0 %12743 }
 0x93f   : > { %14273 = vst [vmem:[%s23837_s12 + $0x60] sm:$0xff] %v14246_v6   ;;  %v12761_v11 = vmul.f32 %v17540_v23, %v23805_v24  ;;  %17549 = vrcp.f32 %v12744_v7  ;;  %v12746_v30 = vpop.xlane.xlu1 %12745 }
 0x940   : > { %17551 = vrcp.f32 %v12746_v30 }
 0x941   : > { %v17542_v39 = vpop.eup %17541  ;;  %v14241_v14 = vpack.c.bf16 %v12761_v11, %v12760_v25 }
 0x942   : > { %v17544_v4 = vpop.eup %17543  ;;  %v12766_v0 = vmul.f32 %v17542_v39, %v23810_v22  ;;  %v12748_v29 = vpop.xlane.xlu0 %12747 }
 0x943   : > { %14272 = vst [vmem:[%s23837_s12 + $0x58] sm:$0xff] %v14241_v14   ;;  %v12767_v42 = vmul.f32 %v17544_v4, %v23812_v26  ;;  %17553 = vrcp.f32 %v12748_v29 }
 0x945   : > { %v17546_v15 = vpop.eup %17545  ;;  %v14256_v34 = vpack.c.bf16 %v12767_v42, %v12766_v0 }
 0x946   : > { %v17548_v24 = vpop.eup %17547  ;;  %v12764_v63 = vmul.f32 %v17546_v15, %v23816_v3 }
 0x947   : > { %14275 = vst [vmem:[%s23837_s12 + $0x70] sm:$0xff] %v14256_v34   ;;  %v12765_v46 = vmul.f32 %v17548_v24, %v23818_v5 }
 0x949   : > { %v17550_v13 = vpop.eup %17549  ;;  %v14251_v55 = vpack.c.bf16 %v12765_v46, %v12764_v63 }
 0x94a   : > { %v17552_v51 = vpop.eup %17551  ;;  %v12768_v22 = vmul.f32 %v17550_v13, %v23822_v52 }
 0x94b   : > { %14274 = vst [vmem:[%s23837_s12 + $0x68] sm:$0xff] %v14251_v55   ;;  %v12769_v62 = vmul.f32 %v17552_v51, %v23824_v16 }
 0x94d   : > { %v17554_v26 = vpop.eup %17553  ;;  %v14261_v56 = vpack.c.bf16 %v12769_v62, %v12768_v22 }
 0x94e   : > { %v12770_v8 = vmul.f32 %v17554_v26, %v23829_v32 }
 0x94f   : > { %14276 = vst [vmem:[%s23837_s12 + $0x78] sm:$0xff] %v14261_v56  }
 0x950   : > { %v14187_v19 = vpack.c.bf16 %v12770_v8, %v12770_v8 }
 0x952   : > { %12826 = vst [vmem:[%s23837_s12 + $0x80] sm:$0xf] %v14187_v19 }
 0x953 PF: > { %s17_s24 = sadd.s32 1, %s17592_s24  }
 0x954   : > { %p14_p4 = scmp.ge.s32.totalorder %s17_s24, 4  }
 0x956   :  { %16 = sbr.rel (!%p14_p4) target bundleno = 1 (0x1), region = 84 }

</bundles_post_ra>
